<compile_context>
chip_gen: v7x
topology: tpu7x:2x2x1
jax: 0.10.0
libtpu: 0.0.40
codegen_flags: <defaults>
</compile_context>

<pallas_src>
import jax
import jax.numpy as jnp
from jax.experimental import pallas as pl
from jax.experimental.pallas import tpu as pltpu

# PyTorch layer sizes.
D_IN, H1, H2, H3, D_OUT = 1536, 1000, 1000, 512, 1
# Lane-padded sizes used inside the kernel.
H1P, H2P, D_OUTP = 1024, 1024, 128
# Max batch rows per grid step (amortizes ~0.35us/step overhead; ~9 MiB live tiles).
MAX_TILE_B = 512


def _mlp_kernel(x_ref,
                w1_ref, b1_ref,
                w2_ref, b2_ref,
                w3_ref, b3_ref,
                w4_ref, b4_ref,
                o_ref):
    """Whole forward pass fused in VMEM: 3 MXU matmuls + lane-reduce + activations."""
    x = x_ref[...]  # (tile_b, 1536) bf16

    # Layer 1: (tile_b,1536) @ (1536,1024) -> f32 acc, bias + ReLU in f32.
    h = jnp.dot(x, w1_ref[...], preferred_element_type=jnp.float32) + b1_ref[...]
    h = jnp.maximum(h, 0.0)

    # Layer 2: (tile_b,1024) @ (1024,1024).
    h = jnp.dot(h.astype(jnp.bfloat16), w2_ref[...],
                preferred_element_type=jnp.float32) + b2_ref[...]
    h = jnp.maximum(h, 0.0)

    # Layer 3: (tile_b,1024) @ (1024,512).
    h = jnp.dot(h.astype(jnp.bfloat16), w3_ref[...],
                preferred_element_type=jnp.float32) + b3_ref[...]
    h = jnp.maximum(h, 0.0)

    # Layer 4: Linear(512,1) as an XLU lane reduction in f32 (avoids 128x-padded MXU).
    z = jnp.sum(h * w4_ref[...], axis=-1, keepdims=True)          # (tile_b, 1)
    z = jnp.broadcast_to(z, o_ref.shape) + b4_ref[...]            # lane-dense output
    o_ref[...] = jax.nn.sigmoid(z)


def prepare_params(params):
    """Pad / cast params ONCE (call at init, not per forward).

    params: [(w1,b1), (w2,b2), (w3,b3), (w4,b4)] with w_i shaped (in, out), b_i (out,).
    (PyTorch nn.Linear stores weight as (out, in); transpose before calling this.)
    """
    (w1, b1), (w2, b2), (w3, b3), (w4, b4) = params

    w1p = jnp.zeros((D_IN, H1P), jnp.bfloat16).at[:, :H1].set(w1.astype(jnp.bfloat16))
    b1p = jnp.zeros((1, H1P), jnp.float32).at[0, :H1].set(b1.astype(jnp.float32))

    w2p = jnp.zeros((H1P, H2P), jnp.bfloat16).at[:H1, :H2].set(w2.astype(jnp.bfloat16))
    b2p = jnp.zeros((1, H2P), jnp.float32).at[0, :H2].set(b2.astype(jnp.float32))

    w3p = jnp.zeros((H2P, H3), jnp.bfloat16).at[:H2, :].set(w3.astype(jnp.bfloat16))
    b3p = b3.reshape(1, H3).astype(jnp.float32)

    # Final layer kept in f32 (tiny): weight as a (1,512) row, bias broadcast to 128 lanes.
    w4r = w4.reshape(1, H3).astype(jnp.float32)
    b4r = jnp.zeros((1, D_OUTP), jnp.float32) + b4.astype(jnp.float32).reshape(1, 1)

    return (w1p, b1p, w2p, b2p, w3p, b3p, w4r, b4r)


def _round_up(n, m):
    return -(-n // m) * m


@jax.jit
def mlp_forward(x, padded_params):
    """x: (B, 1536) float32 -> (B, 1) float32, matching Net.forward."""
    w1p, b1p, w2p, b2p, w3p, b3p, w4r, b4r = padded_params
    B = x.shape[0]

    # Pick an 8-aligned batch tile that minimizes padding waste (all static at trace).
    b_pad = _round_up(B, 8)
    n_tiles = -(-b_pad // MAX_TILE_B)
    tile_b = _round_up(-(-b_pad // n_tiles), 8)
    b_pad = n_tiles * tile_b

    xb = x.astype(jnp.bfloat16)
    if b_pad != B:
        xb = jnp.pad(xb, ((0, b_pad - B), (0, 0)))

    const = lambda i: (0, 0)  # weights/biases: same block every step -> VMEM resident

    out_padded = pl.pallas_call(
        _mlp_kernel,
        out_shape=jax.ShapeDtypeStruct((b_pad, D_OUTP), jnp.float32),
        grid=(n_tiles,),
        in_specs=[
            pl.BlockSpec((tile_b, D_IN), lambda i: (i, 0)),
            pl.BlockSpec((D_IN, H1P), const),
            pl.BlockSpec((1, H1P), const),
            pl.BlockSpec((H1P, H2P), const),
            pl.BlockSpec((1, H2P), const),
            pl.BlockSpec((H2P, H3), const),
            pl.BlockSpec((1, H3), const),
            pl.BlockSpec((1, H3), const),
            pl.BlockSpec((1, D_OUTP), const),
        ],
        out_specs=pl.BlockSpec((tile_b, D_OUTP), lambda i: (i, 0)),
        compiler_params=pltpu.CompilerParams(
            dimension_semantics=("parallel",),   # batch tiles -> both TCs on v7x
            vmem_limit_bytes=48 << 20,           # under v7x's 64 MiB physical VMEM
        ),
    )(xb, w1p, b1p, w2p, b2p, w3p, b3p, w4r, b4r)

    # Column 0 is the real scalar output of the final Linear(512, 1).
    return out_padded[:B, :D_OUT]


def init_params(key):
    """Deterministic PyTorch-style init: U(-1/sqrt(fan_in), 1/sqrt(fan_in))."""
    dims = [(D_IN, H1), (H1, H2), (H2, H3), (H3, D_OUT)]
    params = []
    for fan_in, fan_out in dims:
        key, kw, kb = jax.random.split(key, 3)
        bound = 1.0 / jnp.sqrt(fan_in)
        w = jax.random.uniform(kw, (fan_in, fan_out), jnp.float32, -bound, bound)
        b = jax.random.uniform(kb, (fan_out,), jnp.float32, -bound, bound)
        params.append((w, b))
    return params


def _reference_f32(x, params):
    h = x
    for i, (w, b) in enumerate(params):
        h = h @ w + b
        h = jax.nn.sigmoid(h) if i == 3 else jnp.maximum(h, 0.0)
    return h


def _reference_bf16_path(x, params):
    """Mimics the kernel's numerics: bf16 matmul inputs, f32 accumulation, f32 last layer."""
    (w1, b1), (w2, b2), (w3, b3), (w4, b4) = params
    h = x.astype(jnp.bfloat16)
    h = jnp.maximum(jnp.dot(h, w1.astype(jnp.bfloat16),
                            preferred_element_type=jnp.float32) + b1, 0.0)
    h = jnp.maximum(jnp.dot(h.astype(jnp.bfloat16), w2.astype(jnp.bfloat16),
                            preferred_element_type=jnp.float32) + b2, 0.0)
    h = jnp.maximum(jnp.dot(h.astype(jnp.bfloat16), w3.astype(jnp.bfloat16),
                            preferred_element_type=jnp.float32) + b3, 0.0)
    z = jnp.sum(h * w4.reshape(1, H3), axis=-1, keepdims=True) + b4
    return jax.nn.sigmoid(z)


if __name__ == "__main__":
    key = jax.random.PRNGKey(0)
    key, kx = jax.random.split(key)

    B = 8
    x = jax.random.normal(kx, (B, D_IN), jnp.float32)
    params = init_params(key)
    padded_params = prepare_params(params)   # padded / cast ONCE

    out = mlp_forward(x, padded_params)
    out = jax.block_until_ready(out)
    assert out.shape == (B, D_OUT)

    # Tight check against a reference using the kernel's own bf16/f32 numerics.
    ref_bf16 = _reference_bf16_path(x, params)
    assert jnp.allclose(out, ref_bf16, atol=5e-3, rtol=5e-3), \
        f"max err vs bf16-path ref: {jnp.max(jnp.abs(out - ref_bf16))}"

    # Loose check against pure-f32 PyTorch semantics (bf16 weight quantization).
    ref_f32 = _reference_f32(x, params)
    assert jnp.allclose(out, ref_f32, atol=2e-2, rtol=2e-2), \
        f"max err vs f32 ref: {jnp.max(jnp.abs(out - ref_f32))}"

    print("KERNEL_OK")
</pallas_src>

<mosaic_0001>
module attributes {stable_mosaic.version = 11 : i64} {
  func.func @_mlp_kernel(%arg0: i32, %arg1: memref<8x1536xbf16, #tpu.memory_space<vmem>>, %arg2: memref<1536x1024xbf16, #tpu.memory_space<vmem>>, %arg3: memref<1x1024xf32, #tpu.memory_space<vmem>>, %arg4: memref<1024x1024xbf16, #tpu.memory_space<vmem>>, %arg5: memref<1x1024xf32, #tpu.memory_space<vmem>>, %arg6: memref<1024x512xbf16, #tpu.memory_space<vmem>>, %arg7: memref<1x512xf32, #tpu.memory_space<vmem>>, %arg8: memref<1x512xf32, #tpu.memory_space<vmem>>, %arg9: memref<1x128xf32, #tpu.memory_space<vmem>>, %arg10: memref<8x128xf32, #tpu.memory_space<vmem>>) attributes {dimension_semantics = [#tpu.dimension_semantics<parallel>], iteration_bounds = array<i64: 1>, scalar_prefetch = 0 : i64, scratch_operands = 0 : i64, tpu.core_type = #tpu.core_type<tc>, window_params = [{transform_indices = @transform_0, window_bounds = array<i64: 8, 1536>}, {pipeline_mode = #tpu.pipeline_mode<synchronous>, transform_indices = @transform_1, window_bounds = array<i64: 1536, 1024>}, {pipeline_mode = #tpu.pipeline_mode<synchronous>, transform_indices = @transform_2, window_bounds = array<i64: 1, 1024>}, {pipeline_mode = #tpu.pipeline_mode<synchronous>, transform_indices = @transform_3, window_bounds = array<i64: 1024, 1024>}, {pipeline_mode = #tpu.pipeline_mode<synchronous>, transform_indices = @transform_4, window_bounds = array<i64: 1, 1024>}, {pipeline_mode = #tpu.pipeline_mode<synchronous>, transform_indices = @transform_5, window_bounds = array<i64: 1024, 512>}, {pipeline_mode = #tpu.pipeline_mode<synchronous>, transform_indices = @transform_6, window_bounds = array<i64: 1, 512>}, {pipeline_mode = #tpu.pipeline_mode<synchronous>, transform_indices = @transform_7, window_bounds = array<i64: 1, 512>}, {pipeline_mode = #tpu.pipeline_mode<synchronous>, transform_indices = @transform_8, window_bounds = array<i64: 1, 128>}, {transform_indices = @transform_9, window_bounds = array<i64: 8, 128>}]} {
    %c0 = arith.constant 0 : index
    %c0_0 = arith.constant 0 : index
    %0 = vector.load %arg1[%c0, %c0_0] : memref<8x1536xbf16, #tpu.memory_space<vmem>>, vector<8x1536xbf16>
    %c0_1 = arith.constant 0 : index
    %c0_2 = arith.constant 0 : index
    %1 = vector.load %arg2[%c0_1, %c0_2] : memref<1536x1024xbf16, #tpu.memory_space<vmem>>, vector<1536x1024xbf16>
    %cst = arith.constant dense<0.000000e+00> : vector<8x1024xf32>
    %2 = tpu.matmul %0, %1, %cst {dimension_numbers = #tpu.dot_dimension_numbers<[1], [0], [0], [1], [0, 0, 1, 1], [], []>} : vector<8x1536xbf16>, vector<1536x1024xbf16>, vector<8x1024xf32> -> vector<8x1024xf32>
    %c0_3 = arith.constant 0 : index
    %c0_4 = arith.constant 0 : index
    %3 = vector.load %arg3[%c0_3, %c0_4] : memref<1x1024xf32, #tpu.memory_space<vmem>>, vector<1x1024xf32>
    %4 = vector.broadcast %3 : vector<1x1024xf32> to vector<8x1024xf32>
    %5 = arith.addf %2, %4 : vector<8x1024xf32>
    %cst_5 = arith.constant 0.000000e+00 : f32
    %6 = vector.broadcast %cst_5 : f32 to vector<8x1024xf32>
    %7 = arith.maximumf %5, %6 : vector<8x1024xf32>
    %8 = arith.truncf %7 : vector<8x1024xf32> to vector<8x1024xbf16>
    %c0_6 = arith.constant 0 : index
    %c0_7 = arith.constant 0 : index
    %9 = vector.load %arg4[%c0_6, %c0_7] : memref<1024x1024xbf16, #tpu.memory_space<vmem>>, vector<1024x1024xbf16>
    %cst_8 = arith.constant dense<0.000000e+00> : vector<8x1024xf32>
    %10 = tpu.matmul %8, %9, %cst_8 {dimension_numbers = #tpu.dot_dimension_numbers<[1], [0], [0], [1], [0, 0, 1, 1], [], []>} : vector<8x1024xbf16>, vector<1024x1024xbf16>, vector<8x1024xf32> -> vector<8x1024xf32>
    %c0_9 = arith.constant 0 : index
    %c0_10 = arith.constant 0 : index
    %11 = vector.load %arg5[%c0_9, %c0_10] : memref<1x1024xf32, #tpu.memory_space<vmem>>, vector<1x1024xf32>
    %12 = vector.broadcast %11 : vector<1x1024xf32> to vector<8x1024xf32>
    %13 = arith.addf %10, %12 : vector<8x1024xf32>
    %cst_11 = arith.constant 0.000000e+00 : f32
    %14 = vector.broadcast %cst_11 : f32 to vector<8x1024xf32>
    %15 = arith.maximumf %13, %14 : vector<8x1024xf32>
    %16 = arith.truncf %15 : vector<8x1024xf32> to vector<8x1024xbf16>
    %c0_12 = arith.constant 0 : index
    %c0_13 = arith.constant 0 : index
    %17 = vector.load %arg6[%c0_12, %c0_13] : memref<1024x512xbf16, #tpu.memory_space<vmem>>, vector<1024x512xbf16>
    %cst_14 = arith.constant dense<0.000000e+00> : vector<8x512xf32>
    %18 = tpu.matmul %16, %17, %cst_14 {dimension_numbers = #tpu.dot_dimension_numbers<[1], [0], [0], [1], [0, 0, 1, 1], [], []>} : vector<8x1024xbf16>, vector<1024x512xbf16>, vector<8x512xf32> -> vector<8x512xf32>
    %c0_15 = arith.constant 0 : index
    %c0_16 = arith.constant 0 : index
    %19 = vector.load %arg7[%c0_15, %c0_16] : memref<1x512xf32, #tpu.memory_space<vmem>>, vector<1x512xf32>
    %20 = vector.broadcast %19 : vector<1x512xf32> to vector<8x512xf32>
    %21 = arith.addf %18, %20 : vector<8x512xf32>
    %cst_17 = arith.constant 0.000000e+00 : f32
    %22 = vector.broadcast %cst_17 : f32 to vector<8x512xf32>
    %23 = arith.maximumf %21, %22 : vector<8x512xf32>
    %c0_18 = arith.constant 0 : index
    %c0_19 = arith.constant 0 : index
    %24 = vector.load %arg8[%c0_18, %c0_19] : memref<1x512xf32, #tpu.memory_space<vmem>>, vector<1x512xf32>
    %25 = vector.broadcast %24 : vector<1x512xf32> to vector<8x512xf32>
    %26 = arith.mulf %23, %25 : vector<8x512xf32>
    %cst_20 = arith.constant dense<0.000000e+00> : vector<8xf32>
    %27 = vector.multi_reduction <add>, %26, %cst_20 [1] : vector<8x512xf32> to vector<8xf32>
    %28 = vector.shape_cast %27 : vector<8xf32> to vector<8x1xf32>
    %29 = vector.shape_cast %28 : vector<8x1xf32> to vector<8x1xf32>
    %30 = vector.broadcast %29 : vector<8x1xf32> to vector<8x128xf32>
    %c0_21 = arith.constant 0 : index
    %c0_22 = arith.constant 0 : index
    %31 = vector.load %arg9[%c0_21, %c0_22] : memref<1x128xf32, #tpu.memory_space<vmem>>, vector<1x128xf32>
    %32 = vector.broadcast %31 : vector<1x128xf32> to vector<8x128xf32>
    %33 = arith.addf %30, %32 : vector<8x128xf32>
    %34 = arith.negf %33 : vector<8x128xf32>
    %35 = math.exp %34 : vector<8x128xf32>
    %cst_23 = arith.constant 1.000000e+00 : f32
    %36 = vector.broadcast %cst_23 : f32 to vector<8x128xf32>
    %37 = arith.addf %36, %35 : vector<8x128xf32>
    %38 = arith.divf %36, %37 : vector<8x128xf32>
    %c0_24 = arith.constant 0 : index
    %c0_25 = arith.constant 0 : index
    %39 = vector.load %arg10[%c0_24, %c0_25] : memref<8x128xf32, #tpu.memory_space<vmem>>, vector<8x128xf32>
    tpu.vector_store %arg10[%c0_24, %c0_25], %38 {strides = array<i32>} : memref<8x128xf32, #tpu.memory_space<vmem>>, vector<8x128xf32>,
    return
  }
  func.func @transform_0(%arg0: i32) -> (i32, i32) {
    %c0_i32 = arith.constant 0 : i32
    %c0_i32_0 = arith.constant 0 : i32
    return %arg0, %c0_i32 : i32, i32
  }
  func.func @transform_1(%arg0: i32) -> (i32, i32) {
    %c0_i32 = arith.constant 0 : i32
    %c0_i32_0 = arith.constant 0 : i32
    %c0_i32_1 = arith.constant 0 : i32
    return %c0_i32, %c0_i32_0 : i32, i32
  }
  func.func @transform_2(%arg0: i32) -> (i32, i32) {
    %c0_i32 = arith.constant 0 : i32
    %c0_i32_0 = arith.constant 0 : i32
    %c0_i32_1 = arith.constant 0 : i32
    return %c0_i32, %c0_i32_0 : i32, i32
  }
  func.func @transform_3(%arg0: i32) -> (i32, i32) {
    %c0_i32 = arith.constant 0 : i32
    %c0_i32_0 = arith.constant 0 : i32
    %c0_i32_1 = arith.constant 0 : i32
    return %c0_i32, %c0_i32_0 : i32, i32
  }
  func.func @transform_4(%arg0: i32) -> (i32, i32) {
    %c0_i32 = arith.constant 0 : i32
    %c0_i32_0 = arith.constant 0 : i32
    %c0_i32_1 = arith.constant 0 : i32
    return %c0_i32, %c0_i32_0 : i32, i32
  }
  func.func @transform_5(%arg0: i32) -> (i32, i32) {
    %c0_i32 = arith.constant 0 : i32
    %c0_i32_0 = arith.constant 0 : i32
    %c0_i32_1 = arith.constant 0 : i32
    return %c0_i32, %c0_i32_0 : i32, i32
  }
  func.func @transform_6(%arg0: i32) -> (i32, i32) {
    %c0_i32 = arith.constant 0 : i32
    %c0_i32_0 = arith.constant 0 : i32
    %c0_i32_1 = arith.constant 0 : i32
    return %c0_i32, %c0_i32_0 : i32, i32
  }
  func.func @transform_7(%arg0: i32) -> (i32, i32) {
    %c0_i32 = arith.constant 0 : i32
    %c0_i32_0 = arith.constant 0 : i32
    %c0_i32_1 = arith.constant 0 : i32
    return %c0_i32, %c0_i32_0 : i32, i32
  }
  func.func @transform_8(%arg0: i32) -> (i32, i32) {
    %c0_i32 = arith.constant 0 : i32
    %c0_i32_0 = arith.constant 0 : i32
    %c0_i32_1 = arith.constant 0 : i32
    return %c0_i32, %c0_i32_0 : i32, i32
  }
  func.func @transform_9(%arg0: i32) -> (i32, i32) {
    %c0_i32 = arith.constant 0 : i32
    %c0_i32_0 = arith.constant 0 : i32
    return %arg0, %c0_i32 : i32, i32
  }
}

</mosaic_0001>

<bundles_post_ra>
// kernel: mlp_forward.1
= control target key start
LH: loop header
LB: loop body
LE: loop exit
PB: predicated region body
PF: predicated region fallthrough
CT: control target
= control target key end

     0   :  { %14 = vsyncpa [#allocation3], 0  ;;  %s14332_s0 = inlined_call_operand.vmem [shape: bf16[8,1536], index: 0, kind: input, shape index: {}]   ;;  %s14333_s1 = inlined_call_operand.hbm [shape: bf16[1536,1024], index: 1, kind: input, shape index: {}]   ;;  %s14334_s2 = inlined_call_operand.hbm [shape: f32[1,1024], index: 2, kind: input, shape index: {}]   ;;  %s14335_s3 = inlined_call_operand.hbm [shape: bf16[1024,1024], index: 3, kind: input, shape index: {}]   ;;  %s14336_s4 = inlined_call_operand.hbm [shape: f32[1,1024], index: 4, kind: input, shape index: {}]   ;;  %s14337_s5 = inlined_call_operand.hbm [shape: bf16[1024,512], index: 5, kind: input, shape index: {}]   ;;  %s14338_s6 = inlined_call_operand.hbm [shape: f32[1,512], index: 6, kind: input, shape index: {}]   ;;  %s14339_s7 = inlined_call_operand.hbm [shape: f32[1,512], index: 7, kind: input, shape index: {}]   ;;  %s14340_s8 = inlined_call_operand.hbm [shape: f32[1,128], index: 8, kind: input, shape index: {}]   ;;  %s14341_s9 = inlined_call_operand.vmem [shape: f32[8,128], index: 9, kind: output, shape index: {}]  }
   0x1   :  { %15 = vsyncpa [#allocation5], 0 }
   0x2   :  { %16 = vsyncpa [#allocation8], 0 }
   0x3   :  { %17 = vsyncpa [#allocation11], 0 }
   0x4   :  { %18 = vsyncpa [#allocation14], 0  ;;  %s13882_s30 = smov [#allocation4]   ;;  %s13883_s11 = smov [#allocation7]  }
   0x5   :  { %s39_s10 = sshll.u32 %s13882_s30, 4  ;;  %s61_s12 = sshll.u32 %s13883_s11, 4  ;;  %s40_s10 = int_to_ptr.vmem [resolvable:$true] %s39_s10  ;;  %s62_s12 = int_to_ptr.vmem [resolvable:$true] %s61_s12 }
   0x6   :  { %s13696_s15 = scalar_lea.hbm %s14334_s2, 128 }
   0x7   :  { %p13697_p0 = scmp.ne.s32.totalorder %s14334_s2, %s13696_s15  ;;  %p13700_p1 = scmp.lt.u32.totalorder %s13696_s15, %s14334_s2 }
   0x9   :  { %p13702_p2 = pnand %p13700_p1, %p13697_p0 }
   0xb   :  { %13705 = shalt.err (!%p13702_p2)
}
   0xc   :  { %s13706_s20 = scalar_lea.vmem %s40_s10, 128  ;;  %p13711_p4 = scmp.lt.s32.totalorder %s40_s10, %s40_s10 }
   0xd   :  { %p13707_p3 = scmp.ne.s32.totalorder %s40_s10, %s13706_s20  ;;  %p13712_p5 = scmp.lt.s32.totalorder %s13706_s20, %s13706_s20 }
   0xf   :  { %p13713_p6 = por %p13712_p5, %p13711_p4 }
  0x11   :  { %p13714_p7 = pnand %p13713_p6, %p13707_p3 }
  0x13   :  { %13717 = shalt.err (!%p13714_p7)
}
  0x14   :  { %42 = dma.hbm_to_vmem [thread:$0]  %s14334_s2, 128, %s40_s10, [#allocation5]  }
  0x15   :  { %s13718_s25 = scalar_lea.hbm %s14336_s4, 128 }
  0x16   :  { %p13719_p8 = scmp.ne.s32.totalorder %s14336_s4, %s13718_s25  ;;  %p13722_p9 = scmp.lt.u32.totalorder %s13718_s25, %s14336_s4 }
  0x18   :  { %p13724_p10 = pnand %p13722_p9, %p13719_p8 }
  0x1a   :  { %13727 = shalt.err (!%p13724_p10)
}
  0x1b   :  { %s13728_s30 = scalar_lea.vmem %s62_s12, 128  ;;  %p13733_p12 = scmp.lt.s32.totalorder %s62_s12, %s62_s12 }
  0x1c   :  { %p13729_p11 = scmp.ne.s32.totalorder %s62_s12, %s13728_s30  ;;  %p13734_p13 = scmp.lt.s32.totalorder %s13728_s30, %s13728_s30 }
  0x1e   :  { %p13735_p0 = por %p13734_p13, %p13733_p12 }
  0x20   :  { %p13736_p1 = pnand %p13735_p0, %p13729_p11 }
  0x22   :  { %13739 = shalt.err (!%p13736_p1)
}
  0x23   :  { %64 = dma.hbm_to_vmem [thread:$0]  %s14336_s4, 128, %s62_s12, [#allocation8]  }
  0x24   :  { %s13884_s11 = smov [#allocation10]   ;;  %s13885_s14 = smov [#allocation2]  }
  0x25   :  { %s83_s13 = sshll.u32 %s13884_s11, 4  ;;  %s26_s15 = sshll.u32 %s13885_s14, 4  ;;  %s84_s13 = int_to_ptr.vmem [resolvable:$true] %s83_s13  ;;  %s13968_s15 = int_to_ptr.vmem [resolvable:$true] %s26_s15 }
  0x26   :  { %s13740_s18 = scalar_lea.hbm %s14338_s6, 64 }
  0x27   :  { %p13741_p2 = scmp.ne.s32.totalorder %s14338_s6, %s13740_s18  ;;  %p13744_p3 = scmp.lt.u32.totalorder %s13740_s18, %s14338_s6 }
  0x29   :  { %p13746_p4 = pnand %p13744_p3, %p13741_p2 }
  0x2b   :  { %13749 = shalt.err (!%p13746_p4)
}
  0x2c   :  { %s13750_s4 = scalar_lea.vmem %s84_s13, 64  ;;  %p13755_p6 = scmp.lt.s32.totalorder %s84_s13, %s84_s13 }
  0x2d   :  { %p13751_p5 = scmp.ne.s32.totalorder %s84_s13, %s13750_s4  ;;  %p13756_p7 = scmp.lt.s32.totalorder %s13750_s4, %s13750_s4 }
  0x2f   :  { %p13757_p8 = por %p13756_p7, %p13755_p6 }
  0x31   :  { %p13758_p9 = pnand %p13757_p8, %p13751_p5 }
  0x33   :  { %13761 = shalt.err (!%p13758_p9)
}
  0x34   :  { %86 = dma.hbm_to_vmem [thread:$0]  %s14338_s6, 64, %s84_s13, [#allocation11]  }
  0x35   :  { %s13762_s26 = scalar_lea.hbm %s14333_s1, 98304 }
  0x36   :  { %p13763_p10 = scmp.ne.s32.totalorder %s14333_s1, %s13762_s26  ;;  %p13766_p11 = scmp.lt.u32.totalorder %s13762_s26, %s14333_s1 }
  0x38   :  { %p13768_p12 = pnand %p13766_p11, %p13763_p10 }
  0x3a   :  { %13771 = shalt.err (!%p13768_p12)
}
  0x3b   :  { %s13772_s2 = scalar_lea.vmem %s13968_s15, 98304  ;;  %p13777_p0 = scmp.lt.s32.totalorder %s13968_s15, %s13968_s15 }
  0x3c   :  { %p13773_p13 = scmp.ne.s32.totalorder %s13968_s15, %s13772_s2  ;;  %p13778_p1 = scmp.lt.s32.totalorder %s13772_s2, %s13772_s2 }
  0x3e   :  { %p13779_p2 = por %p13778_p1, %p13777_p0 }
  0x40   :  { %p13780_p3 = pnand %p13779_p2, %p13773_p13 }
  0x42   :  { %13783 = shalt.err (!%p13780_p3)
}
  0x43   :  { %s13886_s6 = smov 512   ;;  %s13887_s10 = smov 32  }
  0x44   :  { %32 = dma.hbm_to_vmem [thread:$0]  %s14333_s1, 98304, %s13968_s15, [#allocation3], %s13886_s6, %s13886_s6, %s13887_s10  }
  0x45   :  { %s13888_s14 = smov [#allocation6]   ;;  %s13889_s17 = smov [#allocation9]  }
  0x46   :  { %s48_s16 = sshll.u32 %s13888_s14, 4  ;;  %s70_s18 = sshll.u32 %s13889_s17, 4  ;;  %s49_s16 = int_to_ptr.vmem [resolvable:$true] %s48_s16  ;;  %s13999_s18 = int_to_ptr.vmem [resolvable:$true] %s70_s18 }
  0x47   :  { %s13784_s21 = scalar_lea.hbm %s14335_s3, 65536 }
  0x48   :  { %p13785_p4 = scmp.ne.s32.totalorder %s14335_s3, %s13784_s21  ;;  %p13788_p5 = scmp.lt.u32.totalorder %s13784_s21, %s14335_s3 }
  0x4a   :  { %p13790_p6 = pnand %p13788_p5, %p13785_p4 }
  0x4c   :  { %13793 = shalt.err (!%p13790_p6)
}
  0x4d   :  { %s13794_s1 = scalar_lea.vmem %s49_s16, 65536  ;;  %p13799_p8 = scmp.lt.s32.totalorder %s49_s16, %s49_s16 }
  0x4e   :  { %p13795_p7 = scmp.ne.s32.totalorder %s49_s16, %s13794_s1  ;;  %p13800_p9 = scmp.lt.s32.totalorder %s13794_s1, %s13794_s1 }
  0x50   :  { %p13801_p10 = por %p13800_p9, %p13799_p8 }
  0x52   :  { %p13802_p11 = pnand %p13801_p10, %p13795_p7 }
  0x54   :  { %13805 = shalt.err (!%p13802_p11)
}
  0x55   :  { %54 = dma.hbm_to_vmem [thread:$0]  %s14335_s3, 65536, %s49_s16, [#allocation5], %s13886_s6, %s13886_s6, %s13887_s10  }
  0x56   :  { %s13806_s27 = scalar_lea.hbm %s14337_s5, 32768 }
  0x57   :  { %p13807_p12 = scmp.ne.s32.totalorder %s14337_s5, %s13806_s27  ;;  %p13810_p13 = scmp.lt.u32.totalorder %s13806_s27, %s14337_s5 }
  0x59   :  { %p13812_p0 = pnand %p13810_p13, %p13807_p12 }
  0x5b   :  { %13815 = shalt.err (!%p13812_p0)
}
  0x5c   :  { %s13816_s11 = scalar_lea.vmem %s13999_s18, 32768  ;;  %p13821_p2 = scmp.lt.s32.totalorder %s13999_s18, %s13999_s18 }
  0x5d   :  { %p13817_p1 = scmp.ne.s32.totalorder %s13999_s18, %s13816_s11  ;;  %p13822_p3 = scmp.lt.s32.totalorder %s13816_s11, %s13816_s11 }
  0x5f   :  { %p13823_p4 = por %p13822_p3, %p13821_p2 }
  0x61   :  { %p13824_p5 = pnand %p13823_p4, %p13817_p1 }
  0x63   :  { %13827 = shalt.err (!%p13824_p5)
}
  0x64   :  { %s13890_s3 = smov 256   ;;  %s13891_s6 = smov 16  }
  0x65   :  { %76 = dma.hbm_to_vmem [thread:$0]  %s14337_s5, 32768, %s13999_s18, [#allocation8], %s13890_s3, %s13890_s3, %s13891_s6  }
  0x66   :  { %s13892_s14 = smov [#allocation12]   ;;  %s13893_s17 = smov [#allocation13]  }
  0x67   :  { %s93_s16 = sshll.u32 %s13892_s14, 4  ;;  %s103_s19 = sshll.u32 %s13893_s17, 4  ;;  %s94_s16 = int_to_ptr.vmem [resolvable:$true] %s93_s16  ;;  %s104_s19 = int_to_ptr.vmem [resolvable:$true] %s103_s19 }
  0x68   :  { %s13828_s22 = scalar_lea.hbm %s14339_s7, 64 }
  0x69   :  { %p13829_p6 = scmp.ne.s32.totalorder %s14339_s7, %s13828_s22  ;;  %p13832_p7 = scmp.lt.u32.totalorder %s13828_s22, %s14339_s7 }
  0x6b   :  { %p13834_p8 = pnand %p13832_p7, %p13829_p6 }
  0x6d   :  { %13837 = shalt.err (!%p13834_p8)
}
  0x6e   :  { %s13838_s5 = scalar_lea.vmem %s94_s16, 64  ;;  %p13843_p10 = scmp.lt.s32.totalorder %s94_s16, %s94_s16 }
  0x6f   :  { %p13839_p9 = scmp.ne.s32.totalorder %s94_s16, %s13838_s5  ;;  %p13844_p11 = scmp.lt.s32.totalorder %s13838_s5, %s13838_s5 }
  0x71   :  { %p13845_p12 = por %p13844_p11, %p13843_p10 }
  0x73   :  { %p13846_p13 = pnand %p13845_p12, %p13839_p9 }
  0x75   :  { %13849 = shalt.err (!%p13846_p13)
}
  0x76   :  { %96 = dma.hbm_to_vmem [thread:$0]  %s14339_s7, 64, %s94_s16, [#allocation11]  }
  0x77   :  { %s13850_s26 = scalar_lea.hbm %s14340_s8, 16 }
  0x78   :  { %p13851_p0 = scmp.ne.s32.totalorder %s14340_s8, %s13850_s26  ;;  %p13854_p1 = scmp.lt.u32.totalorder %s13850_s26, %s14340_s8 }
  0x7a   :  { %p13856_p2 = pnand %p13854_p1, %p13851_p0 }
  0x7c   :  { %13859 = shalt.err (!%p13856_p2)
}
  0x7d   :  { %s13860_s2 = scalar_lea.vmem %s104_s19, 16  ;;  %s13864_s11 = scalar_lea.vmem %s104_s19, 32 }
  0x7e   :  { %p13861_p3 = scmp.ne.s32.totalorder %s104_s19, %s13860_s2  ;;  %p13865_p4 = scmp.lt.s32.totalorder %s104_s19, %s104_s19 }
  0x7f   :  { %p13866_p5 = scmp.lt.s32.totalorder %s13864_s11, %s13860_s2 }
  0x81   :  { %p13867_p6 = por %p13866_p5, %p13865_p4 }
  0x83   :  { %p13868_p7 = pnand %p13867_p6, %p13861_p3 }
  0x85   :  { %13871 = shalt.err (!%p13868_p7)
}
  0x86   :  { %106 = dma.hbm_to_vmem [thread:$0]  %s14340_s8, 16, %s104_s19, [#allocation14]  }
  0x87   :  { %13872 = dma.done.wait [#allocation3], 98304  }
  0x88   :  { %13873 = vsyncadd [#allocation3], 4294868992 }
  0x89   :  { %13874 = dma.done.wait [#allocation5], 65664  }
  0x8a   :  { %13875 = vsyncadd [#allocation5], 4294901632 }
  0x8b   :  { %13876 = dma.done.wait [#allocation8], 32896  }
  0x8c   :  { %13877 = vsyncadd [#allocation8], 4294934400 }
  0x8d   :  { %13878 = dma.done.wait [#allocation11], 128  }
  0x8e   :  { %13879 = vsyncadd [#allocation11], 4294967168 }
  0x8f   :  { %13880 = dma.done.wait [#allocation14], 16  }
  0x90   :  { %13881 = vsyncadd [#allocation14], 4294967280  ;;  %v137_v0 = vld [vmem:[#allocation2] sm:$0xff]  ;;  %v138_v2 = vld [vmem:[#allocation2 + $0x8] sm:$0xff] }
  0x91   :  { %v141_v1 = vld [vmem:[#allocation2 + $0x20] sm:$0xff]  ;;  %v142_v4 = vld [vmem:[#allocation2 + $0x28] sm:$0xff] }
  0x92   :  { %v11573_v3 = vcombine.high %v137_v0, %v141_v1  ;;  %v11572_v5 = vcombine.low %v137_v0, %v141_v1  ;;  %v145_v6 = vld [vmem:[#allocation2 + $0x40] sm:$0xff]  ;;  %v11575_v8 = vcombine.high %v138_v2, %v142_v4  ;;  %v11574_v9 = vcombine.low %v138_v2, %v142_v4  ;;  %v146_v11 = vld [vmem:[#allocation2 + $0x48] sm:$0xff] }
  0x93   :  { %v149_v7 = vld [vmem:[#allocation2 + $0x60] sm:$0xff]  ;;  %v150_v12 = vld [vmem:[#allocation2 + $0x68] sm:$0xff] }
  0x94   :  { %v11581_v10 = vcombine.high %v145_v6, %v149_v7  ;;  %v153_v13 = vld [vmem:[#allocation2 + $0x80] sm:$0xff]  ;;  %4829 = vmatprep.subr.bf16.mxu0 %v11573_v3  ;;  %v11583_v14 = vcombine.high %v146_v11, %v150_v12  ;;  %v154_v16 = vld [vmem:[#allocation2 + $0x88] sm:$0xff]  ;;  %5075 = vmatprep.subr.bf16.mxu1 %v11575_v8  ;;  %v11580_v18 = vcombine.low %v145_v6, %v149_v7 }
  0x95   :  { %v157_v15 = vld [vmem:[#allocation2 + $0xa0] sm:$0xff]  ;;  %v158_v17 = vld [vmem:[#allocation2 + $0xa8] sm:$0xff]  ;;  %4830 = vmatpush1.bf16.msra.mxu0 %v11572_v5  ;;  %5076 = vmatpush1.bf16.msra.mxu1 %v11574_v9  ;;  %v11582_v19 = vcombine.low %v146_v11, %v150_v12 }
  0x96   :  { %4831 = vmatprep.subr.bf16.mxu0 %v11581_v10  ;;  %v11589_v20 = vcombine.high %v153_v13, %v157_v15  ;;  %5077 = vmatprep.subr.bf16.mxu1 %v11583_v14  ;;  %v11591_v21 = vcombine.high %v154_v16, %v158_v17  ;;  %v161_v22 = vld [vmem:[#allocation2 + $0xc0] sm:$0xff]  ;;  %v162_v24 = vld [vmem:[#allocation2 + $0xc8] sm:$0xff]  ;;  %v11588_v26 = vcombine.low %v153_v13, %v157_v15 }
  0x97   :  { %v165_v23 = vld [vmem:[#allocation2 + $0xe0] sm:$0xff]  ;;  %v166_v25 = vld [vmem:[#allocation2 + $0xe8] sm:$0xff]  ;;  %v11590_v27 = vcombine.low %v154_v16, %v158_v17 }
  0x98   :  { %v11597_v28 = vcombine.high %v161_v22, %v165_v23  ;;  %v11599_v29 = vcombine.high %v162_v24, %v166_v25  ;;  %v169_v30 = vld [vmem:[#allocation2 + $0x100] sm:$0xff]  ;;  %v170_v32 = vld [vmem:[#allocation2 + $0x108] sm:$0xff]  ;;  %v11596_v34 = vcombine.low %v161_v22, %v165_v23  ;;  %v11598_v35 = vcombine.low %v162_v24, %v166_v25 }
  0x99   :  { %4832 = vmatpush1.bf16.msra.mxu0 %v11580_v18  ;;  %5078 = vmatpush1.bf16.msra.mxu1 %v11582_v19  ;;  %v173_v31 = vld [vmem:[#allocation2 + $0x120] sm:$0xff]  ;;  %v174_v33 = vld [vmem:[#allocation2 + $0x128] sm:$0xff] }
  0x9a   :  { %4833 = vmatprep.subr.bf16.mxu0 %v11589_v20  ;;  %5079 = vmatprep.subr.bf16.mxu1 %v11591_v21  ;;  %v11605_v36 = vcombine.high %v169_v30, %v173_v31  ;;  %v11607_v37 = vcombine.high %v170_v32, %v174_v33  ;;  %v177_v38 = vld [vmem:[#allocation2 + $0x140] sm:$0xff]  ;;  %v178_v40 = vld [vmem:[#allocation2 + $0x148] sm:$0xff]  ;;  %v11604_v42 = vcombine.low %v169_v30, %v173_v31 }
  0x9b   :  { %v181_v39 = vld [vmem:[#allocation2 + $0x160] sm:$0xff]  ;;  %v182_v41 = vld [vmem:[#allocation2 + $0x168] sm:$0xff]  ;;  %v11606_v43 = vcombine.low %v170_v32, %v174_v33 }
  0x9c   :  { %v11613_v44 = vcombine.high %v177_v38, %v181_v39  ;;  %v11615_v45 = vcombine.high %v178_v40, %v182_v41  ;;  %v185_v46 = vld [vmem:[#allocation2 + $0x180] sm:$0xff]  ;;  %v186_v48 = vld [vmem:[#allocation2 + $0x188] sm:$0xff]  ;;  %v11612_v50 = vcombine.low %v177_v38, %v181_v39  ;;  %v11614_v51 = vcombine.low %v178_v40, %v182_v41 }
  0x9d   :  { %4834 = vmatpush1.bf16.msra.mxu0 %v11588_v26  ;;  %5080 = vmatpush1.bf16.msra.mxu1 %v11590_v27  ;;  %v189_v47 = vld [vmem:[#allocation2 + $0x1a0] sm:$0xff]  ;;  %v190_v49 = vld [vmem:[#allocation2 + $0x1a8] sm:$0xff] }
  0x9e   :  { %4835 = vmatprep.subr.bf16.mxu0 %v11597_v28  ;;  %5081 = vmatprep.subr.bf16.mxu1 %v11599_v29  ;;  %v11621_v52 = vcombine.high %v185_v46, %v189_v47  ;;  %v14057_v53 = vld [vmem:[%s14332_s0] sm:$0xff]  ;;  %v11623_v54 = vcombine.high %v186_v48, %v190_v49  ;;  %v194_v58 = vld [vmem:[#allocation2 + $0x1c8] sm:$0xff]  ;;  %v11620_v60 = vcombine.low %v185_v46, %v189_v47 }
  0x9f   :  { %v193_v55 = vld [vmem:[#allocation2 + $0x1c0] sm:$0xff]  ;;  %v14061_v57 = vcombine.high %v14057_v53, %v14057_v53  ;;  %v198_v59 = vld [vmem:[#allocation2 + $0x1e8] sm:$0xff]  ;;  %v11622_v61 = vcombine.low %v186_v48, %v190_v49 }
  0xa0   :  { %v197_v56 = vld [vmem:[#allocation2 + $0x1e0] sm:$0xff]  ;;  %v11631_v63 = vcombine.high %v194_v58, %v198_v59  ;;  %v202_v2 = vld [vmem:[#allocation2 + $0x208] sm:$0xff]  ;;  %v11630_v5 = vcombine.low %v194_v58, %v198_v59 }
  0xa1   :  { %4836 = vmatpush1.bf16.msra.mxu0 %v11596_v34  ;;  %5082 = vmatpush1.bf16.msra.mxu1 %v11598_v35  ;;  %v11629_v62 = vcombine.high %v193_v55, %v197_v56  ;;  %v201_v0 = vld [vmem:[#allocation2 + $0x200] sm:$0xff]  ;;  %v206_v3 = vld [vmem:[#allocation2 + $0x228] sm:$0xff]  ;;  %v11628_v4 = vcombine.low %v193_v55, %v197_v56 }
  0xa2   :  { %4837 = vmatprep.subr.bf16.mxu0 %v11605_v36  ;;  %5083 = vmatprep.subr.bf16.mxu1 %v11607_v37  ;;  %v205_v1 = vld [vmem:[#allocation2 + $0x220] sm:$0xff]  ;;  %v11639_v7 = vcombine.high %v202_v2, %v206_v3  ;;  %v210_v10 = vld [vmem:[#allocation2 + $0x248] sm:$0xff]  ;;  %v11638_v13 = vcombine.low %v202_v2, %v206_v3 }
  0xa3   :  { %4861 = vmatprep.mubr.bf16.mxu0 %v14061_v57  ;;  %5107 = vmatprep.mubr.bf16.mxu1 %v14061_v57  ;;  %v11637_v6 = vcombine.high %v201_v0, %v205_v1  ;;  %v209_v8 = vld [vmem:[#allocation2 + $0x240] sm:$0xff]  ;;  %v214_v11 = vld [vmem:[#allocation2 + $0x268] sm:$0xff]  ;;  %v11636_v12 = vcombine.low %v201_v0, %v205_v1 }
  0xa4   :  { %v213_v9 = vld [vmem:[#allocation2 + $0x260] sm:$0xff]  ;;  %v11647_v15 = vcombine.high %v210_v10, %v214_v11  ;;  %v218_v18 = vld [vmem:[#allocation2 + $0x288] sm:$0xff]  ;;  %v11646_v21 = vcombine.low %v210_v10, %v214_v11 }
  0xa5   :  { %4838 = vmatpush1.bf16.msra.mxu0 %v11604_v42  ;;  %5084 = vmatpush1.bf16.msra.mxu1 %v11606_v43  ;;  %v11645_v14 = vcombine.high %v209_v8, %v213_v9  ;;  %v217_v16 = vld [vmem:[#allocation2 + $0x280] sm:$0xff]  ;;  %v222_v19 = vld [vmem:[#allocation2 + $0x2a8] sm:$0xff]  ;;  %v11644_v20 = vcombine.low %v209_v8, %v213_v9 }
  0xa6   :  { %4839 = vmatprep.subr.bf16.mxu0 %v11613_v44  ;;  %5085 = vmatprep.subr.bf16.mxu1 %v11615_v45  ;;  %v221_v17 = vld [vmem:[#allocation2 + $0x2a0] sm:$0xff]  ;;  %v11655_v23 = vcombine.high %v218_v18, %v222_v19  ;;  %v226_v26 = vld [vmem:[#allocation2 + $0x2c8] sm:$0xff]  ;;  %v11654_v29 = vcombine.low %v218_v18, %v222_v19 }
  0xa7   :  { %v11653_v22 = vcombine.high %v217_v16, %v221_v17  ;;  %v225_v24 = vld [vmem:[#allocation2 + $0x2c0] sm:$0xff]  ;;  %v230_v27 = vld [vmem:[#allocation2 + $0x2e8] sm:$0xff]  ;;  %v11652_v28 = vcombine.low %v217_v16, %v221_v17 }
  0xa8   :  { %v229_v25 = vld [vmem:[#allocation2 + $0x2e0] sm:$0xff]  ;;  %v11663_v31 = vcombine.high %v226_v26, %v230_v27  ;;  %v234_v34 = vld [vmem:[#allocation2 + $0x308] sm:$0xff]  ;;  %v11662_v37 = vcombine.low %v226_v26, %v230_v27 }
  0xa9   :  { %4840 = vmatpush1.bf16.msra.mxu0 %v11612_v50  ;;  %5086 = vmatpush1.bf16.msra.mxu1 %v11614_v51  ;;  %v11661_v30 = vcombine.high %v225_v24, %v229_v25  ;;  %v233_v32 = vld [vmem:[#allocation2 + $0x300] sm:$0xff]  ;;  %v238_v35 = vld [vmem:[#allocation2 + $0x328] sm:$0xff]  ;;  %v11660_v36 = vcombine.low %v225_v24, %v229_v25 }
  0xaa   :  { %4841 = vmatprep.subr.bf16.mxu0 %v11621_v52  ;;  %5087 = vmatprep.subr.bf16.mxu1 %v11623_v54  ;;  %v237_v33 = vld [vmem:[#allocation2 + $0x320] sm:$0xff]  ;;  %v11671_v39 = vcombine.high %v234_v34, %v238_v35  ;;  %v242_v42 = vld [vmem:[#allocation2 + $0x348] sm:$0xff]  ;;  %v11670_v45 = vcombine.low %v234_v34, %v238_v35 }
  0xab   :  { %v11669_v38 = vcombine.high %v233_v32, %v237_v33  ;;  %v241_v40 = vld [vmem:[#allocation2 + $0x340] sm:$0xff]  ;;  %v246_v43 = vld [vmem:[#allocation2 + $0x368] sm:$0xff]  ;;  %v11668_v44 = vcombine.low %v233_v32, %v237_v33 }
  0xac   :  { %v245_v41 = vld [vmem:[#allocation2 + $0x360] sm:$0xff]  ;;  %v11679_v47 = vcombine.high %v242_v42, %v246_v43  ;;  %v250_v50 = vld [vmem:[#allocation2 + $0x388] sm:$0xff]  ;;  %v11678_v54 = vcombine.low %v242_v42, %v246_v43 }
  0xad   :  { %4842 = vmatpush1.bf16.msra.mxu0 %v11620_v60  ;;  %5088 = vmatpush1.bf16.msra.mxu1 %v11622_v61  ;;  %v11677_v46 = vcombine.high %v241_v40, %v245_v41  ;;  %v249_v48 = vld [vmem:[#allocation2 + $0x380] sm:$0xff]  ;;  %v254_v51 = vld [vmem:[#allocation2 + $0x3a8] sm:$0xff]  ;;  %v11676_v52 = vcombine.low %v241_v40, %v245_v41 }
  0xae   :  { %4843 = vmatprep.subr.bf16.mxu0 %v11629_v62  ;;  %5089 = vmatprep.subr.bf16.mxu1 %v11631_v63  ;;  %v253_v49 = vld [vmem:[#allocation2 + $0x3a0] sm:$0xff]  ;;  %v11687_v56 = vcombine.high %v250_v50, %v254_v51  ;;  %v258_v60 = vld [vmem:[#allocation2 + $0x3c8] sm:$0xff]  ;;  %v11686_v63 = vcombine.low %v250_v50, %v254_v51 }
  0xaf   :  { %v11685_v55 = vcombine.high %v249_v48, %v253_v49  ;;  %v257_v58 = vld [vmem:[#allocation2 + $0x3c0] sm:$0xff]  ;;  %v262_v61 = vld [vmem:[#allocation2 + $0x3e8] sm:$0xff]  ;;  %v11684_v62 = vcombine.low %v249_v48, %v253_v49 }
  0xb0   :  { %v261_v59 = vld [vmem:[#allocation2 + $0x3e0] sm:$0xff]  ;;  %v11695_v1 = vcombine.high %v258_v60, %v262_v61 }
  0xb1   :  { %4844 = vmatpush1.bf16.msra.mxu0 %v11628_v4  ;;  %5090 = vmatpush1.bf16.msra.mxu1 %v11630_v5  ;;  %v11693_v0 = vcombine.high %v257_v58, %v261_v59  ;;  %v265_v2 = vld [vmem:[#allocation2 + $0x400] sm:$0xff]  ;;  %v266_v4 = vld [vmem:[#allocation2 + $0x408] sm:$0xff] }
  0xb2   :  { %4845 = vmatprep.subr.bf16.mxu0 %v11637_v6  ;;  %5091 = vmatprep.subr.bf16.mxu1 %v11639_v7  ;;  %v269_v3 = vld [vmem:[#allocation2 + $0x420] sm:$0xff]  ;;  %v270_v5 = vld [vmem:[#allocation2 + $0x428] sm:$0xff]  ;;  %v11692_v6 = vcombine.low %v257_v58, %v261_v59  ;;  %v11694_v7 = vcombine.low %v258_v60, %v262_v61 }
  0xb3   :  { %v11701_v8 = vcombine.high %v265_v2, %v269_v3  ;;  %v11703_v9 = vcombine.high %v266_v4, %v270_v5  ;;  %v273_v10 = vld [vmem:[#allocation2 + $0x440] sm:$0xff]  ;;  %v11700_v16 = vcombine.low %v265_v2, %v269_v3  ;;  %v11702_v17 = vcombine.low %v266_v4, %v270_v5 }
  0xb4   :  { %v277_v11 = vld [vmem:[#allocation2 + $0x460] sm:$0xff] }
  0xb5   :  { %4846 = vmatpush1.bf16.msra.mxu0 %v11636_v12  ;;  %5092 = vmatpush1.bf16.msra.mxu1 %v11638_v13  ;;  %v14067_v12 = vcombine.low %v14057_v53, %v14057_v53  ;;  %v274_v13 = vld [vmem:[#allocation2 + $0x448] sm:$0xff]  ;;  %v11709_v18 = vcombine.high %v273_v10, %v277_v11  ;;  %v281_v19 = vld [vmem:[#allocation2 + $0x480] sm:$0xff]  ;;  %v11708_v24 = vcombine.low %v273_v10, %v277_v11 }
  0xb6   :  { %4847 = vmatprep.subr.bf16.mxu0 %v11645_v14  ;;  %5093 = vmatprep.subr.bf16.mxu1 %v11647_v15  ;;  %v278_v14 = vld [vmem:[#allocation2 + $0x468] sm:$0xff]  ;;  %v289_v27 = vld [vmem:[#allocation2 + $0x4c0] sm:$0xff] }
  0xb7   :  { %v14072_v15 = vld [vmem:[%s14332_s0 + $0x8] sm:$0xff]  ;;  %v11710_v25 = vcombine.low %v274_v13, %v278_v14  ;;  %v297_v35 = vld [vmem:[#allocation2 + $0x500] sm:$0xff] }
  0xb8   :  { %v286_v53 = vld [vmem:[#allocation2 + $0x4a8] sm:$0xff]  ;;  %v305_v43 = vld [vmem:[#allocation2 + $0x540] sm:$0xff] }
  0xb9   :  { %4848 = vmatpush1.bf16.msra.mxu0 %v11644_v20  ;;  %5094 = vmatpush1.bf16.msra.mxu1 %v11646_v21  ;;  %v285_v20 = vld [vmem:[#allocation2 + $0x4a0] sm:$0xff]  ;;  %v11711_v21 = vcombine.high %v274_v13, %v278_v14 }
  0xba   :  { %4849 = vmatprep.subr.bf16.mxu0 %v11653_v22  ;;  %5095 = vmatprep.subr.bf16.mxu1 %v11655_v23  ;;  %v282_v22 = vld [vmem:[#allocation2 + $0x488] sm:$0xff]  ;;  %v14076_v23 = vcombine.high %v14072_v15, %v14072_v15  ;;  %v11717_v26 = vcombine.high %v281_v19, %v285_v20  ;;  %v11716_v32 = vcombine.low %v281_v19, %v285_v20  ;;  %v313_v51 = vld [vmem:[#allocation2 + $0x580] sm:$0xff] }
  0xbb   :  { %v11718_v33 = vcombine.low %v282_v22, %v286_v53  ;;  %v321_v61 = vld [vmem:[#allocation2 + $0x5c0] sm:$0xff]  ;;  %v342_v19 = vld [vmem:[#allocation2 + $0x668] sm:$0xff] }
  0xbc   :  { %v329_v5 = vld [vmem:[#allocation2 + $0x600] sm:$0xff] }
  0xbd   :  { %4850 = vmatpush1.bf16.msra.mxu0 %v11652_v28  ;;  %5096 = vmatpush1.bf16.msra.mxu1 %v11654_v29  ;;  %v293_v28 = vld [vmem:[#allocation2 + $0x4e0] sm:$0xff]  ;;  %v290_v29 = vld [vmem:[#allocation2 + $0x4c8] sm:$0xff] }
  0xbe   :  { %4851 = vmatprep.subr.bf16.mxu0 %v11661_v30  ;;  %5097 = vmatprep.subr.bf16.mxu1 %v11663_v31  ;;  %v11719_v30 = vcombine.high %v282_v22, %v286_v53  ;;  %v294_v31 = vld [vmem:[#allocation2 + $0x4e8] sm:$0xff]  ;;  %v11725_v34 = vcombine.high %v289_v27, %v293_v28  ;;  %v11724_v40 = vcombine.low %v289_v27, %v293_v28  ;;  %v337_v14 = vld [vmem:[#allocation2 + $0x640] sm:$0xff] }
  0xbf   :  { %v11726_v41 = vcombine.low %v290_v29, %v294_v31  ;;  %v345_v53 = vld [vmem:[#allocation2 + $0x680] sm:$0xff]  ;;  %v350_v27 = vld [vmem:[#allocation2 + $0x6a8] sm:$0xff] }
  0xc1   :  { %4852 = vmatpush1.bf16.msra.mxu0 %v11660_v36  ;;  %5098 = vmatpush1.bf16.msra.mxu1 %v11662_v37  ;;  %v301_v36 = vld [vmem:[#allocation2 + $0x520] sm:$0xff]  ;;  %v298_v37 = vld [vmem:[#allocation2 + $0x508] sm:$0xff] }
  0xc2   :  { %4853 = vmatprep.subr.bf16.mxu0 %v11669_v38  ;;  %5099 = vmatprep.subr.bf16.mxu1 %v11671_v39  ;;  %v11727_v38 = vcombine.high %v290_v29, %v294_v31  ;;  %v302_v39 = vld [vmem:[#allocation2 + $0x528] sm:$0xff]  ;;  %v11733_v42 = vcombine.high %v297_v35, %v301_v36  ;;  %v11732_v48 = vcombine.low %v297_v35, %v301_v36  ;;  %v353_v31 = vld [vmem:[#allocation2 + $0x6c0] sm:$0xff] }
  0xc3   :  { %v11734_v49 = vcombine.low %v298_v37, %v302_v39  ;;  %v358_v35 = vld [vmem:[#allocation2 + $0x6e8] sm:$0xff] }
  0xc5   :  { %4854 = vmatpush1.bf16.msra.mxu0 %v11668_v44  ;;  %5100 = vmatpush1.bf16.msra.mxu1 %v11670_v45  ;;  %v309_v44 = vld [vmem:[#allocation2 + $0x560] sm:$0xff]  ;;  %v306_v45 = vld [vmem:[#allocation2 + $0x548] sm:$0xff] }
  0xc6   :  { %4855 = vmatprep.subr.bf16.mxu0 %v11677_v46  ;;  %5101 = vmatprep.subr.bf16.mxu1 %v11679_v47  ;;  %v11735_v46 = vcombine.high %v298_v37, %v302_v39  ;;  %v310_v47 = vld [vmem:[#allocation2 + $0x568] sm:$0xff]  ;;  %v11741_v50 = vcombine.high %v305_v43, %v309_v44  ;;  %v11740_v58 = vcombine.low %v305_v43, %v309_v44  ;;  %v361_v39 = vld [vmem:[#allocation2 + $0x700] sm:$0xff] }
  0xc7   :  { %v11742_v59 = vcombine.low %v306_v45, %v310_v47  ;;  %v366_v43 = vld [vmem:[#allocation2 + $0x728] sm:$0xff] }
  0xc9   :  { %4856 = vmatpush1.bf16.msra.mxu0 %v11676_v52  ;;  %5102 = vmatpush1.bf16.msra.mxu1 %v11678_v54  ;;  %v317_v52 = vld [vmem:[#allocation2 + $0x5a0] sm:$0xff]  ;;  %v314_v54 = vld [vmem:[#allocation2 + $0x588] sm:$0xff] }
  0xca   :  { %4857 = vmatprep.subr.bf16.mxu0 %v11685_v55  ;;  %5103 = vmatprep.subr.bf16.mxu1 %v11687_v56  ;;  %v11743_v55 = vcombine.high %v306_v45, %v310_v47  ;;  %v318_v56 = vld [vmem:[#allocation2 + $0x5a8] sm:$0xff]  ;;  %v11749_v60 = vcombine.high %v313_v51, %v317_v52  ;;  %v11748_v2 = vcombine.low %v313_v51, %v317_v52  ;;  %v369_v47 = vld [vmem:[#allocation2 + $0x740] sm:$0xff] }
  0xcb   :  { %v11750_v3 = vcombine.low %v314_v54, %v318_v56  ;;  %v374_v51 = vld [vmem:[#allocation2 + $0x768] sm:$0xff] }
  0xcd   :  { %4858 = vmatpush1.bf16.msra.mxu0 %v11684_v62  ;;  %5104 = vmatpush1.bf16.msra.mxu1 %v11686_v63  ;;  %v325_v62 = vld [vmem:[#allocation2 + $0x5e0] sm:$0xff]  ;;  %v322_v63 = vld [vmem:[#allocation2 + $0x5c8] sm:$0xff] }
  0xce   :  { %4859 = vmatprep.subr.bf16.mxu0 %v11693_v0  ;;  %5105 = vmatprep.subr.bf16.mxu1 %v11695_v1  ;;  %v11751_v0 = vcombine.high %v314_v54, %v318_v56  ;;  %v326_v1 = vld [vmem:[#allocation2 + $0x5e8] sm:$0xff]  ;;  %v11757_v4 = vcombine.high %v321_v61, %v325_v62  ;;  %v11756_v10 = vcombine.low %v321_v61, %v325_v62  ;;  %v377_v56 = vld [vmem:[#allocation2 + $0x780] sm:$0xff] }
  0xcf   :  { %v11758_v11 = vcombine.low %v322_v63, %v326_v1  ;;  %v382_v61 = vld [vmem:[#allocation2 + $0x7a8] sm:$0xff] }
  0xd1   :  { %4860 = vmatpush1.bf16.msra.mxu0 %v11692_v6  ;;  %5106 = vmatpush1.bf16.msra.mxu1 %v11694_v7  ;;  %v333_v6 = vld [vmem:[#allocation2 + $0x620] sm:$0xff]  ;;  %v330_v7 = vld [vmem:[#allocation2 + $0x608] sm:$0xff] }
  0xd2   :  { %4870 = vmatprep.subr.bf16.mxu0 %v11701_v8  ;;  %5116 = vmatprep.subr.bf16.mxu1 %v11703_v9  ;;  %v11759_v8 = vcombine.high %v322_v63, %v326_v1  ;;  %v334_v9 = vld [vmem:[#allocation2 + $0x628] sm:$0xff]  ;;  %v11765_v13 = vcombine.high %v329_v5, %v333_v6  ;;  %v11764_v20 = vcombine.low %v329_v5, %v333_v6  ;;  %v385_v1 = vld [vmem:[#allocation2 + $0x7c0] sm:$0xff] }
  0xd3   :  { %v390_v5 = vld [vmem:[#allocation2 + $0x7e8] sm:$0xff] }
  0xd4   :  { %4862 = vmatmul.mubr.bf16.vlgmr.msra.gmra.mrb[0].mxu0 %v14067_v12  ;;  %5108 = vmatmul.mubr.bf16.vlgmr.msra.gmra.mrb[0].mxu1 %v14067_v12 }
  0xd5   :  { %4871 = vmatpush1.bf16.msra.mxu0 %v11700_v16  ;;  %5117 = vmatpush1.bf16.msra.mxu1 %v11702_v17  ;;  %v341_v16 = vld [vmem:[#allocation2 + $0x660] sm:$0xff]  ;;  %v338_v17 = vld [vmem:[#allocation2 + $0x648] sm:$0xff] }
  0xd6   :  { %4872 = vmatprep.subr.bf16.mxu0 %v11709_v18  ;;  %5118 = vmatprep.subr.bf16.mxu1 %v11711_v21  ;;  %v11767_v18 = vcombine.high %v330_v7, %v334_v9  ;;  %v11766_v21 = vcombine.low %v330_v7, %v334_v9  ;;  %v11773_v22 = vcombine.high %v337_v14, %v341_v16  ;;  %v393_v9 = vld [vmem:[#allocation2 + $0x800] sm:$0xff] }
  0xd7   :  { %4902 = vmatprep.mubr.bf16.mxu0 %v14076_v23  ;;  %5148 = vmatprep.mubr.bf16.mxu1 %v14076_v23  ;;  %v11772_v28 = vcombine.low %v337_v14, %v341_v16  ;;  %v11774_v29 = vcombine.low %v338_v17, %v342_v19  ;;  %v398_v14 = vld [vmem:[#allocation2 + $0x828] sm:$0xff] }
  0xd9   :  { %4873 = vmatpush1.bf16.msra.mxu0 %v11708_v24  ;;  %5119 = vmatpush1.bf16.msra.mxu1 %v11710_v25  ;;  %v349_v24 = vld [vmem:[#allocation2 + $0x6a0] sm:$0xff]  ;;  %v346_v25 = vld [vmem:[#allocation2 + $0x688] sm:$0xff] }
  0xda   :  { %4874 = vmatprep.subr.bf16.mxu0 %v11717_v26  ;;  %5120 = vmatprep.subr.bf16.mxu1 %v11719_v30  ;;  %v11775_v26 = vcombine.high %v338_v17, %v342_v19  ;;  %v11781_v30 = vcombine.high %v345_v53, %v349_v24  ;;  %v11780_v36 = vcombine.low %v345_v53, %v349_v24  ;;  %v401_v17 = vld [vmem:[#allocation2 + $0x840] sm:$0xff]  ;;  %v14085_v24 = vld [vmem:[%s14332_s0 + $0x10] sm:$0xff] }
  0xdb   :  { %v11782_v37 = vcombine.low %v346_v25, %v350_v27 }
  0xdd   :  { %4875 = vmatpush1.bf16.msra.mxu0 %v11716_v32  ;;  %5121 = vmatpush1.bf16.msra.mxu1 %v11718_v33  ;;  %v357_v32 = vld [vmem:[#allocation2 + $0x6e0] sm:$0xff]  ;;  %v354_v33 = vld [vmem:[#allocation2 + $0x6c8] sm:$0xff] }
  0xde   :  { %4876 = vmatprep.subr.bf16.mxu0 %v11725_v34  ;;  %5122 = vmatprep.subr.bf16.mxu1 %v11727_v38  ;;  %v11783_v34 = vcombine.high %v346_v25, %v350_v27  ;;  %v11789_v38 = vcombine.high %v353_v31, %v357_v32  ;;  %v11788_v44 = vcombine.low %v353_v31, %v357_v32  ;;  %v410_v32 = vld [vmem:[#allocation2 + $0x888] sm:$0xff] }
  0xdf   :  { %v11790_v45 = vcombine.low %v354_v33, %v358_v35  ;;  %v14089_v25 = vcombine.low %v14072_v15, %v14072_v15 }
  0xe1   :  { %4877 = vmatpush1.bf16.msra.mxu0 %v11724_v40  ;;  %5123 = vmatpush1.bf16.msra.mxu1 %v11726_v41  ;;  %v365_v40 = vld [vmem:[#allocation2 + $0x720] sm:$0xff]  ;;  %v362_v41 = vld [vmem:[#allocation2 + $0x708] sm:$0xff] }
  0xe2   :  { %4878 = vmatprep.subr.bf16.mxu0 %v11733_v42  ;;  %5124 = vmatprep.subr.bf16.mxu1 %v11735_v46  ;;  %v11791_v42 = vcombine.high %v354_v33, %v358_v35  ;;  %v11797_v46 = vcombine.high %v361_v39, %v365_v40  ;;  %v11796_v52 = vcombine.low %v361_v39, %v365_v40  ;;  %v414_v33 = vld [vmem:[#allocation2 + $0x8a8] sm:$0xff] }
  0xe3   :  { %v11798_v54 = vcombine.low %v362_v41, %v366_v43  ;;  %v418_v39 = vld [vmem:[#allocation2 + $0x8c8] sm:$0xff]  ;;  %v11847_v40 = vcombine.high %v410_v32, %v414_v33 }
  0xe5   :  { %4879 = vmatpush1.bf16.msra.mxu0 %v11732_v48  ;;  %5125 = vmatpush1.bf16.msra.mxu1 %v11734_v49  ;;  %v373_v48 = vld [vmem:[#allocation2 + $0x760] sm:$0xff]  ;;  %v370_v49 = vld [vmem:[#allocation2 + $0x748] sm:$0xff] }
  0xe6   :  { %4880 = vmatprep.subr.bf16.mxu0 %v11741_v50  ;;  %5126 = vmatprep.subr.bf16.mxu1 %v11743_v55  ;;  %v11799_v50 = vcombine.high %v362_v41, %v366_v43  ;;  %v11805_v55 = vcombine.high %v369_v47, %v373_v48  ;;  %v11804_v62 = vcombine.low %v369_v47, %v373_v48  ;;  %v422_v41 = vld [vmem:[#allocation2 + $0x8e8] sm:$0xff] }
  0xe7   :  { %v11806_v63 = vcombine.low %v370_v49, %v374_v51  ;;  %v11846_v43 = vcombine.low %v410_v32, %v414_v33  ;;  %v426_v47 = vld [vmem:[#allocation2 + $0x908] sm:$0xff]  ;;  %v11855_v48 = vcombine.high %v418_v39, %v422_v41 }
  0xe9   :  { %4881 = vmatpush1.bf16.msra.mxu0 %v11740_v58  ;;  %5127 = vmatpush1.bf16.msra.mxu1 %v11742_v59  ;;  %v381_v58 = vld [vmem:[#allocation2 + $0x7a0] sm:$0xff]  ;;  %v378_v59 = vld [vmem:[#allocation2 + $0x788] sm:$0xff] }
  0xea   :  { %4882 = vmatprep.subr.bf16.mxu0 %v11749_v60  ;;  %5128 = vmatprep.subr.bf16.mxu1 %v11751_v0  ;;  %v11807_v60 = vcombine.high %v370_v49, %v374_v51  ;;  %v11813_v0 = vcombine.high %v377_v56, %v381_v58  ;;  %v11812_v6 = vcombine.low %v377_v56, %v381_v58  ;;  %v430_v49 = vld [vmem:[#allocation2 + $0x928] sm:$0xff] }
  0xeb   :  { %v11814_v7 = vcombine.low %v378_v59, %v382_v61  ;;  %v11854_v51 = vcombine.low %v418_v39, %v422_v41  ;;  %v434_v56 = vld [vmem:[#allocation2 + $0x948] sm:$0xff]  ;;  %v11863_v58 = vcombine.high %v426_v47, %v430_v49 }
  0xec   :  { %v478_v39 = vld [vmem:[#allocation2 + $0xaa8] sm:$0xff] }
  0xed   :  { %4883 = vmatpush1.bf16.msra.mxu0 %v11748_v2  ;;  %5129 = vmatpush1.bf16.msra.mxu1 %v11750_v3  ;;  %v389_v2 = vld [vmem:[#allocation2 + $0x7e0] sm:$0xff]  ;;  %v386_v3 = vld [vmem:[#allocation2 + $0x7c8] sm:$0xff] }
  0xee   :  { %4884 = vmatprep.subr.bf16.mxu0 %v11757_v4  ;;  %5130 = vmatprep.subr.bf16.mxu1 %v11759_v8  ;;  %v11815_v4 = vcombine.high %v378_v59, %v382_v61  ;;  %v11821_v8 = vcombine.high %v385_v1, %v389_v2  ;;  %v11820_v16 = vcombine.low %v385_v1, %v389_v2  ;;  %v438_v59 = vld [vmem:[#allocation2 + $0x968] sm:$0xff] }
  0xef   :  { %v11862_v61 = vcombine.low %v426_v47, %v430_v49  ;;  %v442_v1 = vld [vmem:[#allocation2 + $0x988] sm:$0xff]  ;;  %v11871_v2 = vcombine.high %v434_v56, %v438_v59 }
  0xf0   :  { %v486_v47 = vld [vmem:[#allocation2 + $0xae8] sm:$0xff] }
  0xf1   :  { %4885 = vmatpush1.bf16.msra.mxu0 %v11756_v10  ;;  %5131 = vmatpush1.bf16.msra.mxu1 %v11758_v11  ;;  %v397_v10 = vld [vmem:[#allocation2 + $0x820] sm:$0xff]  ;;  %v394_v11 = vld [vmem:[#allocation2 + $0x808] sm:$0xff] }
  0xf2   :  { %4886 = vmatprep.subr.bf16.mxu0 %v11765_v13  ;;  %5132 = vmatprep.subr.bf16.mxu1 %v11767_v18  ;;  %v11823_v13 = vcombine.high %v386_v3, %v390_v5  ;;  %v11822_v18 = vcombine.low %v386_v3, %v390_v5  ;;  %v11829_v19 = vcombine.high %v393_v9, %v397_v10  ;;  %v446_v3 = vld [vmem:[#allocation2 + $0x9a8] sm:$0xff] }
  0xf3   :  { %v11831_v53 = vcombine.high %v394_v11, %v398_v14  ;;  %v11830_v27 = vcombine.low %v394_v11, %v398_v14  ;;  %v11870_v5 = vcombine.low %v434_v56, %v438_v59  ;;  %v454_v11 = vld [vmem:[#allocation2 + $0x9e8] sm:$0xff]  ;;  %v11878_v14 = vcombine.low %v442_v1, %v446_v3 }
  0xf4   :  { %v494_v56 = vld [vmem:[#allocation2 + $0xb28] sm:$0xff] }
  0xf5   :  { %4887 = vmatpush1.bf16.msra.mxu0 %v11764_v20  ;;  %5133 = vmatpush1.bf16.msra.mxu1 %v11766_v21  ;;  %v405_v20 = vld [vmem:[#allocation2 + $0x860] sm:$0xff]  ;;  %v402_v21 = vld [vmem:[#allocation2 + $0x848] sm:$0xff] }
  0xf6   :  { %4888 = vmatprep.subr.bf16.mxu0 %v11773_v22  ;;  %5134 = vmatprep.subr.bf16.mxu1 %v11775_v26  ;;  %v406_v22 = vld [vmem:[#allocation2 + $0x868] sm:$0xff]  ;;  %v11828_v26 = vcombine.low %v393_v9, %v397_v10  ;;  %v11836_v15 = vcombine.low %v401_v17, %v405_v20  ;;  %v11879_v10 = vcombine.high %v442_v1, %v446_v3 }
  0xf7   :  { %v11839_v31 = vcombine.high %v402_v21, %v406_v22  ;;  %v11838_v35 = vcombine.low %v402_v21, %v406_v22  ;;  %v450_v9 = vld [vmem:[#allocation2 + $0x9c8] sm:$0xff] }
  0xf8   :  { %v462_v21 = vld [vmem:[#allocation2 + $0xa28] sm:$0xff] }
  0xf9   :  { %4889 = vmatpush1.bf16.msra.mxu0 %v11772_v28  ;;  %5135 = vmatpush1.bf16.msra.mxu1 %v11774_v29  ;;  %v11837_v28 = vcombine.high %v401_v17, %v405_v20  ;;  %v409_v29 = vld [vmem:[#allocation2 + $0x880] sm:$0xff]  ;;  %v11887_v20 = vcombine.high %v450_v9, %v454_v11  ;;  %v502_v1 = vld [vmem:[#allocation2 + $0xb68] sm:$0xff] }
  0xfa   :  { %4890 = vmatprep.subr.bf16.mxu0 %v11781_v30  ;;  %5136 = vmatprep.subr.bf16.mxu1 %v11783_v34  ;;  %v413_v30 = vld [vmem:[#allocation2 + $0x8a0] sm:$0xff]  ;;  %v14093_v34 = vcombine.high %v14085_v24, %v14085_v24 }
  0xfb   :  { %v457_v17 = vld [vmem:[#allocation2 + $0xa00] sm:$0xff] }
  0xfd   :  { %4891 = vmatpush1.bf16.msra.mxu0 %v11780_v36  ;;  %5137 = vmatpush1.bf16.msra.mxu1 %v11782_v37  ;;  %v11845_v36 = vcombine.high %v409_v29, %v413_v30  ;;  %v417_v37 = vld [vmem:[#allocation2 + $0x8c0] sm:$0xff] }
  0xfe   :  { %4892 = vmatprep.subr.bf16.mxu0 %v11789_v38  ;;  %5138 = vmatprep.subr.bf16.mxu1 %v11791_v42  ;;  %v421_v38 = vld [vmem:[#allocation2 + $0x8e0] sm:$0xff]  ;;  %v11844_v42 = vcombine.low %v409_v29, %v413_v30  ;;  %v466_v29 = vld [vmem:[#allocation2 + $0xa48] sm:$0xff] }
 0x101   :  { %4893 = vmatpush1.bf16.msra.mxu0 %v11788_v44  ;;  %5139 = vmatpush1.bf16.msra.mxu1 %v11790_v45  ;;  %v11853_v44 = vcombine.high %v417_v37, %v421_v38  ;;  %v425_v45 = vld [vmem:[#allocation2 + $0x900] sm:$0xff] }
 0x102   :  { %4894 = vmatprep.subr.bf16.mxu0 %v11797_v46  ;;  %5140 = vmatprep.subr.bf16.mxu1 %v11799_v50  ;;  %v429_v46 = vld [vmem:[#allocation2 + $0x920] sm:$0xff]  ;;  %v11852_v50 = vcombine.low %v417_v37, %v421_v38  ;;  %v474_v37 = vld [vmem:[#allocation2 + $0xa88] sm:$0xff] }
 0x103   :  { %v11910_v49 = vcombine.low %v474_v37, %v478_v39 }
 0x105   :  { %4895 = vmatpush1.bf16.msra.mxu0 %v11796_v52  ;;  %5141 = vmatpush1.bf16.msra.mxu1 %v11798_v54  ;;  %v11861_v52 = vcombine.high %v425_v45, %v429_v46  ;;  %v433_v54 = vld [vmem:[#allocation2 + $0x940] sm:$0xff] }
 0x106   :  { %4896 = vmatprep.subr.bf16.mxu0 %v11805_v55  ;;  %5142 = vmatprep.subr.bf16.mxu1 %v11807_v60  ;;  %v437_v55 = vld [vmem:[#allocation2 + $0x960] sm:$0xff]  ;;  %v11860_v60 = vcombine.low %v425_v45, %v429_v46  ;;  %v482_v45 = vld [vmem:[#allocation2 + $0xac8] sm:$0xff]  ;;  %v11911_v46 = vcombine.high %v474_v37, %v478_v39  ;;  %v14106_v39 = vcombine.low %v14085_v24, %v14085_v24 }
 0x107   :  { %v11918_v59 = vcombine.low %v482_v45, %v486_v47 }
 0x109   :  { %4897 = vmatpush1.bf16.msra.mxu0 %v11804_v62  ;;  %5143 = vmatpush1.bf16.msra.mxu1 %v11806_v63  ;;  %v11869_v62 = vcombine.high %v433_v54, %v437_v55  ;;  %v441_v63 = vld [vmem:[#allocation2 + $0x980] sm:$0xff] }
 0x10a   :  { %4898 = vmatprep.subr.bf16.mxu0 %v11813_v0  ;;  %5144 = vmatprep.subr.bf16.mxu1 %v11815_v4  ;;  %v445_v0 = vld [vmem:[#allocation2 + $0x9a0] sm:$0xff]  ;;  %v11868_v4 = vcombine.low %v433_v54, %v437_v55  ;;  %v490_v54 = vld [vmem:[#allocation2 + $0xb08] sm:$0xff]  ;;  %v11919_v55 = vcombine.high %v482_v45, %v486_v47 }
 0x10b   :  { %v11926_v3 = vcombine.low %v490_v54, %v494_v56  ;;  %v541_v45 = vld [vmem:[#allocation2 + $0xca0] sm:$0xff]  ;;  %v538_v47 = vld [vmem:[#allocation2 + $0xc88] sm:$0xff] }
 0x10d   :  { %4899 = vmatpush1.bf16.msra.mxu0 %v11812_v6  ;;  %5145 = vmatpush1.bf16.msra.mxu1 %v11814_v7  ;;  %v11877_v6 = vcombine.high %v441_v63, %v445_v0  ;;  %v449_v7 = vld [vmem:[#allocation2 + $0x9c0] sm:$0xff] }
 0x10e   :  { %4900 = vmatprep.subr.bf16.mxu0 %v11821_v8  ;;  %5146 = vmatprep.subr.bf16.mxu1 %v11823_v13  ;;  %v453_v8 = vld [vmem:[#allocation2 + $0x9e0] sm:$0xff]  ;;  %v11876_v13 = vcombine.low %v441_v63, %v445_v0  ;;  %v498_v63 = vld [vmem:[#allocation2 + $0xb48] sm:$0xff]  ;;  %v11927_v0 = vcombine.high %v490_v54, %v494_v56 }
 0x10f   :  { %v11884_v22 = vcombine.low %v449_v7, %v453_v8  ;;  %v549_v54 = vld [vmem:[#allocation2 + $0xce0] sm:$0xff]  ;;  %v550_v56 = vld [vmem:[#allocation2 + $0xce8] sm:$0xff] }
 0x111   :  { %4901 = vmatpush1.bf16.msra.mxu0 %v11820_v16  ;;  %5147 = vmatpush1.bf16.msra.mxu1 %v11822_v18  ;;  %v11885_v16 = vcombine.high %v449_v7, %v453_v8  ;;  %v461_v18 = vld [vmem:[#allocation2 + $0xa20] sm:$0xff]  ;;  %v506_v7 = vld [vmem:[#allocation2 + $0xb88] sm:$0xff]  ;;  %v11935_v8 = vcombine.high %v498_v63, %v502_v1 }
 0x112   :  { %4911 = vmatprep.subr.bf16.mxu0 %v11829_v19  ;;  %5157 = vmatprep.subr.bf16.mxu1 %v11831_v53  ;;  %v458_v19 = vld [vmem:[#allocation2 + $0xa08] sm:$0xff]  ;;  %v11886_v53 = vcombine.low %v450_v9, %v454_v11  ;;  %v11892_v32 = vcombine.low %v457_v17, %v461_v18  ;;  %v11934_v11 = vcombine.low %v498_v63, %v502_v1  ;;  %v557_v63 = vld [vmem:[#allocation2 + $0xd20] sm:$0xff] }
 0x113   :  { %v11895_v30 = vcombine.high %v458_v19, %v462_v21  ;;  %v11894_v33 = vcombine.low %v458_v19, %v462_v21  ;;  %v510_v9 = vld [vmem:[#allocation2 + $0xba8] sm:$0xff] }
 0x114   :  { %4903 = vmatmul.mubr.bf16.vlgmr.msra.gmra.mrb[0].mxu0 %v14089_v25  ;;  %5149 = vmatmul.mubr.bf16.vlgmr.msra.gmra.mrb[0].mxu1 %v14089_v25  ;;  %v518_v19 = vld [vmem:[#allocation2 + $0xbe8] sm:$0xff]  ;;  %v11942_v21 = vcombine.low %v506_v7, %v510_v9 }
 0x115   :  { %4912 = vmatpush1.bf16.msra.mxu0 %v11828_v26  ;;  %5158 = vmatpush1.bf16.msra.mxu1 %v11830_v27  ;;  %v11893_v26 = vcombine.high %v457_v17, %v461_v18  ;;  %v465_v27 = vld [vmem:[#allocation2 + $0xa40] sm:$0xff]  ;;  %v514_v17 = vld [vmem:[#allocation2 + $0xbc8] sm:$0xff]  ;;  %v11943_v18 = vcombine.high %v506_v7, %v510_v9 }
 0x116   :  { %4913 = vmatprep.subr.bf16.mxu0 %v11837_v28  ;;  %5159 = vmatprep.subr.bf16.mxu1 %v11839_v31  ;;  %v469_v28 = vld [vmem:[#allocation2 + $0xa60] sm:$0xff]  ;;  %v470_v31 = vld [vmem:[#allocation2 + $0xa68] sm:$0xff] }
 0x117   :  { %4943 = vmatprep.mubr.bf16.mxu0 %v14093_v34  ;;  %5189 = vmatprep.mubr.bf16.mxu1 %v14093_v34  ;;  %v11903_v38 = vcombine.high %v466_v29, %v470_v31  ;;  %v11902_v41 = vcombine.low %v466_v29, %v470_v31  ;;  %v526_v29 = vld [vmem:[#allocation2 + $0xc28] sm:$0xff]  ;;  %v529_v31 = vld [vmem:[#allocation2 + $0xc40] sm:$0xff] }
 0x118   :  { %v558_v1 = vld [vmem:[#allocation2 + $0xd28] sm:$0xff]  ;;  %v565_v7 = vld [vmem:[#allocation2 + $0xd60] sm:$0xff] }
 0x119   :  { %4914 = vmatpush1.bf16.msra.mxu0 %v11836_v15  ;;  %5160 = vmatpush1.bf16.msra.mxu1 %v11838_v35  ;;  %v11901_v15 = vcombine.high %v465_v27, %v469_v28  ;;  %v473_v35 = vld [vmem:[#allocation2 + $0xa80] sm:$0xff]  ;;  %v566_v9 = vld [vmem:[#allocation2 + $0xd68] sm:$0xff] }
 0x11a   :  { %4915 = vmatprep.subr.bf16.mxu0 %v11845_v36  ;;  %5161 = vmatprep.subr.bf16.mxu1 %v11847_v40  ;;  %v477_v36 = vld [vmem:[#allocation2 + $0xaa0] sm:$0xff]  ;;  %v11900_v40 = vcombine.low %v465_v27, %v469_v28  ;;  %v522_v27 = vld [vmem:[#allocation2 + $0xc08] sm:$0xff]  ;;  %v11951_v28 = vcombine.high %v514_v17, %v518_v19 }
 0x11b   :  { %v11959_v37 = vcombine.high %v522_v27, %v526_v29 }
 0x11d   :  { %4916 = vmatpush1.bf16.msra.mxu0 %v11844_v42  ;;  %5162 = vmatpush1.bf16.msra.mxu1 %v11846_v43  ;;  %v11909_v42 = vcombine.high %v473_v35, %v477_v36  ;;  %v481_v43 = vld [vmem:[#allocation2 + $0xac0] sm:$0xff] }
 0x11e   :  { %4917 = vmatprep.subr.bf16.mxu0 %v11853_v44  ;;  %5163 = vmatprep.subr.bf16.mxu1 %v11855_v48  ;;  %v485_v44 = vld [vmem:[#allocation2 + $0xae0] sm:$0xff]  ;;  %v11908_v48 = vcombine.low %v473_v35, %v477_v36  ;;  %v530_v35 = vld [vmem:[#allocation2 + $0xc48] sm:$0xff] }
 0x11f   :  { %v534_v36 = vld [vmem:[#allocation2 + $0xc68] sm:$0xff] }
 0x121   :  { %4918 = vmatpush1.bf16.msra.mxu0 %v11852_v50  ;;  %5164 = vmatpush1.bf16.msra.mxu1 %v11854_v51  ;;  %v11917_v50 = vcombine.high %v481_v43, %v485_v44  ;;  %v489_v51 = vld [vmem:[#allocation2 + $0xb00] sm:$0xff] }
 0x122   :  { %4919 = vmatprep.subr.bf16.mxu0 %v11861_v52  ;;  %5165 = vmatprep.subr.bf16.mxu1 %v11863_v58  ;;  %v493_v52 = vld [vmem:[#allocation2 + $0xb20] sm:$0xff]  ;;  %v11916_v58 = vcombine.low %v481_v43, %v485_v44  ;;  %v11967_v43 = vcombine.high %v530_v35, %v534_v36 }
 0x123   :  { %v537_v44 = vld [vmem:[#allocation2 + $0xc80] sm:$0xff] }
 0x125   :  { %4920 = vmatpush1.bf16.msra.mxu0 %v11860_v60  ;;  %5166 = vmatpush1.bf16.msra.mxu1 %v11862_v61  ;;  %v11925_v60 = vcombine.high %v489_v51, %v493_v52  ;;  %v497_v61 = vld [vmem:[#allocation2 + $0xb40] sm:$0xff] }
 0x126   :  { %4921 = vmatprep.subr.bf16.mxu0 %v11869_v62  ;;  %5167 = vmatprep.subr.bf16.mxu1 %v11871_v2  ;;  %v501_v62 = vld [vmem:[#allocation2 + $0xb60] sm:$0xff]  ;;  %v11924_v2 = vcombine.low %v489_v51, %v493_v52 }
 0x127   :  { %v545_v52 = vld [vmem:[#allocation2 + $0xcc0] sm:$0xff] }
 0x129   :  { %4922 = vmatpush1.bf16.msra.mxu0 %v11868_v4  ;;  %5168 = vmatpush1.bf16.msra.mxu1 %v11870_v5  ;;  %v11933_v4 = vcombine.high %v497_v61, %v501_v62  ;;  %v505_v5 = vld [vmem:[#allocation2 + $0xb80] sm:$0xff] }
 0x12a   :  { %4923 = vmatprep.subr.bf16.mxu0 %v11877_v6  ;;  %5169 = vmatprep.subr.bf16.mxu1 %v11879_v10  ;;  %v509_v6 = vld [vmem:[#allocation2 + $0xba0] sm:$0xff]  ;;  %v11932_v10 = vcombine.low %v497_v61, %v501_v62 }
 0x12b   :  { %v553_v62 = vld [vmem:[#allocation2 + $0xd00] sm:$0xff] }
 0x12d   :  { %4924 = vmatpush1.bf16.msra.mxu0 %v11876_v13  ;;  %5170 = vmatpush1.bf16.msra.mxu1 %v11878_v14  ;;  %v11941_v13 = vcombine.high %v505_v5, %v509_v6  ;;  %v513_v14 = vld [vmem:[#allocation2 + $0xbc0] sm:$0xff] }
 0x12e   :  { %4925 = vmatprep.subr.bf16.mxu0 %v11885_v16  ;;  %5171 = vmatprep.subr.bf16.mxu1 %v11887_v20  ;;  %v517_v16 = vld [vmem:[#allocation2 + $0xbe0] sm:$0xff]  ;;  %v11940_v20 = vcombine.low %v505_v5, %v509_v6 }
 0x12f   :  { %v561_v6 = vld [vmem:[#allocation2 + $0xd40] sm:$0xff] }
 0x131   :  { %4926 = vmatpush1.bf16.msra.mxu0 %v11884_v22  ;;  %5172 = vmatpush1.bf16.msra.mxu1 %v11886_v53  ;;  %v11949_v22 = vcombine.high %v513_v14, %v517_v16  ;;  %v521_v53 = vld [vmem:[#allocation2 + $0xc00] sm:$0xff] }
 0x132   :  { %4927 = vmatprep.subr.bf16.mxu0 %v11893_v26  ;;  %5173 = vmatprep.subr.bf16.mxu1 %v11895_v30  ;;  %v525_v26 = vld [vmem:[#allocation2 + $0xc20] sm:$0xff]  ;;  %v11948_v30 = vcombine.low %v513_v14, %v517_v16 }
 0x133   :  { %v569_v16 = vld [vmem:[#allocation2 + $0xd80] sm:$0xff] }
 0x135   :  { %4928 = vmatpush1.bf16.msra.mxu0 %v11892_v32  ;;  %5174 = vmatpush1.bf16.msra.mxu1 %v11894_v33  ;;  %v11950_v32 = vcombine.low %v514_v17, %v518_v19  ;;  %v11957_v33 = vcombine.high %v521_v53, %v525_v26  ;;  %v573_v17 = vld [vmem:[#allocation2 + $0xda0] sm:$0xff]  ;;  %v574_v19 = vld [vmem:[#allocation2 + $0xda8] sm:$0xff] }
 0x136   :  { %4929 = vmatprep.subr.bf16.mxu0 %v11901_v15  ;;  %5175 = vmatprep.subr.bf16.mxu1 %v11903_v38  ;;  %v533_v15 = vld [vmem:[#allocation2 + $0xc60] sm:$0xff]  ;;  %v14102_v38 = vld [vmem:[%s14332_s0 + $0x18] sm:$0xff] }
 0x137   :  { %v11964_v24 = vcombine.low %v529_v31, %v533_v15 }
 0x139   :  { %4930 = vmatpush1.bf16.msra.mxu0 %v11900_v40  ;;  %5176 = vmatpush1.bf16.msra.mxu1 %v11902_v41  ;;  %v11956_v40 = vcombine.low %v521_v53, %v525_v26  ;;  %v11958_v41 = vcombine.low %v522_v27, %v526_v29  ;;  %v577_v26 = vld [vmem:[#allocation2 + $0xdc0] sm:$0xff]  ;;  %v582_v29 = vld [vmem:[#allocation2 + $0xde8] sm:$0xff] }
 0x13a   :  { %4931 = vmatprep.subr.bf16.mxu0 %v11909_v42  ;;  %5177 = vmatprep.subr.bf16.mxu1 %v11911_v46  ;;  %v11965_v42 = vcombine.high %v529_v31, %v533_v15  ;;  %v14110_v46 = vcombine.high %v14102_v38, %v14102_v38  ;;  %v581_v27 = vld [vmem:[#allocation2 + $0xde0] sm:$0xff] }
 0x13b   :  { %v585_v15 = vld [vmem:[#allocation2 + $0xe00] sm:$0xff] }
 0x13d   :  { %4932 = vmatpush1.bf16.msra.mxu0 %v11908_v48  ;;  %5178 = vmatpush1.bf16.msra.mxu1 %v11910_v49  ;;  %v542_v48 = vld [vmem:[#allocation2 + $0xca8] sm:$0xff]  ;;  %v11966_v49 = vcombine.low %v530_v35, %v534_v36  ;;  %v589_v35 = vld [vmem:[#allocation2 + $0xe20] sm:$0xff] }
 0x13e   :  { %4933 = vmatprep.subr.bf16.mxu0 %v11917_v50  ;;  %5179 = vmatprep.subr.bf16.mxu1 %v11919_v55  ;;  %v11973_v50 = vcombine.high %v537_v44, %v541_v45  ;;  %v11975_v51 = vcombine.high %v538_v47, %v542_v48  ;;  %v546_v55 = vld [vmem:[#allocation2 + $0xcc8] sm:$0xff] }
 0x13f   :  { %v11983_v61 = vcombine.high %v546_v55, %v550_v56  ;;  %v586_v36 = vld [vmem:[#allocation2 + $0xe08] sm:$0xff] }
 0x141   :  { %4934 = vmatpush1.bf16.msra.mxu0 %v11916_v58  ;;  %5180 = vmatpush1.bf16.msra.mxu1 %v11918_v59  ;;  %v11972_v58 = vcombine.low %v537_v44, %v541_v45  ;;  %v11974_v59 = vcombine.low %v538_v47, %v542_v48  ;;  %v593_v44 = vld [vmem:[#allocation2 + $0xe40] sm:$0xff]  ;;  %v594_v47 = vld [vmem:[#allocation2 + $0xe48] sm:$0xff] }
 0x142   :  { %4935 = vmatprep.subr.bf16.mxu0 %v11925_v60  ;;  %5181 = vmatprep.subr.bf16.mxu1 %v11927_v0  ;;  %v11981_v60 = vcombine.high %v545_v52, %v549_v54  ;;  %v554_v0 = vld [vmem:[#allocation2 + $0xd08] sm:$0xff]  ;;  %v597_v45 = vld [vmem:[#allocation2 + $0xe60] sm:$0xff] }
 0x143   :  { %v11991_v5 = vcombine.high %v554_v0, %v558_v1  ;;  %v598_v48 = vld [vmem:[#allocation2 + $0xe68] sm:$0xff] }
 0x145   :  { %4936 = vmatpush1.bf16.msra.mxu0 %v11924_v2  ;;  %5182 = vmatpush1.bf16.msra.mxu1 %v11926_v3  ;;  %v11980_v2 = vcombine.low %v545_v52, %v549_v54  ;;  %v11982_v3 = vcombine.low %v546_v55, %v550_v56  ;;  %v601_v52 = vld [vmem:[#allocation2 + $0xe80] sm:$0xff]  ;;  %v602_v55 = vld [vmem:[#allocation2 + $0xe88] sm:$0xff] }
 0x146   :  { %4937 = vmatprep.subr.bf16.mxu0 %v11933_v4  ;;  %5183 = vmatprep.subr.bf16.mxu1 %v11935_v8  ;;  %v11989_v4 = vcombine.high %v553_v62, %v557_v63  ;;  %v562_v8 = vld [vmem:[#allocation2 + $0xd48] sm:$0xff]  ;;  %v605_v54 = vld [vmem:[#allocation2 + $0xea0] sm:$0xff] }
 0x147   :  { %v11999_v14 = vcombine.high %v562_v8, %v566_v9  ;;  %v606_v56 = vld [vmem:[#allocation2 + $0xea8] sm:$0xff] }
 0x149   :  { %4938 = vmatpush1.bf16.msra.mxu0 %v11932_v10  ;;  %5184 = vmatpush1.bf16.msra.mxu1 %v11934_v11  ;;  %v11988_v10 = vcombine.low %v553_v62, %v557_v63  ;;  %v11990_v11 = vcombine.low %v554_v0, %v558_v1  ;;  %v609_v62 = vld [vmem:[#allocation2 + $0xec0] sm:$0xff]  ;;  %v610_v0 = vld [vmem:[#allocation2 + $0xec8] sm:$0xff] }
 0x14a   :  { %4939 = vmatprep.subr.bf16.mxu0 %v11941_v13  ;;  %5185 = vmatprep.subr.bf16.mxu1 %v11943_v18  ;;  %v11997_v13 = vcombine.high %v561_v6, %v565_v7  ;;  %v570_v18 = vld [vmem:[#allocation2 + $0xd88] sm:$0xff]  ;;  %v613_v63 = vld [vmem:[#allocation2 + $0xee0] sm:$0xff] }
 0x14b   :  { %v12007_v53 = vcombine.high %v570_v18, %v574_v19  ;;  %v12006_v31 = vcombine.low %v570_v18, %v574_v19  ;;  %v614_v1 = vld [vmem:[#allocation2 + $0xee8] sm:$0xff] }
 0x14c   :  { %v626_v18 = vld [vmem:[#allocation2 + $0xf48] sm:$0xff] }
 0x14d   :  { %4940 = vmatpush1.bf16.msra.mxu0 %v11940_v20  ;;  %5186 = vmatpush1.bf16.msra.mxu1 %v11942_v21  ;;  %v11996_v20 = vcombine.low %v561_v6, %v565_v7  ;;  %v11998_v21 = vcombine.low %v562_v8, %v566_v9  ;;  %v617_v6 = vld [vmem:[#allocation2 + $0xf00] sm:$0xff]  ;;  %v618_v8 = vld [vmem:[#allocation2 + $0xf08] sm:$0xff] }
 0x14e   :  { %4941 = vmatprep.subr.bf16.mxu0 %v11949_v22  ;;  %5187 = vmatprep.subr.bf16.mxu1 %v11951_v28  ;;  %v12005_v22 = vcombine.high %v569_v16, %v573_v17  ;;  %v578_v28 = vld [vmem:[#allocation2 + $0xdc8] sm:$0xff]  ;;  %v621_v7 = vld [vmem:[#allocation2 + $0xf20] sm:$0xff] }
 0x14f   :  { %v622_v9 = vld [vmem:[#allocation2 + $0xf28] sm:$0xff] }
 0x150   :  { %v630_v19 = vld [vmem:[#allocation2 + $0xf68] sm:$0xff] }
 0x151   :  { %4942 = vmatpush1.bf16.msra.mxu0 %v11948_v30  ;;  %5188 = vmatpush1.bf16.msra.mxu1 %v11950_v32  ;;  %v12004_v30 = vcombine.low %v569_v16, %v573_v17  ;;  %v12013_v32 = vcombine.high %v577_v26, %v581_v27  ;;  %v625_v16 = vld [vmem:[#allocation2 + $0xf40] sm:$0xff] }
 0x152   :  { %4952 = vmatprep.subr.bf16.mxu0 %v11957_v33  ;;  %5198 = vmatprep.subr.bf16.mxu1 %v11959_v37  ;;  %v12015_v33 = vcombine.high %v578_v28, %v582_v29  ;;  %v590_v37 = vld [vmem:[#allocation2 + $0xe28] sm:$0xff]  ;;  %v629_v17 = vld [vmem:[#allocation2 + $0xf60] sm:$0xff] }
 0x154   :  { %4944 = vmatmul.mubr.bf16.vlgmr.msra.gmra.mrb[0].mxu0 %v14106_v39  ;;  %5190 = vmatmul.mubr.bf16.vlgmr.msra.gmra.mrb[0].mxu1 %v14106_v39 }
 0x155   :  { %4953 = vmatpush1.bf16.msra.mxu0 %v11956_v40  ;;  %5199 = vmatpush1.bf16.msra.mxu1 %v11958_v41  ;;  %v12012_v40 = vcombine.low %v577_v26, %v581_v27  ;;  %v12014_v41 = vcombine.low %v578_v28, %v582_v29  ;;  %v633_v26 = vld [vmem:[#allocation2 + $0xf80] sm:$0xff]  ;;  %v634_v28 = vld [vmem:[#allocation2 + $0xf88] sm:$0xff] }
 0x156   :  { %4954 = vmatprep.subr.bf16.mxu0 %v11965_v42  ;;  %5200 = vmatprep.subr.bf16.mxu1 %v11967_v43  ;;  %v12021_v42 = vcombine.high %v585_v15, %v589_v35  ;;  %v12023_v43 = vcombine.high %v586_v36, %v590_v37  ;;  %v637_v27 = vld [vmem:[#allocation2 + $0xfa0] sm:$0xff]  ;;  %v638_v29 = vld [vmem:[#allocation2 + $0xfa8] sm:$0xff] }
 0x157   :  { %4984 = vmatprep.mubr.bf16.mxu0 %v14110_v46  ;;  %5230 = vmatprep.mubr.bf16.mxu1 %v14110_v46 }
 0x159   :  { %4955 = vmatpush1.bf16.msra.mxu0 %v11964_v24  ;;  %5201 = vmatpush1.bf16.msra.mxu1 %v11966_v49  ;;  %v12020_v24 = vcombine.low %v585_v15, %v589_v35  ;;  %v12022_v49 = vcombine.low %v586_v36, %v590_v37  ;;  %v641_v15 = vld [vmem:[#allocation2 + $0xfc0] sm:$0xff]  ;;  %v642_v36 = vld [vmem:[#allocation2 + $0xfc8] sm:$0xff] }
 0x15a   :  { %4956 = vmatprep.subr.bf16.mxu0 %v11973_v50  ;;  %5202 = vmatprep.subr.bf16.mxu1 %v11975_v51  ;;  %v12029_v50 = vcombine.high %v593_v44, %v597_v45  ;;  %v12031_v51 = vcombine.high %v594_v47, %v598_v48  ;;  %v645_v35 = vld [vmem:[#allocation2 + $0xfe0] sm:$0xff]  ;;  %v646_v37 = vld [vmem:[#allocation2 + $0xfe8] sm:$0xff] }
 0x15d   :  { %4957 = vmatpush1.bf16.msra.mxu0 %v11972_v58  ;;  %5203 = vmatpush1.bf16.msra.mxu1 %v11974_v59  ;;  %v12028_v58 = vcombine.low %v593_v44, %v597_v45  ;;  %v12030_v59 = vcombine.low %v594_v47, %v598_v48  ;;  %v649_v44 = vld [vmem:[#allocation2 + $0x1000] sm:$0xff]  ;;  %v650_v47 = vld [vmem:[#allocation2 + $0x1008] sm:$0xff] }
 0x15e   :  { %4958 = vmatprep.subr.bf16.mxu0 %v11981_v60  ;;  %5204 = vmatprep.subr.bf16.mxu1 %v11983_v61  ;;  %v12037_v60 = vcombine.high %v601_v52, %v605_v54  ;;  %v12039_v61 = vcombine.high %v602_v55, %v606_v56  ;;  %v653_v45 = vld [vmem:[#allocation2 + $0x1020] sm:$0xff]  ;;  %v654_v48 = vld [vmem:[#allocation2 + $0x1028] sm:$0xff] }
 0x161   :  { %4959 = vmatpush1.bf16.msra.mxu0 %v11980_v2  ;;  %5205 = vmatpush1.bf16.msra.mxu1 %v11982_v3  ;;  %v12036_v2 = vcombine.low %v601_v52, %v605_v54  ;;  %v12038_v3 = vcombine.low %v602_v55, %v606_v56  ;;  %v657_v52 = vld [vmem:[#allocation2 + $0x1040] sm:$0xff]  ;;  %v14118_v55 = vcombine.low %v14102_v38, %v14102_v38  ;;  %v658_v56 = vld [vmem:[#allocation2 + $0x1048] sm:$0xff] }
 0x162   :  { %4960 = vmatprep.subr.bf16.mxu0 %v11989_v4  ;;  %5206 = vmatprep.subr.bf16.mxu1 %v11991_v5  ;;  %v12045_v4 = vcombine.high %v609_v62, %v613_v63  ;;  %v12047_v5 = vcombine.high %v610_v0, %v614_v1  ;;  %v661_v54 = vld [vmem:[#allocation2 + $0x1060] sm:$0xff] }
 0x165   :  { %4961 = vmatpush1.bf16.msra.mxu0 %v11988_v10  ;;  %5207 = vmatpush1.bf16.msra.mxu1 %v11990_v11  ;;  %v12044_v10 = vcombine.low %v609_v62, %v613_v63  ;;  %v12046_v11 = vcombine.low %v610_v0, %v614_v1  ;;  %v12093_v62 = vcombine.high %v657_v52, %v661_v54  ;;  %v665_v0 = vld [vmem:[#allocation2 + $0x1080] sm:$0xff] }
 0x166   :  { %4962 = vmatprep.subr.bf16.mxu0 %v11997_v13  ;;  %5208 = vmatprep.subr.bf16.mxu1 %v11999_v14  ;;  %v12053_v13 = vcombine.high %v617_v6, %v621_v7  ;;  %v12055_v14 = vcombine.high %v618_v8, %v622_v9  ;;  %v669_v1 = vld [vmem:[#allocation2 + $0x10a0] sm:$0xff] }
 0x169   :  { %4963 = vmatpush1.bf16.msra.mxu0 %v11996_v20  ;;  %5209 = vmatpush1.bf16.msra.mxu1 %v11998_v21  ;;  %v12052_v20 = vcombine.low %v617_v6, %v621_v7  ;;  %v12054_v21 = vcombine.low %v618_v8, %v622_v9  ;;  %v12101_v6 = vcombine.high %v665_v0, %v669_v1  ;;  %v673_v8 = vld [vmem:[#allocation2 + $0x10c0] sm:$0xff] }
 0x16a   :  { %4964 = vmatprep.subr.bf16.mxu0 %v12005_v22  ;;  %5210 = vmatprep.subr.bf16.mxu1 %v12007_v53  ;;  %v12061_v22 = vcombine.high %v625_v16, %v629_v17  ;;  %v12063_v53 = vcombine.high %v626_v18, %v630_v19  ;;  %v677_v9 = vld [vmem:[#allocation2 + $0x10e0] sm:$0xff] }
 0x16d   :  { %4965 = vmatpush1.bf16.msra.mxu0 %v12004_v30  ;;  %5211 = vmatpush1.bf16.msra.mxu1 %v12006_v31  ;;  %v12060_v30 = vcombine.low %v625_v16, %v629_v17  ;;  %v12062_v31 = vcombine.low %v626_v18, %v630_v19  ;;  %v12109_v16 = vcombine.high %v673_v8, %v677_v9  ;;  %v681_v18 = vld [vmem:[#allocation2 + $0x1100] sm:$0xff] }
 0x16e   :  { %4966 = vmatprep.subr.bf16.mxu0 %v12013_v32  ;;  %5212 = vmatprep.subr.bf16.mxu1 %v12015_v33  ;;  %v12069_v32 = vcombine.high %v633_v26, %v637_v27  ;;  %v12071_v33 = vcombine.high %v634_v28, %v638_v29  ;;  %v685_v19 = vld [vmem:[#allocation2 + $0x1120] sm:$0xff] }
 0x171   :  { %4967 = vmatpush1.bf16.msra.mxu0 %v12012_v40  ;;  %5213 = vmatpush1.bf16.msra.mxu1 %v12014_v41  ;;  %v12068_v40 = vcombine.low %v633_v26, %v637_v27  ;;  %v12070_v41 = vcombine.low %v634_v28, %v638_v29  ;;  %v12117_v26 = vcombine.high %v681_v18, %v685_v19  ;;  %v689_v28 = vld [vmem:[#allocation2 + $0x1140] sm:$0xff] }
 0x172   :  { %4968 = vmatprep.subr.bf16.mxu0 %v12021_v42  ;;  %5214 = vmatprep.subr.bf16.mxu1 %v12023_v43  ;;  %v12077_v42 = vcombine.high %v641_v15, %v645_v35  ;;  %v12079_v43 = vcombine.high %v642_v36, %v646_v37  ;;  %v693_v29 = vld [vmem:[#allocation2 + $0x1160] sm:$0xff] }
 0x175   :  { %4969 = vmatpush1.bf16.msra.mxu0 %v12020_v24  ;;  %5215 = vmatpush1.bf16.msra.mxu1 %v12022_v49  ;;  %v12076_v24 = vcombine.low %v641_v15, %v645_v35  ;;  %v12078_v49 = vcombine.low %v642_v36, %v646_v37  ;;  %v12125_v15 = vcombine.high %v689_v28, %v693_v29  ;;  %v697_v36 = vld [vmem:[#allocation2 + $0x1180] sm:$0xff] }
 0x176   :  { %4970 = vmatprep.subr.bf16.mxu0 %v12029_v50  ;;  %5216 = vmatprep.subr.bf16.mxu1 %v12031_v51  ;;  %v12085_v50 = vcombine.high %v649_v44, %v653_v45  ;;  %v12087_v51 = vcombine.high %v650_v47, %v654_v48  ;;  %v701_v37 = vld [vmem:[#allocation2 + $0x11a0] sm:$0xff] }
 0x179   :  { %4971 = vmatpush1.bf16.msra.mxu0 %v12028_v58  ;;  %5217 = vmatpush1.bf16.msra.mxu1 %v12030_v59  ;;  %v662_v58 = vld [vmem:[#allocation2 + $0x1068] sm:$0xff]  ;;  %v14123_v59 = vld [vmem:[%s14332_s0 + $0x20] sm:$0xff] }
 0x17a   :  { %4972 = vmatprep.subr.bf16.mxu0 %v12037_v60  ;;  %5218 = vmatprep.subr.bf16.mxu1 %v12039_v61  ;;  %v12084_v60 = vcombine.low %v649_v44, %v653_v45  ;;  %v12086_v61 = vcombine.low %v650_v47, %v654_v48  ;;  %v12095_v63 = vcombine.high %v658_v56, %v662_v58  ;;  %v705_v47 = vld [vmem:[#allocation2 + $0x11c0] sm:$0xff] }
 0x17b   :  { %v14127_v38 = vcombine.high %v14123_v59, %v14123_v59  ;;  %v12133_v44 = vcombine.high %v697_v36, %v701_v37  ;;  %v709_v48 = vld [vmem:[#allocation2 + $0x11e0] sm:$0xff] }
 0x17d   :  { %4973 = vmatpush1.bf16.msra.mxu0 %v12036_v2  ;;  %5219 = vmatpush1.bf16.msra.mxu1 %v12038_v3  ;;  %v666_v2 = vld [vmem:[#allocation2 + $0x1088] sm:$0xff] }
 0x17e   :  { %4974 = vmatprep.subr.bf16.mxu0 %v12045_v4  ;;  %5220 = vmatprep.subr.bf16.mxu1 %v12047_v5  ;;  %v670_v3 = vld [vmem:[#allocation2 + $0x10a8] sm:$0xff]  ;;  %v12092_v4 = vcombine.low %v657_v52, %v661_v54  ;;  %v12094_v5 = vcombine.low %v658_v56, %v662_v58  ;;  %v12141_v52 = vcombine.high %v705_v47, %v709_v48  ;;  %v713_v56 = vld [vmem:[#allocation2 + $0x1200] sm:$0xff] }
 0x17f   :  { %v12103_v7 = vcombine.high %v666_v2, %v670_v3  ;;  %v717_v58 = vld [vmem:[#allocation2 + $0x1220] sm:$0xff] }
 0x181   :  { %4975 = vmatpush1.bf16.msra.mxu0 %v12044_v10  ;;  %5221 = vmatpush1.bf16.msra.mxu1 %v12046_v11  ;;  %v674_v10 = vld [vmem:[#allocation2 + $0x10c8] sm:$0xff] }
 0x182   :  { %4976 = vmatprep.subr.bf16.mxu0 %v12053_v13  ;;  %5222 = vmatprep.subr.bf16.mxu1 %v12055_v14  ;;  %v678_v11 = vld [vmem:[#allocation2 + $0x10e8] sm:$0xff]  ;;  %v12100_v13 = vcombine.low %v665_v0, %v669_v1  ;;  %v12102_v14 = vcombine.low %v666_v2, %v670_v3  ;;  %v12149_v0 = vcombine.high %v713_v56, %v717_v58  ;;  %v721_v2 = vld [vmem:[#allocation2 + $0x1240] sm:$0xff] }
 0x183   :  { %v12111_v17 = vcombine.high %v674_v10, %v678_v11  ;;  %v725_v3 = vld [vmem:[#allocation2 + $0x1260] sm:$0xff] }
 0x185   :  { %4977 = vmatpush1.bf16.msra.mxu0 %v12052_v20  ;;  %5223 = vmatpush1.bf16.msra.mxu1 %v12054_v21  ;;  %v682_v20 = vld [vmem:[#allocation2 + $0x1108] sm:$0xff] }
 0x186   :  { %4978 = vmatprep.subr.bf16.mxu0 %v12061_v22  ;;  %5224 = vmatprep.subr.bf16.mxu1 %v12063_v53  ;;  %v686_v21 = vld [vmem:[#allocation2 + $0x1128] sm:$0xff]  ;;  %v12108_v22 = vcombine.low %v673_v8, %v677_v9  ;;  %v12110_v53 = vcombine.low %v674_v10, %v678_v11  ;;  %v12157_v8 = vcombine.high %v721_v2, %v725_v3  ;;  %v729_v10 = vld [vmem:[#allocation2 + $0x1280] sm:$0xff] }
 0x187   :  { %v12119_v27 = vcombine.high %v682_v20, %v686_v21  ;;  %v733_v11 = vld [vmem:[#allocation2 + $0x12a0] sm:$0xff] }
 0x189   :  { %4979 = vmatpush1.bf16.msra.mxu0 %v12060_v30  ;;  %5225 = vmatpush1.bf16.msra.mxu1 %v12062_v31  ;;  %v690_v30 = vld [vmem:[#allocation2 + $0x1148] sm:$0xff] }
 0x18a   :  { %4980 = vmatprep.subr.bf16.mxu0 %v12069_v32  ;;  %5226 = vmatprep.subr.bf16.mxu1 %v12071_v33  ;;  %v694_v31 = vld [vmem:[#allocation2 + $0x1168] sm:$0xff]  ;;  %v12116_v32 = vcombine.low %v681_v18, %v685_v19  ;;  %v12118_v33 = vcombine.low %v682_v20, %v686_v21  ;;  %v12165_v18 = vcombine.high %v729_v10, %v733_v11  ;;  %v737_v20 = vld [vmem:[#allocation2 + $0x12c0] sm:$0xff] }
 0x18b   :  { %v12127_v35 = vcombine.high %v690_v30, %v694_v31  ;;  %v741_v21 = vld [vmem:[#allocation2 + $0x12e0] sm:$0xff] }
 0x18d   :  { %4981 = vmatpush1.bf16.msra.mxu0 %v12068_v40  ;;  %5227 = vmatpush1.bf16.msra.mxu1 %v12070_v41  ;;  %v698_v40 = vld [vmem:[#allocation2 + $0x1188] sm:$0xff] }
 0x18e   :  { %4982 = vmatprep.subr.bf16.mxu0 %v12077_v42  ;;  %5228 = vmatprep.subr.bf16.mxu1 %v12079_v43  ;;  %v702_v41 = vld [vmem:[#allocation2 + $0x11a8] sm:$0xff]  ;;  %v12124_v42 = vcombine.low %v689_v28, %v693_v29  ;;  %v12126_v43 = vcombine.low %v690_v30, %v694_v31  ;;  %v12173_v28 = vcombine.high %v737_v20, %v741_v21  ;;  %v745_v30 = vld [vmem:[#allocation2 + $0x1300] sm:$0xff] }
 0x18f   :  { %v12135_v45 = vcombine.high %v698_v40, %v702_v41  ;;  %v749_v31 = vld [vmem:[#allocation2 + $0x1320] sm:$0xff] }
 0x191   :  { %4983 = vmatpush1.bf16.msra.mxu0 %v12076_v24  ;;  %5229 = vmatpush1.bf16.msra.mxu1 %v12078_v49  ;;  %v706_v24 = vld [vmem:[#allocation2 + $0x11c8] sm:$0xff] }
 0x192   :  { %4993 = vmatprep.subr.bf16.mxu0 %v12085_v50  ;;  %5239 = vmatprep.subr.bf16.mxu1 %v12087_v51  ;;  %v710_v49 = vld [vmem:[#allocation2 + $0x11e8] sm:$0xff]  ;;  %v12132_v50 = vcombine.low %v697_v36, %v701_v37  ;;  %v12134_v51 = vcombine.low %v698_v40, %v702_v41  ;;  %v12181_v36 = vcombine.high %v745_v30, %v749_v31  ;;  %v753_v40 = vld [vmem:[#allocation2 + $0x1340] sm:$0xff] }
 0x193   :  { %v12143_v54 = vcombine.high %v706_v24, %v710_v49  ;;  %v757_v41 = vld [vmem:[#allocation2 + $0x1360] sm:$0xff] }
 0x194   :  { %4985 = vmatmul.mubr.bf16.vlgmr.msra.gmra.mrb[0].mxu0 %v14118_v55  ;;  %5231 = vmatmul.mubr.bf16.vlgmr.msra.gmra.mrb[0].mxu1 %v14118_v55 }
 0x195   :  { %4994 = vmatpush1.bf16.msra.mxu0 %v12084_v60  ;;  %5240 = vmatpush1.bf16.msra.mxu1 %v12086_v61  ;;  %v714_v60 = vld [vmem:[#allocation2 + $0x1208] sm:$0xff] }
 0x196   :  { %4995 = vmatprep.subr.bf16.mxu0 %v12093_v62  ;;  %5241 = vmatprep.subr.bf16.mxu1 %v12095_v63  ;;  %v718_v61 = vld [vmem:[#allocation2 + $0x1228] sm:$0xff]  ;;  %v12140_v62 = vcombine.low %v705_v47, %v709_v48  ;;  %v12142_v63 = vcombine.low %v706_v24, %v710_v49  ;;  %v12189_v47 = vcombine.high %v753_v40, %v757_v41  ;;  %v761_v24 = vld [vmem:[#allocation2 + $0x1380] sm:$0xff] }
 0x197   :  { %5025 = vmatprep.mubr.bf16.mxu0 %v14127_v38  ;;  %5271 = vmatprep.mubr.bf16.mxu1 %v14127_v38  ;;  %v12151_v1 = vcombine.high %v714_v60, %v718_v61  ;;  %v765_v49 = vld [vmem:[#allocation2 + $0x13a0] sm:$0xff] }
 0x199   :  { %4996 = vmatpush1.bf16.msra.mxu0 %v12092_v4  ;;  %5242 = vmatpush1.bf16.msra.mxu1 %v12094_v5  ;;  %v722_v4 = vld [vmem:[#allocation2 + $0x1248] sm:$0xff] }
 0x19a   :  { %4997 = vmatprep.subr.bf16.mxu0 %v12101_v6  ;;  %5243 = vmatprep.subr.bf16.mxu1 %v12103_v7  ;;  %v726_v5 = vld [vmem:[#allocation2 + $0x1268] sm:$0xff]  ;;  %v12148_v6 = vcombine.low %v713_v56, %v717_v58  ;;  %v12150_v7 = vcombine.low %v714_v60, %v718_v61  ;;  %v12197_v56 = vcombine.high %v761_v24, %v765_v49  ;;  %v769_v60 = vld [vmem:[#allocation2 + $0x13c0] sm:$0xff] }
 0x19b   :  { %v12159_v9 = vcombine.high %v722_v4, %v726_v5  ;;  %v773_v61 = vld [vmem:[#allocation2 + $0x13e0] sm:$0xff] }
 0x19d   :  { %4998 = vmatpush1.bf16.msra.mxu0 %v12100_v13  ;;  %5244 = vmatpush1.bf16.msra.mxu1 %v12102_v14  ;;  %v730_v13 = vld [vmem:[#allocation2 + $0x1288] sm:$0xff] }
 0x19e   :  { %4999 = vmatprep.subr.bf16.mxu0 %v12109_v16  ;;  %5245 = vmatprep.subr.bf16.mxu1 %v12111_v17  ;;  %v734_v14 = vld [vmem:[#allocation2 + $0x12a8] sm:$0xff]  ;;  %v12156_v16 = vcombine.low %v721_v2, %v725_v3  ;;  %v12158_v17 = vcombine.low %v722_v4, %v726_v5  ;;  %v12205_v2 = vcombine.high %v769_v60, %v773_v61  ;;  %v777_v4 = vld [vmem:[#allocation2 + $0x1400] sm:$0xff] }
 0x19f   :  { %v12167_v19 = vcombine.high %v730_v13, %v734_v14  ;;  %v781_v5 = vld [vmem:[#allocation2 + $0x1420] sm:$0xff] }
 0x1a1   :  { %5000 = vmatpush1.bf16.msra.mxu0 %v12108_v22  ;;  %5246 = vmatpush1.bf16.msra.mxu1 %v12110_v53  ;;  %v738_v22 = vld [vmem:[#allocation2 + $0x12c8] sm:$0xff] }
 0x1a2   :  { %5001 = vmatprep.subr.bf16.mxu0 %v12117_v26  ;;  %5247 = vmatprep.subr.bf16.mxu1 %v12119_v27  ;;  %v742_v53 = vld [vmem:[#allocation2 + $0x12e8] sm:$0xff]  ;;  %v12164_v26 = vcombine.low %v729_v10, %v733_v11  ;;  %v12166_v27 = vcombine.low %v730_v13, %v734_v14  ;;  %v12213_v10 = vcombine.high %v777_v4, %v781_v5  ;;  %v785_v13 = vld [vmem:[#allocation2 + $0x1440] sm:$0xff] }
 0x1a3   :  { %v12175_v29 = vcombine.high %v738_v22, %v742_v53  ;;  %v789_v14 = vld [vmem:[#allocation2 + $0x1460] sm:$0xff] }
 0x1a5   :  { %5002 = vmatpush1.bf16.msra.mxu0 %v12116_v32  ;;  %5248 = vmatpush1.bf16.msra.mxu1 %v12118_v33  ;;  %v746_v32 = vld [vmem:[#allocation2 + $0x1308] sm:$0xff] }
 0x1a6   :  { %5003 = vmatprep.subr.bf16.mxu0 %v12125_v15  ;;  %5249 = vmatprep.subr.bf16.mxu1 %v12127_v35  ;;  %v750_v33 = vld [vmem:[#allocation2 + $0x1328] sm:$0xff]  ;;  %v12172_v15 = vcombine.low %v737_v20, %v741_v21  ;;  %v12174_v35 = vcombine.low %v738_v22, %v742_v53  ;;  %v12212_v20 = vcombine.low %v777_v4, %v781_v5 }
 0x1a7   :  { %v12183_v37 = vcombine.high %v746_v32, %v750_v33  ;;  %v12221_v22 = vcombine.high %v785_v13, %v789_v14 }
 0x1a9   :  { %5004 = vmatpush1.bf16.msra.mxu0 %v12124_v42  ;;  %5250 = vmatpush1.bf16.msra.mxu1 %v12126_v43  ;;  %v754_v42 = vld [vmem:[#allocation2 + $0x1348] sm:$0xff] }
 0x1aa   :  { %5005 = vmatprep.subr.bf16.mxu0 %v12133_v44  ;;  %5251 = vmatprep.subr.bf16.mxu1 %v12135_v45  ;;  %v758_v43 = vld [vmem:[#allocation2 + $0x1368] sm:$0xff]  ;;  %v12180_v44 = vcombine.low %v745_v30, %v749_v31  ;;  %v12182_v45 = vcombine.low %v746_v32, %v750_v33  ;;  %v12220_v30 = vcombine.low %v785_v13, %v789_v14 }
 0x1ab   :  { %v12191_v48 = vcombine.high %v754_v42, %v758_v43 }
 0x1ad   :  { %5006 = vmatpush1.bf16.msra.mxu0 %v12132_v50  ;;  %5252 = vmatpush1.bf16.msra.mxu1 %v12134_v51  ;;  %v762_v50 = vld [vmem:[#allocation2 + $0x1388] sm:$0xff] }
 0x1ae   :  { %5007 = vmatprep.subr.bf16.mxu0 %v12141_v52  ;;  %5253 = vmatprep.subr.bf16.mxu1 %v12143_v54  ;;  %v766_v51 = vld [vmem:[#allocation2 + $0x13a8] sm:$0xff]  ;;  %v12188_v52 = vcombine.low %v753_v40, %v757_v41  ;;  %v12190_v54 = vcombine.low %v754_v42, %v758_v43 }
 0x1af   :  { %v12199_v58 = vcombine.high %v762_v50, %v766_v51 }
 0x1b1   :  { %5008 = vmatpush1.bf16.msra.mxu0 %v12140_v62  ;;  %5254 = vmatpush1.bf16.msra.mxu1 %v12142_v63  ;;  %v770_v62 = vld [vmem:[#allocation2 + $0x13c8] sm:$0xff] }
 0x1b2   :  { %5009 = vmatprep.subr.bf16.mxu0 %v12149_v0  ;;  %5255 = vmatprep.subr.bf16.mxu1 %v12151_v1  ;;  %v774_v63 = vld [vmem:[#allocation2 + $0x13e8] sm:$0xff]  ;;  %v12196_v0 = vcombine.low %v761_v24, %v765_v49  ;;  %v12198_v1 = vcombine.low %v762_v50, %v766_v51 }
 0x1b3   :  { %v12207_v3 = vcombine.high %v770_v62, %v774_v63 }
 0x1b5   :  { %5010 = vmatpush1.bf16.msra.mxu0 %v12148_v6  ;;  %5256 = vmatpush1.bf16.msra.mxu1 %v12150_v7  ;;  %v778_v6 = vld [vmem:[#allocation2 + $0x1408] sm:$0xff] }
 0x1b6   :  { %5011 = vmatprep.subr.bf16.mxu0 %v12157_v8  ;;  %5257 = vmatprep.subr.bf16.mxu1 %v12159_v9  ;;  %v782_v7 = vld [vmem:[#allocation2 + $0x1428] sm:$0xff]  ;;  %v12204_v8 = vcombine.low %v769_v60, %v773_v61  ;;  %v12206_v9 = vcombine.low %v770_v62, %v774_v63 }
 0x1b7   :  { %v12215_v11 = vcombine.high %v778_v6, %v782_v7  ;;  %v12214_v21 = vcombine.low %v778_v6, %v782_v7 }
 0x1b9   :  { %5012 = vmatpush1.bf16.msra.mxu0 %v12156_v16  ;;  %5258 = vmatpush1.bf16.msra.mxu1 %v12158_v17  ;;  %v14135_v16 = vcombine.low %v14123_v59, %v14123_v59  ;;  %v786_v17 = vld [vmem:[#allocation2 + $0x1448] sm:$0xff] }
 0x1ba   :  { %5013 = vmatprep.subr.bf16.mxu0 %v12165_v18  ;;  %5259 = vmatprep.subr.bf16.mxu1 %v12167_v19  ;;  %v790_v18 = vld [vmem:[#allocation2 + $0x1468] sm:$0xff] }
 0x1bb   :  { %v14140_v19 = vld [vmem:[%s14332_s0 + $0x28] sm:$0xff]  ;;  %v12223_v53 = vcombine.high %v786_v17, %v790_v18  ;;  %v12222_v31 = vcombine.low %v786_v17, %v790_v18 }
 0x1bc   :  { %v14144_v59 = vcombine.high %v14140_v19, %v14140_v19 }
 0x1bd   :  { %5014 = vmatpush1.bf16.msra.mxu0 %v12164_v26  ;;  %5260 = vmatpush1.bf16.msra.mxu1 %v12166_v27  ;;  %v793_v26 = vld [vmem:[#allocation2 + $0x1480] sm:$0xff] }
 0x1be   :  { %5015 = vmatprep.subr.bf16.mxu0 %v12173_v28  ;;  %5261 = vmatprep.subr.bf16.mxu1 %v12175_v29  ;;  %v797_v27 = vld [vmem:[#allocation2 + $0x14a0] sm:$0xff]  ;;  %v794_v28 = vld [vmem:[#allocation2 + $0x1488] sm:$0xff] }
 0x1bf   :  { %v798_v29 = vld [vmem:[#allocation2 + $0x14a8] sm:$0xff]  ;;  %v12229_v32 = vcombine.high %v793_v26, %v797_v27  ;;  %v12228_v40 = vcombine.low %v793_v26, %v797_v27 }
 0x1c0   :  { %v12231_v33 = vcombine.high %v794_v28, %v798_v29  ;;  %v12230_v41 = vcombine.low %v794_v28, %v798_v29 }
 0x1c1   :  { %5016 = vmatpush1.bf16.msra.mxu0 %v12172_v15  ;;  %5262 = vmatpush1.bf16.msra.mxu1 %v12174_v35  ;;  %v801_v15 = vld [vmem:[#allocation2 + $0x14c0] sm:$0xff] }
 0x1c2   :  { %5017 = vmatprep.subr.bf16.mxu0 %v12181_v36  ;;  %5263 = vmatprep.subr.bf16.mxu1 %v12183_v37  ;;  %v805_v35 = vld [vmem:[#allocation2 + $0x14e0] sm:$0xff]  ;;  %v802_v36 = vld [vmem:[#allocation2 + $0x14c8] sm:$0xff] }
 0x1c3   :  { %v806_v37 = vld [vmem:[#allocation2 + $0x14e8] sm:$0xff]  ;;  %v12237_v42 = vcombine.high %v801_v15, %v805_v35  ;;  %v12236_v24 = vcombine.low %v801_v15, %v805_v35 }
 0x1c4   :  { %v12239_v43 = vcombine.high %v802_v36, %v806_v37  ;;  %v12238_v49 = vcombine.low %v802_v36, %v806_v37 }
 0x1c5   :  { %5018 = vmatpush1.bf16.msra.mxu0 %v12180_v44  ;;  %5264 = vmatpush1.bf16.msra.mxu1 %v12182_v45  ;;  %v809_v44 = vld [vmem:[#allocation2 + $0x1500] sm:$0xff] }
 0x1c6   :  { %5019 = vmatprep.subr.bf16.mxu0 %v12189_v47  ;;  %5265 = vmatprep.subr.bf16.mxu1 %v12191_v48  ;;  %v813_v45 = vld [vmem:[#allocation2 + $0x1520] sm:$0xff]  ;;  %v810_v47 = vld [vmem:[#allocation2 + $0x1508] sm:$0xff] }
 0x1c7   :  { %v814_v48 = vld [vmem:[#allocation2 + $0x1528] sm:$0xff]  ;;  %v12245_v50 = vcombine.high %v809_v44, %v813_v45  ;;  %v12244_v60 = vcombine.low %v809_v44, %v813_v45 }
 0x1c8   :  { %v12247_v51 = vcombine.high %v810_v47, %v814_v48  ;;  %v12246_v61 = vcombine.low %v810_v47, %v814_v48 }
 0x1c9   :  { %5020 = vmatpush1.bf16.msra.mxu0 %v12188_v52  ;;  %5266 = vmatpush1.bf16.msra.mxu1 %v12190_v54  ;;  %v817_v52 = vld [vmem:[#allocation2 + $0x1540] sm:$0xff] }
 0x1ca   :  { %5021 = vmatprep.subr.bf16.mxu0 %v12197_v56  ;;  %5267 = vmatprep.subr.bf16.mxu1 %v12199_v58  ;;  %v821_v54 = vld [vmem:[#allocation2 + $0x1560] sm:$0xff]  ;;  %v818_v56 = vld [vmem:[#allocation2 + $0x1548] sm:$0xff] }
 0x1cb   :  { %v822_v58 = vld [vmem:[#allocation2 + $0x1568] sm:$0xff]  ;;  %v12253_v62 = vcombine.high %v817_v52, %v821_v54  ;;  %v12252_v4 = vcombine.low %v817_v52, %v821_v54 }
 0x1cc   :  { %v12255_v63 = vcombine.high %v818_v56, %v822_v58  ;;  %v12254_v5 = vcombine.low %v818_v56, %v822_v58 }
 0x1cd   :  { %5022 = vmatpush1.bf16.msra.mxu0 %v12196_v0  ;;  %5268 = vmatpush1.bf16.msra.mxu1 %v12198_v1  ;;  %v825_v0 = vld [vmem:[#allocation2 + $0x1580] sm:$0xff] }
 0x1ce   :  { %5023 = vmatprep.subr.bf16.mxu0 %v12205_v2  ;;  %5269 = vmatprep.subr.bf16.mxu1 %v12207_v3  ;;  %v829_v1 = vld [vmem:[#allocation2 + $0x15a0] sm:$0xff]  ;;  %v826_v2 = vld [vmem:[#allocation2 + $0x1588] sm:$0xff] }
 0x1cf   :  { %v830_v3 = vld [vmem:[#allocation2 + $0x15a8] sm:$0xff]  ;;  %v12261_v6 = vcombine.high %v825_v0, %v829_v1  ;;  %v12260_v13 = vcombine.low %v825_v0, %v829_v1 }
 0x1d0   :  { %v12263_v7 = vcombine.high %v826_v2, %v830_v3  ;;  %v12262_v14 = vcombine.low %v826_v2, %v830_v3 }
 0x1d1   :  { %5024 = vmatpush1.bf16.msra.mxu0 %v12204_v8  ;;  %5270 = vmatpush1.bf16.msra.mxu1 %v12206_v9  ;;  %v833_v8 = vld [vmem:[#allocation2 + $0x15c0] sm:$0xff] }
 0x1d2   :  { %5034 = vmatprep.subr.bf16.mxu0 %v12213_v10  ;;  %5280 = vmatprep.subr.bf16.mxu1 %v12215_v11  ;;  %v837_v9 = vld [vmem:[#allocation2 + $0x15e0] sm:$0xff]  ;;  %v834_v10 = vld [vmem:[#allocation2 + $0x15c8] sm:$0xff] }
 0x1d3   :  { %v838_v11 = vld [vmem:[#allocation2 + $0x15e8] sm:$0xff]  ;;  %v12269_v17 = vcombine.high %v833_v8, %v837_v9  ;;  %v12268_v26 = vcombine.low %v833_v8, %v837_v9 }
 0x1d4   :  { %5026 = vmatmul.mubr.bf16.vlgmr.msra.gmra.mrb[0].mxu0 %v14135_v16  ;;  %5272 = vmatmul.mubr.bf16.vlgmr.msra.gmra.mrb[0].mxu1 %v14135_v16  ;;  %v12271_v18 = vcombine.high %v834_v10, %v838_v11  ;;  %v12270_v27 = vcombine.low %v834_v10, %v838_v11 }
 0x1d5   :  { %5035 = vmatpush1.bf16.msra.mxu0 %v12212_v20  ;;  %5281 = vmatpush1.bf16.msra.mxu1 %v12214_v21  ;;  %v841_v20 = vld [vmem:[#allocation2 + $0x1600] sm:$0xff] }
 0x1d6   :  { %5036 = vmatprep.subr.bf16.mxu0 %v12221_v22  ;;  %5282 = vmatprep.subr.bf16.mxu1 %v12223_v53  ;;  %v845_v21 = vld [vmem:[#allocation2 + $0x1620] sm:$0xff]  ;;  %v842_v22 = vld [vmem:[#allocation2 + $0x1608] sm:$0xff] }
 0x1d7   :  { %5066 = vmatprep.mubr.bf16.mxu0 %v14144_v59  ;;  %5312 = vmatprep.mubr.bf16.mxu1 %v14144_v59  ;;  %v846_v53 = vld [vmem:[#allocation2 + $0x1628] sm:$0xff]  ;;  %v12277_v28 = vcombine.high %v841_v20, %v845_v21  ;;  %v12276_v15 = vcombine.low %v841_v20, %v845_v21 }
 0x1d8   :  { %v12279_v29 = vcombine.high %v842_v22, %v846_v53  ;;  %v12278_v35 = vcombine.low %v842_v22, %v846_v53 }
 0x1d9   :  { %5037 = vmatpush1.bf16.msra.mxu0 %v12220_v30  ;;  %5283 = vmatpush1.bf16.msra.mxu1 %v12222_v31  ;;  %v849_v30 = vld [vmem:[#allocation2 + $0x1640] sm:$0xff] }
 0x1da   :  { %5038 = vmatprep.subr.bf16.mxu0 %v12229_v32  ;;  %5284 = vmatprep.subr.bf16.mxu1 %v12231_v33  ;;  %v853_v31 = vld [vmem:[#allocation2 + $0x1660] sm:$0xff]  ;;  %v850_v32 = vld [vmem:[#allocation2 + $0x1648] sm:$0xff] }
 0x1db   :  { %v854_v33 = vld [vmem:[#allocation2 + $0x1668] sm:$0xff]  ;;  %v12285_v36 = vcombine.high %v849_v30, %v853_v31  ;;  %v12284_v44 = vcombine.low %v849_v30, %v853_v31 }
 0x1dc   :  { %v12287_v37 = vcombine.high %v850_v32, %v854_v33  ;;  %v12286_v45 = vcombine.low %v850_v32, %v854_v33 }
 0x1dd   :  { %5039 = vmatpush1.bf16.msra.mxu0 %v12228_v40  ;;  %5285 = vmatpush1.bf16.msra.mxu1 %v12230_v41  ;;  %v857_v40 = vld [vmem:[#allocation2 + $0x1680] sm:$0xff] }
 0x1de   :  { %5040 = vmatprep.subr.bf16.mxu0 %v12237_v42  ;;  %5286 = vmatprep.subr.bf16.mxu1 %v12239_v43  ;;  %v861_v41 = vld [vmem:[#allocation2 + $0x16a0] sm:$0xff]  ;;  %v858_v42 = vld [vmem:[#allocation2 + $0x1688] sm:$0xff] }
 0x1df   :  { %v862_v43 = vld [vmem:[#allocation2 + $0x16a8] sm:$0xff]  ;;  %v12293_v47 = vcombine.high %v857_v40, %v861_v41  ;;  %v12292_v52 = vcombine.low %v857_v40, %v861_v41 }
 0x1e0   :  { %v12295_v48 = vcombine.high %v858_v42, %v862_v43  ;;  %v12294_v54 = vcombine.low %v858_v42, %v862_v43 }
 0x1e1   :  { %5041 = vmatpush1.bf16.msra.mxu0 %v12236_v24  ;;  %5287 = vmatpush1.bf16.msra.mxu1 %v12238_v49  ;;  %v865_v24 = vld [vmem:[#allocation2 + $0x16c0] sm:$0xff] }
 0x1e2   :  { %5042 = vmatprep.subr.bf16.mxu0 %v12245_v50  ;;  %5288 = vmatprep.subr.bf16.mxu1 %v12247_v51  ;;  %v869_v49 = vld [vmem:[#allocation2 + $0x16e0] sm:$0xff]  ;;  %v866_v50 = vld [vmem:[#allocation2 + $0x16c8] sm:$0xff] }
 0x1e3   :  { %v870_v51 = vld [vmem:[#allocation2 + $0x16e8] sm:$0xff]  ;;  %v12301_v56 = vcombine.high %v865_v24, %v869_v49  ;;  %v12300_v0 = vcombine.low %v865_v24, %v869_v49  ;;  %v152_v24 = vld [vmem:[#allocation2 + $0x78] sm:$0xff] }
 0x1e4   :  { %v12303_v58 = vcombine.high %v866_v50, %v870_v51  ;;  %v12302_v1 = vcombine.low %v866_v50, %v870_v51 }
 0x1e5   :  { %5043 = vmatpush1.bf16.msra.mxu0 %v12244_v60  ;;  %5289 = vmatpush1.bf16.msra.mxu1 %v12246_v61  ;;  %v873_v60 = vld [vmem:[#allocation2 + $0x1700] sm:$0xff] }
 0x1e6   :  { %5044 = vmatprep.subr.bf16.mxu0 %v12253_v62  ;;  %5290 = vmatprep.subr.bf16.mxu1 %v12255_v63  ;;  %v877_v61 = vld [vmem:[#allocation2 + $0x1720] sm:$0xff]  ;;  %v874_v62 = vld [vmem:[#allocation2 + $0x1708] sm:$0xff] }
 0x1e7   :  { %v878_v63 = vld [vmem:[#allocation2 + $0x1728] sm:$0xff]  ;;  %v12309_v2 = vcombine.high %v873_v60, %v877_v61  ;;  %v12308_v8 = vcombine.low %v873_v60, %v877_v61  ;;  %v160_v60 = vld [vmem:[#allocation2 + $0xb8] sm:$0xff] }
 0x1e8   :  { %v12311_v3 = vcombine.high %v874_v62, %v878_v63  ;;  %v12310_v9 = vcombine.low %v874_v62, %v878_v63 }
 0x1e9   :  { %5045 = vmatpush1.bf16.msra.mxu0 %v12252_v4  ;;  %5291 = vmatpush1.bf16.msra.mxu1 %v12254_v5  ;;  %v881_v4 = vld [vmem:[#allocation2 + $0x1740] sm:$0xff] }
 0x1ea   :  { %5046 = vmatprep.subr.bf16.mxu0 %v12261_v6  ;;  %5292 = vmatprep.subr.bf16.mxu1 %v12263_v7  ;;  %v885_v5 = vld [vmem:[#allocation2 + $0x1760] sm:$0xff]  ;;  %v882_v6 = vld [vmem:[#allocation2 + $0x1748] sm:$0xff] }
 0x1eb   :  { %v886_v7 = vld [vmem:[#allocation2 + $0x1768] sm:$0xff]  ;;  %v12317_v10 = vcombine.high %v881_v4, %v885_v5  ;;  %v12316_v20 = vcombine.low %v881_v4, %v885_v5 }
 0x1ec   :  { %v12319_v11 = vcombine.high %v882_v6, %v886_v7  ;;  %v12318_v21 = vcombine.low %v882_v6, %v886_v7 }
 0x1ed   :  { %5047 = vmatpush1.bf16.msra.mxu0 %v12260_v13  ;;  %5293 = vmatpush1.bf16.msra.mxu1 %v12262_v14  ;;  %v889_v13 = vld [vmem:[#allocation2 + $0x1780] sm:$0xff] }
 0x1ee   :  { %5048 = vmatprep.subr.bf16.mxu0 %v12269_v17  ;;  %5294 = vmatprep.subr.bf16.mxu1 %v12271_v18  ;;  %v893_v14 = vld [vmem:[#allocation2 + $0x17a0] sm:$0xff]  ;;  %v890_v17 = vld [vmem:[#allocation2 + $0x1788] sm:$0xff] }
 0x1ef   :  { %v894_v18 = vld [vmem:[#allocation2 + $0x17a8] sm:$0xff]  ;;  %v12325_v22 = vcombine.high %v889_v13, %v893_v14  ;;  %v12324_v30 = vcombine.low %v889_v13, %v893_v14 }
 0x1f0   :  { %v12327_v53 = vcombine.high %v890_v17, %v894_v18  ;;  %v12326_v31 = vcombine.low %v890_v17, %v894_v18  ;;  %v179_v18 = vld [vmem:[#allocation2 + $0x150] sm:$0xff] }
 0x1f1   :  { %5049 = vmatpush1.bf16.msra.mxu0 %v12268_v26  ;;  %5295 = vmatpush1.bf16.msra.mxu1 %v12270_v27  ;;  %v897_v26 = vld [vmem:[#allocation2 + $0x17c0] sm:$0xff] }
 0x1f2   :  { %5050 = vmatprep.subr.bf16.mxu0 %v12277_v28  ;;  %5296 = vmatprep.subr.bf16.mxu1 %v12279_v29  ;;  %v901_v27 = vld [vmem:[#allocation2 + $0x17e0] sm:$0xff]  ;;  %v898_v28 = vld [vmem:[#allocation2 + $0x17c8] sm:$0xff] }
 0x1f3   :  { %v902_v29 = vld [vmem:[#allocation2 + $0x17e8] sm:$0xff]  ;;  %v12333_v32 = vcombine.high %v897_v26, %v901_v27  ;;  %v12332_v40 = vcombine.low %v897_v26, %v901_v27 }
 0x1f4   :  { %v12335_v33 = vcombine.high %v898_v28, %v902_v29  ;;  %v12334_v41 = vcombine.low %v898_v28, %v902_v29  ;;  %v187_v29 = vld [vmem:[#allocation2 + $0x190] sm:$0xff] }
 0x1f5   :  { %5051 = vmatpush1.bf16.msra.mxu0 %v12276_v15  ;;  %5297 = vmatpush1.bf16.msra.mxu1 %v12278_v35  ;;  %v139_v15 = vld [vmem:[#allocation2 + $0x10] sm:$0xff] }
 0x1f6   :  { %5052 = vmatprep.subr.bf16.mxu0 %v12285_v36  ;;  %5298 = vmatprep.subr.bf16.mxu1 %v12287_v37  ;;  %v143_v35 = vld [vmem:[#allocation2 + $0x30] sm:$0xff]  ;;  %v140_v36 = vld [vmem:[#allocation2 + $0x18] sm:$0xff] }
 0x1f7   :  { %v144_v37 = vld [vmem:[#allocation2 + $0x38] sm:$0xff]  ;;  %v11577_v42 = vcombine.high %v139_v15, %v143_v35  ;;  %v11576_v49 = vcombine.low %v139_v15, %v143_v35 }
 0x1f8   :  { %v11579_v43 = vcombine.high %v140_v36, %v144_v37  ;;  %v11578_v50 = vcombine.low %v140_v36, %v144_v37  ;;  %v195_v37 = vld [vmem:[#allocation2 + $0x1d0] sm:$0xff] }
 0x1f9   :  { %5053 = vmatpush1.bf16.msra.mxu0 %v12284_v44  ;;  %5299 = vmatpush1.bf16.msra.mxu1 %v12286_v45  ;;  %v147_v44 = vld [vmem:[#allocation2 + $0x50] sm:$0xff] }
 0x1fa   :  { %5054 = vmatprep.subr.bf16.mxu0 %v12293_v47  ;;  %5300 = vmatprep.subr.bf16.mxu1 %v12295_v48  ;;  %v151_v45 = vld [vmem:[#allocation2 + $0x70] sm:$0xff]  ;;  %v14152_v47 = vcombine.low %v14140_v19, %v14140_v19  ;;  %v148_v48 = vld [vmem:[#allocation2 + $0x58] sm:$0xff] }
 0x1fb   :  { %v11585_v51 = vcombine.high %v147_v44, %v151_v45  ;;  %v11584_v19 = vcombine.low %v147_v44, %v151_v45  ;;  %v11586_v61 = vcombine.low %v148_v48, %v152_v24 }
 0x1fd   :  { %5055 = vmatpush1.bf16.msra.mxu0 %v12292_v52  ;;  %5301 = vmatpush1.bf16.msra.mxu1 %v12294_v54  ;;  %v11587_v52 = vcombine.high %v148_v48, %v152_v24  ;;  %v155_v54 = vld [vmem:[#allocation2 + $0x90] sm:$0xff] }
 0x1fe   :  { %5056 = vmatprep.subr.bf16.mxu0 %v12301_v56  ;;  %5302 = vmatprep.subr.bf16.mxu1 %v12303_v58  ;;  %v159_v56 = vld [vmem:[#allocation2 + $0xb0] sm:$0xff]  ;;  %v156_v58 = vld [vmem:[#allocation2 + $0x98] sm:$0xff] }
 0x1ff   :  { %v11593_v62 = vcombine.high %v155_v54, %v159_v56  ;;  %v11595_v63 = vcombine.high %v156_v58, %v160_v60  ;;  %v11592_v4 = vcombine.low %v155_v54, %v159_v56  ;;  %v11594_v5 = vcombine.low %v156_v58, %v160_v60  ;;  %v203_v24 = vld [vmem:[#allocation2 + $0x210] sm:$0xff] }
 0x200   :  { %v211_v60 = vld [vmem:[#allocation2 + $0x250] sm:$0xff] }
 0x201   :  { %5057 = vmatpush1.bf16.msra.mxu0 %v12300_v0  ;;  %5303 = vmatpush1.bf16.msra.mxu1 %v12302_v1  ;;  %v163_v0 = vld [vmem:[#allocation2 + $0xd0] sm:$0xff] }
 0x202   :  { %5058 = vmatprep.subr.bf16.mxu0 %v12309_v2  ;;  %5304 = vmatprep.subr.bf16.mxu1 %v12311_v3  ;;  %v167_v1 = vld [vmem:[#allocation2 + $0xf0] sm:$0xff]  ;;  %v164_v2 = vld [vmem:[#allocation2 + $0xd8] sm:$0xff] }
 0x203   :  { %v168_v3 = vld [vmem:[#allocation2 + $0xf8] sm:$0xff]  ;;  %v11601_v6 = vcombine.high %v163_v0, %v167_v1  ;;  %v11600_v13 = vcombine.low %v163_v0, %v167_v1 }
 0x204   :  { %v11603_v7 = vcombine.high %v164_v2, %v168_v3  ;;  %v11602_v14 = vcombine.low %v164_v2, %v168_v3  ;;  %v219_v3 = vld [vmem:[#allocation2 + $0x290] sm:$0xff] }
 0x205   :  { %5059 = vmatpush1.bf16.msra.mxu0 %v12308_v8  ;;  %5305 = vmatpush1.bf16.msra.mxu1 %v12310_v9  ;;  %v171_v8 = vld [vmem:[#allocation2 + $0x110] sm:$0xff] }
 0x206   :  { %5060 = vmatprep.subr.bf16.mxu0 %v12317_v10  ;;  %5306 = vmatprep.subr.bf16.mxu1 %v12319_v11  ;;  %v175_v9 = vld [vmem:[#allocation2 + $0x130] sm:$0xff]  ;;  %v172_v10 = vld [vmem:[#allocation2 + $0x118] sm:$0xff] }
 0x207   :  { %v176_v11 = vld [vmem:[#allocation2 + $0x138] sm:$0xff]  ;;  %v11609_v17 = vcombine.high %v171_v8, %v175_v9 }
 0x208   :  { %v11610_v26 = vcombine.low %v172_v10, %v176_v11 }
 0x209   :  { %5061 = vmatpush1.bf16.msra.mxu0 %v12316_v20  ;;  %5307 = vmatpush1.bf16.msra.mxu1 %v12318_v21  ;;  %v183_v20 = vld [vmem:[#allocation2 + $0x170] sm:$0xff]  ;;  %v180_v21 = vld [vmem:[#allocation2 + $0x158] sm:$0xff] }
 0x20a   :  { %5062 = vmatprep.subr.bf16.mxu0 %v12325_v22  ;;  %5308 = vmatprep.subr.bf16.mxu1 %v12327_v53  ;;  %v184_v22 = vld [vmem:[#allocation2 + $0x178] sm:$0xff]  ;;  %v11608_v53 = vcombine.low %v171_v8, %v175_v9  ;;  %v11617_v27 = vcombine.high %v179_v18, %v183_v20 }
 0x20b   :  { %v11619_v28 = vcombine.high %v180_v21, %v184_v22  ;;  %v11618_v15 = vcombine.low %v180_v21, %v184_v22  ;;  %v235_v22 = vld [vmem:[#allocation2 + $0x310] sm:$0xff] }
 0x20d   :  { %5063 = vmatpush1.bf16.msra.mxu0 %v12324_v30  ;;  %5309 = vmatpush1.bf16.msra.mxu1 %v12326_v31  ;;  %v191_v30 = vld [vmem:[#allocation2 + $0x1b0] sm:$0xff]  ;;  %v188_v31 = vld [vmem:[#allocation2 + $0x198] sm:$0xff] }
 0x20e   :  { %5064 = vmatprep.subr.bf16.mxu0 %v12333_v32  ;;  %5310 = vmatprep.subr.bf16.mxu1 %v12335_v33  ;;  %v192_v32 = vld [vmem:[#allocation2 + $0x1b8] sm:$0xff]  ;;  %v11616_v33 = vcombine.low %v179_v18, %v183_v20  ;;  %v11625_v35 = vcombine.high %v187_v29, %v191_v30 }
 0x20f   :  { %v11627_v36 = vcombine.high %v188_v31, %v192_v32  ;;  %v11626_v44 = vcombine.low %v188_v31, %v192_v32  ;;  %v243_v32 = vld [vmem:[#allocation2 + $0x350] sm:$0xff] }
 0x211   :  { %5065 = vmatpush1.bf16.msra.mxu0 %v12332_v40  ;;  %5311 = vmatpush1.bf16.msra.mxu1 %v12334_v41  ;;  %v199_v40 = vld [vmem:[#allocation2 + $0x1f0] sm:$0xff]  ;;  %v196_v41 = vld [vmem:[#allocation2 + $0x1d8] sm:$0xff] }
 0x212   :  { %5321 = vmatprep.subr.bf16.mxu0 %v11577_v42  ;;  %5567 = vmatprep.subr.bf16.mxu1 %v11579_v43  ;;  %v200_v42 = vld [vmem:[#allocation2 + $0x1f8] sm:$0xff]  ;;  %v11624_v43 = vcombine.low %v187_v29, %v191_v30  ;;  %v11633_v45 = vcombine.high %v195_v37, %v199_v40 }
 0x213   :  { %v11635_v48 = vcombine.high %v196_v41, %v200_v42  ;;  %v11634_v54 = vcombine.low %v196_v41, %v200_v42  ;;  %v251_v42 = vld [vmem:[#allocation2 + $0x390] sm:$0xff] }
 0x214   :  { %5067 = vmatmul.mubr.bf16.vlgmr.msra.gmra.mrb[0].mxu0 %v14152_v47  ;;  %5313 = vmatmul.mubr.bf16.vlgmr.msra.gmra.mrb[0].mxu1 %v14152_v47 }
 0x215   :  { %5322 = vmatpush1.bf16.msra.mxu0 %v11576_v49  ;;  %5568 = vmatpush1.bf16.msra.mxu1 %v11578_v50  ;;  %v207_v49 = vld [vmem:[#allocation2 + $0x230] sm:$0xff]  ;;  %v204_v50 = vld [vmem:[#allocation2 + $0x218] sm:$0xff] }
 0x216   :  { %5323 = vmatprep.subr.bf16.mxu0 %v11585_v51  ;;  %5569 = vmatprep.subr.bf16.mxu1 %v11587_v52  ;;  %v208_v51 = vld [vmem:[#allocation2 + $0x238] sm:$0xff]  ;;  %v11632_v52 = vcombine.low %v195_v37, %v199_v40  ;;  %v11641_v56 = vcombine.high %v203_v24, %v207_v49 }
 0x217   :  { %5353 = vmatprep.mubr.bf16.mxu0 %v14061_v57  ;;  %5599 = vmatprep.mubr.bf16.mxu1 %v14061_v57  ;;  %v11611_v57 = vcombine.high %v172_v10, %v176_v11  ;;  %v11643_v58 = vcombine.high %v204_v50, %v208_v51  ;;  %v11642_v0 = vcombine.low %v204_v50, %v208_v51  ;;  %v227_v11 = vld [vmem:[#allocation2 + $0x2d0] sm:$0xff] }
 0x218   :  { %v259_v51 = vld [vmem:[#allocation2 + $0x3d0] sm:$0xff] }
 0x219   :  { %5324 = vmatpush1.bf16.msra.mxu0 %v11584_v19  ;;  %5570 = vmatpush1.bf16.msra.mxu1 %v11586_v61  ;;  %v215_v19 = vld [vmem:[#allocation2 + $0x270] sm:$0xff]  ;;  %v212_v61 = vld [vmem:[#allocation2 + $0x258] sm:$0xff] }
 0x21a   :  { %5325 = vmatprep.subr.bf16.mxu0 %v11593_v62  ;;  %5571 = vmatprep.subr.bf16.mxu1 %v11595_v63  ;;  %v216_v62 = vld [vmem:[#allocation2 + $0x278] sm:$0xff]  ;;  %v11640_v63 = vcombine.low %v203_v24, %v207_v49  ;;  %v11649_v1 = vcombine.high %v211_v60, %v215_v19 }
 0x21b   :  { %v11651_v2 = vcombine.high %v212_v61, %v216_v62  ;;  %v11650_v8 = vcombine.low %v212_v61, %v216_v62  ;;  %v267_v62 = vld [vmem:[#allocation2 + $0x410] sm:$0xff] }
 0x21d   :  { %5326 = vmatpush1.bf16.msra.mxu0 %v11592_v4  ;;  %5572 = vmatpush1.bf16.msra.mxu1 %v11594_v5  ;;  %v223_v4 = vld [vmem:[#allocation2 + $0x2b0] sm:$0xff]  ;;  %v220_v5 = vld [vmem:[#allocation2 + $0x298] sm:$0xff] }
 0x21e   :  { %5327 = vmatprep.subr.bf16.mxu0 %v11601_v6  ;;  %5573 = vmatprep.subr.bf16.mxu1 %v11603_v7  ;;  %v224_v6 = vld [vmem:[#allocation2 + $0x2b8] sm:$0xff]  ;;  %v11648_v7 = vcombine.low %v211_v60, %v215_v19  ;;  %v11657_v9 = vcombine.high %v219_v3, %v223_v4 }
 0x21f   :  { %v11659_v10 = vcombine.high %v220_v5, %v224_v6  ;;  %v11658_v18 = vcombine.low %v220_v5, %v224_v6  ;;  %v275_v6 = vld [vmem:[#allocation2 + $0x450] sm:$0xff] }
 0x221   :  { %5328 = vmatpush1.bf16.msra.mxu0 %v11600_v13  ;;  %5574 = vmatpush1.bf16.msra.mxu1 %v11602_v14  ;;  %v231_v13 = vld [vmem:[#allocation2 + $0x2f0] sm:$0xff]  ;;  %v228_v14 = vld [vmem:[#allocation2 + $0x2d8] sm:$0xff] }
 0x222   :  { %5329 = vmatprep.subr.bf16.mxu0 %v11609_v17  ;;  %5575 = vmatprep.subr.bf16.mxu1 %v11611_v57  ;;  %v232_v17 = vld [vmem:[#allocation2 + $0x2f8] sm:$0xff]  ;;  %v11656_v57 = vcombine.low %v219_v3, %v223_v4  ;;  %v11665_v20 = vcombine.high %v227_v11, %v231_v13 }
 0x223   :  { %v11667_v21 = vcombine.high %v228_v14, %v232_v17  ;;  %v11666_v29 = vcombine.low %v228_v14, %v232_v17  ;;  %v283_v17 = vld [vmem:[#allocation2 + $0x490] sm:$0xff] }
 0x225   :  { %5330 = vmatpush1.bf16.msra.mxu0 %v11608_v53  ;;  %5576 = vmatpush1.bf16.msra.mxu1 %v11610_v26  ;;  %v239_v53 = vld [vmem:[#allocation2 + $0x330] sm:$0xff]  ;;  %v236_v26 = vld [vmem:[#allocation2 + $0x318] sm:$0xff] }
 0x226   :  { %5331 = vmatprep.subr.bf16.mxu0 %v11617_v27  ;;  %5577 = vmatprep.subr.bf16.mxu1 %v11619_v28  ;;  %v240_v27 = vld [vmem:[#allocation2 + $0x338] sm:$0xff]  ;;  %v11664_v28 = vcombine.low %v227_v11, %v231_v13  ;;  %v11673_v30 = vcombine.high %v235_v22, %v239_v53 }
 0x227   :  { %v11675_v31 = vcombine.high %v236_v26, %v240_v27  ;;  %v11674_v37 = vcombine.low %v236_v26, %v240_v27  ;;  %v291_v27 = vld [vmem:[#allocation2 + $0x4d0] sm:$0xff] }
 0x229   :  { %5332 = vmatpush1.bf16.msra.mxu0 %v11616_v33  ;;  %5578 = vmatpush1.bf16.msra.mxu1 %v11618_v15  ;;  %v247_v33 = vld [vmem:[#allocation2 + $0x370] sm:$0xff]  ;;  %v244_v15 = vld [vmem:[#allocation2 + $0x358] sm:$0xff] }
 0x22a   :  { %5333 = vmatprep.subr.bf16.mxu0 %v11625_v35  ;;  %5579 = vmatprep.subr.bf16.mxu1 %v11627_v36  ;;  %v248_v35 = vld [vmem:[#allocation2 + $0x378] sm:$0xff]  ;;  %v11672_v36 = vcombine.low %v235_v22, %v239_v53  ;;  %v11681_v40 = vcombine.high %v243_v32, %v247_v33 }
 0x22b   :  { %v11683_v41 = vcombine.high %v244_v15, %v248_v35  ;;  %v11682_v24 = vcombine.low %v244_v15, %v248_v35  ;;  %v299_v15 = vld [vmem:[#allocation2 + $0x510] sm:$0xff] }
 0x22c   :  { %v303_v35 = vld [vmem:[#allocation2 + $0x530] sm:$0xff] }
 0x22d   :  { %5334 = vmatpush1.bf16.msra.mxu0 %v11624_v43  ;;  %5580 = vmatpush1.bf16.msra.mxu1 %v11626_v44  ;;  %v255_v43 = vld [vmem:[#allocation2 + $0x3b0] sm:$0xff]  ;;  %v252_v44 = vld [vmem:[#allocation2 + $0x398] sm:$0xff] }
 0x22e   :  { %5335 = vmatprep.subr.bf16.mxu0 %v11633_v45  ;;  %5581 = vmatprep.subr.bf16.mxu1 %v11635_v48  ;;  %v256_v45 = vld [vmem:[#allocation2 + $0x3b8] sm:$0xff]  ;;  %v11680_v48 = vcombine.low %v243_v32, %v247_v33  ;;  %v11689_v49 = vcombine.high %v251_v42, %v255_v43 }
 0x22f   :  { %v11691_v50 = vcombine.high %v252_v44, %v256_v45  ;;  %v11690_v60 = vcombine.low %v252_v44, %v256_v45  ;;  %v311_v44 = vld [vmem:[#allocation2 + $0x570] sm:$0xff]  ;;  %v308_v45 = vld [vmem:[#allocation2 + $0x558] sm:$0xff] }
 0x231   :  { %5336 = vmatpush1.bf16.msra.mxu0 %v11632_v52  ;;  %5582 = vmatpush1.bf16.msra.mxu1 %v11634_v54  ;;  %v263_v52 = vld [vmem:[#allocation2 + $0x3f0] sm:$0xff]  ;;  %v260_v54 = vld [vmem:[#allocation2 + $0x3d8] sm:$0xff] }
 0x232   :  { %5337 = vmatprep.subr.bf16.mxu0 %v11641_v56  ;;  %5583 = vmatprep.subr.bf16.mxu1 %v11643_v58  ;;  %v264_v56 = vld [vmem:[#allocation2 + $0x3f8] sm:$0xff]  ;;  %v11688_v58 = vcombine.low %v251_v42, %v255_v43  ;;  %v11697_v19 = vcombine.high %v259_v51, %v263_v52  ;;  %v11737_v42 = vcombine.high %v299_v15, %v303_v35  ;;  %v307_v43 = vld [vmem:[#allocation2 + $0x550] sm:$0xff] }
 0x233   :  { %v11699_v61 = vcombine.high %v260_v54, %v264_v56  ;;  %v11698_v3 = vcombine.low %v260_v54, %v264_v56  ;;  %v319_v54 = vld [vmem:[#allocation2 + $0x5b0] sm:$0xff]  ;;  %v316_v56 = vld [vmem:[#allocation2 + $0x598] sm:$0xff] }
 0x235   :  { %5338 = vmatpush1.bf16.msra.mxu0 %v11640_v63  ;;  %5584 = vmatpush1.bf16.msra.mxu1 %v11642_v0  ;;  %v271_v63 = vld [vmem:[#allocation2 + $0x430] sm:$0xff]  ;;  %v268_v0 = vld [vmem:[#allocation2 + $0x418] sm:$0xff] }
 0x236   :  { %5339 = vmatprep.subr.bf16.mxu0 %v11649_v1  ;;  %5585 = vmatprep.subr.bf16.mxu1 %v11651_v2  ;;  %v272_v1 = vld [vmem:[#allocation2 + $0x438] sm:$0xff]  ;;  %v11696_v2 = vcombine.low %v259_v51, %v263_v52  ;;  %v11705_v4 = vcombine.high %v267_v62, %v271_v63  ;;  %v315_v52 = vld [vmem:[#allocation2 + $0x590] sm:$0xff] }
 0x237   :  { %v11707_v5 = vcombine.high %v268_v0, %v272_v1  ;;  %v11706_v11 = vcombine.low %v268_v0, %v272_v1  ;;  %v327_v0 = vld [vmem:[#allocation2 + $0x5f0] sm:$0xff]  ;;  %v324_v1 = vld [vmem:[#allocation2 + $0x5d8] sm:$0xff] }
 0x239   :  { %5340 = vmatpush1.bf16.msra.mxu0 %v11648_v7  ;;  %5586 = vmatpush1.bf16.msra.mxu1 %v11650_v8  ;;  %v279_v7 = vld [vmem:[#allocation2 + $0x470] sm:$0xff]  ;;  %v276_v8 = vld [vmem:[#allocation2 + $0x458] sm:$0xff] }
 0x23a   :  { %5341 = vmatprep.subr.bf16.mxu0 %v11657_v9  ;;  %5587 = vmatprep.subr.bf16.mxu1 %v11659_v10  ;;  %v280_v9 = vld [vmem:[#allocation2 + $0x478] sm:$0xff]  ;;  %v11704_v10 = vcombine.low %v267_v62, %v271_v63  ;;  %v11713_v13 = vcombine.high %v275_v6, %v279_v7  ;;  %v323_v63 = vld [vmem:[#allocation2 + $0x5d0] sm:$0xff] }
 0x23b   :  { %v11715_v14 = vcombine.high %v276_v8, %v280_v9  ;;  %v11714_v22 = vcombine.low %v276_v8, %v280_v9  ;;  %v335_v8 = vld [vmem:[#allocation2 + $0x630] sm:$0xff]  ;;  %v332_v9 = vld [vmem:[#allocation2 + $0x618] sm:$0xff] }
 0x23d   :  { %5342 = vmatpush1.bf16.msra.mxu0 %v11656_v57  ;;  %5588 = vmatpush1.bf16.msra.mxu1 %v11658_v18  ;;  %v287_v57 = vld [vmem:[#allocation2 + $0x4b0] sm:$0xff]  ;;  %v284_v18 = vld [vmem:[#allocation2 + $0x498] sm:$0xff] }
 0x23e   :  { %5343 = vmatprep.subr.bf16.mxu0 %v11665_v20  ;;  %5589 = vmatprep.subr.bf16.mxu1 %v11667_v21  ;;  %v288_v20 = vld [vmem:[#allocation2 + $0x4b8] sm:$0xff]  ;;  %v11712_v21 = vcombine.low %v275_v6, %v279_v7  ;;  %v11721_v53 = vcombine.high %v283_v17, %v287_v57  ;;  %v331_v7 = vld [vmem:[#allocation2 + $0x610] sm:$0xff] }
 0x23f   :  { %v11723_v26 = vcombine.high %v284_v18, %v288_v20 }
 0x241   :  { %5344 = vmatpush1.bf16.msra.mxu0 %v11664_v28  ;;  %5590 = vmatpush1.bf16.msra.mxu1 %v11666_v29  ;;  %v295_v28 = vld [vmem:[#allocation2 + $0x4f0] sm:$0xff]  ;;  %v292_v29 = vld [vmem:[#allocation2 + $0x4d8] sm:$0xff] }
 0x242   :  { %5345 = vmatprep.subr.bf16.mxu0 %v11673_v30  ;;  %5591 = vmatprep.subr.bf16.mxu1 %v11675_v31  ;;  %v296_v30 = vld [vmem:[#allocation2 + $0x4f8] sm:$0xff]  ;;  %v11720_v31 = vcombine.low %v283_v17, %v287_v57  ;;  %v11729_v32 = vcombine.high %v291_v27, %v295_v28  ;;  %v339_v57 = vld [vmem:[#allocation2 + $0x650] sm:$0xff] }
 0x243   :  { %v11731_v33 = vcombine.high %v292_v29, %v296_v30 }
 0x245   :  { %5346 = vmatpush1.bf16.msra.mxu0 %v11672_v36  ;;  %5592 = vmatpush1.bf16.msra.mxu1 %v11674_v37  ;;  %v300_v36 = vld [vmem:[#allocation2 + $0x518] sm:$0xff] }
 0x246   :  { %5347 = vmatprep.subr.bf16.mxu0 %v11681_v40  ;;  %5593 = vmatprep.subr.bf16.mxu1 %v11683_v41  ;;  %v304_v37 = vld [vmem:[#allocation2 + $0x538] sm:$0xff]  ;;  %v11728_v40 = vcombine.low %v291_v27, %v295_v28  ;;  %v11730_v41 = vcombine.low %v292_v29, %v296_v30  ;;  %v347_v28 = vld [vmem:[#allocation2 + $0x690] sm:$0xff] }
 0x247   :  { %v351_v29 = vld [vmem:[#allocation2 + $0x6b0] sm:$0xff]  ;;  %v348_v30 = vld [vmem:[#allocation2 + $0x698] sm:$0xff] }
 0x249   :  { %5348 = vmatpush1.bf16.msra.mxu0 %v11680_v48  ;;  %5594 = vmatpush1.bf16.msra.mxu1 %v11682_v24  ;;  %v312_v48 = vld [vmem:[#allocation2 + $0x578] sm:$0xff]  ;;  %v11736_v24 = vcombine.low %v299_v15, %v303_v35  ;;  %v355_v35 = vld [vmem:[#allocation2 + $0x6d0] sm:$0xff] }
 0x24a   :  { %5349 = vmatprep.subr.bf16.mxu0 %v11689_v49  ;;  %5595 = vmatprep.subr.bf16.mxu1 %v11691_v50  ;;  %v11738_v49 = vcombine.low %v300_v36, %v304_v37  ;;  %v11745_v50 = vcombine.high %v307_v43, %v311_v44  ;;  %v11747_v51 = vcombine.high %v308_v45, %v312_v48 }
 0x24d   :  { %5350 = vmatpush1.bf16.msra.mxu0 %v11688_v58  ;;  %5596 = vmatpush1.bf16.msra.mxu1 %v11690_v60  ;;  %v320_v58 = vld [vmem:[#allocation2 + $0x5b8] sm:$0xff]  ;;  %v11744_v60 = vcombine.low %v307_v43, %v311_v44  ;;  %v363_v44 = vld [vmem:[#allocation2 + $0x710] sm:$0xff] }
 0x24e   :  { %5351 = vmatprep.subr.bf16.mxu0 %v11697_v19  ;;  %5597 = vmatprep.subr.bf16.mxu1 %v11699_v61  ;;  %v11746_v19 = vcombine.low %v308_v45, %v312_v48  ;;  %v11753_v61 = vcombine.high %v315_v52, %v319_v54  ;;  %v11755_v62 = vcombine.high %v316_v56, %v320_v58  ;;  %v367_v45 = vld [vmem:[#allocation2 + $0x730] sm:$0xff]  ;;  %v364_v48 = vld [vmem:[#allocation2 + $0x718] sm:$0xff] }
 0x251   :  { %5352 = vmatpush1.bf16.msra.mxu0 %v11696_v2  ;;  %5598 = vmatpush1.bf16.msra.mxu1 %v11698_v3  ;;  %v328_v2 = vld [vmem:[#allocation2 + $0x5f8] sm:$0xff]  ;;  %v11752_v3 = vcombine.low %v315_v52, %v319_v54  ;;  %v371_v54 = vld [vmem:[#allocation2 + $0x750] sm:$0xff] }
 0x252   :  { %5362 = vmatprep.subr.bf16.mxu0 %v11705_v4  ;;  %5608 = vmatprep.subr.bf16.mxu1 %v11707_v5  ;;  %v11754_v4 = vcombine.low %v316_v56, %v320_v58  ;;  %v11761_v5 = vcombine.high %v323_v63, %v327_v0  ;;  %v11763_v6 = vcombine.high %v324_v1, %v328_v2  ;;  %v375_v56 = vld [vmem:[#allocation2 + $0x770] sm:$0xff]  ;;  %v372_v58 = vld [vmem:[#allocation2 + $0x758] sm:$0xff] }
 0x254   :  { %5354 = vmatmul.mubr.bf16.vlgmr.msra.gmra.mrb[4].mxu0 %v14067_v12  ;;  %5600 = vmatmul.mubr.bf16.vlgmr.msra.gmra.mrb[4].mxu1 %v14067_v12  ;;  %v11722_v12 = vcombine.low %v284_v18, %v288_v20  ;;  %v343_v18 = vld [vmem:[#allocation2 + $0x670] sm:$0xff]  ;;  %v340_v20 = vld [vmem:[#allocation2 + $0x658] sm:$0xff] }
 0x255   :  { %5363 = vmatpush1.bf16.msra.mxu0 %v11704_v10  ;;  %5609 = vmatpush1.bf16.msra.mxu1 %v11706_v11  ;;  %v336_v10 = vld [vmem:[#allocation2 + $0x638] sm:$0xff]  ;;  %v11760_v11 = vcombine.low %v323_v63, %v327_v0  ;;  %v379_v0 = vld [vmem:[#allocation2 + $0x790] sm:$0xff] }
 0x256   :  { %5364 = vmatprep.subr.bf16.mxu0 %v11713_v13  ;;  %5610 = vmatprep.subr.bf16.mxu1 %v11715_v14  ;;  %v11762_v13 = vcombine.low %v324_v1, %v328_v2  ;;  %v11769_v14 = vcombine.high %v331_v7, %v335_v8  ;;  %v11771_v17 = vcombine.high %v332_v9, %v336_v10  ;;  %v383_v1 = vld [vmem:[#allocation2 + $0x7b0] sm:$0xff]  ;;  %v380_v2 = vld [vmem:[#allocation2 + $0x798] sm:$0xff] }
 0x257   :  { %5394 = vmatprep.mubr.bf16.mxu0 %v14076_v23  ;;  %5640 = vmatprep.mubr.bf16.mxu1 %v14076_v23  ;;  %v11739_v23 = vcombine.high %v300_v36, %v304_v37  ;;  %v359_v36 = vld [vmem:[#allocation2 + $0x6f0] sm:$0xff]  ;;  %v356_v37 = vld [vmem:[#allocation2 + $0x6d8] sm:$0xff] }
 0x259   :  { %5365 = vmatpush1.bf16.msra.mxu0 %v11712_v21  ;;  %5611 = vmatpush1.bf16.msra.mxu1 %v11714_v22  ;;  %v344_v21 = vld [vmem:[#allocation2 + $0x678] sm:$0xff]  ;;  %v11768_v22 = vcombine.low %v331_v7, %v335_v8  ;;  %v387_v8 = vld [vmem:[#allocation2 + $0x7d0] sm:$0xff] }
 0x25a   :  { %5366 = vmatprep.subr.bf16.mxu0 %v11721_v53  ;;  %5612 = vmatprep.subr.bf16.mxu1 %v11723_v26  ;;  %v11770_v53 = vcombine.low %v332_v9, %v336_v10  ;;  %v11777_v26 = vcombine.high %v339_v57, %v343_v18  ;;  %v11779_v27 = vcombine.high %v340_v20, %v344_v21  ;;  %v391_v9 = vld [vmem:[#allocation2 + $0x7f0] sm:$0xff]  ;;  %v388_v10 = vld [vmem:[#allocation2 + $0x7d8] sm:$0xff] }
 0x25d   :  { %5367 = vmatpush1.bf16.msra.mxu0 %v11720_v31  ;;  %5613 = vmatpush1.bf16.msra.mxu1 %v11722_v12  ;;  %v352_v31 = vld [vmem:[#allocation2 + $0x6b8] sm:$0xff]  ;;  %v11776_v12 = vcombine.low %v339_v57, %v343_v18  ;;  %v395_v18 = vld [vmem:[#allocation2 + $0x810] sm:$0xff] }
 0x25e   :  { %5368 = vmatprep.subr.bf16.mxu0 %v11729_v32  ;;  %5614 = vmatprep.subr.bf16.mxu1 %v11731_v33  ;;  %v11778_v32 = vcombine.low %v340_v20, %v344_v21  ;;  %v11785_v33 = vcombine.high %v347_v28, %v351_v29  ;;  %v11787_v15 = vcombine.high %v348_v30, %v352_v31  ;;  %v399_v20 = vld [vmem:[#allocation2 + $0x830] sm:$0xff]  ;;  %v396_v21 = vld [vmem:[#allocation2 + $0x818] sm:$0xff] }
 0x261   :  { %5369 = vmatpush1.bf16.msra.mxu0 %v11728_v40  ;;  %5615 = vmatpush1.bf16.msra.mxu1 %v11730_v41  ;;  %v360_v40 = vld [vmem:[#allocation2 + $0x6f8] sm:$0xff]  ;;  %v11784_v41 = vcombine.low %v347_v28, %v351_v29  ;;  %v403_v29 = vld [vmem:[#allocation2 + $0x850] sm:$0xff] }
 0x262   :  { %5370 = vmatprep.subr.bf16.mxu0 %v11737_v42  ;;  %5616 = vmatprep.subr.bf16.mxu1 %v11739_v23  ;;  %v11786_v42 = vcombine.low %v348_v30, %v352_v31  ;;  %v11793_v23 = vcombine.high %v355_v35, %v359_v36  ;;  %v11795_v43 = vcombine.high %v356_v37, %v360_v40  ;;  %v407_v30 = vld [vmem:[#allocation2 + $0x870] sm:$0xff]  ;;  %v404_v31 = vld [vmem:[#allocation2 + $0x858] sm:$0xff] }
 0x265   :  { %5371 = vmatpush1.bf16.msra.mxu0 %v11736_v24  ;;  %5617 = vmatpush1.bf16.msra.mxu1 %v11738_v49  ;;  %v368_v24 = vld [vmem:[#allocation2 + $0x738] sm:$0xff]  ;;  %v11792_v49 = vcombine.low %v355_v35, %v359_v36  ;;  %v411_v36 = vld [vmem:[#allocation2 + $0x890] sm:$0xff] }
 0x266   :  { %5372 = vmatprep.subr.bf16.mxu0 %v11745_v50  ;;  %5618 = vmatprep.subr.bf16.mxu1 %v11747_v51  ;;  %v11794_v50 = vcombine.low %v356_v37, %v360_v40  ;;  %v11801_v51 = vcombine.high %v363_v44, %v367_v45  ;;  %v11803_v52 = vcombine.high %v364_v48, %v368_v24  ;;  %v415_v37 = vld [vmem:[#allocation2 + $0x8b0] sm:$0xff]  ;;  %v412_v40 = vld [vmem:[#allocation2 + $0x898] sm:$0xff] }
 0x269   :  { %5373 = vmatpush1.bf16.msra.mxu0 %v11744_v60  ;;  %5619 = vmatpush1.bf16.msra.mxu1 %v11746_v19  ;;  %v376_v60 = vld [vmem:[#allocation2 + $0x778] sm:$0xff]  ;;  %v11800_v19 = vcombine.low %v363_v44, %v367_v45  ;;  %v419_v45 = vld [vmem:[#allocation2 + $0x8d0] sm:$0xff] }
 0x26a   :  { %5374 = vmatprep.subr.bf16.mxu0 %v11753_v61  ;;  %5620 = vmatprep.subr.bf16.mxu1 %v11755_v62  ;;  %v11802_v61 = vcombine.low %v364_v48, %v368_v24  ;;  %v11809_v62 = vcombine.high %v371_v54, %v375_v56  ;;  %v11811_v63 = vcombine.high %v372_v58, %v376_v60  ;;  %v423_v48 = vld [vmem:[#allocation2 + $0x8f0] sm:$0xff]  ;;  %v420_v24 = vld [vmem:[#allocation2 + $0x8d8] sm:$0xff] }
 0x26d   :  { %5375 = vmatpush1.bf16.msra.mxu0 %v11752_v3  ;;  %5621 = vmatpush1.bf16.msra.mxu1 %v11754_v4  ;;  %v384_v3 = vld [vmem:[#allocation2 + $0x7b8] sm:$0xff]  ;;  %v11808_v4 = vcombine.low %v371_v54, %v375_v56  ;;  %v427_v54 = vld [vmem:[#allocation2 + $0x910] sm:$0xff] }
 0x26e   :  { %5376 = vmatprep.subr.bf16.mxu0 %v11761_v5  ;;  %5622 = vmatprep.subr.bf16.mxu1 %v11763_v6  ;;  %v11810_v5 = vcombine.low %v372_v58, %v376_v60  ;;  %v11817_v6 = vcombine.high %v379_v0, %v383_v1  ;;  %v11819_v7 = vcombine.high %v380_v2, %v384_v3  ;;  %v431_v56 = vld [vmem:[#allocation2 + $0x930] sm:$0xff]  ;;  %v428_v58 = vld [vmem:[#allocation2 + $0x918] sm:$0xff] }
 0x26f   :  { %v432_v60 = vld [vmem:[#allocation2 + $0x938] sm:$0xff] }
 0x271   :  { %5377 = vmatpush1.bf16.msra.mxu0 %v11760_v11  ;;  %5623 = vmatpush1.bf16.msra.mxu1 %v11762_v13  ;;  %v392_v11 = vld [vmem:[#allocation2 + $0x7f8] sm:$0xff]  ;;  %v11816_v13 = vcombine.low %v379_v0, %v383_v1  ;;  %v439_v0 = vld [vmem:[#allocation2 + $0x970] sm:$0xff] }
 0x272   :  { %5378 = vmatprep.subr.bf16.mxu0 %v11769_v14  ;;  %5624 = vmatprep.subr.bf16.mxu1 %v11771_v17  ;;  %v11818_v14 = vcombine.low %v380_v2, %v384_v3  ;;  %v11825_v17 = vcombine.high %v387_v8, %v391_v9  ;;  %v11827_v57 = vcombine.high %v388_v10, %v392_v11  ;;  %v436_v1 = vld [vmem:[#allocation2 + $0x958] sm:$0xff] }
 0x273   :  { %v440_v2 = vld [vmem:[#allocation2 + $0x978] sm:$0xff]  ;;  %v11864_v3 = vcombine.low %v427_v54, %v431_v56 }
 0x275   :  { %5379 = vmatpush1.bf16.msra.mxu0 %v11768_v22  ;;  %5625 = vmatpush1.bf16.msra.mxu1 %v11770_v53  ;;  %v400_v22 = vld [vmem:[#allocation2 + $0x838] sm:$0xff]  ;;  %v11824_v53 = vcombine.low %v387_v8, %v391_v9  ;;  %v447_v8 = vld [vmem:[#allocation2 + $0x9b0] sm:$0xff] }
 0x276   :  { %5380 = vmatprep.subr.bf16.mxu0 %v11777_v26  ;;  %5626 = vmatprep.subr.bf16.mxu1 %v11779_v27  ;;  %v11826_v26 = vcombine.low %v388_v10, %v392_v11  ;;  %v11833_v27 = vcombine.high %v395_v18, %v399_v20  ;;  %v11835_v28 = vcombine.high %v396_v21, %v400_v22  ;;  %v444_v9 = vld [vmem:[#allocation2 + $0x998] sm:$0xff] }
 0x277   :  { %v448_v10 = vld [vmem:[#allocation2 + $0x9b8] sm:$0xff] }
 0x279   :  { %5381 = vmatpush1.bf16.msra.mxu0 %v11776_v12  ;;  %5627 = vmatpush1.bf16.msra.mxu1 %v11778_v32  ;;  %v408_v12 = vld [vmem:[#allocation2 + $0x878] sm:$0xff]  ;;  %v11832_v32 = vcombine.low %v395_v18, %v399_v20  ;;  %v455_v18 = vld [vmem:[#allocation2 + $0x9f0] sm:$0xff] }
 0x27a   :  { %5382 = vmatprep.subr.bf16.mxu0 %v11785_v33  ;;  %5628 = vmatprep.subr.bf16.mxu1 %v11787_v15  ;;  %v11834_v33 = vcombine.low %v396_v21, %v400_v22  ;;  %v11841_v15 = vcombine.high %v403_v29, %v407_v30  ;;  %v11843_v35 = vcombine.high %v404_v31, %v408_v12  ;;  %v452_v20 = vld [vmem:[#allocation2 + $0x9d8] sm:$0xff] }
 0x27b   :  { %v456_v21 = vld [vmem:[#allocation2 + $0x9f8] sm:$0xff] }
 0x27d   :  { %5383 = vmatpush1.bf16.msra.mxu0 %v11784_v41  ;;  %5629 = vmatpush1.bf16.msra.mxu1 %v11786_v42  ;;  %v416_v41 = vld [vmem:[#allocation2 + $0x8b8] sm:$0xff]  ;;  %v11840_v42 = vcombine.low %v403_v29, %v407_v30  ;;  %v463_v29 = vld [vmem:[#allocation2 + $0xa30] sm:$0xff] }
 0x27e   :  { %5384 = vmatprep.subr.bf16.mxu0 %v11793_v23  ;;  %5630 = vmatprep.subr.bf16.mxu1 %v11795_v43  ;;  %v11842_v23 = vcombine.low %v404_v31, %v408_v12  ;;  %v11849_v43 = vcombine.high %v411_v36, %v415_v37  ;;  %v11851_v44 = vcombine.high %v412_v40, %v416_v41  ;;  %v460_v30 = vld [vmem:[#allocation2 + $0xa18] sm:$0xff] }
 0x27f   :  { %v464_v31 = vld [vmem:[#allocation2 + $0xa38] sm:$0xff] }
 0x281   :  { %5385 = vmatpush1.bf16.msra.mxu0 %v11792_v49  ;;  %5631 = vmatpush1.bf16.msra.mxu1 %v11794_v50  ;;  %v424_v49 = vld [vmem:[#allocation2 + $0x8f8] sm:$0xff]  ;;  %v11848_v50 = vcombine.low %v411_v36, %v415_v37  ;;  %v471_v36 = vld [vmem:[#allocation2 + $0xa70] sm:$0xff] }
 0x282   :  { %5386 = vmatprep.subr.bf16.mxu0 %v11801_v51  ;;  %5632 = vmatprep.subr.bf16.mxu1 %v11803_v52  ;;  %v11857_v51 = vcombine.high %v419_v45, %v423_v48  ;;  %v11859_v52 = vcombine.high %v420_v24, %v424_v49  ;;  %v468_v37 = vld [vmem:[#allocation2 + $0xa58] sm:$0xff] }
 0x285   :  { %5387 = vmatpush1.bf16.msra.mxu0 %v11800_v19  ;;  %5633 = vmatpush1.bf16.msra.mxu1 %v11802_v61  ;;  %v11856_v19 = vcombine.low %v419_v45, %v423_v48  ;;  %v11858_v61 = vcombine.low %v420_v24, %v424_v49  ;;  %v479_v45 = vld [vmem:[#allocation2 + $0xab0] sm:$0xff]  ;;  %v476_v48 = vld [vmem:[#allocation2 + $0xa98] sm:$0xff] }
 0x286   :  { %5388 = vmatprep.subr.bf16.mxu0 %v11809_v62  ;;  %5634 = vmatprep.subr.bf16.mxu1 %v11811_v63  ;;  %v11865_v62 = vcombine.high %v427_v54, %v431_v56  ;;  %v435_v63 = vld [vmem:[#allocation2 + $0x950] sm:$0xff]  ;;  %v480_v24 = vld [vmem:[#allocation2 + $0xab8] sm:$0xff] }
 0x287   :  { %v11872_v11 = vcombine.low %v435_v63, %v439_v0  ;;  %v487_v54 = vld [vmem:[#allocation2 + $0xaf0] sm:$0xff]  ;;  %v484_v56 = vld [vmem:[#allocation2 + $0xad8] sm:$0xff] }
 0x289   :  { %5389 = vmatpush1.bf16.msra.mxu0 %v11808_v4  ;;  %5635 = vmatpush1.bf16.msra.mxu1 %v11810_v5  ;;  %v11866_v4 = vcombine.low %v428_v58, %v432_v60  ;;  %v11873_v5 = vcombine.high %v435_v63, %v439_v0  ;;  %v495_v63 = vld [vmem:[#allocation2 + $0xb30] sm:$0xff]  ;;  %v492_v0 = vld [vmem:[#allocation2 + $0xb18] sm:$0xff] }
 0x28a   :  { %5390 = vmatprep.subr.bf16.mxu0 %v11817_v6  ;;  %5636 = vmatprep.subr.bf16.mxu1 %v11819_v7  ;;  %v11875_v6 = vcombine.high %v436_v1, %v440_v2  ;;  %v443_v7 = vld [vmem:[#allocation2 + $0x990] sm:$0xff] }
 0x28b   :  { %v11880_v22 = vcombine.low %v443_v7, %v447_v8 }
 0x28d   :  { %5391 = vmatpush1.bf16.msra.mxu0 %v11816_v13  ;;  %5637 = vmatpush1.bf16.msra.mxu1 %v11818_v14  ;;  %v11874_v13 = vcombine.low %v436_v1, %v440_v2  ;;  %v11881_v14 = vcombine.high %v443_v7, %v447_v8  ;;  %v496_v1 = vld [vmem:[#allocation2 + $0xb38] sm:$0xff]  ;;  %v503_v7 = vld [vmem:[#allocation2 + $0xb70] sm:$0xff] }
 0x28e   :  { %5392 = vmatprep.subr.bf16.mxu0 %v11825_v17  ;;  %5638 = vmatprep.subr.bf16.mxu1 %v11827_v57  ;;  %v11883_v17 = vcombine.high %v444_v9, %v448_v10  ;;  %v451_v57 = vld [vmem:[#allocation2 + $0x9d0] sm:$0xff]  ;;  %v500_v8 = vld [vmem:[#allocation2 + $0xb58] sm:$0xff] }
 0x28f   :  { %v11888_v12 = vcombine.low %v451_v57, %v455_v18 }
 0x291   :  { %5393 = vmatpush1.bf16.msra.mxu0 %v11824_v53  ;;  %5639 = vmatpush1.bf16.msra.mxu1 %v11826_v26  ;;  %v11882_v53 = vcombine.low %v444_v9, %v448_v10  ;;  %v11889_v26 = vcombine.high %v451_v57, %v455_v18  ;;  %v504_v9 = vld [vmem:[#allocation2 + $0xb78] sm:$0xff]  ;;  %v511_v57 = vld [vmem:[#allocation2 + $0xbb0] sm:$0xff] }
 0x292   :  { %5403 = vmatprep.subr.bf16.mxu0 %v11833_v27  ;;  %5649 = vmatprep.subr.bf16.mxu1 %v11835_v28  ;;  %v11891_v27 = vcombine.high %v452_v20, %v456_v21  ;;  %v459_v28 = vld [vmem:[#allocation2 + $0xa10] sm:$0xff]  ;;  %v508_v18 = vld [vmem:[#allocation2 + $0xb98] sm:$0xff] }
 0x294   :  { %5395 = vmatmul.mubr.bf16.vlgmr.msra.gmra.mrb[4].mxu0 %v14089_v25  ;;  %5641 = vmatmul.mubr.bf16.vlgmr.msra.gmra.mrb[4].mxu1 %v14089_v25  ;;  %v11850_v25 = vcombine.low %v412_v40, %v416_v41  ;;  %v472_v40 = vld [vmem:[#allocation2 + $0xa78] sm:$0xff]  ;;  %v11896_v41 = vcombine.low %v459_v28, %v463_v29 }
 0x295   :  { %5404 = vmatpush1.bf16.msra.mxu0 %v11832_v32  ;;  %5650 = vmatpush1.bf16.msra.mxu1 %v11834_v33  ;;  %v11890_v32 = vcombine.low %v452_v20, %v456_v21  ;;  %v11897_v33 = vcombine.high %v459_v28, %v463_v29  ;;  %v512_v20 = vld [vmem:[#allocation2 + $0xbb8] sm:$0xff]  ;;  %v519_v28 = vld [vmem:[#allocation2 + $0xbf0] sm:$0xff] }
 0x296   :  { %5405 = vmatprep.subr.bf16.mxu0 %v11841_v15  ;;  %5651 = vmatprep.subr.bf16.mxu1 %v11843_v35  ;;  %v11899_v15 = vcombine.high %v460_v30, %v464_v31  ;;  %v467_v35 = vld [vmem:[#allocation2 + $0xa50] sm:$0xff]  ;;  %v516_v29 = vld [vmem:[#allocation2 + $0xbd8] sm:$0xff] }
 0x297   :  { %5435 = vmatprep.mubr.bf16.mxu0 %v14093_v34  ;;  %5681 = vmatprep.mubr.bf16.mxu1 %v14093_v34  ;;  %v11867_v34 = vcombine.high %v428_v58, %v432_v60  ;;  %v11904_v49 = vcombine.low %v467_v35, %v471_v36  ;;  %v488_v58 = vld [vmem:[#allocation2 + $0xaf8] sm:$0xff] }
 0x299   :  { %5406 = vmatpush1.bf16.msra.mxu0 %v11840_v42  ;;  %5652 = vmatpush1.bf16.msra.mxu1 %v11842_v23  ;;  %v11898_v42 = vcombine.low %v460_v30, %v464_v31  ;;  %v11905_v23 = vcombine.high %v467_v35, %v471_v36  ;;  %v520_v30 = vld [vmem:[#allocation2 + $0xbf8] sm:$0xff]  ;;  %v527_v35 = vld [vmem:[#allocation2 + $0xc30] sm:$0xff] }
 0x29a   :  { %5407 = vmatprep.subr.bf16.mxu0 %v11849_v43  ;;  %5653 = vmatprep.subr.bf16.mxu1 %v11851_v44  ;;  %v11907_v43 = vcombine.high %v468_v37, %v472_v40  ;;  %v475_v44 = vld [vmem:[#allocation2 + $0xa90] sm:$0xff]  ;;  %v524_v36 = vld [vmem:[#allocation2 + $0xc18] sm:$0xff] }
 0x29b   :  { %v11912_v60 = vcombine.low %v475_v44, %v479_v45 }
 0x29d   :  { %5408 = vmatpush1.bf16.msra.mxu0 %v11848_v50  ;;  %5654 = vmatpush1.bf16.msra.mxu1 %v11850_v25  ;;  %v11906_v50 = vcombine.low %v468_v37, %v472_v40  ;;  %v11913_v25 = vcombine.high %v475_v44, %v479_v45  ;;  %v528_v37 = vld [vmem:[#allocation2 + $0xc38] sm:$0xff]  ;;  %v535_v44 = vld [vmem:[#allocation2 + $0xc70] sm:$0xff] }
 0x29e   :  { %5409 = vmatprep.subr.bf16.mxu0 %v11857_v51  ;;  %5655 = vmatprep.subr.bf16.mxu1 %v11859_v52  ;;  %v11915_v51 = vcombine.high %v476_v48, %v480_v24  ;;  %v483_v52 = vld [vmem:[#allocation2 + $0xad0] sm:$0xff]  ;;  %v532_v45 = vld [vmem:[#allocation2 + $0xc58] sm:$0xff] }
 0x29f   :  { %v11920_v2 = vcombine.low %v483_v52, %v487_v54 }
 0x2a1   :  { %5410 = vmatpush1.bf16.msra.mxu0 %v11856_v19  ;;  %5656 = vmatpush1.bf16.msra.mxu1 %v11858_v61  ;;  %v11914_v19 = vcombine.low %v476_v48, %v480_v24  ;;  %v11921_v61 = vcombine.high %v483_v52, %v487_v54  ;;  %v536_v48 = vld [vmem:[#allocation2 + $0xc78] sm:$0xff]  ;;  %v543_v52 = vld [vmem:[#allocation2 + $0xcb0] sm:$0xff] }
 0x2a2   :  { %5411 = vmatprep.subr.bf16.mxu0 %v11865_v62  ;;  %5657 = vmatprep.subr.bf16.mxu1 %v11867_v34  ;;  %v11923_v62 = vcombine.high %v484_v56, %v488_v58  ;;  %v491_v34 = vld [vmem:[#allocation2 + $0xb10] sm:$0xff]  ;;  %v540_v54 = vld [vmem:[#allocation2 + $0xc98] sm:$0xff] }
 0x2a3   :  { %v11928_v10 = vcombine.low %v491_v34, %v495_v63 }
 0x2a5   :  { %5412 = vmatpush1.bf16.msra.mxu0 %v11864_v3  ;;  %5658 = vmatpush1.bf16.msra.mxu1 %v11866_v4  ;;  %v11922_v3 = vcombine.low %v484_v56, %v488_v58  ;;  %v11929_v4 = vcombine.high %v491_v34, %v495_v63  ;;  %v544_v56 = vld [vmem:[#allocation2 + $0xcb8] sm:$0xff]  ;;  %v551_v34 = vld [vmem:[#allocation2 + $0xcf0] sm:$0xff] }
 0x2a6   :  { %5413 = vmatprep.subr.bf16.mxu0 %v11873_v5  ;;  %5659 = vmatprep.subr.bf16.mxu1 %v11875_v6  ;;  %v11931_v5 = vcombine.high %v492_v0, %v496_v1  ;;  %v499_v6 = vld [vmem:[#allocation2 + $0xb50] sm:$0xff]  ;;  %v548_v63 = vld [vmem:[#allocation2 + $0xcd8] sm:$0xff] }
 0x2a7   :  { %v11936_v21 = vcombine.low %v499_v6, %v503_v7 }
 0x2a9   :  { %5414 = vmatpush1.bf16.msra.mxu0 %v11872_v11  ;;  %5660 = vmatpush1.bf16.msra.mxu1 %v11874_v13  ;;  %v11930_v11 = vcombine.low %v492_v0, %v496_v1  ;;  %v11937_v13 = vcombine.high %v499_v6, %v503_v7  ;;  %v552_v0 = vld [vmem:[#allocation2 + $0xcf8] sm:$0xff] }
 0x2aa   :  { %5415 = vmatprep.subr.bf16.mxu0 %v11881_v14  ;;  %5661 = vmatprep.subr.bf16.mxu1 %v11883_v17  ;;  %v11939_v14 = vcombine.high %v500_v8, %v504_v9  ;;  %v507_v17 = vld [vmem:[#allocation2 + $0xb90] sm:$0xff]  ;;  %v556_v6 = vld [vmem:[#allocation2 + $0xd18] sm:$0xff] }
 0x2ab   :  { %v11944_v31 = vcombine.low %v507_v17, %v511_v57  ;;  %v560_v7 = vld [vmem:[#allocation2 + $0xd38] sm:$0xff] }
 0x2ad   :  { %5416 = vmatpush1.bf16.msra.mxu0 %v11880_v22  ;;  %5662 = vmatpush1.bf16.msra.mxu1 %v11882_v53  ;;  %v11938_v22 = vcombine.low %v500_v8, %v504_v9  ;;  %v11945_v53 = vcombine.high %v507_v17, %v511_v57  ;;  %v11986_v9 = vcombine.low %v548_v63, %v552_v0  ;;  %v568_v17 = vld [vmem:[#allocation2 + $0xd78] sm:$0xff] }
 0x2ae   :  { %5417 = vmatprep.subr.bf16.mxu0 %v11889_v26  ;;  %5663 = vmatprep.subr.bf16.mxu1 %v11891_v27  ;;  %v11947_v26 = vcombine.high %v508_v18, %v512_v20  ;;  %v515_v27 = vld [vmem:[#allocation2 + $0xbd0] sm:$0xff] }
 0x2af   :  { %v11952_v40 = vcombine.low %v515_v27, %v519_v28 }
 0x2b1   :  { %5418 = vmatpush1.bf16.msra.mxu0 %v11888_v12  ;;  %5664 = vmatpush1.bf16.msra.mxu1 %v11890_v32  ;;  %v11946_v12 = vcombine.low %v508_v18, %v512_v20  ;;  %v11953_v32 = vcombine.high %v515_v27, %v519_v28  ;;  %v11994_v18 = vcombine.low %v556_v6, %v560_v7  ;;  %v576_v27 = vld [vmem:[#allocation2 + $0xdb8] sm:$0xff] }
 0x2b2   :  { %5419 = vmatprep.subr.bf16.mxu0 %v11897_v33  ;;  %5665 = vmatprep.subr.bf16.mxu1 %v11899_v15  ;;  %v11955_v33 = vcombine.high %v516_v29, %v520_v30  ;;  %v523_v15 = vld [vmem:[#allocation2 + $0xc10] sm:$0xff] }
 0x2b3   :  { %v11960_v24 = vcombine.low %v523_v15, %v527_v35 }
 0x2b5   :  { %5420 = vmatpush1.bf16.msra.mxu0 %v11896_v41  ;;  %5666 = vmatpush1.bf16.msra.mxu1 %v11898_v42  ;;  %v11954_v41 = vcombine.low %v516_v29, %v520_v30  ;;  %v11961_v42 = vcombine.high %v523_v15, %v527_v35 }
 0x2b6   :  { %5421 = vmatprep.subr.bf16.mxu0 %v11905_v23  ;;  %5667 = vmatprep.subr.bf16.mxu1 %v11907_v43  ;;  %v11963_v23 = vcombine.high %v524_v36, %v528_v37  ;;  %v531_v43 = vld [vmem:[#allocation2 + $0xc50] sm:$0xff] }
 0x2b7   :  { %v11968_v58 = vcombine.low %v531_v43, %v535_v44 }
 0x2b9   :  { %5422 = vmatpush1.bf16.msra.mxu0 %v11904_v49  ;;  %5668 = vmatpush1.bf16.msra.mxu1 %v11906_v50  ;;  %v11962_v49 = vcombine.low %v524_v36, %v528_v37  ;;  %v11969_v50 = vcombine.high %v531_v43, %v535_v44  ;;  %v580_v36 = vld [vmem:[#allocation2 + $0xdd8] sm:$0xff] }
 0x2ba   :  { %5423 = vmatprep.subr.bf16.mxu0 %v11913_v25  ;;  %5669 = vmatprep.subr.bf16.mxu1 %v11915_v51  ;;  %v11971_v25 = vcombine.high %v532_v45, %v536_v48  ;;  %v539_v51 = vld [vmem:[#allocation2 + $0xc90] sm:$0xff]  ;;  %v584_v37 = vld [vmem:[#allocation2 + $0xdf8] sm:$0xff] }
 0x2bb   :  { %v11976_v1 = vcombine.low %v539_v51, %v543_v52 }
 0x2bd   :  { %5424 = vmatpush1.bf16.msra.mxu0 %v11912_v60  ;;  %5670 = vmatpush1.bf16.msra.mxu1 %v11914_v19  ;;  %v11970_v60 = vcombine.low %v532_v45, %v536_v48  ;;  %v11977_v19 = vcombine.high %v539_v51, %v543_v52  ;;  %v592_v51 = vld [vmem:[#allocation2 + $0xe38] sm:$0xff] }
 0x2be   :  { %5425 = vmatprep.subr.bf16.mxu0 %v11921_v61  ;;  %5671 = vmatprep.subr.bf16.mxu1 %v11923_v62  ;;  %v11979_v61 = vcombine.high %v540_v54, %v544_v56  ;;  %v547_v62 = vld [vmem:[#allocation2 + $0xcd0] sm:$0xff] }
 0x2bf   :  { %v11984_v8 = vcombine.low %v547_v62, %v551_v34 }
 0x2c1   :  { %5426 = vmatpush1.bf16.msra.mxu0 %v11920_v2  ;;  %5672 = vmatpush1.bf16.msra.mxu1 %v11922_v3  ;;  %v11985_v2 = vcombine.high %v547_v62, %v551_v34  ;;  %v11987_v3 = vcombine.high %v548_v63, %v552_v0  ;;  %v600_v62 = vld [vmem:[#allocation2 + $0xe78] sm:$0xff] }
 0x2c2   :  { %5427 = vmatprep.subr.bf16.mxu0 %v11929_v4  ;;  %5673 = vmatprep.subr.bf16.mxu1 %v11931_v5  ;;  %v555_v4 = vld [vmem:[#allocation2 + $0xd10] sm:$0xff] }
 0x2c3   :  { %v559_v5 = vld [vmem:[#allocation2 + $0xd30] sm:$0xff] }
 0x2c4   :  { %v11992_v57 = vcombine.low %v555_v4, %v559_v5 }
 0x2c5   :  { %5428 = vmatpush1.bf16.msra.mxu0 %v11928_v10  ;;  %5674 = vmatpush1.bf16.msra.mxu1 %v11930_v11  ;;  %v11993_v10 = vcombine.high %v555_v4, %v559_v5  ;;  %v563_v11 = vld [vmem:[#allocation2 + $0xd50] sm:$0xff]  ;;  %v608_v4 = vld [vmem:[#allocation2 + $0xeb8] sm:$0xff] }
 0x2c6   :  { %5429 = vmatprep.subr.bf16.mxu0 %v11937_v13  ;;  %5675 = vmatprep.subr.bf16.mxu1 %v11939_v14  ;;  %v567_v13 = vld [vmem:[#allocation2 + $0xd70] sm:$0xff]  ;;  %v564_v14 = vld [vmem:[#allocation2 + $0xd58] sm:$0xff] }
 0x2c7   :  { %v12001_v20 = vcombine.high %v563_v11, %v567_v13  ;;  %v12000_v28 = vcombine.low %v563_v11, %v567_v13  ;;  %v12002_v29 = vcombine.low %v564_v14, %v568_v17  ;;  %v616_v11 = vld [vmem:[#allocation2 + $0xef8] sm:$0xff] }
 0x2c9   :  { %5430 = vmatpush1.bf16.msra.mxu0 %v11936_v21  ;;  %5676 = vmatpush1.bf16.msra.mxu1 %v11938_v22  ;;  %v12003_v21 = vcombine.high %v564_v14, %v568_v17  ;;  %v571_v22 = vld [vmem:[#allocation2 + $0xd90] sm:$0xff] }
 0x2ca   :  { %5431 = vmatprep.subr.bf16.mxu0 %v11945_v53  ;;  %5677 = vmatprep.subr.bf16.mxu1 %v11947_v26  ;;  %v575_v53 = vld [vmem:[#allocation2 + $0xdb0] sm:$0xff]  ;;  %v572_v26 = vld [vmem:[#allocation2 + $0xd98] sm:$0xff] }
 0x2cb   :  { %v12009_v30 = vcombine.high %v571_v22, %v575_v53  ;;  %v12010_v44 = vcombine.low %v572_v26, %v576_v27 }
 0x2cd   :  { %5432 = vmatpush1.bf16.msra.mxu0 %v11944_v31  ;;  %5678 = vmatpush1.bf16.msra.mxu1 %v11946_v12  ;;  %v12011_v12 = vcombine.high %v572_v26, %v576_v27 }
 0x2ce   :  { %5433 = vmatprep.subr.bf16.mxu0 %v11953_v32  ;;  %5679 = vmatprep.subr.bf16.mxu1 %v11955_v33  ;;  %v579_v32 = vld [vmem:[#allocation2 + $0xdd0] sm:$0xff] }
 0x2cf   :  { %v583_v33 = vld [vmem:[#allocation2 + $0xdf0] sm:$0xff] }
 0x2d0   :  { %v12017_v45 = vcombine.high %v579_v32, %v583_v33  ;;  %v12016_v52 = vcombine.low %v579_v32, %v583_v33  ;;  %v632_v32 = vld [vmem:[#allocation2 + $0xf78] sm:$0xff] }
 0x2d1   :  { %5434 = vmatpush1.bf16.msra.mxu0 %v11952_v40  ;;  %5680 = vmatpush1.bf16.msra.mxu1 %v11954_v41 }
 0x2d2   :  { %5444 = vmatprep.subr.bf16.mxu0 %v11961_v42  ;;  %5690 = vmatprep.subr.bf16.mxu1 %v11963_v23  ;;  %v12008_v42 = vcombine.low %v571_v22, %v575_v53  ;;  %v624_v22 = vld [vmem:[#allocation2 + $0xf38] sm:$0xff] }
 0x2d4   :  { %5436 = vmatmul.mubr.bf16.vlgmr.msra.gmra.mrb[4].mxu0 %v14106_v39  ;;  %5682 = vmatmul.mubr.bf16.vlgmr.msra.gmra.mrb[4].mxu1 %v14106_v39  ;;  %v11978_v39 = vcombine.low %v540_v54, %v544_v56  ;;  %v12018_v54 = vcombine.low %v580_v36, %v584_v37 }
 0x2d5   :  { %5445 = vmatpush1.bf16.msra.mxu0 %v11960_v24  ;;  %5691 = vmatpush1.bf16.msra.mxu1 %v11962_v49  ;;  %v12019_v24 = vcombine.high %v580_v36, %v584_v37  ;;  %v587_v49 = vld [vmem:[#allocation2 + $0xe10] sm:$0xff] }
 0x2d6   :  { %5446 = vmatprep.subr.bf16.mxu0 %v11969_v50  ;;  %5692 = vmatprep.subr.bf16.mxu1 %v11971_v25  ;;  %v591_v50 = vld [vmem:[#allocation2 + $0xe30] sm:$0xff]  ;;  %v588_v25 = vld [vmem:[#allocation2 + $0xe18] sm:$0xff] }
 0x2d7   :  { %5476 = vmatprep.mubr.bf16.mxu0 %v14110_v46  ;;  %5722 = vmatprep.mubr.bf16.mxu1 %v14110_v46  ;;  %v11995_v46 = vcombine.high %v556_v6, %v560_v7  ;;  %v12025_v56 = vcombine.high %v587_v49, %v591_v50  ;;  %v12024_v34 = vcombine.low %v587_v49, %v591_v50  ;;  %v643_v50 = vld [vmem:[#allocation2 + $0xfd0] sm:$0xff] }
 0x2d8   :  { %v12026_v63 = vcombine.low %v588_v25, %v592_v51 }
 0x2d9   :  { %5447 = vmatpush1.bf16.msra.mxu0 %v11968_v58  ;;  %5693 = vmatpush1.bf16.msra.mxu1 %v11970_v60  ;;  %v12027_v58 = vcombine.high %v588_v25, %v592_v51  ;;  %v595_v60 = vld [vmem:[#allocation2 + $0xe50] sm:$0xff]  ;;  %v644_v51 = vld [vmem:[#allocation2 + $0xfd8] sm:$0xff] }
 0x2da   :  { %5448 = vmatprep.subr.bf16.mxu0 %v11977_v19  ;;  %5694 = vmatprep.subr.bf16.mxu1 %v11979_v61  ;;  %v599_v19 = vld [vmem:[#allocation2 + $0xe70] sm:$0xff]  ;;  %v596_v61 = vld [vmem:[#allocation2 + $0xe58] sm:$0xff] }
 0x2db   :  { %v12033_v0 = vcombine.high %v595_v60, %v599_v19  ;;  %v12032_v5 = vcombine.low %v595_v60, %v599_v19  ;;  %v12034_v6 = vcombine.low %v596_v61, %v600_v62  ;;  %v647_v25 = vld [vmem:[#allocation2 + $0xff0] sm:$0xff] }
 0x2dc   :  { %v651_v19 = vld [vmem:[#allocation2 + $0x1010] sm:$0xff] }
 0x2dd   :  { %5449 = vmatpush1.bf16.msra.mxu0 %v11976_v1  ;;  %5695 = vmatpush1.bf16.msra.mxu1 %v11978_v39  ;;  %v12035_v1 = vcombine.high %v596_v61, %v600_v62  ;;  %v603_v39 = vld [vmem:[#allocation2 + $0xe90] sm:$0xff]  ;;  %v652_v62 = vld [vmem:[#allocation2 + $0x1018] sm:$0xff] }
 0x2de   :  { %5450 = vmatprep.subr.bf16.mxu0 %v11985_v2  ;;  %5696 = vmatprep.subr.bf16.mxu1 %v11987_v3  ;;  %v607_v2 = vld [vmem:[#allocation2 + $0xeb0] sm:$0xff]  ;;  %v604_v3 = vld [vmem:[#allocation2 + $0xe98] sm:$0xff] }
 0x2df   :  { %v12041_v7 = vcombine.high %v603_v39, %v607_v2  ;;  %v12040_v13 = vcombine.low %v603_v39, %v607_v2  ;;  %v12042_v14 = vcombine.low %v604_v3, %v608_v4  ;;  %v655_v61 = vld [vmem:[#allocation2 + $0x1030] sm:$0xff] }
 0x2e0   :  { %v659_v2 = vld [vmem:[#allocation2 + $0x1050] sm:$0xff] }
 0x2e1   :  { %5451 = vmatpush1.bf16.msra.mxu0 %v11984_v8  ;;  %5697 = vmatpush1.bf16.msra.mxu1 %v11986_v9  ;;  %v12043_v8 = vcombine.high %v604_v3, %v608_v4  ;;  %v611_v9 = vld [vmem:[#allocation2 + $0xed0] sm:$0xff]  ;;  %v660_v4 = vld [vmem:[#allocation2 + $0x1058] sm:$0xff] }
 0x2e2   :  { %5452 = vmatprep.subr.bf16.mxu0 %v11993_v10  ;;  %5698 = vmatprep.subr.bf16.mxu1 %v11995_v46  ;;  %v615_v10 = vld [vmem:[#allocation2 + $0xef0] sm:$0xff]  ;;  %v612_v46 = vld [vmem:[#allocation2 + $0xed8] sm:$0xff] }
 0x2e3   :  { %v12049_v17 = vcombine.high %v611_v9, %v615_v10  ;;  %v12048_v53 = vcombine.low %v611_v9, %v615_v10  ;;  %v12050_v26 = vcombine.low %v612_v46, %v616_v11  ;;  %v663_v3 = vld [vmem:[#allocation2 + $0x1070] sm:$0xff] }
 0x2e4   :  { %v667_v10 = vld [vmem:[#allocation2 + $0x1090] sm:$0xff] }
 0x2e5   :  { %5453 = vmatpush1.bf16.msra.mxu0 %v11992_v57  ;;  %5699 = vmatpush1.bf16.msra.mxu1 %v11994_v18  ;;  %v12051_v57 = vcombine.high %v612_v46, %v616_v11  ;;  %v619_v18 = vld [vmem:[#allocation2 + $0xf10] sm:$0xff]  ;;  %v668_v11 = vld [vmem:[#allocation2 + $0x1098] sm:$0xff] }
 0x2e6   :  { %5454 = vmatprep.subr.bf16.mxu0 %v12001_v20  ;;  %5700 = vmatprep.subr.bf16.mxu1 %v12003_v21  ;;  %v623_v20 = vld [vmem:[#allocation2 + $0xf30] sm:$0xff]  ;;  %v620_v21 = vld [vmem:[#allocation2 + $0xf18] sm:$0xff] }
 0x2e7   :  { %v14170_v31 = vpop.f32.mrb[0].mxu0  ;;  %v14172_v15 = vpop.f32.mrb[0].mxu1  ;;  %v12057_v27 = vcombine.high %v619_v18, %v623_v20  ;;  %v12056_v33 = vcombine.low %v619_v18, %v623_v20  ;;  %v12058_v36 = vcombine.low %v620_v21, %v624_v22  ;;  %v671_v46 = vld [vmem:[#allocation2 + $0x10b0] sm:$0xff] }
 0x2e8   :  { %v14174_v35 = vpop.f32.mrb[1].mxu0  ;;  %v14176_v40 = vpop.f32.mrb[1].mxu1  ;;  %v675_v20 = vld [vmem:[#allocation2 + $0x10d0] sm:$0xff] }
 0x2e9   :  { %v5072_v41 = vpop.f32.mrb[2].mxu0  ;;  %5455 = vmatpush1.bf16.msra.mxu0 %v12000_v28  ;;  %v5318_v23 = vpop.f32.mrb[2].mxu1  ;;  %5701 = vmatpush1.bf16.msra.mxu1 %v12002_v29  ;;  %v12059_v28 = vcombine.high %v620_v21, %v624_v22  ;;  %v627_v29 = vld [vmem:[#allocation2 + $0xf50] sm:$0xff]  ;;  %v676_v22 = vld [vmem:[#allocation2 + $0x10d8] sm:$0xff] }
 0x2ea   :  { %v5073_v43 = vpop.f32.mrb[3].mxu0  ;;  %5456 = vmatprep.subr.bf16.mxu0 %v12009_v30  ;;  %v5319_v48 = vpop.f32.mrb[3].mxu1  ;;  %5702 = vmatprep.subr.bf16.mxu1 %v12011_v12  ;;  %v631_v30 = vld [vmem:[#allocation2 + $0xf70] sm:$0xff]  ;;  %v628_v12 = vld [vmem:[#allocation2 + $0xf58] sm:$0xff] }
 0x2eb   :  { %v12065_v37 = vcombine.high %v627_v29, %v631_v30  ;;  %v12067_v41 = vcombine.high %v628_v12, %v632_v32  ;;  %v639_v23 = vld [vmem:[#allocation2 + $0xfb0] sm:$0xff]  ;;  %v636_v43 = vld [vmem:[#allocation2 + $0xf98] sm:$0xff]  ;;  %v12066_v48 = vcombine.low %v628_v12, %v632_v32 }
 0x2ec   :  { %v679_v21 = vld [vmem:[#allocation2 + $0x10f0] sm:$0xff]  ;;  %v684_v12 = vld [vmem:[#allocation2 + $0x1118] sm:$0xff] }
 0x2ed   :  { %5457 = vmatpush1.bf16.msra.mxu0 %v12008_v42  ;;  %5703 = vmatpush1.bf16.msra.mxu1 %v12010_v44  ;;  %v635_v42 = vld [vmem:[#allocation2 + $0xf90] sm:$0xff]  ;;  %v640_v44 = vld [vmem:[#allocation2 + $0xfb8] sm:$0xff] }
 0x2ee   :  { %5458 = vmatprep.subr.bf16.mxu0 %v12017_v45  ;;  %5704 = vmatprep.subr.bf16.mxu1 %v12019_v24  ;;  %v12064_v45 = vcombine.low %v627_v29, %v631_v30  ;;  %v12073_v24 = vcombine.high %v635_v42, %v639_v23  ;;  %v12075_v49 = vcombine.high %v636_v43, %v640_v44  ;;  %v683_v29 = vld [vmem:[#allocation2 + $0x1110] sm:$0xff]  ;;  %v688_v32 = vld [vmem:[#allocation2 + $0x1138] sm:$0xff] }
 0x2ef   :  { %v687_v30 = vld [vmem:[#allocation2 + $0x1130] sm:$0xff] }
 0x2f1   :  { %5459 = vmatpush1.bf16.msra.mxu0 %v12016_v52  ;;  %5705 = vmatpush1.bf16.msra.mxu1 %v12018_v54  ;;  %v648_v52 = vld [vmem:[#allocation2 + $0xff8] sm:$0xff]  ;;  %v12072_v54 = vcombine.low %v635_v42, %v639_v23  ;;  %v695_v42 = vld [vmem:[#allocation2 + $0x1170] sm:$0xff] }
 0x2f2   :  { %5460 = vmatprep.subr.bf16.mxu0 %v12025_v56  ;;  %5706 = vmatprep.subr.bf16.mxu1 %v12027_v58  ;;  %v12074_v56 = vcombine.low %v636_v43, %v640_v44  ;;  %v12081_v58 = vcombine.high %v643_v50, %v647_v25  ;;  %v12083_v60 = vcombine.high %v644_v51, %v648_v52  ;;  %v692_v23 = vld [vmem:[#allocation2 + $0x1158] sm:$0xff] }
 0x2f3   :  { %v696_v43 = vld [vmem:[#allocation2 + $0x1178] sm:$0xff]  ;;  %v12120_v44 = vcombine.low %v683_v29, %v687_v30 }
 0x2f5   :  { %5461 = vmatpush1.bf16.msra.mxu0 %v12024_v34  ;;  %5707 = vmatpush1.bf16.msra.mxu1 %v12026_v63  ;;  %v656_v34 = vld [vmem:[#allocation2 + $0x1038] sm:$0xff]  ;;  %v12080_v63 = vcombine.low %v643_v50, %v647_v25  ;;  %v703_v50 = vld [vmem:[#allocation2 + $0x11b0] sm:$0xff] }
 0x2f6   :  { %5462 = vmatprep.subr.bf16.mxu0 %v12033_v0  ;;  %5708 = vmatprep.subr.bf16.mxu1 %v12035_v1  ;;  %v12082_v0 = vcombine.low %v644_v51, %v648_v52  ;;  %v12089_v1 = vcombine.high %v651_v19, %v655_v61  ;;  %v12091_v39 = vcombine.high %v652_v62, %v656_v34  ;;  %v700_v25 = vld [vmem:[#allocation2 + $0x1198] sm:$0xff] }
 0x2f7   :  { %v704_v51 = vld [vmem:[#allocation2 + $0x11b8] sm:$0xff] }
 0x2f9   :  { %5463 = vmatpush1.bf16.msra.mxu0 %v12032_v5  ;;  %5709 = vmatpush1.bf16.msra.mxu1 %v12034_v6  ;;  %v664_v5 = vld [vmem:[#allocation2 + $0x1078] sm:$0xff]  ;;  %v12088_v6 = vcombine.low %v651_v19, %v655_v61  ;;  %v711_v19 = vld [vmem:[#allocation2 + $0x11f0] sm:$0xff] }
 0x2fa   :  { %5464 = vmatprep.subr.bf16.mxu0 %v12041_v7  ;;  %5710 = vmatprep.subr.bf16.mxu1 %v12043_v8  ;;  %v12090_v7 = vcombine.low %v652_v62, %v656_v34  ;;  %v12097_v8 = vcombine.high %v659_v2, %v663_v3  ;;  %v12099_v9 = vcombine.high %v660_v4, %v664_v5  ;;  %v708_v61 = vld [vmem:[#allocation2 + $0x11d8] sm:$0xff] }
 0x2fb   :  { %v712_v62 = vld [vmem:[#allocation2 + $0x11f8] sm:$0xff] }
 0x2fd   :  { %5465 = vmatpush1.bf16.msra.mxu0 %v12040_v13  ;;  %5711 = vmatpush1.bf16.msra.mxu1 %v12042_v14  ;;  %v672_v13 = vld [vmem:[#allocation2 + $0x10b8] sm:$0xff]  ;;  %v12096_v14 = vcombine.low %v659_v2, %v663_v3  ;;  %v719_v2 = vld [vmem:[#allocation2 + $0x1230] sm:$0xff] }
 0x2fe   :  { %5466 = vmatprep.subr.bf16.mxu0 %v12049_v17  ;;  %5712 = vmatprep.subr.bf16.mxu1 %v12051_v57  ;;  %v12098_v17 = vcombine.low %v660_v4, %v664_v5  ;;  %v12105_v57 = vcombine.high %v667_v10, %v671_v46  ;;  %v12107_v18 = vcombine.high %v668_v11, %v672_v13  ;;  %v716_v3 = vld [vmem:[#allocation2 + $0x1218] sm:$0xff] }
 0x2ff   :  { %v720_v4 = vld [vmem:[#allocation2 + $0x1238] sm:$0xff] }
 0x301   :  { %5467 = vmatpush1.bf16.msra.mxu0 %v12048_v53  ;;  %5713 = vmatpush1.bf16.msra.mxu1 %v12050_v26  ;;  %v680_v53 = vld [vmem:[#allocation2 + $0x10f8] sm:$0xff]  ;;  %v12104_v26 = vcombine.low %v667_v10, %v671_v46  ;;  %v727_v10 = vld [vmem:[#allocation2 + $0x1270] sm:$0xff] }
 0x302   :  { %5468 = vmatprep.subr.bf16.mxu0 %v12057_v27  ;;  %5714 = vmatprep.subr.bf16.mxu1 %v12059_v28  ;;  %v12113_v27 = vcombine.high %v675_v20, %v679_v21  ;;  %v12115_v28 = vcombine.high %v676_v22, %v680_v53  ;;  %v724_v46 = vld [vmem:[#allocation2 + $0x1258] sm:$0xff] }
 0x305   :  { %5469 = vmatpush1.bf16.msra.mxu0 %v12056_v33  ;;  %5715 = vmatpush1.bf16.msra.mxu1 %v12058_v36  ;;  %v12112_v33 = vcombine.low %v675_v20, %v679_v21  ;;  %v12114_v36 = vcombine.low %v676_v22, %v680_v53  ;;  %v735_v20 = vld [vmem:[#allocation2 + $0x12b0] sm:$0xff]  ;;  %v732_v21 = vld [vmem:[#allocation2 + $0x1298] sm:$0xff] }
 0x306   :  { %5470 = vmatprep.subr.bf16.mxu0 %v12065_v37  ;;  %5716 = vmatprep.subr.bf16.mxu1 %v12067_v41  ;;  %v12121_v37 = vcombine.high %v683_v29, %v687_v30  ;;  %v691_v41 = vld [vmem:[#allocation2 + $0x1150] sm:$0xff]  ;;  %v736_v22 = vld [vmem:[#allocation2 + $0x12b8] sm:$0xff] }
 0x307   :  { %v12128_v52 = vcombine.low %v691_v41, %v695_v42  ;;  %v743_v29 = vld [vmem:[#allocation2 + $0x12f0] sm:$0xff]  ;;  %v740_v30 = vld [vmem:[#allocation2 + $0x12d8] sm:$0xff] }
 0x309   :  { %5471 = vmatpush1.bf16.msra.mxu0 %v12064_v45  ;;  %5717 = vmatpush1.bf16.msra.mxu1 %v12066_v48  ;;  %v12122_v45 = vcombine.low %v684_v12, %v688_v32  ;;  %v12129_v48 = vcombine.high %v691_v41, %v695_v42  ;;  %v751_v41 = vld [vmem:[#allocation2 + $0x1330] sm:$0xff]  ;;  %v748_v42 = vld [vmem:[#allocation2 + $0x1318] sm:$0xff] }
 0x30a   :  { %5472 = vmatprep.subr.bf16.mxu0 %v12073_v24  ;;  %5718 = vmatprep.subr.bf16.mxu1 %v12075_v49  ;;  %v12131_v24 = vcombine.high %v692_v23, %v696_v43  ;;  %v699_v49 = vld [vmem:[#allocation2 + $0x1190] sm:$0xff] }
 0x30b   :  { %v12136_v34 = vcombine.low %v699_v49, %v703_v50 }
 0x30d   :  { %5473 = vmatpush1.bf16.msra.mxu0 %v12072_v54  ;;  %5719 = vmatpush1.bf16.msra.mxu1 %v12074_v56  ;;  %v12130_v54 = vcombine.low %v692_v23, %v696_v43  ;;  %v12137_v56 = vcombine.high %v699_v49, %v703_v50  ;;  %v752_v23 = vld [vmem:[#allocation2 + $0x1338] sm:$0xff]  ;;  %v759_v49 = vld [vmem:[#allocation2 + $0x1370] sm:$0xff] }
 0x30e   :  { %5474 = vmatprep.subr.bf16.mxu0 %v12081_v58  ;;  %5720 = vmatprep.subr.bf16.mxu1 %v12083_v60  ;;  %v12139_v58 = vcombine.high %v700_v25, %v704_v51  ;;  %v707_v60 = vld [vmem:[#allocation2 + $0x11d0] sm:$0xff]  ;;  %v756_v50 = vld [vmem:[#allocation2 + $0x1358] sm:$0xff] }
 0x30f   :  { %v12144_v5 = vcombine.low %v707_v60, %v711_v19 }
 0x311   :  { %5475 = vmatpush1.bf16.msra.mxu0 %v12080_v63  ;;  %5721 = vmatpush1.bf16.msra.mxu1 %v12082_v0  ;;  %v12138_v63 = vcombine.low %v700_v25, %v704_v51  ;;  %v12145_v0 = vcombine.high %v707_v60, %v711_v19  ;;  %v760_v25 = vld [vmem:[#allocation2 + $0x1378] sm:$0xff]  ;;  %v767_v60 = vld [vmem:[#allocation2 + $0x13b0] sm:$0xff] }
 0x312   :  { %5485 = vmatprep.subr.bf16.mxu0 %v12089_v1  ;;  %5731 = vmatprep.subr.bf16.mxu1 %v12091_v39  ;;  %v12147_v1 = vcombine.high %v708_v61, %v712_v62  ;;  %v715_v39 = vld [vmem:[#allocation2 + $0x1210] sm:$0xff]  ;;  %v764_v19 = vld [vmem:[#allocation2 + $0x1398] sm:$0xff] }
 0x314   :  { %5477 = vmatmul.mubr.bf16.vlgmr.msra.gmra.mrb[4].mxu0 %v14118_v55  ;;  %5723 = vmatmul.mubr.bf16.vlgmr.msra.gmra.mrb[4].mxu1 %v14118_v55  ;;  %v12106_v55 = vcombine.low %v668_v11, %v672_v13  ;;  %v728_v11 = vld [vmem:[#allocation2 + $0x1278] sm:$0xff]  ;;  %v12152_v13 = vcombine.low %v715_v39, %v719_v2 }
 0x315   :  { %5486 = vmatpush1.bf16.msra.mxu0 %v12088_v6  ;;  %5732 = vmatpush1.bf16.msra.mxu1 %v12090_v7  ;;  %v12146_v6 = vcombine.low %v708_v61, %v712_v62  ;;  %v12153_v7 = vcombine.high %v715_v39, %v719_v2  ;;  %v768_v61 = vld [vmem:[#allocation2 + $0x13b8] sm:$0xff]  ;;  %v775_v39 = vld [vmem:[#allocation2 + $0x13f0] sm:$0xff] }
 0x316   :  { %5487 = vmatprep.subr.bf16.mxu0 %v12097_v8  ;;  %5733 = vmatprep.subr.bf16.mxu1 %v12099_v9  ;;  %v12155_v8 = vcombine.high %v716_v3, %v720_v4  ;;  %v723_v9 = vld [vmem:[#allocation2 + $0x1250] sm:$0xff]  ;;  %v772_v2 = vld [vmem:[#allocation2 + $0x13d8] sm:$0xff] }
 0x317   :  { %5517 = vmatprep.mubr.bf16.mxu0 %v14127_v38  ;;  %5763 = vmatprep.mubr.bf16.mxu1 %v14127_v38  ;;  %v12123_v38 = vcombine.high %v684_v12, %v688_v32  ;;  %v12160_v53 = vcombine.low %v723_v9, %v727_v10  ;;  %v744_v12 = vld [vmem:[#allocation2 + $0x12f8] sm:$0xff] }
 0x319   :  { %5488 = vmatpush1.bf16.msra.mxu0 %v12096_v14  ;;  %5734 = vmatpush1.bf16.msra.mxu1 %v12098_v17  ;;  %v12154_v14 = vcombine.low %v716_v3, %v720_v4  ;;  %v12161_v17 = vcombine.high %v723_v9, %v727_v10  ;;  %v776_v3 = vld [vmem:[#allocation2 + $0x13f8] sm:$0xff]  ;;  %v783_v9 = vld [vmem:[#allocation2 + $0x1430] sm:$0xff] }
 0x31a   :  { %5489 = vmatprep.subr.bf16.mxu0 %v12105_v57  ;;  %5735 = vmatprep.subr.bf16.mxu1 %v12107_v18  ;;  %v12163_v57 = vcombine.high %v724_v46, %v728_v11  ;;  %v731_v18 = vld [vmem:[#allocation2 + $0x1290] sm:$0xff]  ;;  %v780_v10 = vld [vmem:[#allocation2 + $0x1418] sm:$0xff] }
 0x31b   :  { %v12168_v32 = vcombine.low %v731_v18, %v735_v20 }
 0x31d   :  { %5490 = vmatpush1.bf16.msra.mxu0 %v12104_v26  ;;  %5736 = vmatpush1.bf16.msra.mxu1 %v12106_v55  ;;  %v12162_v26 = vcombine.low %v724_v46, %v728_v11  ;;  %v12169_v55 = vcombine.high %v731_v18, %v735_v20  ;;  %v784_v46 = vld [vmem:[#allocation2 + $0x1438] sm:$0xff]  ;;  %v791_v18 = vld [vmem:[#allocation2 + $0x1470] sm:$0xff] }
 0x31e   :  { %5491 = vmatprep.subr.bf16.mxu0 %v12113_v27  ;;  %5737 = vmatprep.subr.bf16.mxu1 %v12115_v28  ;;  %v12171_v27 = vcombine.high %v732_v21, %v736_v22  ;;  %v739_v28 = vld [vmem:[#allocation2 + $0x12d0] sm:$0xff]  ;;  %v788_v20 = vld [vmem:[#allocation2 + $0x1458] sm:$0xff] }
 0x31f   :  { %v12176_v43 = vcombine.low %v739_v28, %v743_v29 }
 0x321   :  { %5492 = vmatpush1.bf16.msra.mxu0 %v12112_v33  ;;  %5738 = vmatpush1.bf16.msra.mxu1 %v12114_v36  ;;  %v12170_v33 = vcombine.low %v732_v21, %v736_v22  ;;  %v12177_v36 = vcombine.high %v739_v28, %v743_v29  ;;  %v792_v21 = vld [vmem:[#allocation2 + $0x1478] sm:$0xff]  ;;  %v799_v28 = vld [vmem:[#allocation2 + $0x14b0] sm:$0xff] }
 0x322   :  { %5493 = vmatprep.subr.bf16.mxu0 %v12121_v37  ;;  %5739 = vmatprep.subr.bf16.mxu1 %v12123_v38  ;;  %v12179_v37 = vcombine.high %v740_v30, %v744_v12  ;;  %v747_v38 = vld [vmem:[#allocation2 + $0x1310] sm:$0xff]  ;;  %v796_v29 = vld [vmem:[#allocation2 + $0x1498] sm:$0xff] }
 0x323   :  { %v12184_v51 = vcombine.low %v747_v38, %v751_v41 }
 0x325   :  { %5494 = vmatpush1.bf16.msra.mxu0 %v12120_v44  ;;  %5740 = vmatpush1.bf16.msra.mxu1 %v12122_v45  ;;  %v12178_v44 = vcombine.low %v740_v30, %v744_v12  ;;  %v12185_v45 = vcombine.high %v747_v38, %v751_v41  ;;  %v800_v30 = vld [vmem:[#allocation2 + $0x14b8] sm:$0xff]  ;;  %v807_v38 = vld [vmem:[#allocation2 + $0x14f0] sm:$0xff] }
 0x326   :  { %5495 = vmatprep.subr.bf16.mxu0 %v12129_v48  ;;  %5741 = vmatprep.subr.bf16.mxu1 %v12131_v24  ;;  %v12187_v48 = vcombine.high %v748_v42, %v752_v23  ;;  %v755_v24 = vld [vmem:[#allocation2 + $0x1350] sm:$0xff]  ;;  %v804_v41 = vld [vmem:[#allocation2 + $0x14d8] sm:$0xff] }
 0x327   :  { %v12192_v62 = vcombine.low %v755_v24, %v759_v49 }
 0x329   :  { %5496 = vmatpush1.bf16.msra.mxu0 %v12128_v52  ;;  %5742 = vmatpush1.bf16.msra.mxu1 %v12130_v54  ;;  %v12186_v52 = vcombine.low %v748_v42, %v752_v23  ;;  %v12193_v54 = vcombine.high %v755_v24, %v759_v49  ;;  %v808_v42 = vld [vmem:[#allocation2 + $0x14f8] sm:$0xff] }
 0x32a   :  { %5497 = vmatprep.subr.bf16.mxu0 %v12137_v56  ;;  %5743 = vmatprep.subr.bf16.mxu1 %v12139_v58  ;;  %v12195_v56 = vcombine.high %v756_v50, %v760_v25  ;;  %v763_v58 = vld [vmem:[#allocation2 + $0x1390] sm:$0xff]  ;;  %v812_v24 = vld [vmem:[#allocation2 + $0x1518] sm:$0xff] }
 0x32b   :  { %v12200_v4 = vcombine.low %v763_v58, %v767_v60  ;;  %v816_v49 = vld [vmem:[#allocation2 + $0x1538] sm:$0xff] }
 0x32d   :  { %5498 = vmatpush1.bf16.msra.mxu0 %v12136_v34  ;;  %5744 = vmatpush1.bf16.msra.mxu1 %v12138_v63  ;;  %v12194_v34 = vcombine.low %v756_v50, %v760_v25  ;;  %v12201_v63 = vcombine.high %v763_v58, %v767_v60  ;;  %v12242_v25 = vcombine.low %v804_v41, %v808_v42  ;;  %v824_v58 = vld [vmem:[#allocation2 + $0x1578] sm:$0xff] }
 0x32e   :  { %5499 = vmatprep.subr.bf16.mxu0 %v12145_v0  ;;  %5745 = vmatprep.subr.bf16.mxu1 %v12147_v1  ;;  %v12203_v0 = vcombine.high %v764_v19, %v768_v61  ;;  %v771_v1 = vld [vmem:[#allocation2 + $0x13d0] sm:$0xff] }
 0x32f   :  { %v12208_v11 = vcombine.low %v771_v1, %v775_v39 }
 0x331   :  { %5500 = vmatpush1.bf16.msra.mxu0 %v12144_v5  ;;  %5746 = vmatpush1.bf16.msra.mxu1 %v12146_v6  ;;  %v12202_v5 = vcombine.low %v764_v19, %v768_v61  ;;  %v12209_v6 = vcombine.high %v771_v1, %v775_v39  ;;  %v12250_v19 = vcombine.low %v812_v24, %v816_v49  ;;  %v832_v1 = vld [vmem:[#allocation2 + $0x15b8] sm:$0xff] }
 0x332   :  { %5501 = vmatprep.subr.bf16.mxu0 %v12153_v7  ;;  %5747 = vmatprep.subr.bf16.mxu1 %v12155_v8  ;;  %v12211_v7 = vcombine.high %v772_v2, %v776_v3  ;;  %v779_v8 = vld [vmem:[#allocation2 + $0x1410] sm:$0xff] }
 0x333   :  { %v12216_v22 = vcombine.low %v779_v8, %v783_v9 }
 0x335   :  { %5502 = vmatpush1.bf16.msra.mxu0 %v12152_v13  ;;  %5748 = vmatpush1.bf16.msra.mxu1 %v12154_v14  ;;  %v12210_v13 = vcombine.low %v772_v2, %v776_v3  ;;  %v12217_v14 = vcombine.high %v779_v8, %v783_v9  ;;  %v840_v8 = vld [vmem:[#allocation2 + $0x15f8] sm:$0xff] }
 0x336   :  { %5503 = vmatprep.subr.bf16.mxu0 %v12161_v17  ;;  %5749 = vmatprep.subr.bf16.mxu1 %v12163_v57  ;;  %v12219_v17 = vcombine.high %v780_v10, %v784_v46  ;;  %v787_v57 = vld [vmem:[#allocation2 + $0x1450] sm:$0xff] }
 0x337   :  { %v12224_v12 = vcombine.low %v787_v57, %v791_v18 }
 0x339   :  { %5504 = vmatpush1.bf16.msra.mxu0 %v12160_v53  ;;  %5750 = vmatpush1.bf16.msra.mxu1 %v12162_v26  ;;  %v12218_v53 = vcombine.low %v780_v10, %v784_v46  ;;  %v12225_v26 = vcombine.high %v787_v57, %v791_v18  ;;  %v848_v57 = vld [vmem:[#allocation2 + $0x1638] sm:$0xff] }
 0x33a   :  { %5505 = vmatprep.subr.bf16.mxu0 %v12169_v55  ;;  %5751 = vmatprep.subr.bf16.mxu1 %v12171_v27  ;;  %v12227_v55 = vcombine.high %v788_v20, %v792_v21  ;;  %v795_v27 = vld [vmem:[#allocation2 + $0x1490] sm:$0xff] }
 0x33b   :  { %v12232_v23 = vcombine.low %v795_v27, %v799_v28 }
 0x33d   :  { %5506 = vmatpush1.bf16.msra.mxu0 %v12168_v32  ;;  %5752 = vmatpush1.bf16.msra.mxu1 %v12170_v33  ;;  %v12226_v32 = vcombine.low %v788_v20, %v792_v21  ;;  %v12233_v33 = vcombine.high %v795_v27, %v799_v28  ;;  %v856_v27 = vld [vmem:[#allocation2 + $0x1678] sm:$0xff] }
 0x33e   :  { %5507 = vmatprep.subr.bf16.mxu0 %v12177_v36  ;;  %5753 = vmatprep.subr.bf16.mxu1 %v12179_v37  ;;  %v12235_v36 = vcombine.high %v796_v29, %v800_v30  ;;  %v803_v37 = vld [vmem:[#allocation2 + $0x14d0] sm:$0xff] }
 0x33f   :  { %v12240_v50 = vcombine.low %v803_v37, %v807_v38 }
 0x341   :  { %5508 = vmatpush1.bf16.msra.mxu0 %v12176_v43  ;;  %5754 = vmatpush1.bf16.msra.mxu1 %v12178_v44  ;;  %v12241_v43 = vcombine.high %v803_v37, %v807_v38  ;;  %v12243_v44 = vcombine.high %v804_v41, %v808_v42  ;;  %v864_v37 = vld [vmem:[#allocation2 + $0x16b8] sm:$0xff] }
 0x342   :  { %5509 = vmatprep.subr.bf16.mxu0 %v12185_v45  ;;  %5755 = vmatprep.subr.bf16.mxu1 %v12187_v48  ;;  %v811_v45 = vld [vmem:[#allocation2 + $0x1510] sm:$0xff] }
 0x343   :  { %v815_v48 = vld [vmem:[#allocation2 + $0x1530] sm:$0xff] }
 0x344   :  { %v12248_v60 = vcombine.low %v811_v45, %v815_v48 }
 0x345   :  { %5510 = vmatpush1.bf16.msra.mxu0 %v12184_v51  ;;  %5756 = vmatpush1.bf16.msra.mxu1 %v12186_v52  ;;  %v12249_v51 = vcombine.high %v811_v45, %v815_v48  ;;  %v819_v52 = vld [vmem:[#allocation2 + $0x1550] sm:$0xff]  ;;  %v872_v45 = vld [vmem:[#allocation2 + $0x16f8] sm:$0xff] }
 0x346   :  { %5511 = vmatprep.subr.bf16.mxu0 %v12193_v54  ;;  %5757 = vmatprep.subr.bf16.mxu1 %v12195_v56  ;;  %v823_v54 = vld [vmem:[#allocation2 + $0x1570] sm:$0xff]  ;;  %v820_v56 = vld [vmem:[#allocation2 + $0x1558] sm:$0xff] }
 0x347   :  { %v12257_v61 = vcombine.high %v819_v52, %v823_v54  ;;  %v12256_v39 = vcombine.low %v819_v52, %v823_v54  ;;  %v12258_v2 = vcombine.low %v820_v56, %v824_v58  ;;  %v876_v52 = vld [vmem:[#allocation2 + $0x1718] sm:$0xff] }
 0x348   :  { %v880_v54 = vld [vmem:[#allocation2 + $0x1738] sm:$0xff] }
 0x349   :  { %5512 = vmatpush1.bf16.msra.mxu0 %v12192_v62  ;;  %5758 = vmatpush1.bf16.msra.mxu1 %v12194_v34  ;;  %v12259_v62 = vcombine.high %v820_v56, %v824_v58  ;;  %v827_v34 = vld [vmem:[#allocation2 + $0x1590] sm:$0xff] }
 0x34a   :  { %5513 = vmatprep.subr.bf16.mxu0 %v12201_v63  ;;  %5759 = vmatprep.subr.bf16.mxu1 %v12203_v0  ;;  %v831_v63 = vld [vmem:[#allocation2 + $0x15b0] sm:$0xff]  ;;  %v828_v0 = vld [vmem:[#allocation2 + $0x1598] sm:$0xff] }
 0x34b   :  { %v12265_v3 = vcombine.high %v827_v34, %v831_v63  ;;  %v12264_v9 = vcombine.low %v827_v34, %v831_v63  ;;  %v12266_v10 = vcombine.low %v828_v0, %v832_v1  ;;  %v884_v63 = vld [vmem:[#allocation2 + $0x1758] sm:$0xff] }
 0x34d   :  { %5514 = vmatpush1.bf16.msra.mxu0 %v12200_v4  ;;  %5760 = vmatpush1.bf16.msra.mxu1 %v12202_v5  ;;  %v12267_v4 = vcombine.high %v828_v0, %v832_v1  ;;  %v835_v5 = vld [vmem:[#allocation2 + $0x15d0] sm:$0xff]  ;;  %v888_v0 = vld [vmem:[#allocation2 + $0x1778] sm:$0xff] }
 0x34e   :  { %5515 = vmatprep.subr.bf16.mxu0 %v12209_v6  ;;  %5761 = vmatprep.subr.bf16.mxu1 %v12211_v7  ;;  %v839_v6 = vld [vmem:[#allocation2 + $0x15f0] sm:$0xff]  ;;  %v836_v7 = vld [vmem:[#allocation2 + $0x15d8] sm:$0xff] }
 0x34f   :  { %v12273_v46 = vcombine.high %v835_v5, %v839_v6  ;;  %v12272_v18 = vcombine.low %v835_v5, %v839_v6  ;;  %v12274_v20 = vcombine.low %v836_v7, %v840_v8  ;;  %v895_v5 = vld [vmem:[#allocation2 + $0x17b0] sm:$0xff] }
 0x351   :  { %5516 = vmatpush1.bf16.msra.mxu0 %v12208_v11  ;;  %5762 = vmatpush1.bf16.msra.mxu1 %v12210_v13  ;;  %v12275_v11 = vcombine.high %v836_v7, %v840_v8  ;;  %v843_v13 = vld [vmem:[#allocation2 + $0x1610] sm:$0xff]  ;;  %v892_v7 = vld [vmem:[#allocation2 + $0x1798] sm:$0xff] }
 0x352   :  { %5526 = vmatprep.subr.bf16.mxu0 %v12217_v14  ;;  %5772 = vmatprep.subr.bf16.mxu1 %v12219_v17  ;;  %v847_v14 = vld [vmem:[#allocation2 + $0x1630] sm:$0xff]  ;;  %v844_v17 = vld [vmem:[#allocation2 + $0x1618] sm:$0xff] }
 0x353   :  { %v12281_v21 = vcombine.high %v843_v13, %v847_v14  ;;  %v12280_v28 = vcombine.low %v843_v13, %v847_v14  ;;  %v896_v8 = vld [vmem:[#allocation2 + $0x17b8] sm:$0xff]  ;;  %v899_v14 = vld [vmem:[#allocation2 + $0x17d0] sm:$0xff] }
 0x354   :  { %5518 = vmatmul.mubr.bf16.vlgmr.msra.gmra.mrb[4].mxu0 %v14135_v16  ;;  %5764 = vmatmul.mubr.bf16.vlgmr.msra.gmra.mrb[4].mxu1 %v14135_v16  ;;  %v12234_v16 = vcombine.low %v796_v29, %v800_v30  ;;  %v12282_v29 = vcombine.low %v844_v17, %v848_v57  ;;  %v12331_v13 = vcombine.high %v892_v7, %v896_v8 }
 0x355   :  { %5527 = vmatpush1.bf16.msra.mxu0 %v12216_v22  ;;  %5773 = vmatpush1.bf16.msra.mxu1 %v12218_v53  ;;  %v12283_v22 = vcombine.high %v844_v17, %v848_v57  ;;  %v851_v53 = vld [vmem:[#allocation2 + $0x1650] sm:$0xff] }
 0x356   :  { %5528 = vmatprep.subr.bf16.mxu0 %v12225_v26  ;;  %5774 = vmatprep.subr.bf16.mxu1 %v12227_v55  ;;  %v855_v26 = vld [vmem:[#allocation2 + $0x1670] sm:$0xff]  ;;  %v852_v55 = vld [vmem:[#allocation2 + $0x1658] sm:$0xff] }
 0x357   :  { %5558 = vmatprep.mubr.bf16.mxu0 %v14144_v59  ;;  %5804 = vmatprep.mubr.bf16.mxu1 %v14144_v59  ;;  %v12251_v59 = vcombine.high %v812_v24, %v816_v49  ;;  %v12289_v30 = vcombine.high %v851_v53, %v855_v26  ;;  %v12288_v38 = vcombine.low %v851_v53, %v855_v26  ;;  %v903_v17 = vld [vmem:[#allocation2 + $0x17f0] sm:$0xff] }
 0x358   :  { %v12290_v41 = vcombine.low %v852_v55, %v856_v27  ;;  %v12337_v53 = vcombine.high %v899_v14, %v903_v17 }
 0x359   :  { %5529 = vmatpush1.bf16.msra.mxu0 %v12224_v12  ;;  %5775 = vmatpush1.bf16.msra.mxu1 %v12226_v32  ;;  %v12291_v12 = vcombine.high %v852_v55, %v856_v27  ;;  %v859_v32 = vld [vmem:[#allocation2 + $0x1690] sm:$0xff]  ;;  %v5829_v55 = vld [vmem:[#allocation6] sm:$0xff] }
 0x35a   :  { %5530 = vmatprep.subr.bf16.mxu0 %v12233_v33  ;;  %5776 = vmatprep.subr.bf16.mxu1 %v12235_v36  ;;  %v863_v33 = vld [vmem:[#allocation2 + $0x16b0] sm:$0xff]  ;;  %v860_v36 = vld [vmem:[#allocation2 + $0x1698] sm:$0xff]  ;;  %v5833_v27 = vld [vmem:[#allocation6 + $0x20] sm:$0xff] }
 0x35b   :  { %v12297_v42 = vcombine.high %v859_v32, %v863_v33  ;;  %v12296_v48 = vcombine.low %v859_v32, %v863_v33  ;;  %v12298_v24 = vcombine.low %v860_v36, %v864_v37  ;;  %v12341_v33 = vcombine.high %v5829_v55, %v5833_v27 }
 0x35d   :  { %5531 = vmatpush1.bf16.msra.mxu0 %v12232_v23  ;;  %5777 = vmatpush1.bf16.msra.mxu1 %v12234_v16  ;;  %v12299_v23 = vcombine.high %v860_v36, %v864_v37  ;;  %v867_v16 = vld [vmem:[#allocation2 + $0x16d0] sm:$0xff] }
 0x35e   :  { %5532 = vmatprep.subr.bf16.mxu0 %v12241_v43  ;;  %5778 = vmatprep.subr.bf16.mxu1 %v12243_v44  ;;  %v871_v43 = vld [vmem:[#allocation2 + $0x16f0] sm:$0xff]  ;;  %v868_v44 = vld [vmem:[#allocation2 + $0x16d8] sm:$0xff] }
 0x35f   :  { %v12305_v49 = vcombine.high %v867_v16, %v871_v43  ;;  %v12304_v56 = vcombine.low %v867_v16, %v871_v43  ;;  %v12306_v58 = vcombine.low %v868_v44, %v872_v45  ;;  %v5842_v16 = vld [vmem:[#allocation6 + $0x68] sm:$0xff] }
 0x361   :  { %5533 = vmatpush1.bf16.msra.mxu0 %v12240_v50  ;;  %5779 = vmatpush1.bf16.msra.mxu1 %v12242_v25  ;;  %v12307_v50 = vcombine.high %v868_v44, %v872_v45  ;;  %v875_v25 = vld [vmem:[#allocation2 + $0x1710] sm:$0xff]  ;;  %v5845_v44 = vld [vmem:[#allocation6 + $0x80] sm:$0xff] }
 0x362   :  { %5534 = vmatprep.subr.bf16.mxu0 %v12249_v51  ;;  %5780 = vmatprep.subr.bf16.mxu1 %v12251_v59  ;;  %v879_v51 = vld [vmem:[#allocation2 + $0x1730] sm:$0xff]  ;;  %v907_v59 = vlaneseq  ;;  %v5849_v45 = vld [vmem:[#allocation6 + $0xa0] sm:$0xff] }
 0x363   :  { %v12312_v1 = vcombine.low %v875_v25, %v879_v51 }
 0x364   :  { %v14186_v34 = vshrl.u32 %v907_v59, 7  ;;  %v12357_v59 = vcombine.high %v5845_v44, %v5849_v45 }
 0x365   :  { %5535 = vmatpush1.bf16.msra.mxu0 %v12248_v60  ;;  %5781 = vmatpush1.bf16.msra.mxu1 %v12250_v19  ;;  %v12313_v60 = vcombine.high %v875_v25, %v879_v51  ;;  %v12315_v19 = vcombine.high %v876_v52, %v880_v54 }
 0x366   :  { %5536 = vmatprep.subr.bf16.mxu0 %v12257_v61  ;;  %5782 = vmatprep.subr.bf16.mxu1 %v12259_v62  ;;  %v883_v61 = vld [vmem:[#allocation2 + $0x1750] sm:$0xff]  ;;  %v14189_v6 = vsub.s32 1, %v14186_v34 }
 0x367   :  { %v887_v62 = vld [vmem:[#allocation2 + $0x1770] sm:$0xff] }
 0x369   :  { %5537 = vmatpush1.bf16.msra.mxu0 %v12256_v39  ;;  %5783 = vmatpush1.bf16.msra.mxu1 %v12258_v2  ;;  %v12314_v39 = vcombine.low %v876_v52, %v880_v54  ;;  %v12321_v2 = vcombine.high %v883_v61, %v887_v62  ;;  %v5853_v54 = vld [vmem:[#allocation6 + $0xc0] sm:$0xff] }
 0x36a   :  { %5538 = vmatprep.subr.bf16.mxu0 %v12265_v3  ;;  %5784 = vmatprep.subr.bf16.mxu1 %v12267_v4  ;;  %v12323_v3 = vcombine.high %v884_v63, %v888_v0  ;;  %v891_v4 = vld [vmem:[#allocation2 + $0x1790] sm:$0xff] }
 0x36d   :  { %5539 = vmatpush1.bf16.msra.mxu0 %v12264_v9  ;;  %5785 = vmatpush1.bf16.msra.mxu1 %v12266_v10  ;;  %v14191_v9 = vld [vmem:[#allocation4] sm:$0xff]  ;;  %v12320_v10 = vcombine.low %v883_v61, %v887_v62 }
 0x36e   :  { %5540 = vmatprep.subr.bf16.mxu0 %v12273_v46  ;;  %5786 = vmatprep.subr.bf16.mxu1 %v12275_v11  ;;  %v12322_v46 = vcombine.low %v884_v63, %v888_v0  ;;  %v12329_v11 = vcombine.high %v891_v4, %v895_v5  ;;  %v914_v57 = vrot.slane %v14191_v9, %v14189_v6  ;;  %v5861_v63 = vld [vmem:[#allocation6 + $0x100] sm:$0xff] }
 0x36f   :  { %v5865_v0 = vld [vmem:[#allocation6 + $0x120] sm:$0xff] }
 0x371   :  { %5541 = vmatpush1.bf16.msra.mxu0 %v12272_v18  ;;  %5787 = vmatpush1.bf16.msra.mxu1 %v12274_v20  ;;  %v900_v18 = vld [vmem:[#allocation2 + $0x17d8] sm:$0xff] }
 0x372   :  { %5542 = vmatprep.subr.bf16.mxu0 %v12281_v21  ;;  %5788 = vmatprep.subr.bf16.mxu1 %v12283_v22  ;;  %v904_v20 = vld [vmem:[#allocation2 + $0x17f8] sm:$0xff]  ;;  %v12328_v21 = vcombine.low %v891_v4, %v895_v5  ;;  %v12330_v22 = vcombine.low %v892_v7, %v896_v8  ;;  %v12373_v4 = vcombine.high %v5861_v63, %v5865_v0  ;;  %v5869_v7 = vld [vmem:[#allocation6 + $0x140] sm:$0xff] }
 0x373   :  { %v12339_v26 = vcombine.high %v900_v18, %v904_v20  ;;  %v12338_v32 = vcombine.low %v900_v18, %v904_v20  ;;  %v5873_v8 = vld [vmem:[#allocation6 + $0x160] sm:$0xff]  ;;  %v5878_v20 = vld [vmem:[#allocation6 + $0x188] sm:$0xff] }
 0x374   :  { %v5881_v18 = vld [vmem:[#allocation6 + $0x1a0] sm:$0xff] }
 0x375   :  { %5543 = vmatpush1.bf16.msra.mxu0 %v12280_v28  ;;  %5789 = vmatpush1.bf16.msra.mxu1 %v12282_v29  ;;  %v13111_v28 = vadd.f32 %v14174_v35, %v914_v57  ;;  %v5830_v29 = vld [vmem:[#allocation6 + $0x8] sm:$0xff]  ;;  %v5877_v57 = vld [vmem:[#allocation6 + $0x180] sm:$0xff] }
 0x376   :  { %5544 = vmatprep.subr.bf16.mxu0 %v12289_v30  ;;  %5790 = vmatprep.subr.bf16.mxu1 %v12291_v12  ;;  %v5834_v30 = vld [vmem:[#allocation6 + $0x28] sm:$0xff]  ;;  %v12336_v12 = vcombine.low %v899_v14, %v903_v17  ;;  %v12381_v14 = vcombine.high %v5869_v7, %v5873_v8 }
 0x377   :  { %v12343_v36 = vcombine.high %v5830_v29, %v5834_v30  ;;  %v5814_v37 = vmax.f32 %v13111_v28, 0.0  ;;  %v12342_v35 = vcombine.low %v5830_v29, %v5834_v30  ;;  %v5889_v28 = vld [vmem:[#allocation6 + $0x1e0] sm:$0xff]  ;;  %v5886_v29 = vld [vmem:[#allocation6 + $0x1c8] sm:$0xff] }
 0x378   :  { %v5890_v30 = vld [vmem:[#allocation6 + $0x1e8] sm:$0xff] }
 0x379   :  { %5545 = vmatpush1.bf16.msra.mxu0 %v12288_v38  ;;  %5791 = vmatpush1.bf16.msra.mxu1 %v12290_v41  ;;  %v5837_v38 = vld [vmem:[#allocation6 + $0x40] sm:$0xff] }
 0x37a   :  { %5546 = vmatprep.subr.bf16.mxu0 %v12297_v42  ;;  %5792 = vmatprep.subr.bf16.mxu1 %v12299_v23  ;;  %v5841_v41 = vld [vmem:[#allocation6 + $0x60] sm:$0xff]  ;;  %v12340_v42 = vcombine.low %v5829_v55, %v5833_v27  ;;  %v5838_v23 = vld [vmem:[#allocation6 + $0x48] sm:$0xff] }
 0x37b   :  { %v12349_v43 = vcombine.high %v5837_v38, %v5841_v41  ;;  %v12348_v25 = vcombine.low %v5837_v38, %v5841_v41  ;;  %v12350_v51 = vcombine.low %v5838_v23, %v5842_v16  ;;  %v5885_v27 = vld [vmem:[#allocation6 + $0x1c0] sm:$0xff]  ;;  %v5894_v41 = vld [vmem:[#allocation6 + $0x208] sm:$0xff] }
 0x37c   :  { %v5897_v38 = vld [vmem:[#allocation6 + $0x220] sm:$0xff] }
 0x37d   :  { %5547 = vmatpush1.bf16.msra.mxu0 %v12296_v48  ;;  %5793 = vmatpush1.bf16.msra.mxu1 %v12298_v24  ;;  %v14196_v48 = vpack.c.bf16 %v5814_v37, %v5814_v37  ;;  %v12351_v24 = vcombine.high %v5838_v23, %v5842_v16  ;;  %v5893_v37 = vld [vmem:[#allocation6 + $0x200] sm:$0xff]  ;;  %v12396_v23 = vcombine.low %v5885_v27, %v5889_v28 }
 0x37e   :  { %5548 = vmatprep.subr.bf16.mxu0 %v12305_v49  ;;  %5794 = vmatprep.subr.bf16.mxu1 %v12307_v50  ;;  %v5846_v49 = vld [vmem:[#allocation6 + $0x88] sm:$0xff]  ;;  %v12398_v16 = vcombine.low %v5886_v29, %v5890_v30 }
 0x37f   :  { %v5850_v50 = vld [vmem:[#allocation6 + $0xa8] sm:$0xff] }
 0x380   :  { %v12359_v52 = vcombine.high %v5846_v49, %v5850_v50 }
 0x381   :  { %5549 = vmatpush1.bf16.msra.mxu0 %v12304_v56  ;;  %5795 = vmatpush1.bf16.msra.mxu1 %v12306_v58  ;;  %v5857_v56 = vld [vmem:[#allocation6 + $0xe0] sm:$0xff]  ;;  %v5854_v58 = vld [vmem:[#allocation6 + $0xc8] sm:$0xff] }
 0x382   :  { %5550 = vmatprep.subr.bf16.mxu0 %v12313_v60  ;;  %5796 = vmatprep.subr.bf16.mxu1 %v12315_v19  ;;  %v5858_v60 = vld [vmem:[#allocation6 + $0xe8] sm:$0xff]  ;;  %v12356_v19 = vcombine.low %v5845_v44, %v5849_v45  ;;  %v12365_v61 = vcombine.high %v5853_v54, %v5857_v56  ;;  %v5901_v44 = vld [vmem:[#allocation6 + $0x240] sm:$0xff] }
 0x383   :  { %v12367_v62 = vcombine.high %v5854_v58, %v5858_v60  ;;  %v5905_v45 = vld [vmem:[#allocation6 + $0x260] sm:$0xff] }
 0x385   :  { %5551 = vmatpush1.bf16.msra.mxu0 %v12312_v1  ;;  %5797 = vmatpush1.bf16.msra.mxu1 %v12314_v39  ;;  %v5862_v1 = vld [vmem:[#allocation6 + $0x108] sm:$0xff] }
 0x386   :  { %5552 = vmatprep.subr.bf16.mxu0 %v12321_v2  ;;  %5798 = vmatprep.subr.bf16.mxu1 %v12323_v3  ;;  %v5866_v39 = vld [vmem:[#allocation6 + $0x128] sm:$0xff]  ;;  %v12364_v2 = vcombine.low %v5853_v54, %v5857_v56  ;;  %v12366_v3 = vcombine.low %v5854_v58, %v5858_v60  ;;  %v5913_v54 = vld [vmem:[#allocation6 + $0x2a0] sm:$0xff]  ;;  %v12412_v60 = vcombine.low %v5901_v44, %v5905_v45 }
 0x387   :  { %v12375_v5 = vcombine.high %v5862_v1, %v5866_v39  ;;  %v5910_v56 = vld [vmem:[#allocation6 + $0x288] sm:$0xff] }
 0x388   :  { %v5914_v58 = vld [vmem:[#allocation6 + $0x2a8] sm:$0xff] }
 0x389   :  { %5553 = vmatpush1.bf16.msra.mxu0 %v12320_v10  ;;  %5799 = vmatpush1.bf16.msra.mxu1 %v12322_v46  ;;  %v5870_v10 = vld [vmem:[#allocation6 + $0x148] sm:$0xff] }
 0x38a   :  { %5554 = vmatprep.subr.bf16.mxu0 %v12329_v11  ;;  %5800 = vmatprep.subr.bf16.mxu1 %v12331_v13  ;;  %v5874_v46 = vld [vmem:[#allocation6 + $0x168] sm:$0xff]  ;;  %v12372_v11 = vcombine.low %v5861_v63, %v5865_v0  ;;  %v12374_v13 = vcombine.low %v5862_v1, %v5866_v39  ;;  %v5921_v63 = vld [vmem:[#allocation6 + $0x2e0] sm:$0xff] }
 0x38b   :  { %v12383_v17 = vcombine.high %v5870_v10, %v5874_v46  ;;  %v5918_v0 = vld [vmem:[#allocation6 + $0x2c8] sm:$0xff] }
 0x38c   :  { %v5922_v1 = vld [vmem:[#allocation6 + $0x2e8] sm:$0xff] }
 0x38d   :  { %5555 = vmatpush1.bf16.msra.mxu0 %v12328_v21  ;;  %5801 = vmatpush1.bf16.msra.mxu1 %v12330_v22  ;;  %v5882_v21 = vld [vmem:[#allocation6 + $0x1a8] sm:$0xff]  ;;  %v12380_v22 = vcombine.low %v5869_v7, %v5873_v8  ;;  %v5929_v7 = vld [vmem:[#allocation6 + $0x320] sm:$0xff] }
 0x38e   :  { %5556 = vmatprep.subr.bf16.mxu0 %v12337_v53  ;;  %5802 = vmatprep.subr.bf16.mxu1 %v12339_v26  ;;  %v12382_v53 = vcombine.low %v5870_v10, %v5874_v46  ;;  %v12389_v26 = vcombine.high %v5877_v57, %v5881_v18  ;;  %v12391_v55 = vcombine.high %v5878_v20, %v5882_v21  ;;  %v5926_v8 = vld [vmem:[#allocation6 + $0x308] sm:$0xff] }
 0x38f   :  { %v5930_v10 = vld [vmem:[#allocation6 + $0x328] sm:$0xff] }
 0x391   :  { %5557 = vmatpush1.bf16.msra.mxu0 %v12336_v12  ;;  %5803 = vmatpush1.bf16.msra.mxu1 %v12338_v32  ;;  %v12388_v12 = vcombine.low %v5877_v57, %v5881_v18  ;;  %v12390_v32 = vcombine.low %v5878_v20, %v5882_v21  ;;  %v5937_v57 = vld [vmem:[#allocation6 + $0x360] sm:$0xff]  ;;  %v5934_v18 = vld [vmem:[#allocation6 + $0x348] sm:$0xff] }
 0x392   :  { %8943 = vmatprep.subr.bf16.mxu0 %v12341_v33  ;;  %9107 = vmatprep.subr.bf16.mxu1 %v12343_v36  ;;  %v12397_v33 = vcombine.high %v5885_v27, %v5889_v28  ;;  %v12399_v36 = vcombine.high %v5886_v29, %v5890_v30  ;;  %v5938_v20 = vld [vmem:[#allocation6 + $0x368] sm:$0xff]  ;;  %v5941_v27 = vld [vmem:[#allocation6 + $0x380] sm:$0xff]  ;;  %v14206_v29 = vsub.s32 3, %v14186_v34 }
 0x393   :  { %v5945_v28 = vld [vmem:[#allocation6 + $0x3a0] sm:$0xff]  ;;  %v5942_v30 = vld [vmem:[#allocation6 + $0x388] sm:$0xff] }
 0x394   :  { %5559 = vmatmul.mubr.bf16.vlgmr.msra.gmra.mrb[4].mxu0 %v14152_v47  ;;  %5805 = vmatmul.mubr.bf16.vlgmr.msra.gmra.mrb[4].mxu1 %v14152_v47  ;;  %v12358_v47 = vcombine.low %v5846_v49, %v5850_v50  ;;  %v5906_v49 = vld [vmem:[#allocation6 + $0x268] sm:$0xff]  ;;  %v12404_v50 = vcombine.low %v5893_v37, %v5897_v38 }
 0x395   :  { %8944 = vmatpush1.bf16.msra.mxu0 %v12340_v42  ;;  %8975 = vmatprep.mubr.bf16.mxu0 %v14196_v48  ;;  %v5898_v42 = vld [vmem:[#allocation6 + $0x228] sm:$0xff] }
 0x396   :  { %9108 = vmatpush1.bf16.msra.mxu1 %v12342_v35  ;;  %9139 = vmatprep.mubr.bf16.mxu1 %v14196_v48  ;;  %v12405_v35 = vcombine.high %v5893_v37, %v5897_v38  ;;  %v12453_v37 = vcombine.high %v5941_v27, %v5945_v28 }
 0x397   :  { %8945 = vmatprep.subr.bf16.mxu0 %v12349_v43  ;;  %9109 = vmatprep.subr.bf16.mxu1 %v12351_v24  ;;  %v12407_v43 = vcombine.high %v5894_v41, %v5898_v42  ;;  %v5902_v24 = vld [vmem:[#allocation6 + $0x248] sm:$0xff] }
 0x399   :  { %8946 = vmatpush1.bf16.msra.mxu0 %v12348_v25  ;;  %v12406_v25 = vcombine.low %v5894_v41, %v5898_v42  ;;  %v5949_v41 = vld [vmem:[#allocation6 + $0x3c0] sm:$0xff] }
 0x39a   :  { %9110 = vmatpush1.bf16.msra.mxu1 %v12350_v51  ;;  %8947 = vmatprep.subr.bf16.mxu0 %v12357_v59  ;;  %v12413_v51 = vcombine.high %v5901_v44, %v5905_v45  ;;  %v12415_v59 = vcombine.high %v5902_v24, %v5906_v49  ;;  %v5953_v42 = vld [vmem:[#allocation6 + $0x3e0] sm:$0xff] }
 0x39b   :  { %9111 = vmatprep.subr.bf16.mxu1 %v12359_v52  ;;  %v5909_v52 = vld [vmem:[#allocation6 + $0x280] sm:$0xff] }
 0x39c   :  { %v12420_v39 = vcombine.low %v5909_v52, %v5913_v54 }
 0x39d   :  { %8948 = vmatpush1.bf16.msra.mxu0 %v12356_v19  ;;  %v12414_v19 = vcombine.low %v5902_v24, %v5906_v49  ;;  %v12461_v24 = vcombine.high %v5949_v41, %v5953_v42 }
 0x39e   :  { %9112 = vmatpush1.bf16.msra.mxu1 %v12358_v47  ;;  %8949 = vmatprep.subr.bf16.mxu0 %v12365_v61  ;;  %v12421_v47 = vcombine.high %v5909_v52, %v5913_v54  ;;  %v12423_v61 = vcombine.high %v5910_v56, %v5914_v58  ;;  %v5962_v52 = vld [vmem:[#allocation6 + $0x428] sm:$0xff]  ;;  %v12460_v54 = vcombine.low %v5949_v41, %v5953_v42 }
 0x39f   :  { %9113 = vmatprep.subr.bf16.mxu1 %v12367_v62  ;;  %v5917_v62 = vld [vmem:[#allocation6 + $0x2c0] sm:$0xff]  ;;  %v5998_v41 = vld [vmem:[#allocation6 + $0x548] sm:$0xff] }
 0x3a0   :  { %v12428_v46 = vcombine.low %v5917_v62, %v5921_v63  ;;  %v6002_v42 = vld [vmem:[#allocation6 + $0x568] sm:$0xff] }
 0x3a1   :  { %8950 = vmatpush1.bf16.msra.mxu0 %v12364_v2  ;;  %v12422_v2 = vcombine.low %v5910_v56, %v5914_v58 }
 0x3a2   :  { %9114 = vmatpush1.bf16.msra.mxu1 %v12366_v3  ;;  %8951 = vmatprep.subr.bf16.mxu0 %v12373_v4  ;;  %v12429_v3 = vcombine.high %v5917_v62, %v5921_v63  ;;  %v12431_v4 = vcombine.high %v5918_v0, %v5922_v1  ;;  %v5966_v63 = vld [vmem:[#allocation6 + $0x448] sm:$0xff] }
 0x3a3   :  { %9115 = vmatprep.subr.bf16.mxu1 %v12375_v5  ;;  %v5925_v5 = vld [vmem:[#allocation6 + $0x300] sm:$0xff] }
 0x3a4   :  { %v12436_v21 = vcombine.low %v5925_v5, %v5929_v7 }
 0x3a5   :  { %8952 = vmatpush1.bf16.msra.mxu0 %v12372_v11  ;;  %v12430_v11 = vcombine.low %v5918_v0, %v5922_v1  ;;  %v5970_v0 = vld [vmem:[#allocation6 + $0x468] sm:$0xff] }
 0x3a6   :  { %9116 = vmatpush1.bf16.msra.mxu1 %v12374_v13  ;;  %8953 = vmatprep.subr.bf16.mxu0 %v12381_v14  ;;  %v12437_v13 = vcombine.high %v5925_v5, %v5929_v7  ;;  %v12439_v14 = vcombine.high %v5926_v8, %v5930_v10  ;;  %v12479_v5 = vcombine.high %v5966_v63, %v5970_v0  ;;  %v5974_v7 = vld [vmem:[#allocation6 + $0x488] sm:$0xff] }
 0x3a7   :  { %9117 = vmatprep.subr.bf16.mxu1 %v12383_v17  ;;  %v5933_v17 = vld [vmem:[#allocation6 + $0x340] sm:$0xff] }
 0x3a9   :  { %8954 = vmatpush1.bf16.msra.mxu0 %v12380_v22  ;;  %v14203_v22 = vsub.s32 0, %v14186_v34 }
 0x3aa   :  { %9118 = vmatpush1.bf16.msra.mxu1 %v12382_v53  ;;  %8955 = vmatprep.subr.bf16.mxu0 %v12389_v26  ;;  %v12438_v53 = vcombine.low %v5926_v8, %v5930_v10  ;;  %v12445_v26 = vcombine.high %v5933_v17, %v5937_v57  ;;  %v5978_v8 = vld [vmem:[#allocation6 + $0x4a8] sm:$0xff] }
 0x3ab   :  { %9119 = vmatprep.subr.bf16.mxu1 %v12391_v55  ;;  %v12447_v55 = vcombine.high %v5934_v18, %v5938_v20 }
 0x3ad   :  { %8956 = vmatpush1.bf16.msra.mxu0 %v12388_v12  ;;  %v5946_v12 = vld [vmem:[#allocation6 + $0x3a8] sm:$0xff] }
 0x3ae   :  { %9120 = vmatpush1.bf16.msra.mxu1 %v12390_v32  ;;  %8957 = vmatprep.subr.bf16.mxu0 %v12397_v33  ;;  %v12444_v32 = vcombine.low %v5933_v17, %v5937_v57  ;;  %v910_v33 = vrot.slane %v14191_v9, %v14203_v22  ;;  %v12455_v38 = vcombine.high %v5942_v30, %v5946_v12  ;;  %v5985_v17 = vld [vmem:[#allocation6 + $0x4e0] sm:$0xff]  ;;  %v5982_v57 = vld [vmem:[#allocation6 + $0x4c8] sm:$0xff] }
 0x3af   :  { %9121 = vmatprep.subr.bf16.mxu1 %v12399_v36  ;;  %v12446_v36 = vcombine.low %v5934_v18, %v5938_v20  ;;  %v12454_v45 = vcombine.low %v5942_v30, %v5946_v12  ;;  %v5986_v18 = vld [vmem:[#allocation6 + $0x4e8] sm:$0xff] }
 0x3b0   :  { %v13110_v44 = vadd.f32 %v14170_v31, %v910_v33  ;;  %v5994_v30 = vld [vmem:[#allocation6 + $0x528] sm:$0xff] }
 0x3b1   :  { %8958 = vmatpush1.bf16.msra.mxu0 %v12396_v23  ;;  %v922_v23 = vrot.slane %v14191_v9, %v14206_v29 }
 0x3b2   :  { %9122 = vmatpush1.bf16.msra.mxu1 %v12398_v16  ;;  %8959 = vmatprep.subr.bf16.mxu0 %v12405_v35  ;;  %v5950_v16 = vld [vmem:[#allocation6 + $0x3c8] sm:$0xff]  ;;  %v5813_v56 = vmax.f32 %v13110_v44, 0.0  ;;  %v6005_v44 = vld [vmem:[#allocation6 + $0x580] sm:$0xff] }
 0x3b3   :  { %9123 = vmatprep.subr.bf16.mxu1 %v12407_v43  ;;  %v5954_v35 = vld [vmem:[#allocation6 + $0x3e8] sm:$0xff]  ;;  %v12452_v43 = vcombine.low %v5941_v27, %v5945_v28  ;;  %v5993_v27 = vld [vmem:[#allocation6 + $0x520] sm:$0xff] }
 0x3b4   :  { %v12463_v49 = vcombine.high %v5950_v16, %v5954_v35  ;;  %v12462_v58 = vcombine.low %v5950_v16, %v5954_v35  ;;  %v14214_v1 = vpack.c.bf16 %v5813_v56, %v5813_v56  ;;  %v5990_v28 = vld [vmem:[#allocation6 + $0x508] sm:$0xff] }
 0x3b5   :  { %8960 = vmatpush1.bf16.msra.mxu0 %v12404_v50  ;;  %v5957_v50 = vld [vmem:[#allocation6 + $0x400] sm:$0xff]  ;;  %v12502_v16 = vcombine.low %v5990_v28, %v5994_v30  ;;  %v6014_v56 = vld [vmem:[#allocation6 + $0x5c8] sm:$0xff] }
 0x3b6   :  { %9124 = vmatpush1.bf16.msra.mxu1 %v12406_v25  ;;  %8961 = vmatprep.subr.bf16.mxu0 %v12413_v51  ;;  %v5961_v25 = vld [vmem:[#allocation6 + $0x420] sm:$0xff]  ;;  %v13113_v51 = vadd.f32 %v14176_v40, %v922_v23 }
 0x3b7   :  { %9125 = vmatprep.subr.bf16.mxu1 %v12415_v59  ;;  %v5958_v59 = vld [vmem:[#allocation6 + $0x408] sm:$0xff]  ;;  %v12468_v62 = vcombine.low %v5957_v50, %v5961_v25 }
 0x3b8   :  { %v12471_v31 = vcombine.high %v5958_v59, %v5962_v52  ;;  %v12470_v40 = vcombine.low %v5958_v59, %v5962_v52  ;;  %v6013_v52 = vld [vmem:[#allocation6 + $0x5c0] sm:$0xff] }
 0x3b9   :  { %8962 = vmatpush1.bf16.msra.mxu0 %v12412_v60  ;;  %v12469_v60 = vcombine.high %v5957_v50, %v5961_v25  ;;  %v12510_v25 = vcombine.low %v5998_v41, %v6002_v42 }
 0x3ba   :  { %9126 = vmatpush1.bf16.msra.mxu1 %v12414_v19  ;;  %8963 = vmatprep.subr.bf16.mxu0 %v12421_v47  ;;  %v5816_v19 = vmax.f32 %v13113_v51, 0.0  ;;  %v5965_v47 = vld [vmem:[#allocation6 + $0x440] sm:$0xff] }
 0x3bb   :  { %9127 = vmatprep.subr.bf16.mxu1 %v12423_v61  ;;  %v5969_v61 = vld [vmem:[#allocation6 + $0x460] sm:$0xff] }
 0x3bc   :  { %v12476_v10 = vcombine.low %v5965_v47, %v5969_v61 }
 0x3bd   :  { %8964 = vmatpush1.bf16.msra.mxu0 %v12420_v39  ;;  %v12477_v39 = vcombine.high %v5965_v47, %v5969_v61  ;;  %v6021_v61 = vld [vmem:[#allocation6 + $0x600] sm:$0xff] }
 0x3be   :  { %9128 = vmatpush1.bf16.msra.mxu1 %v12422_v2  ;;  %8965 = vmatprep.subr.bf16.mxu0 %v12429_v3  ;;  %v5973_v2 = vld [vmem:[#allocation6 + $0x480] sm:$0xff] }
 0x3bf   :  { %9129 = vmatprep.subr.bf16.mxu1 %v12431_v4  ;;  %v5977_v3 = vld [vmem:[#allocation6 + $0x4a0] sm:$0xff]  ;;  %v14216_v4 = vpack.c.bf16 %v5816_v19, %v5816_v19 }
 0x3c0   :  { %v12484_v20 = vcombine.low %v5973_v2, %v5977_v3 }
 0x3c1   :  { %8966 = vmatpush1.bf16.msra.mxu0 %v12428_v46  ;;  %v12478_v46 = vcombine.low %v5966_v63, %v5970_v0  ;;  %v6022_v63 = vld [vmem:[#allocation6 + $0x608] sm:$0xff] }
 0x3c2   :  { %9130 = vmatpush1.bf16.msra.mxu1 %v12430_v11  ;;  %8967 = vmatprep.subr.bf16.mxu0 %v12437_v13  ;;  %v12485_v11 = vcombine.high %v5973_v2, %v5977_v3  ;;  %v12487_v13 = vcombine.high %v5974_v7, %v5978_v8  ;;  %v6026_v0 = vld [vmem:[#allocation6 + $0x628] sm:$0xff] }
 0x3c3   :  { %9131 = vmatprep.subr.bf16.mxu1 %v12439_v14  ;;  %v5981_v14 = vld [vmem:[#allocation6 + $0x4c0] sm:$0xff]  ;;  %v12535_v3 = vcombine.high %v6022_v63, %v6026_v0 }
 0x3c4   :  { %v12492_v12 = vcombine.low %v5981_v14, %v5985_v17 }
 0x3c5   :  { %8968 = vmatpush1.bf16.msra.mxu0 %v12436_v21  ;;  %v12486_v21 = vcombine.low %v5974_v7, %v5978_v8  ;;  %v6033_v7 = vld [vmem:[#allocation6 + $0x660] sm:$0xff]  ;;  %v6030_v8 = vld [vmem:[#allocation6 + $0x648] sm:$0xff] }
 0x3c6   :  { %9132 = vmatpush1.bf16.msra.mxu1 %v12438_v53  ;;  %8969 = vmatprep.subr.bf16.mxu0 %v12445_v26  ;;  %v12493_v53 = vcombine.high %v5981_v14, %v5985_v17  ;;  %v12495_v26 = vcombine.high %v5982_v57, %v5986_v18  ;;  %v6037_v17 = vld [vmem:[#allocation6 + $0x680] sm:$0xff] }
 0x3c7   :  { %9133 = vmatprep.subr.bf16.mxu1 %v12447_v55  ;;  %v5989_v55 = vld [vmem:[#allocation6 + $0x500] sm:$0xff] }
 0x3c8   :  { %v12501_v33 = vcombine.high %v5989_v55, %v5993_v27  ;;  %v12500_v23 = vcombine.low %v5989_v55, %v5993_v27  ;;  %v6045_v27 = vld [vmem:[#allocation6 + $0x6c0] sm:$0xff] }
 0x3c9   :  { %8970 = vmatpush1.bf16.msra.mxu0 %v12444_v32  ;;  %v12494_v32 = vcombine.low %v5982_v57, %v5986_v18  ;;  %v6041_v57 = vld [vmem:[#allocation6 + $0x6a0] sm:$0xff]  ;;  %v6038_v18 = vld [vmem:[#allocation6 + $0x688] sm:$0xff] }
 0x3ca   :  { %9134 = vmatpush1.bf16.msra.mxu1 %v12446_v36  ;;  %8971 = vmatprep.subr.bf16.mxu0 %v12453_v37  ;;  %v12503_v36 = vcombine.high %v5990_v28, %v5994_v30  ;;  %v5997_v37 = vld [vmem:[#allocation6 + $0x540] sm:$0xff]  ;;  %v6046_v30 = vld [vmem:[#allocation6 + $0x6c8] sm:$0xff] }
 0x3cb   :  { %9135 = vmatprep.subr.bf16.mxu1 %v12455_v38  ;;  %v6001_v38 = vld [vmem:[#allocation6 + $0x560] sm:$0xff] }
 0x3cc   :  { %v12509_v35 = vcombine.high %v5997_v37, %v6001_v38  ;;  %v12508_v50 = vcombine.low %v5997_v37, %v6001_v38  ;;  %v6049_v28 = vld [vmem:[#allocation6 + $0x6e0] sm:$0xff] }
 0x3cd   :  { %8972 = vmatpush1.bf16.msra.mxu0 %v12452_v43  ;;  %v12511_v43 = vcombine.high %v5998_v41, %v6002_v42  ;;  %v6053_v38 = vld [vmem:[#allocation6 + $0x700] sm:$0xff]  ;;  %v6054_v42 = vld [vmem:[#allocation6 + $0x708] sm:$0xff] }
 0x3ce   :  { %9136 = vmatpush1.bf16.msra.mxu1 %v12454_v45  ;;  %8973 = vmatprep.subr.bf16.mxu0 %v12461_v24  ;;  %v6009_v45 = vld [vmem:[#allocation6 + $0x5a0] sm:$0xff]  ;;  %v6006_v24 = vld [vmem:[#allocation6 + $0x588] sm:$0xff] }
 0x3cf   :  { %9137 = vmatprep.subr.bf16.mxu1 %v12463_v49  ;;  %v6010_v49 = vld [vmem:[#allocation6 + $0x5a8] sm:$0xff]  ;;  %v12517_v51 = vcombine.high %v6005_v44, %v6009_v45  ;;  %v6057_v41 = vld [vmem:[#allocation6 + $0x720] sm:$0xff] }
 0x3d0   :  { %v12519_v59 = vcombine.high %v6006_v24, %v6010_v49 }
 0x3d1   :  { %8974 = vmatpush1.bf16.msra.mxu0 %v12460_v54  ;;  %v6017_v54 = vld [vmem:[#allocation6 + $0x5e0] sm:$0xff] }
 0x3d2   :  { %9138 = vmatpush1.bf16.msra.mxu1 %v12462_v58  ;;  %8984 = vmatprep.subr.bf16.mxu0 %v12469_v60  ;;  %v6018_v58 = vld [vmem:[#allocation6 + $0x5e8] sm:$0xff]  ;;  %v12516_v60 = vcombine.low %v6005_v44, %v6009_v45  ;;  %v12525_v19 = vcombine.high %v6013_v52, %v6017_v54  ;;  %v6061_v45 = vld [vmem:[#allocation6 + $0x740] sm:$0xff] }
 0x3d3   :  { %9148 = vmatprep.subr.bf16.mxu1 %v12471_v31  ;;  %v12518_v31 = vcombine.low %v6006_v24, %v6010_v49  ;;  %v12527_v47 = vcombine.high %v6014_v56, %v6018_v58  ;;  %v6065_v24 = vld [vmem:[#allocation6 + $0x760] sm:$0xff]  ;;  %v6062_v49 = vld [vmem:[#allocation6 + $0x748] sm:$0xff] }
 0x3d4   :  { %8976 = vmatmul.mubr.bf16.vlgmr.msra.gmra.mrb[8].mxu0 %v14214_v1 }
 0x3d5   :  { %9140 = vmatmul.mubr.bf16.vlgmr.msra.gmra.mrb[8].mxu1 %v14214_v1  ;;  %8985 = vmatpush1.bf16.msra.mxu0 %v12468_v62  ;;  %v6025_v62 = vld [vmem:[#allocation6 + $0x620] sm:$0xff] }
 0x3d6   :  { %9016 = vmatprep.mubr.bf16.mxu0 %v14216_v4  ;;  %9149 = vmatpush1.bf16.msra.mxu1 %v12470_v40  ;;  %v12524_v40 = vcombine.low %v6013_v52, %v6017_v54  ;;  %v12533_v2 = vcombine.high %v6021_v61, %v6025_v62  ;;  %v12573_v52 = vcombine.high %v6061_v45, %v6065_v24 }
 0x3d7   :  { %9180 = vmatprep.mubr.bf16.mxu1 %v14216_v4  ;;  %8986 = vmatprep.subr.bf16.mxu0 %v12477_v39  ;;  %v12526_v39 = vcombine.low %v6014_v56, %v6018_v58  ;;  %v6069_v56 = vld [vmem:[#allocation6 + $0x780] sm:$0xff] }
 0x3d8   :  { %9150 = vmatprep.subr.bf16.mxu1 %v12479_v5  ;;  %v6029_v5 = vld [vmem:[#allocation6 + $0x640] sm:$0xff] }
 0x3d9   :  { %8987 = vmatpush1.bf16.msra.mxu0 %v12476_v10  ;;  %v6034_v10 = vld [vmem:[#allocation6 + $0x668] sm:$0xff]  ;;  %v6073_v58 = vld [vmem:[#allocation6 + $0x7a0] sm:$0xff] }
 0x3da   :  { %9151 = vmatpush1.bf16.msra.mxu1 %v12478_v46  ;;  %8988 = vmatprep.subr.bf16.mxu0 %v12485_v11  ;;  %v12532_v46 = vcombine.low %v6021_v61, %v6025_v62  ;;  %v12534_v11 = vcombine.low %v6022_v63, %v6026_v0  ;;  %v12543_v14 = vcombine.high %v6030_v8, %v6034_v10  ;;  %v6077_v0 = vld [vmem:[#allocation6 + $0x7c0] sm:$0xff] }
 0x3db   :  { %9152 = vmatprep.subr.bf16.mxu1 %v12487_v13  ;;  %v12541_v13 = vcombine.high %v6029_v5, %v6033_v7  ;;  %v12581_v62 = vcombine.high %v6069_v56, %v6073_v58 }
 0x3dd   :  { %8989 = vmatpush1.bf16.msra.mxu0 %v12484_v20  ;;  %v6042_v20 = vld [vmem:[#allocation6 + $0x6a8] sm:$0xff] }
 0x3de   :  { %9153 = vmatpush1.bf16.msra.mxu1 %v12486_v21  ;;  %8990 = vmatprep.subr.bf16.mxu0 %v12493_v53  ;;  %v12540_v21 = vcombine.low %v6029_v5, %v6033_v7  ;;  %v12542_v53 = vcombine.low %v6030_v8, %v6034_v10  ;;  %v12551_v55 = vcombine.high %v6038_v18, %v6042_v20  ;;  %v6085_v10 = vld [vmem:[#allocation6 + $0x800] sm:$0xff] }
 0x3df   :  { %9154 = vmatprep.subr.bf16.mxu1 %v12495_v26  ;;  %v12549_v26 = vcombine.high %v6037_v17, %v6041_v57 }
 0x3e1   :  { %8991 = vmatpush1.bf16.msra.mxu0 %v12492_v12  ;;  %v6050_v12 = vld [vmem:[#allocation6 + $0x6e8] sm:$0xff] }
 0x3e2   :  { %9155 = vmatpush1.bf16.msra.mxu1 %v12494_v32  ;;  %8992 = vmatprep.subr.bf16.mxu0 %v12501_v33  ;;  %v12548_v32 = vcombine.low %v6037_v17, %v6041_v57  ;;  %v12550_v33 = vcombine.low %v6038_v18, %v6042_v20  ;;  %v12559_v37 = vcombine.high %v6046_v30, %v6050_v12 }
 0x3e3   :  { %9156 = vmatprep.subr.bf16.mxu1 %v12503_v36  ;;  %v12557_v36 = vcombine.high %v6045_v27, %v6049_v28 }
 0x3e5   :  { %8993 = vmatpush1.bf16.msra.mxu0 %v12500_v23  ;;  %v6058_v23 = vld [vmem:[#allocation6 + $0x728] sm:$0xff] }
 0x3e6   :  { %9157 = vmatpush1.bf16.msra.mxu1 %v12502_v16  ;;  %8994 = vmatprep.subr.bf16.mxu0 %v12509_v35  ;;  %v12556_v16 = vcombine.low %v6045_v27, %v6049_v28  ;;  %v12558_v35 = vcombine.low %v6046_v30, %v6050_v12  ;;  %v12567_v44 = vcombine.high %v6054_v42, %v6058_v23 }
 0x3e7   :  { %9158 = vmatprep.subr.bf16.mxu1 %v12511_v43  ;;  %v12565_v43 = vcombine.high %v6053_v38, %v6057_v41 }
 0x3e9   :  { %8995 = vmatpush1.bf16.msra.mxu0 %v12508_v50  ;;  %v6066_v50 = vld [vmem:[#allocation6 + $0x768] sm:$0xff] }
 0x3ea   :  { %9159 = vmatpush1.bf16.msra.mxu1 %v12510_v25  ;;  %8996 = vmatprep.subr.bf16.mxu0 %v12517_v51  ;;  %v12564_v25 = vcombine.low %v6053_v38, %v6057_v41  ;;  %v14223_v51 = vsub.s32 2, %v14186_v34  ;;  %v12575_v54 = vcombine.high %v6062_v49, %v6066_v50  ;;  %v12574_v61 = vcombine.low %v6062_v49, %v6066_v50 }
 0x3eb   :  { %9160 = vmatprep.subr.bf16.mxu1 %v12519_v59  ;;  %v12566_v59 = vcombine.low %v6054_v42, %v6058_v23 }
 0x3ed   :  { %8997 = vmatpush1.bf16.msra.mxu0 %v12516_v60  ;;  %v6070_v60 = vld [vmem:[#allocation6 + $0x788] sm:$0xff] }
 0x3ee   :  { %9161 = vmatpush1.bf16.msra.mxu1 %v12518_v31  ;;  %8998 = vmatprep.subr.bf16.mxu0 %v12525_v19  ;;  %v6074_v31 = vld [vmem:[#allocation6 + $0x7a8] sm:$0xff]  ;;  %v12572_v19 = vcombine.low %v6061_v45, %v6065_v24 }
 0x3ef   :  { %9162 = vmatprep.subr.bf16.mxu1 %v12527_v47  ;;  %v918_v47 = vrot.slane %v14191_v9, %v14223_v51  ;;  %v12583_v63 = vcombine.high %v6070_v60, %v6074_v31  ;;  %v12582_v7 = vcombine.low %v6070_v60, %v6074_v31 }
 0x3f1   :  { %8999 = vmatpush1.bf16.msra.mxu0 %v12524_v40  ;;  %v6081_v40 = vld [vmem:[#allocation6 + $0x7e0] sm:$0xff]  ;;  %v13112_v5 = vadd.f32 %v14172_v15, %v918_v47 }
 0x3f2   :  { %9163 = vmatpush1.bf16.msra.mxu1 %v12526_v39  ;;  %9000 = vmatprep.subr.bf16.mxu0 %v12533_v2  ;;  %v6078_v39 = vld [vmem:[#allocation6 + $0x7c8] sm:$0xff]  ;;  %v12589_v8 = vcombine.high %v6077_v0, %v6081_v40  ;;  %v6093_v15 = vld [vmem:[#allocation6 + $0x840] sm:$0xff] }
 0x3f3   :  { %9164 = vmatprep.subr.bf16.mxu1 %v12535_v3  ;;  %v6082_v2 = vld [vmem:[#allocation6 + $0x7e8] sm:$0xff]  ;;  %v12580_v3 = vcombine.low %v6069_v56, %v6073_v58  ;;  %v5815_v17 = vmax.f32 %v13112_v5, 0.0  ;;  %v6129_v47 = vld [vmem:[#allocation6 + $0x960] sm:$0xff] }
 0x3f4   :  { %v12591_v9 = vcombine.high %v6078_v39, %v6082_v2  ;;  %v12590_v57 = vcombine.low %v6078_v39, %v6082_v2  ;;  %v6133_v2 = vld [vmem:[#allocation6 + $0x980] sm:$0xff]  ;;  %v6134_v5 = vld [vmem:[#allocation6 + $0x988] sm:$0xff] }
 0x3f5   :  { %9001 = vmatpush1.bf16.msra.mxu0 %v12532_v46  ;;  %v6089_v46 = vld [vmem:[#allocation6 + $0x820] sm:$0xff]  ;;  %v14228_v27 = vpack.c.bf16 %v5815_v17, %v5815_v17  ;;  %v6146_v17 = vld [vmem:[#allocation6 + $0x9e8] sm:$0xff] }
 0x3f6   :  { %9165 = vmatpush1.bf16.msra.mxu1 %v12534_v11  ;;  %9002 = vmatprep.subr.bf16.mxu0 %v12541_v13  ;;  %v6086_v11 = vld [vmem:[#allocation6 + $0x808] sm:$0xff]  ;;  %v12597_v18 = vcombine.high %v6085_v10, %v6089_v46 }
 0x3f7   :  { %9166 = vmatprep.subr.bf16.mxu1 %v12543_v14  ;;  %v6090_v13 = vld [vmem:[#allocation6 + $0x828] sm:$0xff]  ;;  %v12588_v14 = vcombine.low %v6077_v0, %v6081_v40 }
 0x3f8   :  { %v12599_v20 = vcombine.high %v6086_v11, %v6090_v13  ;;  %v12598_v28 = vcombine.low %v6086_v11, %v6090_v13  ;;  %v6141_v11 = vld [vmem:[#allocation6 + $0x9c0] sm:$0xff] }
 0x3f9   :  { %9003 = vmatpush1.bf16.msra.mxu0 %v12540_v21  ;;  %v6097_v21 = vld [vmem:[#allocation6 + $0x860] sm:$0xff] }
 0x3fa   :  { %9167 = vmatpush1.bf16.msra.mxu1 %v12542_v53  ;;  %9004 = vmatprep.subr.bf16.mxu0 %v12549_v26  ;;  %v6094_v53 = vld [vmem:[#allocation6 + $0x848] sm:$0xff]  ;;  %v12605_v30 = vcombine.high %v6093_v15, %v6097_v21  ;;  %v12604_v38 = vcombine.low %v6093_v15, %v6097_v21  ;;  %v6145_v13 = vld [vmem:[#allocation6 + $0x9e0] sm:$0xff] }
 0x3fb   :  { %9168 = vmatprep.subr.bf16.mxu1 %v12551_v55  ;;  %v6098_v26 = vld [vmem:[#allocation6 + $0x868] sm:$0xff]  ;;  %v12596_v55 = vcombine.low %v6085_v10, %v6089_v46  ;;  %v6149_v21 = vld [vmem:[#allocation6 + $0xa00] sm:$0xff] }
 0x3fc   :  { %v12607_v12 = vcombine.high %v6094_v53, %v6098_v26  ;;  %v12606_v41 = vcombine.low %v6094_v53, %v6098_v26  ;;  %v6153_v53 = vld [vmem:[#allocation6 + $0xa20] sm:$0xff]  ;;  %v6150_v26 = vld [vmem:[#allocation6 + $0xa08] sm:$0xff] }
 0x3fd   :  { %9005 = vmatpush1.bf16.msra.mxu0 %v12548_v32  ;;  %v6101_v32 = vld [vmem:[#allocation6 + $0x880] sm:$0xff] }
 0x3fe   :  { %9169 = vmatpush1.bf16.msra.mxu1 %v12550_v33  ;;  %9006 = vmatprep.subr.bf16.mxu0 %v12557_v36  ;;  %v6105_v33 = vld [vmem:[#allocation6 + $0x8a0] sm:$0xff]  ;;  %v6102_v36 = vld [vmem:[#allocation6 + $0x888] sm:$0xff] }
 0x3ff   :  { %9170 = vmatprep.subr.bf16.mxu1 %v12559_v37  ;;  %v6106_v37 = vld [vmem:[#allocation6 + $0x8a8] sm:$0xff]  ;;  %v12613_v42 = vcombine.high %v6101_v32, %v6105_v33  ;;  %v12612_v45 = vcombine.low %v6101_v32, %v6105_v33  ;;  %v6157_v33 = vld [vmem:[#allocation6 + $0xa40] sm:$0xff] }
 0x400   :  { %v12615_v23 = vcombine.high %v6102_v36, %v6106_v37  ;;  %v12614_v24 = vcombine.low %v6102_v36, %v6106_v37  ;;  %v6161_v36 = vld [vmem:[#allocation6 + $0xa60] sm:$0xff]  ;;  %v6158_v37 = vld [vmem:[#allocation6 + $0xa48] sm:$0xff] }
 0x401   :  { %9007 = vmatpush1.bf16.msra.mxu0 %v12556_v16  ;;  %v6109_v16 = vld [vmem:[#allocation6 + $0x8c0] sm:$0xff] }
 0x402   :  { %9171 = vmatpush1.bf16.msra.mxu1 %v12558_v35  ;;  %9008 = vmatprep.subr.bf16.mxu0 %v12565_v43  ;;  %v6113_v35 = vld [vmem:[#allocation6 + $0x8e0] sm:$0xff]  ;;  %v6110_v43 = vld [vmem:[#allocation6 + $0x8c8] sm:$0xff] }
 0x403   :  { %9172 = vmatprep.subr.bf16.mxu1 %v12567_v44  ;;  %v6114_v44 = vld [vmem:[#allocation6 + $0x8e8] sm:$0xff]  ;;  %v12621_v49 = vcombine.high %v6109_v16, %v6113_v35  ;;  %v12620_v56 = vcombine.low %v6109_v16, %v6113_v35  ;;  %v6165_v35 = vld [vmem:[#allocation6 + $0xa80] sm:$0xff] }
 0x404   :  { %v12623_v50 = vcombine.high %v6110_v43, %v6114_v44  ;;  %v12622_v58 = vcombine.low %v6110_v43, %v6114_v44  ;;  %v6169_v43 = vld [vmem:[#allocation6 + $0xaa0] sm:$0xff]  ;;  %v6166_v44 = vld [vmem:[#allocation6 + $0xa88] sm:$0xff] }
 0x405   :  { %9009 = vmatpush1.bf16.msra.mxu0 %v12564_v25  ;;  %v6117_v25 = vld [vmem:[#allocation6 + $0x900] sm:$0xff] }
 0x406   :  { %9173 = vmatpush1.bf16.msra.mxu1 %v12566_v59  ;;  %9010 = vmatprep.subr.bf16.mxu0 %v12573_v52  ;;  %v6121_v59 = vld [vmem:[#allocation6 + $0x920] sm:$0xff]  ;;  %v6118_v52 = vld [vmem:[#allocation6 + $0x908] sm:$0xff] }
 0x407   :  { %9174 = vmatprep.subr.bf16.mxu1 %v12575_v54  ;;  %v6122_v54 = vld [vmem:[#allocation6 + $0x928] sm:$0xff]  ;;  %v12629_v60 = vcombine.high %v6117_v25, %v6121_v59 }
 0x408   :  { %v12631_v31 = vcombine.high %v6118_v52, %v6122_v54  ;;  %v12630_v0 = vcombine.low %v6118_v52, %v6122_v54  ;;  %v6177_v52 = vld [vmem:[#allocation6 + $0xae0] sm:$0xff]  ;;  %v6174_v54 = vld [vmem:[#allocation6 + $0xac8] sm:$0xff] }
 0x409   :  { %9011 = vmatpush1.bf16.msra.mxu0 %v12572_v19  ;;  %v6125_v19 = vld [vmem:[#allocation6 + $0x940] sm:$0xff] }
 0x40a   :  { %9175 = vmatpush1.bf16.msra.mxu1 %v12574_v61  ;;  %9012 = vmatprep.subr.bf16.mxu0 %v12581_v62  ;;  %v6126_v61 = vld [vmem:[#allocation6 + $0x948] sm:$0xff]  ;;  %v12637_v40 = vcombine.high %v6125_v19, %v6129_v47 }
 0x40b   :  { %9176 = vmatprep.subr.bf16.mxu1 %v12583_v63  ;;  %v6130_v62 = vld [vmem:[#allocation6 + $0x968] sm:$0xff]  ;;  %v12628_v63 = vcombine.low %v6117_v25, %v6121_v59  ;;  %v6173_v59 = vld [vmem:[#allocation6 + $0xac0] sm:$0xff] }
 0x40c   :  { %v12639_v39 = vcombine.high %v6126_v61, %v6130_v62 }
 0x40d   :  { %9013 = vmatpush1.bf16.msra.mxu0 %v12580_v3  ;;  %v6137_v3 = vld [vmem:[#allocation6 + $0x9a0] sm:$0xff] }
 0x40e   :  { %9177 = vmatpush1.bf16.msra.mxu1 %v12582_v7  ;;  %9014 = vmatprep.subr.bf16.mxu0 %v12589_v8  ;;  %v6138_v7 = vld [vmem:[#allocation6 + $0x9a8] sm:$0xff]  ;;  %v12636_v8 = vcombine.low %v6125_v19, %v6129_v47  ;;  %v12645_v10 = vcombine.high %v6133_v2, %v6137_v3  ;;  %v6181_v47 = vld [vmem:[#allocation6 + $0xb00] sm:$0xff] }
 0x40f   :  { %9178 = vmatprep.subr.bf16.mxu1 %v12591_v9  ;;  %v12638_v9 = vcombine.low %v6126_v61, %v6130_v62  ;;  %v12647_v46 = vcombine.high %v6134_v5, %v6138_v7  ;;  %v6185_v61 = vld [vmem:[#allocation6 + $0xb20] sm:$0xff]  ;;  %v6182_v62 = vld [vmem:[#allocation6 + $0xb08] sm:$0xff] }
 0x411   :  { %9015 = vmatpush1.bf16.msra.mxu0 %v12588_v14  ;;  %v6142_v14 = vld [vmem:[#allocation6 + $0x9c8] sm:$0xff] }
 0x412   :  { %9179 = vmatpush1.bf16.msra.mxu1 %v12590_v57  ;;  %9025 = vmatprep.subr.bf16.mxu0 %v12597_v18  ;;  %v12644_v57 = vcombine.low %v6133_v2, %v6137_v3  ;;  %v12646_v18 = vcombine.low %v6134_v5, %v6138_v7  ;;  %v12655_v15 = vcombine.high %v6142_v14, %v6146_v17  ;;  %v6189_v3 = vld [vmem:[#allocation6 + $0xb40] sm:$0xff]  ;;  %v6190_v7 = vld [vmem:[#allocation6 + $0xb48] sm:$0xff] }
 0x413   :  { %9189 = vmatprep.subr.bf16.mxu1 %v12599_v20  ;;  %v12653_v20 = vcombine.high %v6141_v11, %v6145_v13  ;;  %v6193_v5 = vld [vmem:[#allocation6 + $0xb60] sm:$0xff] }
 0x414   :  { %9017 = vmatmul.mubr.bf16.vlgmr.msra.gmra.mrb[8].mxu0 %v14228_v27 }
 0x415   :  { %9181 = vmatmul.mubr.bf16.vlgmr.msra.gmra.mrb[8].mxu1 %v14228_v27  ;;  %9026 = vmatpush1.bf16.msra.mxu0 %v12596_v55  ;;  %v6154_v55 = vld [vmem:[#allocation6 + $0xa28] sm:$0xff] }
 0x416   :  { %9190 = vmatpush1.bf16.msra.mxu1 %v12598_v28  ;;  %9027 = vmatprep.subr.bf16.mxu0 %v12605_v30  ;;  %v12652_v28 = vcombine.low %v6141_v11, %v6145_v13  ;;  %v12654_v30 = vcombine.low %v6142_v14, %v6146_v17  ;;  %v12663_v32 = vcombine.high %v6150_v26, %v6154_v55  ;;  %v6197_v13 = vld [vmem:[#allocation6 + $0xb80] sm:$0xff]  ;;  %v6198_v17 = vld [vmem:[#allocation6 + $0xb88] sm:$0xff] }
 0x417   :  { %9191 = vmatprep.subr.bf16.mxu1 %v12607_v12  ;;  %v12661_v12 = vcombine.high %v6149_v21, %v6153_v53  ;;  %v6201_v14 = vld [vmem:[#allocation6 + $0xba0] sm:$0xff] }
 0x419   :  { %9028 = vmatpush1.bf16.msra.mxu0 %v12604_v38  ;;  %v6162_v38 = vld [vmem:[#allocation6 + $0xa68] sm:$0xff] }
 0x41a   :  { %9192 = vmatpush1.bf16.msra.mxu1 %v12606_v41  ;;  %9029 = vmatprep.subr.bf16.mxu0 %v12613_v42  ;;  %v12660_v41 = vcombine.low %v6149_v21, %v6153_v53  ;;  %v12662_v42 = vcombine.low %v6150_v26, %v6154_v55  ;;  %v12671_v16 = vcombine.high %v6158_v37, %v6162_v38  ;;  %v6205_v53 = vld [vmem:[#allocation6 + $0xbc0] sm:$0xff]  ;;  %v6206_v55 = vld [vmem:[#allocation6 + $0xbc8] sm:$0xff] }
 0x41b   :  { %9193 = vmatprep.subr.bf16.mxu1 %v12615_v23  ;;  %v12669_v23 = vcombine.high %v6157_v33, %v6161_v36  ;;  %v6209_v26 = vld [vmem:[#allocation6 + $0xbe0] sm:$0xff] }
 0x41d   :  { %9030 = vmatpush1.bf16.msra.mxu0 %v12612_v45  ;;  %v6170_v45 = vld [vmem:[#allocation6 + $0xaa8] sm:$0xff] }
 0x41e   :  { %9194 = vmatpush1.bf16.msra.mxu1 %v12614_v24  ;;  %9031 = vmatprep.subr.bf16.mxu0 %v12621_v49  ;;  %v12668_v24 = vcombine.low %v6157_v33, %v6161_v36  ;;  %v12670_v49 = vcombine.low %v6158_v37, %v6162_v38  ;;  %v12679_v25 = vcombine.high %v6166_v44, %v6170_v45  ;;  %v6213_v36 = vld [vmem:[#allocation6 + $0xc00] sm:$0xff]  ;;  %v6214_v38 = vld [vmem:[#allocation6 + $0xc08] sm:$0xff] }
 0x41f   :  { %9195 = vmatprep.subr.bf16.mxu1 %v12623_v50  ;;  %v12677_v50 = vcombine.high %v6165_v35, %v6169_v43  ;;  %v6217_v37 = vld [vmem:[#allocation6 + $0xc20] sm:$0xff] }
 0x421   :  { %9032 = vmatpush1.bf16.msra.mxu0 %v12620_v56  ;;  %v6178_v56 = vld [vmem:[#allocation6 + $0xae8] sm:$0xff] }
 0x422   :  { %9196 = vmatpush1.bf16.msra.mxu1 %v12622_v58  ;;  %9033 = vmatprep.subr.bf16.mxu0 %v12629_v60  ;;  %v12676_v58 = vcombine.low %v6165_v35, %v6169_v43  ;;  %v12678_v60 = vcombine.low %v6166_v44, %v6170_v45  ;;  %v12687_v19 = vcombine.high %v6174_v54, %v6178_v56  ;;  %v925_v43 = vsub.s32 4, %v14186_v34 }
 0x423   :  { %9197 = vmatprep.subr.bf16.mxu1 %v12631_v31  ;;  %v12685_v31 = vcombine.high %v6173_v59, %v6177_v52  ;;  %v929_v44 = vsub.s32 5, %v14186_v34  ;;  %v937_v45 = vsub.s32 7, %v14186_v34 }
 0x425   :  { %9034 = vmatpush1.bf16.msra.mxu0 %v12628_v63  ;;  %v6186_v63 = vld [vmem:[#allocation6 + $0xb28] sm:$0xff] }
 0x426   :  { %9198 = vmatpush1.bf16.msra.mxu1 %v12630_v0  ;;  %9035 = vmatprep.subr.bf16.mxu0 %v12637_v40  ;;  %v12684_v0 = vcombine.low %v6173_v59, %v6177_v52  ;;  %v12686_v40 = vcombine.low %v6174_v54, %v6178_v56  ;;  %v12695_v2 = vcombine.high %v6182_v62, %v6186_v63 }
 0x427   :  { %9199 = vmatprep.subr.bf16.mxu1 %v12639_v39  ;;  %v12693_v39 = vcombine.high %v6181_v47, %v6185_v61 }
 0x429   :  { %9036 = vmatpush1.bf16.msra.mxu0 %v12636_v8  ;;  %v6194_v8 = vld [vmem:[#allocation6 + $0xb68] sm:$0xff] }
 0x42a   :  { %9200 = vmatpush1.bf16.msra.mxu1 %v12638_v9  ;;  %9037 = vmatprep.subr.bf16.mxu0 %v12645_v10  ;;  %v12692_v9 = vcombine.low %v6181_v47, %v6185_v61  ;;  %v12694_v10 = vcombine.low %v6182_v62, %v6186_v63  ;;  %v12703_v11 = vcombine.high %v6190_v7, %v6194_v8 }
 0x42b   :  { %9201 = vmatprep.subr.bf16.mxu1 %v12647_v46  ;;  %v12701_v46 = vcombine.high %v6189_v3, %v6193_v5 }
 0x42d   :  { %9038 = vmatpush1.bf16.msra.mxu0 %v12644_v57  ;;  %v6202_v57 = vld [vmem:[#allocation6 + $0xba8] sm:$0xff] }
 0x42e   :  { %9202 = vmatpush1.bf16.msra.mxu1 %v12646_v18  ;;  %9039 = vmatprep.subr.bf16.mxu0 %v12653_v20  ;;  %v12700_v18 = vcombine.low %v6189_v3, %v6193_v5  ;;  %v12702_v20 = vcombine.low %v6190_v7, %v6194_v8  ;;  %v12711_v21 = vcombine.high %v6198_v17, %v6202_v57  ;;  %v6222_v3 = vld [vmem:[#allocation6 + $0xc48] sm:$0xff] }
 0x42f   :  { %9203 = vmatprep.subr.bf16.mxu1 %v12655_v15  ;;  %v12709_v15 = vcombine.high %v6197_v13, %v6201_v14  ;;  %v6226_v5 = vld [vmem:[#allocation6 + $0xc68] sm:$0xff]  ;;  %v12724_v8 = vcombine.low %v6213_v36, %v6217_v37 }
 0x431   :  { %9040 = vmatpush1.bf16.msra.mxu0 %v12652_v28  ;;  %v6210_v28 = vld [vmem:[#allocation6 + $0xbe8] sm:$0xff] }
 0x432   :  { %9204 = vmatpush1.bf16.msra.mxu1 %v12654_v30  ;;  %9041 = vmatprep.subr.bf16.mxu0 %v12661_v12  ;;  %v12708_v30 = vcombine.low %v6197_v13, %v6201_v14  ;;  %v12710_v12 = vcombine.low %v6198_v17, %v6202_v57  ;;  %v12719_v33 = vcombine.high %v6206_v55, %v6210_v28  ;;  %v6233_v14 = vld [vmem:[#allocation6 + $0xca0] sm:$0xff]  ;;  %v6230_v17 = vld [vmem:[#allocation6 + $0xc88] sm:$0xff] }
 0x433   :  { %9205 = vmatprep.subr.bf16.mxu1 %v12663_v32  ;;  %v12717_v32 = vcombine.high %v6205_v53, %v6209_v26  ;;  %v12735_v13 = vcombine.high %v6222_v3, %v6226_v5  ;;  %v6234_v57 = vld [vmem:[#allocation6 + $0xca8] sm:$0xff] }
 0x435   :  { %9042 = vmatpush1.bf16.msra.mxu0 %v12660_v41  ;;  %v6218_v41 = vld [vmem:[#allocation6 + $0xc28] sm:$0xff] }
 0x436   :  { %9206 = vmatpush1.bf16.msra.mxu1 %v12662_v42  ;;  %9043 = vmatprep.subr.bf16.mxu0 %v12669_v23  ;;  %v12716_v42 = vcombine.low %v6205_v53, %v6209_v26  ;;  %v12718_v23 = vcombine.low %v6206_v55, %v6210_v28  ;;  %v12727_v35 = vcombine.high %v6214_v38, %v6218_v41  ;;  %v6237_v26 = vld [vmem:[#allocation6 + $0xcc0] sm:$0xff]  ;;  %v6238_v28 = vld [vmem:[#allocation6 + $0xcc8] sm:$0xff] }
 0x437   :  { %9207 = vmatprep.subr.bf16.mxu1 %v12671_v16  ;;  %v12725_v16 = vcombine.high %v6213_v36, %v6217_v37  ;;  %v12743_v53 = vcombine.high %v6230_v17, %v6234_v57  ;;  %v6241_v55 = vld [vmem:[#allocation6 + $0xce0] sm:$0xff] }
 0x438   :  { %v6245_v37 = vld [vmem:[#allocation6 + $0xd00] sm:$0xff] }
 0x439   :  { %9044 = vmatpush1.bf16.msra.mxu0 %v12668_v24  ;;  %v14235_v24 = vld [vmem:[#allocation4] sm:$0xff] }
 0x43a   :  { %9208 = vmatpush1.bf16.msra.mxu1 %v12670_v49  ;;  %9045 = vmatprep.subr.bf16.mxu0 %v12677_v50  ;;  %v926_v49 = vrot.slane %v14235_v24, %v925_v43  ;;  %v930_v50 = vrot.slane %v14235_v24, %v929_v44 }
 0x43b   :  { %9209 = vmatprep.subr.bf16.mxu1 %v12679_v25  ;;  %v938_v25 = vrot.slane %v14235_v24, %v937_v45 }
 0x43d   :  { %9046 = vmatpush1.bf16.msra.mxu0 %v12676_v58 }
 0x43e   :  { %9210 = vmatpush1.bf16.msra.mxu1 %v12678_v60  ;;  %9047 = vmatprep.subr.bf16.mxu0 %v12685_v31 }
 0x43f   :  { %9211 = vmatprep.subr.bf16.mxu1 %v12687_v19 }
 0x441   :  { %9048 = vmatpush1.bf16.msra.mxu0 %v12684_v0 }
 0x442   :  { %9212 = vmatpush1.bf16.msra.mxu1 %v12686_v40  ;;  %9049 = vmatprep.subr.bf16.mxu0 %v12693_v39  ;;  %v6221_v40 = vld [vmem:[#allocation6 + $0xc40] sm:$0xff] }
 0x443   :  { %9213 = vmatprep.subr.bf16.mxu1 %v12695_v2  ;;  %v6225_v2 = vld [vmem:[#allocation6 + $0xc60] sm:$0xff] }
 0x445   :  { %9050 = vmatpush1.bf16.msra.mxu0 %v12692_v9  ;;  %v12726_v9 = vcombine.low %v6214_v38, %v6218_v41  ;;  %v6249_v38 = vld [vmem:[#allocation6 + $0xd20] sm:$0xff]  ;;  %v6246_v41 = vld [vmem:[#allocation6 + $0xd08] sm:$0xff] }
 0x446   :  { %9214 = vmatpush1.bf16.msra.mxu1 %v12694_v10  ;;  %9051 = vmatprep.subr.bf16.mxu0 %v12701_v46  ;;  %v6229_v46 = vld [vmem:[#allocation6 + $0xc80] sm:$0xff] }
 0x447   :  { %9215 = vmatprep.subr.bf16.mxu1 %v12703_v11  ;;  %v12733_v11 = vcombine.high %v6221_v40, %v6225_v2 }
 0x449   :  { %9052 = vmatpush1.bf16.msra.mxu0 %v12700_v18 }
 0x44a   :  { %9216 = vmatpush1.bf16.msra.mxu1 %v12702_v20  ;;  %9053 = vmatprep.subr.bf16.mxu0 %v12709_v15  ;;  %v12732_v20 = vcombine.low %v6221_v40, %v6225_v2  ;;  %v12734_v15 = vcombine.low %v6222_v3, %v6226_v5  ;;  %v6269_v2 = vld [vmem:[#allocation6 + $0xdc0] sm:$0xff]  ;;  %v6270_v5 = vld [vmem:[#allocation6 + $0xdc8] sm:$0xff] }
 0x44b   :  { %9217 = vmatprep.subr.bf16.mxu1 %v12711_v21  ;;  %v12741_v21 = vcombine.high %v6229_v46, %v6233_v14  ;;  %v6273_v3 = vld [vmem:[#allocation6 + $0xde0] sm:$0xff] }
 0x44d   :  { %9054 = vmatpush1.bf16.msra.mxu0 %v12708_v30  ;;  %v6242_v30 = vld [vmem:[#allocation6 + $0xce8] sm:$0xff] }
 0x44e   :  { %9218 = vmatpush1.bf16.msra.mxu1 %v12710_v12  ;;  %9055 = vmatprep.subr.bf16.mxu0 %v12717_v32  ;;  %v12740_v12 = vcombine.low %v6229_v46, %v6233_v14  ;;  %v12742_v32 = vcombine.low %v6230_v17, %v6234_v57  ;;  %v12751_v36 = vcombine.high %v6238_v28, %v6242_v30  ;;  %v6277_v14 = vld [vmem:[#allocation6 + $0xe00] sm:$0xff]  ;;  %v6278_v57 = vld [vmem:[#allocation6 + $0xe08] sm:$0xff] }
 0x44f   :  { %9219 = vmatprep.subr.bf16.mxu1 %v12719_v33  ;;  %v12749_v33 = vcombine.high %v6237_v26, %v6241_v55  ;;  %v6281_v17 = vld [vmem:[#allocation6 + $0xe20] sm:$0xff] }
 0x451   :  { %9056 = vmatpush1.bf16.msra.mxu0 %v12716_v42  ;;  %v6250_v42 = vld [vmem:[#allocation6 + $0xd28] sm:$0xff] }
 0x452   :  { %9220 = vmatpush1.bf16.msra.mxu1 %v12718_v23  ;;  %9066 = vmatprep.subr.bf16.mxu0 %v12725_v16  ;;  %v12748_v23 = vcombine.low %v6237_v26, %v6241_v55  ;;  %v12750_v16 = vcombine.low %v6238_v28, %v6242_v30  ;;  %v6285_v55 = vld [vmem:[#allocation6 + $0xe40] sm:$0xff]  ;;  %v6286_v30 = vld [vmem:[#allocation6 + $0xe48] sm:$0xff] }
 0x453   :  { %9230 = vmatprep.subr.bf16.mxu1 %v12727_v35  ;;  %v12757_v35 = vcombine.high %v6245_v37, %v6249_v38  ;;  %v6289_v28 = vld [vmem:[#allocation6 + $0xe60] sm:$0xff] }
 0x467   :  { %v5560_v59 = vpop.f32.mrb[4].mxu0  ;;  %v14246_v54 = vpop.f32.mrb[4].mxu1 }
 0x468   :  { %v13114_v52 = vadd.f32 %v5560_v59, %v926_v49  ;;  %v5562_v56 = vpop.f32.mrb[5].mxu0  ;;  %v5808_v60 = vpop.f32.mrb[5].mxu1  ;;  %v12759_v49 = vcombine.high %v6246_v41, %v6250_v42  ;;  %v6254_v59 = vld [vmem:[#allocation6 + $0xd48] sm:$0xff] }
 0x469   :  { %v13115_v58 = vadd.f32 %v5562_v56, %v930_v50  ;;  %v5564_v31 = vpop.f32.mrb[6].mxu0  ;;  %v13117_v47 = vadd.f32 %v5808_v60, %v938_v25  ;;  %v5810_v61 = vpop.f32.mrb[6].mxu1  ;;  %v6253_v50 = vld [vmem:[#allocation6 + $0xd40] sm:$0xff]  ;;  %v12756_v56 = vcombine.low %v6245_v37, %v6249_v38 }
 0x46a   :  { %v5817_v19 = vmax.f32 %v13114_v52, 0.0  ;;  %v5565_v62 = vpop.f32.mrb[7].mxu0  ;;  %v5811_v0 = vpop.f32.mrb[7].mxu1  ;;  %v6257_v25 = vld [vmem:[#allocation6 + $0xd60] sm:$0xff]  ;;  %v6258_v52 = vld [vmem:[#allocation6 + $0xd68] sm:$0xff] }
 0x46b   :  { %v5818_v63 = vmax.f32 %v13115_v58, 0.0  ;;  %v5820_v39 = vmax.f32 %v13117_v47, 0.0  ;;  %v12758_v58 = vcombine.low %v6246_v41, %v6250_v42  ;;  %v12765_v60 = vcombine.high %v6253_v50, %v6257_v25  ;;  %v6265_v47 = vld [vmem:[#allocation6 + $0xda0] sm:$0xff]  ;;  %v6262_v61 = vld [vmem:[#allocation6 + $0xd88] sm:$0xff] }
 0x46c   :  { %v14250_v10 = vpack.c.bf16 %v5817_v19, %v5817_v19  ;;  %v12767_v31 = vcombine.high %v6254_v59, %v6258_v52  ;;  %v6261_v19 = vld [vmem:[#allocation6 + $0xd80] sm:$0xff]  ;;  %v6266_v62 = vld [vmem:[#allocation6 + $0xda8] sm:$0xff]  ;;  %v12766_v0 = vcombine.low %v6254_v59, %v6258_v52 }
 0x46d   :  { %v14248_v7 = vpack.c.bf16 %v5818_v63, %v5818_v63  ;;  %v14254_v18 = vpack.c.bf16 %v5820_v39, %v5820_v39  ;;  %v12764_v63 = vcombine.low %v6253_v50, %v6257_v25  ;;  %v12773_v40 = vcombine.high %v6261_v19, %v6265_v47  ;;  %v6293_v38 = vld [vmem:[#allocation6 + $0xe80] sm:$0xff]  ;;  %v6294_v42 = vld [vmem:[#allocation6 + $0xe88] sm:$0xff] }
 0x46e   :  { %v12775_v39 = vcombine.high %v6262_v61, %v6266_v62  ;;  %v12774_v46 = vcombine.low %v6262_v61, %v6266_v62  ;;  %v6297_v41 = vld [vmem:[#allocation6 + $0xea0] sm:$0xff]  ;;  %v6302_v52 = vld [vmem:[#allocation6 + $0xec8] sm:$0xff] }
 0x46f   :  { %9057 = vmatprep.mubr.bf16.mxu0 %v14248_v7  ;;  %9221 = vmatprep.mubr.bf16.mxu1 %v14248_v7  ;;  %v6301_v25 = vld [vmem:[#allocation6 + $0xec0] sm:$0xff]  ;;  %v6310_v62 = vld [vmem:[#allocation6 + $0xf08] sm:$0xff] }
 0x470   :  { %9058 = vmatmul.mubr.bf16.vlgmr.msra.gmra.mrb[8].mxu0 %v14250_v10  ;;  %9222 = vmatmul.mubr.bf16.vlgmr.msra.gmra.mrb[8].mxu1 %v14250_v10  ;;  %v6305_v59 = vld [vmem:[#allocation6 + $0xee0] sm:$0xff] }
 0x471   :  { %9067 = vmatpush1.bf16.msra.mxu0 %v12724_v8  ;;  %9231 = vmatpush1.bf16.msra.mxu1 %v12726_v9  ;;  %v6274_v8 = vld [vmem:[#allocation6 + $0xde8] sm:$0xff]  ;;  %v12772_v9 = vcombine.low %v6261_v19, %v6265_v47  ;;  %v6309_v47 = vld [vmem:[#allocation6 + $0xf00] sm:$0xff] }
 0x472   :  { %9098 = vmatprep.mubr.bf16.mxu0 %v14254_v18  ;;  %9262 = vmatprep.mubr.bf16.mxu1 %v14254_v18  ;;  %v6313_v61 = vld [vmem:[#allocation6 + $0xf20] sm:$0xff] }
 0x473   :  { %9068 = vmatprep.subr.bf16.mxu0 %v12733_v11  ;;  %9232 = vmatprep.subr.bf16.mxu1 %v12735_v13  ;;  %v12781_v11 = vcombine.high %v6269_v2, %v6273_v3  ;;  %v12783_v13 = vcombine.high %v6270_v5, %v6274_v8 }
 0x475   :  { %9069 = vmatpush1.bf16.msra.mxu0 %v12732_v20  ;;  %9233 = vmatpush1.bf16.msra.mxu1 %v12734_v15  ;;  %v6282_v20 = vld [vmem:[#allocation6 + $0xe28] sm:$0xff]  ;;  %v12780_v15 = vcombine.low %v6269_v2, %v6273_v3  ;;  %v6317_v3 = vld [vmem:[#allocation6 + $0xf40] sm:$0xff] }
 0x476   :  { %9070 = vmatprep.subr.bf16.mxu0 %v12741_v21  ;;  %9234 = vmatprep.subr.bf16.mxu1 %v12743_v53  ;;  %v12782_v21 = vcombine.low %v6270_v5, %v6274_v8  ;;  %v12789_v53 = vcombine.high %v6277_v14, %v6281_v17  ;;  %v12791_v26 = vcombine.high %v6278_v57, %v6282_v20  ;;  %v6321_v5 = vld [vmem:[#allocation6 + $0xf60] sm:$0xff]  ;;  %v6318_v8 = vld [vmem:[#allocation6 + $0xf48] sm:$0xff] }
 0x479   :  { %9071 = vmatpush1.bf16.msra.mxu0 %v12740_v12  ;;  %9235 = vmatpush1.bf16.msra.mxu1 %v12742_v32  ;;  %v6290_v12 = vld [vmem:[#allocation6 + $0xe68] sm:$0xff]  ;;  %v12788_v32 = vcombine.low %v6277_v14, %v6281_v17  ;;  %v12829_v14 = vcombine.high %v6317_v3, %v6321_v5 }
 0x47a   :  { %9072 = vmatprep.subr.bf16.mxu0 %v12749_v33  ;;  %9236 = vmatprep.subr.bf16.mxu1 %v12751_v36  ;;  %v12790_v33 = vcombine.low %v6278_v57, %v6282_v20  ;;  %v12797_v36 = vcombine.high %v6285_v55, %v6289_v28  ;;  %v12799_v37 = vcombine.high %v6286_v30, %v6290_v12  ;;  %v6325_v57 = vld [vmem:[#allocation6 + $0xf80] sm:$0xff] }
 0x47b   :  { %v6329_v20 = vld [vmem:[#allocation6 + $0xfa0] sm:$0xff] }
 0x47d   :  { %9073 = vmatpush1.bf16.msra.mxu0 %v12748_v23  ;;  %9237 = vmatpush1.bf16.msra.mxu1 %v12750_v16  ;;  %v6298_v23 = vld [vmem:[#allocation6 + $0xea8] sm:$0xff]  ;;  %v12796_v16 = vcombine.low %v6285_v55, %v6289_v28  ;;  %v12837_v28 = vcombine.high %v6325_v57, %v6329_v20 }
 0x47e   :  { %9074 = vmatprep.subr.bf16.mxu0 %v12757_v35  ;;  %9238 = vmatprep.subr.bf16.mxu1 %v12759_v49  ;;  %v12798_v35 = vcombine.low %v6286_v30, %v6290_v12  ;;  %v12805_v49 = vcombine.high %v6293_v38, %v6297_v41  ;;  %v12807_v50 = vcombine.high %v6294_v42, %v6298_v23  ;;  %v6333_v12 = vld [vmem:[#allocation6 + $0xfc0] sm:$0xff] }
 0x481   :  { %9075 = vmatpush1.bf16.msra.mxu0 %v12756_v56  ;;  %9239 = vmatpush1.bf16.msra.mxu1 %v12758_v58  ;;  %v6306_v56 = vld [vmem:[#allocation6 + $0xee8] sm:$0xff]  ;;  %v12804_v58 = vcombine.low %v6293_v38, %v6297_v41 }
 0x482   :  { %9076 = vmatprep.subr.bf16.mxu0 %v12765_v60  ;;  %9240 = vmatprep.subr.bf16.mxu1 %v12767_v31  ;;  %v12806_v60 = vcombine.low %v6294_v42, %v6298_v23  ;;  %v12813_v31 = vcombine.high %v6301_v25, %v6305_v59  ;;  %v12815_v19 = vcombine.high %v6302_v52, %v6306_v56 }
 0x485   :  { %9077 = vmatpush1.bf16.msra.mxu0 %v12764_v63  ;;  %9241 = vmatpush1.bf16.msra.mxu1 %v12766_v0  ;;  %v6314_v63 = vld [vmem:[#allocation6 + $0xf28] sm:$0xff]  ;;  %v12812_v0 = vcombine.low %v6301_v25, %v6305_v59 }
 0x486   :  { %9078 = vmatprep.subr.bf16.mxu0 %v12773_v40  ;;  %9242 = vmatprep.subr.bf16.mxu1 %v12775_v39  ;;  %v12814_v40 = vcombine.low %v6302_v52, %v6306_v56  ;;  %v12821_v39 = vcombine.high %v6309_v47, %v6313_v61  ;;  %v12823_v2 = vcombine.high %v6310_v62, %v6314_v63 }
 0x489   :  { %9079 = vmatpush1.bf16.msra.mxu0 %v12772_v9  ;;  %9243 = vmatpush1.bf16.msra.mxu1 %v12774_v46  ;;  %v6322_v9 = vld [vmem:[#allocation6 + $0xf68] sm:$0xff]  ;;  %v12820_v46 = vcombine.low %v6309_v47, %v6313_v61 }
 0x48a   :  { %9080 = vmatprep.subr.bf16.mxu0 %v12781_v11  ;;  %9244 = vmatprep.subr.bf16.mxu1 %v12783_v13  ;;  %v12822_v11 = vcombine.low %v6310_v62, %v6314_v63  ;;  %v933_v13 = vsub.s32 6, %v14186_v34  ;;  %v12831_v17 = vcombine.high %v6318_v8, %v6322_v9 }
 0x48c   :  { %v934_v55 = vrot.slane %v14235_v24, %v933_v13  ;;  %v5835_v24 = vld [vmem:[#allocation6 + $0x30] sm:$0xff] }
 0x48d   :  { %9081 = vmatpush1.bf16.msra.mxu0 %v12780_v15  ;;  %9245 = vmatpush1.bf16.msra.mxu1 %v12782_v21  ;;  %v6326_v15 = vld [vmem:[#allocation6 + $0xf88] sm:$0xff] }
 0x48e   :  { %9082 = vmatprep.subr.bf16.mxu0 %v12789_v53  ;;  %9246 = vmatprep.subr.bf16.mxu1 %v12791_v26  ;;  %v6330_v21 = vld [vmem:[#allocation6 + $0xfa8] sm:$0xff]  ;;  %v12828_v53 = vcombine.low %v6317_v3, %v6321_v5  ;;  %v12830_v26 = vcombine.low %v6318_v8, %v6322_v9  ;;  %v13116_v41 = vadd.f32 %v14246_v54, %v934_v55  ;;  %v5840_v54 = vld [vmem:[#allocation6 + $0x58] sm:$0xff] }
 0x48f   :  { %v12839_v30 = vcombine.high %v6326_v15, %v6330_v21  ;;  %v12838_v38 = vcombine.low %v6326_v15, %v6330_v21  ;;  %v5868_v55 = vld [vmem:[#allocation6 + $0x138] sm:$0xff] }
 0x490   :  { %v5819_v59 = vmax.f32 %v13116_v41, 0.0 }
 0x491   :  { %9083 = vmatpush1.bf16.msra.mxu0 %v12788_v32  ;;  %9247 = vmatpush1.bf16.msra.mxu1 %v12790_v33  ;;  %v6337_v32 = vld [vmem:[#allocation6 + $0xfe0] sm:$0xff]  ;;  %v6334_v33 = vld [vmem:[#allocation6 + $0xfc8] sm:$0xff] }
 0x492   :  { %9084 = vmatprep.subr.bf16.mxu0 %v12797_v36  ;;  %9248 = vmatprep.subr.bf16.mxu1 %v12799_v37  ;;  %v6338_v36 = vld [vmem:[#allocation6 + $0xfe8] sm:$0xff]  ;;  %v12836_v37 = vcombine.low %v6325_v57, %v6329_v20  ;;  %v12845_v42 = vcombine.high %v6333_v12, %v6337_v32  ;;  %v14265_v47 = vpack.c.bf16 %v5819_v59, %v5819_v59 }
 0x493   :  { %v12847_v23 = vcombine.high %v6334_v33, %v6338_v36  ;;  %v12846_v25 = vcombine.low %v6334_v33, %v6338_v36  ;;  %v5871_v33 = vld [vmem:[#allocation6 + $0x150] sm:$0xff] }
 0x494   :  { %v5875_v36 = vld [vmem:[#allocation6 + $0x170] sm:$0xff] }
 0x495   :  { %9085 = vmatpush1.bf16.msra.mxu0 %v12796_v16  ;;  %9249 = vmatpush1.bf16.msra.mxu1 %v12798_v35  ;;  %v5831_v16 = vld [vmem:[#allocation6 + $0x10] sm:$0xff]  ;;  %v5832_v35 = vld [vmem:[#allocation6 + $0x18] sm:$0xff] }
 0x496   :  { %9086 = vmatprep.subr.bf16.mxu0 %v12805_v49  ;;  %9250 = vmatprep.subr.bf16.mxu1 %v12807_v50  ;;  %v5836_v49 = vld [vmem:[#allocation6 + $0x38] sm:$0xff]  ;;  %v12844_v50 = vcombine.low %v6333_v12, %v6337_v32  ;;  %v12345_v52 = vcombine.high %v5831_v16, %v5835_v24 }
 0x497   :  { %v12347_v56 = vcombine.high %v5832_v35, %v5836_v49  ;;  %v12346_v61 = vcombine.low %v5832_v35, %v5836_v49  ;;  %v5883_v35 = vld [vmem:[#allocation6 + $0x1b0] sm:$0xff]  ;;  %v5880_v49 = vld [vmem:[#allocation6 + $0x198] sm:$0xff] }
 0x499   :  { %9087 = vmatpush1.bf16.msra.mxu0 %v12804_v58  ;;  %9251 = vmatpush1.bf16.msra.mxu1 %v12806_v60  ;;  %v5839_v58 = vld [vmem:[#allocation6 + $0x50] sm:$0xff] }
 0x49a   :  { %9088 = vmatprep.subr.bf16.mxu0 %v12813_v31  ;;  %9252 = vmatprep.subr.bf16.mxu1 %v12815_v19  ;;  %v5843_v60 = vld [vmem:[#allocation6 + $0x70] sm:$0xff]  ;;  %v5844_v31 = vld [vmem:[#allocation6 + $0x78] sm:$0xff]  ;;  %v12344_v19 = vcombine.low %v5831_v16, %v5835_v24 }
 0x49b   :  { %v12353_v62 = vcombine.high %v5839_v58, %v5843_v60  ;;  %v12355_v63 = vcombine.high %v5840_v54, %v5844_v31  ;;  %v12352_v3 = vcombine.low %v5839_v58, %v5843_v60  ;;  %v12354_v5 = vcombine.low %v5840_v54, %v5844_v31  ;;  %v5879_v24 = vld [vmem:[#allocation6 + $0x190] sm:$0xff]  ;;  %v5888_v54 = vld [vmem:[#allocation6 + $0x1d8] sm:$0xff] }
 0x49c   :  { %v5887_v58 = vld [vmem:[#allocation6 + $0x1d0] sm:$0xff]  ;;  %v5892_v31 = vld [vmem:[#allocation6 + $0x1f8] sm:$0xff] }
 0x49d   :  { %9089 = vmatpush1.bf16.msra.mxu0 %v12812_v0  ;;  %9253 = vmatpush1.bf16.msra.mxu1 %v12814_v40  ;;  %v5847_v0 = vld [vmem:[#allocation6 + $0x90] sm:$0xff] }
 0x49e   :  { %9090 = vmatprep.subr.bf16.mxu0 %v12821_v39  ;;  %9254 = vmatprep.subr.bf16.mxu1 %v12823_v2  ;;  %v5851_v40 = vld [vmem:[#allocation6 + $0xb0] sm:$0xff]  ;;  %v5848_v39 = vld [vmem:[#allocation6 + $0x98] sm:$0xff] }
 0x49f   :  { %v5852_v2 = vld [vmem:[#allocation6 + $0xb8] sm:$0xff]  ;;  %v12361_v8 = vcombine.high %v5847_v0, %v5851_v40  ;;  %v12360_v57 = vcombine.low %v5847_v0, %v5851_v40  ;;  %v5891_v60 = vld [vmem:[#allocation6 + $0x1f0] sm:$0xff] }
 0x4a0   :  { %v12363_v9 = vcombine.high %v5848_v39, %v5852_v2  ;;  %v12362_v20 = vcombine.low %v5848_v39, %v5852_v2  ;;  %v5895_v0 = vld [vmem:[#allocation6 + $0x210] sm:$0xff]  ;;  %v5896_v39 = vld [vmem:[#allocation6 + $0x218] sm:$0xff] }
 0x4a1   :  { %9091 = vmatpush1.bf16.msra.mxu0 %v12820_v46  ;;  %9255 = vmatpush1.bf16.msra.mxu1 %v12822_v11  ;;  %v5855_v46 = vld [vmem:[#allocation6 + $0xd0] sm:$0xff]  ;;  %v5900_v2 = vld [vmem:[#allocation6 + $0x238] sm:$0xff] }
 0x4a2   :  { %9092 = vmatprep.subr.bf16.mxu0 %v12829_v14  ;;  %9256 = vmatprep.subr.bf16.mxu1 %v12831_v17  ;;  %v5859_v11 = vld [vmem:[#allocation6 + $0xf0] sm:$0xff]  ;;  %v5856_v14 = vld [vmem:[#allocation6 + $0xd8] sm:$0xff] }
 0x4a3   :  { %v5860_v17 = vld [vmem:[#allocation6 + $0xf8] sm:$0xff]  ;;  %v12369_v15 = vcombine.high %v5855_v46, %v5859_v11  ;;  %v5899_v40 = vld [vmem:[#allocation6 + $0x230] sm:$0xff] }
 0x4a4   :  { %v12371_v21 = vcombine.high %v5856_v14, %v5860_v17 }
 0x4a5   :  { %9093 = vmatpush1.bf16.msra.mxu0 %v12828_v53  ;;  %9257 = vmatpush1.bf16.msra.mxu1 %v12830_v26  ;;  %v5863_v53 = vld [vmem:[#allocation6 + $0x110] sm:$0xff] }
 0x4a6   :  { %9094 = vmatprep.subr.bf16.mxu0 %v12837_v28  ;;  %9258 = vmatprep.subr.bf16.mxu1 %v12839_v30  ;;  %v5867_v26 = vld [vmem:[#allocation6 + $0x130] sm:$0xff]  ;;  %v12368_v28 = vcombine.low %v5855_v46, %v5859_v11  ;;  %v12370_v30 = vcombine.low %v5856_v14, %v5860_v17  ;;  %v5904_v14 = vld [vmem:[#allocation6 + $0x258] sm:$0xff] }
 0x4a7   :  { %v12377_v12 = vcombine.high %v5863_v53, %v5867_v26  ;;  %v12376_v41 = vcombine.low %v5863_v53, %v5867_v26  ;;  %v5903_v46 = vld [vmem:[#allocation6 + $0x250] sm:$0xff]  ;;  %v5908_v17 = vld [vmem:[#allocation6 + $0x278] sm:$0xff] }
 0x4a8   :  { %v5907_v11 = vld [vmem:[#allocation6 + $0x270] sm:$0xff] }
 0x4a9   :  { %9095 = vmatpush1.bf16.msra.mxu0 %v12836_v37  ;;  %9259 = vmatpush1.bf16.msra.mxu1 %v12838_v38  ;;  %v5872_v37 = vld [vmem:[#allocation6 + $0x158] sm:$0xff]  ;;  %v5911_v53 = vld [vmem:[#allocation6 + $0x290] sm:$0xff] }
 0x4aa   :  { %9096 = vmatprep.subr.bf16.mxu0 %v12845_v42  ;;  %9260 = vmatprep.subr.bf16.mxu1 %v12847_v23  ;;  %v5876_v38 = vld [vmem:[#allocation6 + $0x178] sm:$0xff]  ;;  %v12385_v23 = vcombine.high %v5871_v33, %v5875_v36  ;;  %v5915_v26 = vld [vmem:[#allocation6 + $0x2b0] sm:$0xff] }
 0x4ab   :  { %v12387_v16 = vcombine.high %v5872_v37, %v5876_v38  ;;  %v12386_v59 = vcombine.low %v5872_v37, %v5876_v38  ;;  %v5920_v37 = vld [vmem:[#allocation6 + $0x2d8] sm:$0xff] }
 0x4ac   :  { %v5924_v38 = vld [vmem:[#allocation6 + $0x2f8] sm:$0xff] }
 0x4ad   :  { %9097 = vmatpush1.bf16.msra.mxu0 %v12844_v50  ;;  %9261 = vmatpush1.bf16.msra.mxu1 %v12846_v25  ;;  %v5884_v50 = vld [vmem:[#allocation6 + $0x1b8] sm:$0xff]  ;;  %v12384_v25 = vcombine.low %v5871_v33, %v5875_v36  ;;  %v5919_v33 = vld [vmem:[#allocation6 + $0x2d0] sm:$0xff] }
 0x4ae   :  { %9271 = vmatprep.subr.bf16.mxu0 %v12345_v52  ;;  %9435 = vmatprep.subr.bf16.mxu1 %v12347_v56  ;;  %v12393_v52 = vcombine.high %v5879_v24, %v5883_v35  ;;  %v12395_v56 = vcombine.high %v5880_v49, %v5884_v50  ;;  %v5923_v36 = vld [vmem:[#allocation6 + $0x2f0] sm:$0xff] }
 0x4b0   :  { %9099 = vmatmul.mubr.bf16.vlgmr.msra.gmra.mrb[8].mxu0 %v14265_v47  ;;  %9263 = vmatmul.mubr.bf16.vlgmr.msra.gmra.mrb[8].mxu1 %v14265_v47 }
 0x4b1   :  { %9272 = vmatpush1.bf16.msra.mxu0 %v12344_v19  ;;  %9303 = vmatprep.mubr.bf16.mxu0 %v14196_v48  ;;  %v12392_v19 = vcombine.low %v5879_v24, %v5883_v35  ;;  %v5927_v24 = vld [vmem:[#allocation6 + $0x310] sm:$0xff] }
 0x4b2   :  { %9436 = vmatpush1.bf16.msra.mxu1 %v12346_v61  ;;  %9467 = vmatprep.mubr.bf16.mxu1 %v14196_v48  ;;  %v5864_v48 = vld [vmem:[#allocation6 + $0x118] sm:$0xff]  ;;  %v12394_v61 = vcombine.low %v5880_v49, %v5884_v50  ;;  %v5931_v35 = vld [vmem:[#allocation6 + $0x330] sm:$0xff] }
 0x4b3   :  { %9273 = vmatprep.subr.bf16.mxu0 %v12353_v62  ;;  %9437 = vmatprep.subr.bf16.mxu1 %v12355_v63  ;;  %v12379_v32 = vcombine.high %v5864_v48, %v5868_v55  ;;  %v12378_v42 = vcombine.low %v5864_v48, %v5868_v55  ;;  %v12401_v62 = vcombine.high %v5887_v58, %v5891_v60  ;;  %v5912_v48 = vld [vmem:[#allocation6 + $0x298] sm:$0xff] }
 0x4b4   :  { %v12403_v63 = vcombine.high %v5888_v54, %v5892_v31  ;;  %v5916_v55 = vld [vmem:[#allocation6 + $0x2b8] sm:$0xff] }
 0x4b5   :  { %9274 = vmatpush1.bf16.msra.mxu0 %v12352_v3  ;;  %v12400_v3 = vcombine.low %v5887_v58, %v5891_v60  ;;  %v5928_v49 = vld [vmem:[#allocation6 + $0x318] sm:$0xff]  ;;  %v5935_v58 = vld [vmem:[#allocation6 + $0x350] sm:$0xff] }
 0x4b6   :  { %9438 = vmatpush1.bf16.msra.mxu1 %v12354_v5  ;;  %9275 = vmatprep.subr.bf16.mxu0 %v12361_v8  ;;  %v12402_v5 = vcombine.low %v5888_v54, %v5892_v31  ;;  %v12409_v8 = vcombine.high %v5895_v0, %v5899_v40  ;;  %v5932_v50 = vld [vmem:[#allocation6 + $0x338] sm:$0xff]  ;;  %v5939_v60 = vld [vmem:[#allocation6 + $0x370] sm:$0xff] }
 0x4b7   :  { %9439 = vmatprep.subr.bf16.mxu1 %v12363_v9  ;;  %v12411_v9 = vcombine.high %v5896_v39, %v5900_v2  ;;  %v5936_v54 = vld [vmem:[#allocation6 + $0x358] sm:$0xff] }
 0x4b8   :  { %v5940_v31 = vld [vmem:[#allocation6 + $0x378] sm:$0xff] }
 0x4b9   :  { %9276 = vmatpush1.bf16.msra.mxu0 %v12360_v57  ;;  %v12408_v57 = vcombine.low %v5895_v0, %v5899_v40  ;;  %v5943_v0 = vld [vmem:[#allocation6 + $0x390] sm:$0xff] }
 0x4ba   :  { %9440 = vmatpush1.bf16.msra.mxu1 %v12362_v20  ;;  %9277 = vmatprep.subr.bf16.mxu0 %v12369_v15  ;;  %v12410_v20 = vcombine.low %v5896_v39, %v5900_v2  ;;  %v12417_v15 = vcombine.high %v5903_v46, %v5907_v11  ;;  %v5947_v40 = vld [vmem:[#allocation6 + $0x3b0] sm:$0xff]  ;;  %v5944_v39 = vld [vmem:[#allocation6 + $0x398] sm:$0xff] }
 0x4bb   :  { %9441 = vmatprep.subr.bf16.mxu1 %v12371_v21  ;;  %v12419_v21 = vcombine.high %v5904_v14, %v5908_v17  ;;  %v5948_v2 = vld [vmem:[#allocation6 + $0x3b8] sm:$0xff] }
 0x4bd   :  { %9278 = vmatpush1.bf16.msra.mxu0 %v12368_v28  ;;  %v12416_v28 = vcombine.low %v5903_v46, %v5907_v11  ;;  %v5951_v46 = vld [vmem:[#allocation6 + $0x3d0] sm:$0xff] }
 0x4be   :  { %9442 = vmatpush1.bf16.msra.mxu1 %v12370_v30  ;;  %9279 = vmatprep.subr.bf16.mxu0 %v12377_v12  ;;  %v12418_v30 = vcombine.low %v5904_v14, %v5908_v17  ;;  %v12425_v12 = vcombine.high %v5911_v53, %v5915_v26  ;;  %v5955_v11 = vld [vmem:[#allocation6 + $0x3f0] sm:$0xff]  ;;  %v5952_v14 = vld [vmem:[#allocation6 + $0x3d8] sm:$0xff] }
 0x4bf   :  { %9443 = vmatprep.subr.bf16.mxu1 %v12379_v32  ;;  %v12427_v32 = vcombine.high %v5912_v48, %v5916_v55  ;;  %v5956_v17 = vld [vmem:[#allocation6 + $0x3f8] sm:$0xff] }
 0x4c1   :  { %9280 = vmatpush1.bf16.msra.mxu0 %v12376_v41  ;;  %v12424_v41 = vcombine.low %v5911_v53, %v5915_v26  ;;  %v5959_v53 = vld [vmem:[#allocation6 + $0x410] sm:$0xff] }
 0x4c2   :  { %9444 = vmatpush1.bf16.msra.mxu1 %v12378_v42  ;;  %9281 = vmatprep.subr.bf16.mxu0 %v12385_v23  ;;  %v12426_v42 = vcombine.low %v5912_v48, %v5916_v55  ;;  %v12433_v23 = vcombine.high %v5919_v33, %v5923_v36  ;;  %v5963_v26 = vld [vmem:[#allocation6 + $0x430] sm:$0xff]  ;;  %v5960_v48 = vld [vmem:[#allocation6 + $0x418] sm:$0xff] }
 0x4c3   :  { %9445 = vmatprep.subr.bf16.mxu1 %v12387_v16  ;;  %v12435_v16 = vcombine.high %v5920_v37, %v5924_v38  ;;  %v5964_v55 = vld [vmem:[#allocation6 + $0x438] sm:$0xff] }
 0x4c5   :  { %9282 = vmatpush1.bf16.msra.mxu0 %v12384_v25  ;;  %v12432_v25 = vcombine.low %v5919_v33, %v5923_v36  ;;  %v5967_v33 = vld [vmem:[#allocation6 + $0x450] sm:$0xff] }
 0x4c6   :  { %9446 = vmatpush1.bf16.msra.mxu1 %v12386_v59  ;;  %9283 = vmatprep.subr.bf16.mxu0 %v12393_v52  ;;  %v12434_v59 = vcombine.low %v5920_v37, %v5924_v38  ;;  %v12441_v52 = vcombine.high %v5927_v24, %v5931_v35  ;;  %v5971_v36 = vld [vmem:[#allocation6 + $0x470] sm:$0xff]  ;;  %v12472_v37 = vcombine.low %v5959_v53, %v5963_v26  ;;  %v5968_v38 = vld [vmem:[#allocation6 + $0x458] sm:$0xff] }
 0x4c7   :  { %9447 = vmatprep.subr.bf16.mxu1 %v12395_v56  ;;  %v12443_v56 = vcombine.high %v5928_v49, %v5932_v50 }
 0x4c9   :  { %9284 = vmatpush1.bf16.msra.mxu0 %v12392_v19  ;;  %v12440_v19 = vcombine.low %v5927_v24, %v5931_v35  ;;  %v5979_v24 = vld [vmem:[#allocation6 + $0x4b0] sm:$0xff] }
 0x4ca   :  { %9448 = vmatpush1.bf16.msra.mxu1 %v12394_v61  ;;  %9285 = vmatprep.subr.bf16.mxu0 %v12401_v62  ;;  %v12442_v61 = vcombine.low %v5928_v49, %v5932_v50  ;;  %v12449_v62 = vcombine.high %v5935_v58, %v5939_v60  ;;  %v5976_v49 = vld [vmem:[#allocation6 + $0x498] sm:$0xff] }
 0x4cb   :  { %9449 = vmatprep.subr.bf16.mxu1 %v12403_v63  ;;  %v12451_v63 = vcombine.high %v5936_v54, %v5940_v31  ;;  %v5980_v50 = vld [vmem:[#allocation6 + $0x4b8] sm:$0xff] }
 0x4cd   :  { %9286 = vmatpush1.bf16.msra.mxu0 %v12400_v3  ;;  %v12448_v3 = vcombine.low %v5935_v58, %v5939_v60  ;;  %v5983_v58 = vld [vmem:[#allocation6 + $0x4d0] sm:$0xff] }
 0x4ce   :  { %9450 = vmatpush1.bf16.msra.mxu1 %v12402_v5  ;;  %9287 = vmatprep.subr.bf16.mxu0 %v12409_v8  ;;  %v12450_v5 = vcombine.low %v5936_v54, %v5940_v31  ;;  %v12457_v8 = vcombine.high %v5943_v0, %v5947_v40  ;;  %v5987_v60 = vld [vmem:[#allocation6 + $0x4f0] sm:$0xff]  ;;  %v5984_v54 = vld [vmem:[#allocation6 + $0x4d8] sm:$0xff] }
 0x4cf   :  { %9451 = vmatprep.subr.bf16.mxu1 %v12411_v9  ;;  %v12459_v9 = vcombine.high %v5944_v39, %v5948_v2  ;;  %v5988_v31 = vld [vmem:[#allocation6 + $0x4f8] sm:$0xff] }
 0x4d1   :  { %9288 = vmatpush1.bf16.msra.mxu0 %v12408_v57  ;;  %v12456_v57 = vcombine.low %v5943_v0, %v5947_v40  ;;  %v5995_v0 = vld [vmem:[#allocation6 + $0x530] sm:$0xff]  ;;  %v5992_v40 = vld [vmem:[#allocation6 + $0x518] sm:$0xff] }
 0x4d2   :  { %9452 = vmatpush1.bf16.msra.mxu1 %v12410_v20  ;;  %9289 = vmatprep.subr.bf16.mxu0 %v12417_v15  ;;  %v12458_v20 = vcombine.low %v5944_v39, %v5948_v2  ;;  %v12465_v15 = vcombine.high %v5951_v46, %v5955_v11  ;;  %v5996_v39 = vld [vmem:[#allocation6 + $0x538] sm:$0xff]  ;;  %v12498_v2 = vcombine.low %v5984_v54, %v5988_v31 }
 0x4d3   :  { %9453 = vmatprep.subr.bf16.mxu1 %v12419_v21  ;;  %v12467_v21 = vcombine.high %v5952_v14, %v5956_v17 }
 0x4d5   :  { %9290 = vmatpush1.bf16.msra.mxu0 %v12416_v28  ;;  %v12464_v28 = vcombine.low %v5951_v46, %v5955_v11  ;;  %v6000_v46 = vld [vmem:[#allocation6 + $0x558] sm:$0xff] }
 0x4d6   :  { %9454 = vmatpush1.bf16.msra.mxu1 %v12418_v30  ;;  %9291 = vmatprep.subr.bf16.mxu0 %v12425_v12  ;;  %v12466_v30 = vcombine.low %v5952_v14, %v5956_v17  ;;  %v12473_v12 = vcombine.high %v5959_v53, %v5963_v26  ;;  %v6004_v11 = vld [vmem:[#allocation6 + $0x578] sm:$0xff]  ;;  %v12506_v17 = vcombine.low %v5992_v40, %v5996_v39 }
 0x4d7   :  { %9455 = vmatprep.subr.bf16.mxu1 %v12427_v32  ;;  %v12475_v32 = vcombine.high %v5960_v48, %v5964_v55  ;;  %v6008_v53 = vld [vmem:[#allocation6 + $0x598] sm:$0xff] }
 0x4d8   :  { %v6012_v26 = vld [vmem:[#allocation6 + $0x5b8] sm:$0xff] }
 0x4d9   :  { %9292 = vmatpush1.bf16.msra.mxu0 %v12424_v41  ;;  %v5972_v41 = vld [vmem:[#allocation6 + $0x478] sm:$0xff] }
 0x4da   :  { %9456 = vmatpush1.bf16.msra.mxu1 %v12426_v42  ;;  %9293 = vmatprep.subr.bf16.mxu0 %v12433_v23  ;;  %v12474_v42 = vcombine.low %v5960_v48, %v5964_v55  ;;  %v12481_v23 = vcombine.high %v5967_v33, %v5971_v36  ;;  %v12483_v35 = vcombine.high %v5968_v38, %v5972_v41 }
 0x4db   :  { %9457 = vmatprep.subr.bf16.mxu1 %v12435_v16  ;;  %v5975_v16 = vld [vmem:[#allocation6 + $0x490] sm:$0xff]  ;;  %v12514_v55 = vcombine.low %v6000_v46, %v6004_v11 }
 0x4dd   :  { %9294 = vmatpush1.bf16.msra.mxu0 %v12432_v25  ;;  %v12480_v25 = vcombine.low %v5967_v33, %v5971_v36  ;;  %v6016_v33 = vld [vmem:[#allocation6 + $0x5d8] sm:$0xff] }
 0x4de   :  { %9458 = vmatpush1.bf16.msra.mxu1 %v12434_v59  ;;  %9295 = vmatprep.subr.bf16.mxu0 %v12441_v52  ;;  %v12482_v59 = vcombine.low %v5968_v38, %v5972_v41  ;;  %v12489_v52 = vcombine.high %v5975_v16, %v5979_v24  ;;  %v6020_v36 = vld [vmem:[#allocation6 + $0x5f8] sm:$0xff]  ;;  %v12522_v38 = vcombine.low %v6008_v53, %v6012_v26 }
 0x4df   :  { %9459 = vmatprep.subr.bf16.mxu1 %v12443_v56  ;;  %v12491_v56 = vcombine.high %v5976_v49, %v5980_v50 }
 0x4e1   :  { %9296 = vmatpush1.bf16.msra.mxu0 %v12440_v19  ;;  %v12488_v19 = vcombine.low %v5975_v16, %v5979_v24  ;;  %v6027_v16 = vld [vmem:[#allocation6 + $0x630] sm:$0xff]  ;;  %v6024_v24 = vld [vmem:[#allocation6 + $0x618] sm:$0xff] }
 0x4e2   :  { %9460 = vmatpush1.bf16.msra.mxu1 %v12442_v61  ;;  %9297 = vmatprep.subr.bf16.mxu0 %v12449_v62  ;;  %v12497_v61 = vcombine.high %v5983_v58, %v5987_v60  ;;  %v12499_v62 = vcombine.high %v5984_v54, %v5988_v31 }
 0x4e3   :  { %9461 = vmatprep.subr.bf16.mxu1 %v12451_v63  ;;  %v5991_v63 = vld [vmem:[#allocation6 + $0x510] sm:$0xff] }
 0x4e4   :  { %v12504_v14 = vcombine.low %v5991_v63, %v5995_v0 }
 0x4e5   :  { %9298 = vmatpush1.bf16.msra.mxu0 %v12448_v3  ;;  %v12505_v3 = vcombine.high %v5991_v63, %v5995_v0  ;;  %v6040_v63 = vld [vmem:[#allocation6 + $0x698] sm:$0xff] }
 0x4e6   :  { %9462 = vmatpush1.bf16.msra.mxu1 %v12450_v5  ;;  %9299 = vmatprep.subr.bf16.mxu0 %v12457_v8  ;;  %v12507_v5 = vcombine.high %v5992_v40, %v5996_v39  ;;  %v5999_v8 = vld [vmem:[#allocation6 + $0x550] sm:$0xff]  ;;  %v6044_v0 = vld [vmem:[#allocation6 + $0x6b8] sm:$0xff] }
 0x4e7   :  { %9463 = vmatprep.subr.bf16.mxu1 %v12459_v9  ;;  %v6003_v9 = vld [vmem:[#allocation6 + $0x570] sm:$0xff] }
 0x4e8   :  { %v12512_v48 = vcombine.low %v5999_v8, %v6003_v9 }
 0x4e9   :  { %9300 = vmatpush1.bf16.msra.mxu0 %v12456_v57  ;;  %v12513_v57 = vcombine.high %v5999_v8, %v6003_v9  ;;  %v6048_v8 = vld [vmem:[#allocation6 + $0x6d8] sm:$0xff] }
 0x4ea   :  { %9464 = vmatpush1.bf16.msra.mxu1 %v12458_v20  ;;  %9301 = vmatprep.subr.bf16.mxu0 %v12465_v15  ;;  %v12515_v20 = vcombine.high %v6000_v46, %v6004_v11  ;;  %v6007_v15 = vld [vmem:[#allocation6 + $0x590] sm:$0xff]  ;;  %v6052_v9 = vld [vmem:[#allocation6 + $0x6f8] sm:$0xff]  ;;  %v12554_v11 = vcombine.low %v6040_v63, %v6044_v0 }
 0x4eb   :  { %9465 = vmatprep.subr.bf16.mxu1 %v12467_v21  ;;  %v6011_v21 = vld [vmem:[#allocation6 + $0x5b0] sm:$0xff] }
 0x4ed   :  { %9302 = vmatpush1.bf16.msra.mxu0 %v12464_v28  ;;  %v12521_v28 = vcombine.high %v6007_v15, %v6011_v21 }
 0x4ee   :  { %9466 = vmatpush1.bf16.msra.mxu1 %v12466_v30  ;;  %9312 = vmatprep.subr.bf16.mxu0 %v12473_v12  ;;  %v12523_v30 = vcombine.high %v6008_v53, %v6012_v26  ;;  %v6015_v12 = vld [vmem:[#allocation6 + $0x5d0] sm:$0xff]  ;;  %v12562_v26 = vcombine.low %v6048_v8, %v6052_v9 }
 0x4ef   :  { %9476 = vmatprep.subr.bf16.mxu1 %v12475_v32  ;;  %v6019_v32 = vld [vmem:[#allocation6 + $0x5f0] sm:$0xff] }
 0x4f0   :  { %9304 = vmatmul.mubr.bf16.vlgmr.msra.gmra.mrb[12].mxu0 %v14214_v1  ;;  %v12529_v41 = vcombine.high %v6015_v12, %v6019_v32 }
 0x4f1   :  { %9468 = vmatmul.mubr.bf16.vlgmr.msra.gmra.mrb[12].mxu1 %v14214_v1  ;;  %9313 = vmatpush1.bf16.msra.mxu0 %v12472_v37  ;;  %v12490_v1 = vcombine.low %v5976_v49, %v5980_v50  ;;  %v12520_v37 = vcombine.low %v6007_v15, %v6011_v21  ;;  %v12528_v49 = vcombine.low %v6015_v12, %v6019_v32  ;;  %v6056_v15 = vld [vmem:[#allocation6 + $0x718] sm:$0xff] }
 0x4f2   :  { %9344 = vmatprep.mubr.bf16.mxu0 %v14216_v4  ;;  %9477 = vmatpush1.bf16.msra.mxu1 %v12474_v42  ;;  %v12531_v42 = vcombine.high %v6016_v33, %v6020_v36  ;;  %v12530_v50 = vcombine.low %v6016_v33, %v6020_v36  ;;  %v6060_v21 = vld [vmem:[#allocation6 + $0x738] sm:$0xff] }
 0x4f3   :  { %9508 = vmatprep.mubr.bf16.mxu1 %v14216_v4  ;;  %9314 = vmatprep.subr.bf16.mxu0 %v12481_v23  ;;  %v12496_v4 = vcombine.low %v5983_v58, %v5987_v60  ;;  %v6023_v23 = vld [vmem:[#allocation6 + $0x610] sm:$0xff]  ;;  %v6032_v58 = vld [vmem:[#allocation6 + $0x658] sm:$0xff]  ;;  %v12570_v36 = vcombine.low %v6056_v15, %v6060_v21 }
 0x4f4   :  { %9478 = vmatprep.subr.bf16.mxu1 %v12483_v35  ;;  %v6028_v35 = vld [vmem:[#allocation6 + $0x638] sm:$0xff]  ;;  %v12536_v54 = vcombine.low %v6023_v23, %v6027_v16 }
 0x4f5   :  { %9315 = vmatpush1.bf16.msra.mxu0 %v12480_v25  ;;  %v12537_v25 = vcombine.high %v6023_v23, %v6027_v16  ;;  %v6036_v60 = vld [vmem:[#allocation6 + $0x678] sm:$0xff]  ;;  %v12538_v31 = vcombine.low %v6024_v24, %v6028_v35 }
 0x4f6   :  { %9479 = vmatpush1.bf16.msra.mxu1 %v12482_v59  ;;  %9316 = vmatprep.subr.bf16.mxu0 %v12489_v52  ;;  %v12539_v59 = vcombine.high %v6024_v24, %v6028_v35  ;;  %v6031_v52 = vld [vmem:[#allocation6 + $0x650] sm:$0xff]  ;;  %v12546_v39 = vcombine.low %v6032_v58, %v6036_v60  ;;  %v6064_v12 = vld [vmem:[#allocation6 + $0x758] sm:$0xff] }
 0x4f7   :  { %9480 = vmatprep.subr.bf16.mxu1 %v12491_v56  ;;  %v6035_v56 = vld [vmem:[#allocation6 + $0x670] sm:$0xff]  ;;  %v6068_v32 = vld [vmem:[#allocation6 + $0x778] sm:$0xff] }
 0x4f8   :  { %v12544_v40 = vcombine.low %v6031_v52, %v6035_v56  ;;  %v6072_v23 = vld [vmem:[#allocation6 + $0x798] sm:$0xff]  ;;  %v12578_v35 = vcombine.low %v6064_v12, %v6068_v32 }
 0x4f9   :  { %9317 = vmatpush1.bf16.msra.mxu0 %v12488_v19  ;;  %v12545_v19 = vcombine.high %v6031_v52, %v6035_v56  ;;  %v6076_v16 = vld [vmem:[#allocation6 + $0x7b8] sm:$0xff] }
 0x4fa   :  { %9481 = vmatpush1.bf16.msra.mxu1 %v12490_v1  ;;  %9318 = vmatprep.subr.bf16.mxu0 %v12497_v61  ;;  %v12547_v1 = vcombine.high %v6032_v58, %v6036_v60  ;;  %v6039_v61 = vld [vmem:[#allocation6 + $0x690] sm:$0xff]  ;;  %v6080_v52 = vld [vmem:[#allocation6 + $0x7d8] sm:$0xff]  ;;  %v12586_v60 = vcombine.low %v6072_v23, %v6076_v16 }
 0x4fb   :  { %9482 = vmatprep.subr.bf16.mxu1 %v12499_v62  ;;  %v6043_v62 = vld [vmem:[#allocation6 + $0x6b0] sm:$0xff]  ;;  %v6084_v56 = vld [vmem:[#allocation6 + $0x7f8] sm:$0xff] }
 0x4fc   :  { %v12552_v46 = vcombine.low %v6039_v61, %v6043_v62 }
 0x4fd   :  { %9319 = vmatpush1.bf16.msra.mxu0 %v12496_v4  ;;  %v12553_v4 = vcombine.high %v6039_v61, %v6043_v62  ;;  %v6088_v61 = vld [vmem:[#allocation6 + $0x818] sm:$0xff] }
 0x4fe   :  { %9483 = vmatpush1.bf16.msra.mxu1 %v12498_v2  ;;  %9320 = vmatprep.subr.bf16.mxu0 %v12505_v3  ;;  %v12555_v2 = vcombine.high %v6040_v63, %v6044_v0  ;;  %v6047_v3 = vld [vmem:[#allocation6 + $0x6d0] sm:$0xff]  ;;  %v6092_v62 = vld [vmem:[#allocation6 + $0x838] sm:$0xff]  ;;  %v12594_v0 = vcombine.low %v6080_v52, %v6084_v56 }
 0x4ff   :  { %9484 = vmatprep.subr.bf16.mxu1 %v12507_v5  ;;  %v6051_v5 = vld [vmem:[#allocation6 + $0x6f0] sm:$0xff] }
 0x500   :  { %v12560_v53 = vcombine.low %v6047_v3, %v6051_v5 }
 0x501   :  { %9321 = vmatpush1.bf16.msra.mxu0 %v12504_v14  ;;  %v12561_v14 = vcombine.high %v6047_v3, %v6051_v5  ;;  %v6096_v5 = vld [vmem:[#allocation6 + $0x858] sm:$0xff] }
 0x502   :  { %9485 = vmatpush1.bf16.msra.mxu1 %v12506_v17  ;;  %9322 = vmatprep.subr.bf16.mxu0 %v12513_v57  ;;  %v12563_v17 = vcombine.high %v6048_v8, %v6052_v9  ;;  %v6055_v57 = vld [vmem:[#allocation6 + $0x710] sm:$0xff]  ;;  %v6100_v8 = vld [vmem:[#allocation6 + $0x878] sm:$0xff]  ;;  %v12602_v9 = vcombine.low %v6088_v61, %v6092_v62 }
 0x503   :  { %9486 = vmatprep.subr.bf16.mxu1 %v12515_v20  ;;  %v6059_v20 = vld [vmem:[#allocation6 + $0x730] sm:$0xff] }
 0x504   :  { %v12568_v33 = vcombine.low %v6055_v57, %v6059_v20 }
 0x505   :  { %9323 = vmatpush1.bf16.msra.mxu0 %v12512_v48  ;;  %v12569_v48 = vcombine.high %v6055_v57, %v6059_v20  ;;  %v6104_v57 = vld [vmem:[#allocation6 + $0x898] sm:$0xff] }
 0x506   :  { %9487 = vmatpush1.bf16.msra.mxu1 %v12514_v55  ;;  %9324 = vmatprep.subr.bf16.mxu0 %v12521_v28  ;;  %v12571_v55 = vcombine.high %v6056_v15, %v6060_v21  ;;  %v6063_v28 = vld [vmem:[#allocation6 + $0x750] sm:$0xff]  ;;  %v6108_v20 = vld [vmem:[#allocation6 + $0x8b8] sm:$0xff]  ;;  %v12610_v21 = vcombine.low %v6096_v5, %v6100_v8 }
 0x507   :  { %9488 = vmatprep.subr.bf16.mxu1 %v12523_v30  ;;  %v6067_v30 = vld [vmem:[#allocation6 + $0x770] sm:$0xff] }
 0x508   :  { %v12576_v24 = vcombine.low %v6063_v28, %v6067_v30 }
 0x509   :  { %9325 = vmatpush1.bf16.msra.mxu0 %v12520_v37  ;;  %v12577_v37 = vcombine.high %v6063_v28, %v6067_v30  ;;  %v6112_v28 = vld [vmem:[#allocation6 + $0x8d8] sm:$0xff] }
 0x50a   :  { %9489 = vmatpush1.bf16.msra.mxu1 %v12522_v38  ;;  %9326 = vmatprep.subr.bf16.mxu0 %v12529_v41  ;;  %v12579_v38 = vcombine.high %v6064_v12, %v6068_v32  ;;  %v6071_v41 = vld [vmem:[#allocation6 + $0x790] sm:$0xff]  ;;  %v6116_v30 = vld [vmem:[#allocation6 + $0x8f8] sm:$0xff] }
 0x50b   :  { %9490 = vmatprep.subr.bf16.mxu1 %v12531_v42  ;;  %v6075_v42 = vld [vmem:[#allocation6 + $0x7b0] sm:$0xff] }
 0x50c   :  { %v12584_v58 = vcombine.low %v6071_v41, %v6075_v42 }
 0x50d   :  { %9327 = vmatpush1.bf16.msra.mxu0 %v12528_v49  ;;  %v12585_v49 = vcombine.high %v6071_v41, %v6075_v42  ;;  %v6124_v41 = vld [vmem:[#allocation6 + $0x938] sm:$0xff]  ;;  %v12626_v42 = vcombine.low %v6112_v28, %v6116_v30 }
 0x50e   :  { %9491 = vmatpush1.bf16.msra.mxu1 %v12530_v50  ;;  %9328 = vmatprep.subr.bf16.mxu0 %v12537_v25  ;;  %v12587_v50 = vcombine.high %v6072_v23, %v6076_v16  ;;  %v6079_v25 = vld [vmem:[#allocation6 + $0x7d0] sm:$0xff] }
 0x50f   :  { %9492 = vmatprep.subr.bf16.mxu1 %v12539_v59  ;;  %v6083_v59 = vld [vmem:[#allocation6 + $0x7f0] sm:$0xff] }
 0x510   :  { %v12592_v63 = vcombine.low %v6079_v25, %v6083_v59 }
 0x511   :  { %9329 = vmatpush1.bf16.msra.mxu0 %v12536_v54  ;;  %v12593_v54 = vcombine.high %v6079_v25, %v6083_v59 }
 0x512   :  { %9493 = vmatpush1.bf16.msra.mxu1 %v12538_v31  ;;  %9330 = vmatprep.subr.bf16.mxu0 %v12545_v19  ;;  %v12595_v31 = vcombine.high %v6080_v52, %v6084_v56  ;;  %v6087_v19 = vld [vmem:[#allocation6 + $0x810] sm:$0xff] }
 0x513   :  { %9494 = vmatprep.subr.bf16.mxu1 %v12547_v1  ;;  %v6091_v1 = vld [vmem:[#allocation6 + $0x830] sm:$0xff] }
 0x514   :  { %v12600_v3 = vcombine.low %v6087_v19, %v6091_v1 }
 0x515   :  { %9331 = vmatpush1.bf16.msra.mxu0 %v12544_v40  ;;  %v12601_v40 = vcombine.high %v6087_v19, %v6091_v1 }
 0x516   :  { %9495 = vmatpush1.bf16.msra.mxu1 %v12546_v39  ;;  %9332 = vmatprep.subr.bf16.mxu0 %v12553_v4  ;;  %v12603_v39 = vcombine.high %v6088_v61, %v6092_v62  ;;  %v6095_v4 = vld [vmem:[#allocation6 + $0x850] sm:$0xff] }
 0x517   :  { %9496 = vmatprep.subr.bf16.mxu1 %v12555_v2  ;;  %v6099_v2 = vld [vmem:[#allocation6 + $0x870] sm:$0xff] }
 0x518   :  { %v12608_v15 = vcombine.low %v6095_v4, %v6099_v2 }
 0x519   :  { %9333 = vmatpush1.bf16.msra.mxu0 %v12552_v46  ;;  %v12609_v46 = vcombine.high %v6095_v4, %v6099_v2 }
 0x51a   :  { %9497 = vmatpush1.bf16.msra.mxu1 %v12554_v11  ;;  %9334 = vmatprep.subr.bf16.mxu0 %v12561_v14  ;;  %v6103_v11 = vld [vmem:[#allocation6 + $0x890] sm:$0xff] }
 0x51b   :  { %9498 = vmatprep.subr.bf16.mxu1 %v12563_v17  ;;  %v6107_v14 = vld [vmem:[#allocation6 + $0x8b0] sm:$0xff]  ;;  %v12611_v17 = vcombine.high %v6096_v5, %v6100_v8 }
 0x51c   :  { %v12616_v12 = vcombine.low %v6103_v11, %v6107_v14  ;;  %v6151_v8 = vld [vmem:[#allocation6 + $0xa10] sm:$0xff] }
 0x51d   :  { %9335 = vmatpush1.bf16.msra.mxu0 %v12560_v53  ;;  %v12617_v53 = vcombine.high %v6103_v11, %v6107_v14  ;;  %v6156_v11 = vld [vmem:[#allocation6 + $0xa38] sm:$0xff] }
 0x51e   :  { %9499 = vmatpush1.bf16.msra.mxu1 %v12562_v26  ;;  %9336 = vmatprep.subr.bf16.mxu0 %v12569_v48  ;;  %v12619_v26 = vcombine.high %v6104_v57, %v6108_v20  ;;  %v6111_v48 = vld [vmem:[#allocation6 + $0x8d0] sm:$0xff] }
 0x51f   :  { %9500 = vmatprep.subr.bf16.mxu1 %v12571_v55  ;;  %v6115_v55 = vld [vmem:[#allocation6 + $0x8f0] sm:$0xff] }
 0x520   :  { %v12625_v32 = vcombine.high %v6111_v48, %v6115_v55 }
 0x521   :  { %9337 = vmatpush1.bf16.msra.mxu0 %v12568_v33  ;;  %v12627_v33 = vcombine.high %v6112_v28, %v6116_v30 }
 0x522   :  { %9501 = vmatpush1.bf16.msra.mxu1 %v12570_v36  ;;  %9338 = vmatprep.subr.bf16.mxu0 %v12577_v37  ;;  %v6119_v36 = vld [vmem:[#allocation6 + $0x910] sm:$0xff] }
 0x523   :  { %9502 = vmatprep.subr.bf16.mxu1 %v12579_v38  ;;  %v6123_v37 = vld [vmem:[#allocation6 + $0x930] sm:$0xff]  ;;  %v6120_v38 = vld [vmem:[#allocation6 + $0x918] sm:$0xff] }
 0x524   :  { %v12633_v23 = vcombine.high %v6119_v36, %v6123_v37  ;;  %v12635_v16 = vcombine.high %v6120_v38, %v6124_v41  ;;  %v12632_v25 = vcombine.low %v6119_v36, %v6123_v37  ;;  %v12634_v59 = vcombine.low %v6120_v38, %v6124_v41 }
 0x525   :  { %9339 = vmatpush1.bf16.msra.mxu0 %v12576_v24  ;;  %v6127_v24 = vld [vmem:[#allocation6 + $0x950] sm:$0xff] }
 0x526   :  { %9503 = vmatpush1.bf16.msra.mxu1 %v12578_v35  ;;  %9340 = vmatprep.subr.bf16.mxu0 %v12585_v49  ;;  %v6131_v35 = vld [vmem:[#allocation6 + $0x970] sm:$0xff]  ;;  %v6128_v49 = vld [vmem:[#allocation6 + $0x958] sm:$0xff] }
 0x527   :  { %9504 = vmatprep.subr.bf16.mxu1 %v12587_v50  ;;  %v6132_v50 = vld [vmem:[#allocation6 + $0x978] sm:$0xff]  ;;  %v12641_v52 = vcombine.high %v6127_v24, %v6131_v35  ;;  %v12640_v19 = vcombine.low %v6127_v24, %v6131_v35 }
 0x528   :  { %v12643_v56 = vcombine.high %v6128_v49, %v6132_v50  ;;  %v12642_v1 = vcombine.low %v6128_v49, %v6132_v50 }
 0x529   :  { %9341 = vmatpush1.bf16.msra.mxu0 %v12584_v58  ;;  %v6135_v58 = vld [vmem:[#allocation6 + $0x990] sm:$0xff] }
 0x52a   :  { %9505 = vmatpush1.bf16.msra.mxu1 %v12586_v60  ;;  %9342 = vmatprep.subr.bf16.mxu0 %v12593_v54  ;;  %v6139_v60 = vld [vmem:[#allocation6 + $0x9b0] sm:$0xff]  ;;  %v6136_v54 = vld [vmem:[#allocation6 + $0x998] sm:$0xff] }
 0x52b   :  { %9506 = vmatprep.subr.bf16.mxu1 %v12595_v31  ;;  %v6140_v31 = vld [vmem:[#allocation6 + $0x9b8] sm:$0xff]  ;;  %v12649_v61 = vcombine.high %v6135_v58, %v6139_v60  ;;  %v12648_v4 = vcombine.low %v6135_v58, %v6139_v60 }
 0x52c   :  { %v12651_v62 = vcombine.high %v6136_v54, %v6140_v31  ;;  %v12650_v2 = vcombine.low %v6136_v54, %v6140_v31 }
 0x52d   :  { %9343 = vmatpush1.bf16.msra.mxu0 %v12592_v63  ;;  %v6143_v63 = vld [vmem:[#allocation6 + $0x9d0] sm:$0xff] }
 0x52e   :  { %9507 = vmatpush1.bf16.msra.mxu1 %v12594_v0  ;;  %9353 = vmatprep.subr.bf16.mxu0 %v12601_v40  ;;  %v6147_v0 = vld [vmem:[#allocation6 + $0x9f0] sm:$0xff]  ;;  %v6144_v40 = vld [vmem:[#allocation6 + $0x9d8] sm:$0xff] }
 0x52f   :  { %9517 = vmatprep.subr.bf16.mxu1 %v12603_v39  ;;  %v6148_v39 = vld [vmem:[#allocation6 + $0x9f8] sm:$0xff]  ;;  %v12656_v14 = vcombine.low %v6143_v63, %v6147_v0 }
 0x530   :  { %9345 = vmatmul.mubr.bf16.vlgmr.msra.gmra.mrb[12].mxu0 %v14228_v27  ;;  %v12659_v5 = vcombine.high %v6144_v40, %v6148_v39 }
 0x531   :  { %9509 = vmatmul.mubr.bf16.vlgmr.msra.gmra.mrb[12].mxu1 %v14228_v27  ;;  %9354 = vmatpush1.bf16.msra.mxu0 %v12600_v3  ;;  %v12618_v27 = vcombine.low %v6104_v57, %v6108_v20  ;;  %v12657_v3 = vcombine.high %v6143_v63, %v6147_v0 }
 0x532   :  { %9385 = vmatprep.mubr.bf16.mxu0 %v14248_v7  ;;  %9518 = vmatpush1.bf16.msra.mxu1 %v12602_v9  ;;  %v6155_v9 = vld [vmem:[#allocation6 + $0xa30] sm:$0xff] }
 0x533   :  { %9549 = vmatprep.mubr.bf16.mxu1 %v14248_v7  ;;  %9355 = vmatprep.subr.bf16.mxu0 %v12609_v46  ;;  %v12624_v7 = vcombine.low %v6111_v48, %v6115_v55  ;;  %v6152_v46 = vld [vmem:[#allocation6 + $0xa18] sm:$0xff]  ;;  %v12665_v57 = vcombine.high %v6151_v8, %v6155_v9  ;;  %v12664_v48 = vcombine.low %v6151_v8, %v6155_v9 }
 0x534   :  { %9519 = vmatprep.subr.bf16.mxu1 %v12611_v17  ;;  %v12658_v17 = vcombine.low %v6144_v40, %v6148_v39  ;;  %v12667_v20 = vcombine.high %v6152_v46, %v6156_v11  ;;  %v12666_v55 = vcombine.low %v6152_v46, %v6156_v11 }
 0x535   :  { %9356 = vmatpush1.bf16.msra.mxu0 %v12608_v15  ;;  %v6159_v15 = vld [vmem:[#allocation6 + $0xa50] sm:$0xff] }
 0x536   :  { %9520 = vmatpush1.bf16.msra.mxu1 %v12610_v21  ;;  %9357 = vmatprep.subr.bf16.mxu0 %v12617_v53  ;;  %v6163_v21 = vld [vmem:[#allocation6 + $0xa70] sm:$0xff]  ;;  %v6160_v53 = vld [vmem:[#allocation6 + $0xa58] sm:$0xff] }
 0x537   :  { %9521 = vmatprep.subr.bf16.mxu1 %v12619_v26  ;;  %v6164_v26 = vld [vmem:[#allocation6 + $0xa78] sm:$0xff]  ;;  %v12673_v28 = vcombine.high %v6159_v15, %v6163_v21  ;;  %v12672_v36 = vcombine.low %v6159_v15, %v6163_v21 }
 0x538   :  { %v12675_v30 = vcombine.high %v6160_v53, %v6164_v26  ;;  %v12674_v37 = vcombine.low %v6160_v53, %v6164_v26 }
 0x539   :  { %9358 = vmatpush1.bf16.msra.mxu0 %v12616_v12  ;;  %v6167_v12 = vld [vmem:[#allocation6 + $0xa90] sm:$0xff] }
 0x53a   :  { %9522 = vmatpush1.bf16.msra.mxu1 %v12618_v27  ;;  %9359 = vmatprep.subr.bf16.mxu0 %v12625_v32  ;;  %v6171_v27 = vld [vmem:[#allocation6 + $0xab0] sm:$0xff]  ;;  %v6168_v32 = vld [vmem:[#allocation6 + $0xa98] sm:$0xff] }
 0x53b   :  { %9523 = vmatprep.subr.bf16.mxu1 %v12627_v33  ;;  %v6172_v33 = vld [vmem:[#allocation6 + $0xab8] sm:$0xff]  ;;  %v12681_v38 = vcombine.high %v6167_v12, %v6171_v27  ;;  %v12680_v24 = vcombine.low %v6167_v12, %v6171_v27 }
 0x53c   :  { %v12683_v41 = vcombine.high %v6168_v32, %v6172_v33  ;;  %v12682_v35 = vcombine.low %v6168_v32, %v6172_v33 }
 0x53d   :  { %9360 = vmatpush1.bf16.msra.mxu0 %v12624_v7  ;;  %v6175_v7 = vld [vmem:[#allocation6 + $0xad0] sm:$0xff] }
 0x53e   :  { %9524 = vmatpush1.bf16.msra.mxu1 %v12626_v42  ;;  %9361 = vmatprep.subr.bf16.mxu0 %v12633_v23  ;;  %v6179_v42 = vld [vmem:[#allocation6 + $0xaf0] sm:$0xff]  ;;  %v6176_v23 = vld [vmem:[#allocation6 + $0xad8] sm:$0xff] }
 0x53f   :  { %9525 = vmatprep.subr.bf16.mxu1 %v12635_v16  ;;  %v6180_v16 = vld [vmem:[#allocation6 + $0xaf8] sm:$0xff]  ;;  %v12689_v49 = vcombine.high %v6175_v7, %v6179_v42  ;;  %v12688_v58 = vcombine.low %v6175_v7, %v6179_v42 }
 0x540   :  { %v12691_v50 = vcombine.high %v6176_v23, %v6180_v16  ;;  %v12690_v60 = vcombine.low %v6176_v23, %v6180_v16  ;;  %v6228_v7 = vld [vmem:[#allocation6 + $0xc78] sm:$0xff]  ;;  %v6231_v16 = vld [vmem:[#allocation6 + $0xc90] sm:$0xff] }
 0x541   :  { %9362 = vmatpush1.bf16.msra.mxu0 %v12632_v25  ;;  %v6183_v25 = vld [vmem:[#allocation6 + $0xb10] sm:$0xff] }
 0x542   :  { %9526 = vmatpush1.bf16.msra.mxu1 %v12634_v59  ;;  %9363 = vmatprep.subr.bf16.mxu0 %v12641_v52  ;;  %v6187_v59 = vld [vmem:[#allocation6 + $0xb30] sm:$0xff]  ;;  %v6184_v52 = vld [vmem:[#allocation6 + $0xb18] sm:$0xff] }
 0x543   :  { %9527 = vmatprep.subr.bf16.mxu1 %v12643_v56  ;;  %v6188_v56 = vld [vmem:[#allocation6 + $0xb38] sm:$0xff]  ;;  %v12697_v54 = vcombine.high %v6183_v25, %v6187_v59  ;;  %v12696_v63 = vcombine.low %v6183_v25, %v6187_v59 }
 0x544   :  { %v12699_v31 = vcombine.high %v6184_v52, %v6188_v56  ;;  %v12698_v0 = vcombine.low %v6184_v52, %v6188_v56 }
 0x545   :  { %9364 = vmatpush1.bf16.msra.mxu0 %v12640_v19  ;;  %v6191_v19 = vld [vmem:[#allocation6 + $0xb50] sm:$0xff] }
 0x546   :  { %9528 = vmatpush1.bf16.msra.mxu1 %v12642_v1  ;;  %9365 = vmatprep.subr.bf16.mxu0 %v12649_v61  ;;  %v6195_v1 = vld [vmem:[#allocation6 + $0xb70] sm:$0xff]  ;;  %v6192_v61 = vld [vmem:[#allocation6 + $0xb58] sm:$0xff] }
 0x547   :  { %9529 = vmatprep.subr.bf16.mxu1 %v12651_v62  ;;  %v6196_v62 = vld [vmem:[#allocation6 + $0xb78] sm:$0xff]  ;;  %v12705_v40 = vcombine.high %v6191_v19, %v6195_v1  ;;  %v12704_v8 = vcombine.low %v6191_v19, %v6195_v1 }
 0x548   :  { %v12707_v39 = vcombine.high %v6192_v61, %v6196_v62  ;;  %v12706_v9 = vcombine.low %v6192_v61, %v6196_v62  ;;  %v6247_v62 = vld [vmem:[#allocation6 + $0xd10] sm:$0xff] }
 0x549   :  { %9366 = vmatpush1.bf16.msra.mxu0 %v12648_v4  ;;  %v6199_v4 = vld [vmem:[#allocation6 + $0xb90] sm:$0xff] }
 0x54a   :  { %9530 = vmatpush1.bf16.msra.mxu1 %v12650_v2  ;;  %9367 = vmatprep.subr.bf16.mxu0 %v12657_v3  ;;  %v6203_v2 = vld [vmem:[#allocation6 + $0xbb0] sm:$0xff]  ;;  %v6200_v3 = vld [vmem:[#allocation6 + $0xb98] sm:$0xff] }
 0x54b   :  { %9531 = vmatprep.subr.bf16.mxu1 %v12659_v5  ;;  %v6204_v5 = vld [vmem:[#allocation6 + $0xbb8] sm:$0xff]  ;;  %v12713_v46 = vcombine.high %v6199_v4, %v6203_v2  ;;  %v12712_v15 = vcombine.low %v6199_v4, %v6203_v2 }
 0x54c   :  { %v12715_v11 = vcombine.high %v6200_v3, %v6204_v5  ;;  %v12714_v21 = vcombine.low %v6200_v3, %v6204_v5  ;;  %v6255_v3 = vld [vmem:[#allocation6 + $0xd50] sm:$0xff] }
 0x54d   :  { %9368 = vmatpush1.bf16.msra.mxu0 %v12656_v14  ;;  %v6207_v14 = vld [vmem:[#allocation6 + $0xbd0] sm:$0xff] }
 0x54e   :  { %9532 = vmatpush1.bf16.msra.mxu1 %v12658_v17  ;;  %9369 = vmatprep.subr.bf16.mxu0 %v12665_v57  ;;  %v6211_v17 = vld [vmem:[#allocation6 + $0xbf0] sm:$0xff]  ;;  %v6208_v57 = vld [vmem:[#allocation6 + $0xbd8] sm:$0xff] }
 0x54f   :  { %9533 = vmatprep.subr.bf16.mxu1 %v12667_v20  ;;  %v6212_v20 = vld [vmem:[#allocation6 + $0xbf8] sm:$0xff]  ;;  %v12721_v53 = vcombine.high %v6207_v14, %v6211_v17  ;;  %v12720_v12 = vcombine.low %v6207_v14, %v6211_v17  ;;  %v6259_v5 = vld [vmem:[#allocation6 + $0xd70] sm:$0xff] }
 0x550   :  { %v12723_v26 = vcombine.high %v6208_v57, %v6212_v20  ;;  %v12722_v27 = vcombine.low %v6208_v57, %v6212_v20  ;;  %v12769_v14 = vcombine.high %v6255_v3, %v6259_v5  ;;  %v6263_v57 = vld [vmem:[#allocation6 + $0xd90] sm:$0xff] }
 0x551   :  { %9370 = vmatpush1.bf16.msra.mxu0 %v12664_v48  ;;  %v6215_v48 = vld [vmem:[#allocation6 + $0xc10] sm:$0xff] }
 0x552   :  { %9534 = vmatpush1.bf16.msra.mxu1 %v12666_v55  ;;  %9371 = vmatprep.subr.bf16.mxu0 %v12673_v28  ;;  %v6219_v55 = vld [vmem:[#allocation6 + $0xc30] sm:$0xff]  ;;  %v6216_v28 = vld [vmem:[#allocation6 + $0xc18] sm:$0xff] }
 0x553   :  { %9535 = vmatprep.subr.bf16.mxu1 %v12675_v30  ;;  %v6220_v30 = vld [vmem:[#allocation6 + $0xc38] sm:$0xff]  ;;  %v12729_v32 = vcombine.high %v6215_v48, %v6219_v55  ;;  %v6267_v20 = vld [vmem:[#allocation6 + $0xdb0] sm:$0xff] }
 0x554   :  { %v12731_v33 = vcombine.high %v6216_v28, %v6220_v30  ;;  %v12730_v42 = vcombine.low %v6216_v28, %v6220_v30 }
 0x555   :  { %9372 = vmatpush1.bf16.msra.mxu0 %v12672_v36  ;;  %v6223_v36 = vld [vmem:[#allocation6 + $0xc50] sm:$0xff] }
 0x556   :  { %9536 = vmatpush1.bf16.msra.mxu1 %v12674_v37  ;;  %9373 = vmatprep.subr.bf16.mxu0 %v12681_v38  ;;  %v6227_v37 = vld [vmem:[#allocation6 + $0xc70] sm:$0xff]  ;;  %v12728_v38 = vcombine.low %v6215_v48, %v6219_v55  ;;  %v12777_v48 = vcombine.high %v6263_v57, %v6267_v20 }
 0x557   :  { %9537 = vmatprep.subr.bf16.mxu1 %v12683_v41  ;;  %v6224_v41 = vld [vmem:[#allocation6 + $0xc58] sm:$0xff]  ;;  %v12737_v23 = vcombine.high %v6223_v36, %v6227_v37  ;;  %v12736_v25 = vcombine.low %v6223_v36, %v6227_v37 }
 0x558   :  { %v12738_v59 = vcombine.low %v6224_v41, %v6228_v7  ;;  %v6272_v36 = vld [vmem:[#allocation6 + $0xdd8] sm:$0xff] }
 0x559   :  { %9374 = vmatpush1.bf16.msra.mxu0 %v12680_v24  ;;  %v6235_v24 = vld [vmem:[#allocation6 + $0xcb0] sm:$0xff]  ;;  %v6276_v37 = vld [vmem:[#allocation6 + $0xdf8] sm:$0xff] }
 0x55a   :  { %9538 = vmatpush1.bf16.msra.mxu1 %v12682_v35  ;;  %9375 = vmatprep.subr.bf16.mxu0 %v12689_v49  ;;  %v12739_v35 = vcombine.high %v6224_v41, %v6228_v7  ;;  %v6232_v49 = vld [vmem:[#allocation6 + $0xc98] sm:$0xff]  ;;  %v12745_v52 = vcombine.high %v6231_v16, %v6235_v24  ;;  %v12744_v19 = vcombine.low %v6231_v16, %v6235_v24 }
 0x55b   :  { %9539 = vmatprep.subr.bf16.mxu1 %v12691_v50  ;;  %v6236_v50 = vld [vmem:[#allocation6 + $0xcb8] sm:$0xff]  ;;  %v12776_v7 = vcombine.low %v6263_v57, %v6267_v20 }
 0x55c   :  { %v12747_v56 = vcombine.high %v6232_v49, %v6236_v50 }
 0x55d   :  { %9376 = vmatpush1.bf16.msra.mxu0 %v12688_v58  ;;  %v6239_v58 = vld [vmem:[#allocation6 + $0xcd0] sm:$0xff] }
 0x55e   :  { %9540 = vmatpush1.bf16.msra.mxu1 %v12690_v60  ;;  %9377 = vmatprep.subr.bf16.mxu0 %v12697_v54  ;;  %v6243_v60 = vld [vmem:[#allocation6 + $0xcf0] sm:$0xff]  ;;  %v6240_v54 = vld [vmem:[#allocation6 + $0xcd8] sm:$0xff] }
 0x55f   :  { %9541 = vmatprep.subr.bf16.mxu1 %v12699_v31  ;;  %v6244_v31 = vld [vmem:[#allocation6 + $0xcf8] sm:$0xff]  ;;  %v12753_v1 = vcombine.high %v6239_v58, %v6243_v60 }
 0x560   :  { %v12755_v61 = vcombine.high %v6240_v54, %v6244_v31 }
 0x561   :  { %9378 = vmatpush1.bf16.msra.mxu0 %v12696_v63  ;;  %v6251_v63 = vld [vmem:[#allocation6 + $0xd30] sm:$0xff] }
 0x562   :  { %9542 = vmatpush1.bf16.msra.mxu1 %v12698_v0  ;;  %9379 = vmatprep.subr.bf16.mxu0 %v12705_v40  ;;  %v6248_v0 = vld [vmem:[#allocation6 + $0xd18] sm:$0xff]  ;;  %v12761_v4 = vcombine.high %v6247_v62, %v6251_v63 }
 0x563   :  { %9543 = vmatprep.subr.bf16.mxu1 %v12707_v39  ;;  %v6252_v40 = vld [vmem:[#allocation6 + $0xd38] sm:$0xff]  ;;  %v12754_v39 = vcombine.low %v6240_v54, %v6244_v31  ;;  %v6287_v54 = vld [vmem:[#allocation6 + $0xe50] sm:$0xff] }
 0x564   :  { %v12763_v2 = vcombine.high %v6248_v0, %v6252_v40  ;;  %v6291_v31 = vld [vmem:[#allocation6 + $0xe70] sm:$0xff] }
 0x565   :  { %9380 = vmatpush1.bf16.msra.mxu0 %v12704_v8  ;;  %v6256_v8 = vld [vmem:[#allocation6 + $0xd58] sm:$0xff] }
 0x566   :  { %9544 = vmatpush1.bf16.msra.mxu1 %v12706_v9  ;;  %9381 = vmatprep.subr.bf16.mxu0 %v12713_v46  ;;  %v6260_v9 = vld [vmem:[#allocation6 + $0xd78] sm:$0xff]  ;;  %v12760_v46 = vcombine.low %v6247_v62, %v6251_v63  ;;  %v12801_v62 = vcombine.high %v6287_v54, %v6291_v31 }
 0x567   :  { %9545 = vmatprep.subr.bf16.mxu1 %v12715_v11  ;;  %v12762_v11 = vcombine.low %v6248_v0, %v6252_v40  ;;  %v12771_v17 = vcombine.high %v6256_v8, %v6260_v9  ;;  %v6295_v0 = vld [vmem:[#allocation6 + $0xe90] sm:$0xff] }
 0x568   :  { %v6299_v40 = vld [vmem:[#allocation6 + $0xeb0] sm:$0xff] }
 0x569   :  { %9382 = vmatpush1.bf16.msra.mxu0 %v12712_v15  ;;  %v6264_v15 = vld [vmem:[#allocation6 + $0xd98] sm:$0xff] }
 0x56a   :  { %9546 = vmatpush1.bf16.msra.mxu1 %v12714_v21  ;;  %9383 = vmatprep.subr.bf16.mxu0 %v12721_v53  ;;  %v6268_v21 = vld [vmem:[#allocation6 + $0xdb8] sm:$0xff]  ;;  %v12768_v53 = vcombine.low %v6255_v3, %v6259_v5  ;;  %v12809_v3 = vcombine.high %v6295_v0, %v6299_v40 }
 0x56b   :  { %9547 = vmatprep.subr.bf16.mxu1 %v12723_v26  ;;  %v12770_v26 = vcombine.low %v6256_v8, %v6260_v9  ;;  %v12779_v30 = vcombine.high %v6264_v15, %v6268_v21  ;;  %v12778_v16 = vcombine.low %v6264_v15, %v6268_v21  ;;  %v6303_v8 = vld [vmem:[#allocation6 + $0xed0] sm:$0xff] }
 0x56c   :  { %v6307_v9 = vld [vmem:[#allocation6 + $0xef0] sm:$0xff] }
 0x56d   :  { %9384 = vmatpush1.bf16.msra.mxu0 %v12720_v12  ;;  %v6271_v12 = vld [vmem:[#allocation6 + $0xdd0] sm:$0xff]  ;;  %v12817_v57 = vcombine.high %v6303_v8, %v6307_v9 }
 0x56e   :  { %9548 = vmatpush1.bf16.msra.mxu1 %v12722_v27  ;;  %9394 = vmatprep.subr.bf16.mxu0 %v12729_v32  ;;  %v6275_v27 = vld [vmem:[#allocation6 + $0xdf0] sm:$0xff] }
 0x56f   :  { %9558 = vmatprep.subr.bf16.mxu1 %v12731_v33  ;;  %v12785_v24 = vcombine.high %v6271_v12, %v6275_v27  ;;  %v6311_v15 = vld [vmem:[#allocation6 + $0xf10] sm:$0xff] }
 0x570   :  { %9386 = vmatmul.mubr.bf16.vlgmr.msra.gmra.mrb[12].mxu0 %v14250_v10  ;;  %v6315_v21 = vld [vmem:[#allocation6 + $0xf30] sm:$0xff] }
 0x571   :  { %9550 = vmatmul.mubr.bf16.vlgmr.msra.gmra.mrb[12].mxu1 %v14250_v10  ;;  %9395 = vmatpush1.bf16.msra.mxu0 %v12728_v38  ;;  %v12746_v10 = vcombine.low %v6232_v49, %v6236_v50  ;;  %v6279_v49 = vld [vmem:[#allocation6 + $0xe10] sm:$0xff] }
 0x572   :  { %9426 = vmatprep.mubr.bf16.mxu0 %v14254_v18  ;;  %9559 = vmatpush1.bf16.msra.mxu1 %v12730_v42  ;;  %v6283_v50 = vld [vmem:[#allocation6 + $0xe30] sm:$0xff] }
 0x573   :  { %9590 = vmatprep.mubr.bf16.mxu1 %v14254_v18  ;;  %9396 = vmatprep.subr.bf16.mxu0 %v12737_v23  ;;  %v12752_v18 = vcombine.low %v6239_v58, %v6243_v60  ;;  %v12793_v58 = vcombine.high %v6279_v49, %v6283_v50 }
 0x574   :  { %9560 = vmatprep.subr.bf16.mxu1 %v12739_v35  ;;  %v12787_v35 = vcombine.high %v6272_v36, %v6276_v37 }
 0x575   :  { %9397 = vmatpush1.bf16.msra.mxu0 %v12736_v25  ;;  %v6280_v25 = vld [vmem:[#allocation6 + $0xe18] sm:$0xff] }
 0x576   :  { %9561 = vmatpush1.bf16.msra.mxu1 %v12738_v59  ;;  %9398 = vmatprep.subr.bf16.mxu0 %v12745_v52  ;;  %v6284_v59 = vld [vmem:[#allocation6 + $0xe38] sm:$0xff]  ;;  %v12784_v52 = vcombine.low %v6271_v12, %v6275_v27  ;;  %v12825_v12 = vcombine.high %v6311_v15, %v6315_v21 }
 0x577   :  { %9562 = vmatprep.subr.bf16.mxu1 %v12747_v56  ;;  %v12786_v56 = vcombine.low %v6272_v36, %v6276_v37  ;;  %v12795_v60 = vcombine.high %v6280_v25, %v6284_v59  ;;  %v6319_v36 = vld [vmem:[#allocation6 + $0xf50] sm:$0xff] }
 0x578   :  { %v6323_v37 = vld [vmem:[#allocation6 + $0xf70] sm:$0xff] }
 0x579   :  { %9399 = vmatpush1.bf16.msra.mxu0 %v12744_v19  ;;  %v6288_v19 = vld [vmem:[#allocation6 + $0xe58] sm:$0xff] }
 0x57a   :  { %9563 = vmatpush1.bf16.msra.mxu1 %v12746_v10  ;;  %9400 = vmatprep.subr.bf16.mxu0 %v12753_v1  ;;  %v6292_v10 = vld [vmem:[#allocation6 + $0xe78] sm:$0xff]  ;;  %v12792_v1 = vcombine.low %v6279_v49, %v6283_v50 }
 0x57b   :  { %9564 = vmatprep.subr.bf16.mxu1 %v12755_v61  ;;  %v12794_v61 = vcombine.low %v6280_v25, %v6284_v59  ;;  %v12803_v63 = vcombine.high %v6288_v19, %v6292_v10  ;;  %v6328_v49 = vld [vmem:[#allocation6 + $0xf98] sm:$0xff]  ;;  %v14291_v25 = vld [vmem:[#allocation7] sm:$0xff]  ;;  %v12832_v59 = vcombine.low %v6319_v36, %v6323_v37 }
 0x57c   :  { %v6332_v50 = vld [vmem:[#allocation6 + $0xfb8] sm:$0xff] }
 0x57d   :  { %9401 = vmatpush1.bf16.msra.mxu0 %v12752_v18  ;;  %v6296_v18 = vld [vmem:[#allocation6 + $0xe98] sm:$0xff] }
 0x57e   :  { %9565 = vmatpush1.bf16.msra.mxu1 %v12754_v39  ;;  %9402 = vmatprep.subr.bf16.mxu0 %v12761_v4  ;;  %v6300_v39 = vld [vmem:[#allocation6 + $0xeb8] sm:$0xff]  ;;  %v12800_v4 = vcombine.low %v6287_v54, %v6291_v31  ;;  %v6339_v54 = vld [vmem:[#allocation6 + $0xff0] sm:$0xff]  ;;  %v6350_v31 = vrot.slane %v14291_v25, %v14189_v6 }
 0x57f   :  { %9566 = vmatprep.subr.bf16.mxu1 %v12763_v2  ;;  %v12802_v2 = vcombine.low %v6288_v19, %v6292_v10  ;;  %v12811_v5 = vcombine.high %v6296_v18, %v6300_v39  ;;  %v6336_v19 = vld [vmem:[#allocation6 + $0xfd8] sm:$0xff] }
 0x580   :  { %v6340_v10 = vld [vmem:[#allocation6 + $0xff8] sm:$0xff] }
 0x581   :  { %9403 = vmatpush1.bf16.msra.mxu0 %v12760_v46  ;;  %v6304_v46 = vld [vmem:[#allocation6 + $0xed8] sm:$0xff] }
 0x582   :  { %9567 = vmatpush1.bf16.msra.mxu1 %v12762_v11  ;;  %9404 = vmatprep.subr.bf16.mxu0 %v12769_v14  ;;  %v6308_v11 = vld [vmem:[#allocation6 + $0xef8] sm:$0xff]  ;;  %v12808_v14 = vcombine.low %v6295_v0, %v6299_v40 }
 0x583   :  { %v14283_v55 = vpop.f32.mrb[8].mxu0  ;;  %v14285_v28 = vpop.f32.mrb[8].mxu1  ;;  %9568 = vmatprep.subr.bf16.mxu1 %v12771_v17  ;;  %v12810_v17 = vcombine.low %v6296_v18, %v6300_v39  ;;  %v12819_v20 = vcombine.high %v6304_v46, %v6308_v11  ;;  %v12850_v18 = vcombine.low %v6336_v19, %v6340_v10  ;;  %v13308_v39 = vld [vmem:[#allocation9 + $0x4] ss:$16 sps:$4 sm:$0xff]  }
 0x584   :  { %v14287_v32 = vpop.f32.mrb[9].mxu0  ;;  %v14289_v33 = vpop.f32.mrb[9].mxu1 }
 0x585   :  { %v9104_v38 = vpop.f32.mrb[10].mxu0  ;;  %v9268_v41 = vpop.f32.mrb[10].mxu1  ;;  %9405 = vmatpush1.bf16.msra.mxu0 %v12768_v53  ;;  %v6312_v53 = vld [vmem:[#allocation6 + $0xf18] sm:$0xff]  ;;  %v13119_v0 = vadd.f32 %v14287_v32, %v6350_v31  ;;  %v13317_v32 = vld [vmem:[#allocation9 + $0x2c] ss:$16 sps:$4 sm:$0xff]  }
 0x586   :  { %9569 = vmatpush1.bf16.msra.mxu1 %v12770_v26  ;;  %v9105_v42 = vpop.f32.mrb[11].mxu0  ;;  %v9269_v23 = vpop.f32.mrb[11].mxu1  ;;  %9406 = vmatprep.subr.bf16.mxu0 %v12777_v48  ;;  %v6316_v26 = vld [vmem:[#allocation6 + $0xf38] sm:$0xff]  ;;  %v12816_v48 = vcombine.low %v6303_v8, %v6307_v9  ;;  %v13363_v31 = vld [vmem:[#allocation9 + $0x128] ss:$16 sps:$4 sm:$0xff]  }
 0x587   :  { %9570 = vmatprep.subr.bf16.mxu1 %v12779_v30  ;;  %v12818_v30 = vcombine.low %v6304_v46, %v6308_v11  ;;  %v12827_v27 = vcombine.high %v6312_v53, %v6316_v26  ;;  %v6320_v38 = vld [vmem:[#allocation6 + $0xf58] sm:$0xff]  ;;  %v12826_v42 = vcombine.low %v6312_v53, %v6316_v26  ;;  %v12833_v23 = vcombine.high %v6319_v36, %v6323_v37  ;;  %v13315_v11 = vld [vmem:[#allocation9 + $0x28] ss:$16 sps:$4 sm:$0xff]   ;;  %v13341_v36 = vld [vmem:[#allocation9 + $0xac] ss:$16 sps:$4 sm:$0xff]  }
 0x588   :  { %v6324_v41 = vld [vmem:[#allocation6 + $0xf78] sm:$0xff]  ;;  %v13327_v53 = vld [vmem:[#allocation9 + $0x68] ss:$16 sps:$4 sm:$0xff]  }
 0x589   :  { %9407 = vmatpush1.bf16.msra.mxu0 %v12776_v7  ;;  %v12824_v7 = vcombine.low %v6311_v15, %v6315_v21  ;;  %v13314_v8 = vld [vmem:[#allocation9 + $0x24] ss:$16 sps:$4 sm:$0xff]   ;;  %v13312_v46 = vld [vmem:[#allocation9 + $0x20] ss:$16 sps:$4 sm:$0xff]   ;;  %v13329_v21 = vld [vmem:[#allocation9 + $0x6c] ss:$16 sps:$4 sm:$0xff]  }
 0x58a   :  { %9571 = vmatpush1.bf16.msra.mxu1 %v12778_v16  ;;  %9408 = vmatprep.subr.bf16.mxu0 %v12785_v24  ;;  %v12835_v16 = vcombine.high %v6320_v38, %v6324_v41  ;;  %v6327_v24 = vld [vmem:[#allocation6 + $0xf90] sm:$0xff]  ;;  %v13326_v15 = vld [vmem:[#allocation9 + $0x64] ss:$16 sps:$4 sm:$0xff]   ;;  %v13336_v37 = vld [vmem:[#allocation9 + $0xa0] ss:$16 sps:$4 sm:$0xff]  }
 0x58b   :  { %9572 = vmatprep.subr.bf16.mxu1 %v12787_v35  ;;  %v6331_v35 = vld [vmem:[#allocation6 + $0xfb0] sm:$0xff]  ;;  %v13332_v26 = vld [vmem:[#allocation9 + $0x84] ss:$16 sps:$4 sm:$0xff]  }
 0x58d   :  { %9409 = vmatpush1.bf16.msra.mxu0 %v12784_v52  ;;  %v12834_v52 = vcombine.low %v6320_v38, %v6324_v41  ;;  %v13339_v38 = vld [vmem:[#allocation9 + $0xa8] ss:$16 sps:$4 sm:$0xff]   ;;  %v13344_v41 = vld [vmem:[#allocation9 + $0xc4] ss:$16 sps:$4 sm:$0xff]  }
 0x58e   :  { %9573 = vmatpush1.bf16.msra.mxu1 %v12786_v56  ;;  %9410 = vmatprep.subr.bf16.mxu0 %v12793_v58  ;;  %v12841_v56 = vcombine.high %v6327_v24, %v6331_v35  ;;  %v12843_v58 = vcombine.high %v6328_v49, %v6332_v50 }
 0x58f   :  { %9574 = vmatprep.subr.bf16.mxu1 %v12795_v60  ;;  %v6335_v60 = vld [vmem:[#allocation6 + $0xfd0] sm:$0xff] }
 0x590   :  { %v12848_v40 = vcombine.low %v6335_v60, %v6339_v54 }
 0x591   :  { %9411 = vmatpush1.bf16.msra.mxu0 %v12792_v1  ;;  %v12840_v1 = vcombine.low %v6327_v24, %v6331_v35  ;;  %v13353_v24 = vld [vmem:[#allocation9 + $0xec] ss:$16 sps:$4 sm:$0xff]   ;;  %v13348_v35 = vld [vmem:[#allocation9 + $0xe0] ss:$16 sps:$4 sm:$0xff]  }
 0x592   :  { %9575 = vmatpush1.bf16.msra.mxu1 %v12794_v61  ;;  %9412 = vmatprep.subr.bf16.mxu0 %v12801_v62  ;;  %v12842_v61 = vcombine.low %v6328_v49, %v6332_v50  ;;  %v12849_v62 = vcombine.high %v6335_v60, %v6339_v54  ;;  %v13351_v49 = vld [vmem:[#allocation9 + $0xe8] ss:$16 sps:$4 sm:$0xff]   ;;  %v13356_v50 = vld [vmem:[#allocation9 + $0x104] ss:$16 sps:$4 sm:$0xff]   ;;  %v13365_v60 = vld [vmem:[#allocation9 + $0x12c] ss:$16 sps:$4 sm:$0xff]  }
 0x593   :  { %9576 = vmatprep.subr.bf16.mxu1 %v12803_v63  ;;  %v12851_v63 = vcombine.high %v6336_v19, %v6340_v10  ;;  %v13360_v54 = vld [vmem:[#allocation9 + $0x120] ss:$16 sps:$4 sm:$0xff]   ;;  %v13368_v19 = vld [vmem:[#allocation9 + $0x144] ss:$16 sps:$4 sm:$0xff]   ;;  %v13371_v10 = vld [vmem:[#allocation9 + $0x14c] ss:$16 sps:$4 sm:$0xff]  }
 0x595   :  { %9413 = vmatpush1.bf16.msra.mxu0 %v12800_v4  ;;  %v13311_v4 = vld [vmem:[#allocation9 + $0xc] ss:$16 sps:$4 sm:$0xff]  }
 0x596   :  { %9577 = vmatpush1.bf16.msra.mxu1 %v12802_v2  ;;  %9414 = vmatprep.subr.bf16.mxu0 %v12809_v3  ;;  %v9600_v2 = vmax.f32 %v13119_v0, 0.0  ;;  %v13306_v3 = vld [vmem:[#allocation9] ss:$16 sps:$4 sm:$0xff]  }
 0x597   :  { %9578 = vmatprep.subr.bf16.mxu1 %v12811_v5  ;;  %v13309_v5 = vld [vmem:[#allocation9 + $0x8] ss:$16 sps:$4 sm:$0xff]   ;;  %v13372_v0 = vld [vmem:[#allocation9 + $0x160] ss:$16 sps:$4 sm:$0xff]  }
 0x598   :  { %v9608_v9 = vpack.c.bf16 %v9600_v2, %v9600_v2  ;;  %v13381_v2 = vld [vmem:[#allocation9 + $0x188] ss:$16 sps:$4 sm:$0xff]  }
 0x599   :  { %9415 = vmatpush1.bf16.msra.mxu0 %v12808_v14  ;;  %v13320_v14 = vld [vmem:[#allocation9 + $0x44] ss:$16 sps:$4 sm:$0xff]  }
 0x59a   :  { %9579 = vmatpush1.bf16.msra.mxu1 %v12810_v17  ;;  %9416 = vmatprep.subr.bf16.mxu0 %v12817_v57  ;;  %v13323_v17 = vld [vmem:[#allocation9 + $0x4c] ss:$16 sps:$4 sm:$0xff]   ;;  %v13318_v57 = vld [vmem:[#allocation9 + $0x40] ss:$16 sps:$4 sm:$0xff]  }
 0x59b   :  { %9580 = vmatprep.subr.bf16.mxu1 %v12819_v20  ;;  %v13321_v20 = vld [vmem:[#allocation9 + $0x48] ss:$16 sps:$4 sm:$0xff]  }
 0x59d   :  { %9417 = vmatpush1.bf16.msra.mxu0 %v12816_v48  ;;  %v13335_v48 = vld [vmem:[#allocation9 + $0x8c] ss:$16 sps:$4 sm:$0xff]  }
 0x59e   :  { %9581 = vmatpush1.bf16.msra.mxu1 %v12818_v30  ;;  %9418 = vmatprep.subr.bf16.mxu0 %v12825_v12  ;;  %v13330_v30 = vld [vmem:[#allocation9 + $0x80] ss:$16 sps:$4 sm:$0xff]   ;;  %v13333_v12 = vld [vmem:[#allocation9 + $0x88] ss:$16 sps:$4 sm:$0xff]  }
 0x59f   :  { %9582 = vmatprep.subr.bf16.mxu1 %v12827_v27  ;;  %v13338_v27 = vld [vmem:[#allocation9 + $0xa4] ss:$16 sps:$4 sm:$0xff]  }
 0x5a1   :  { %9419 = vmatpush1.bf16.msra.mxu0 %v12824_v7  ;;  %v13347_v7 = vld [vmem:[#allocation9 + $0xcc] ss:$16 sps:$4 sm:$0xff]  }
 0x5a2   :  { %9583 = vmatpush1.bf16.msra.mxu1 %v12826_v42  ;;  %9420 = vmatprep.subr.bf16.mxu0 %v12833_v23  ;;  %v13342_v42 = vld [vmem:[#allocation9 + $0xc0] ss:$16 sps:$4 sm:$0xff]   ;;  %v13345_v23 = vld [vmem:[#allocation9 + $0xc8] ss:$16 sps:$4 sm:$0xff]  }
 0x5a3   :  { %9584 = vmatprep.subr.bf16.mxu1 %v12835_v16  ;;  %v13350_v16 = vld [vmem:[#allocation9 + $0xe4] ss:$16 sps:$4 sm:$0xff]  }
 0x5a5   :  { %9421 = vmatpush1.bf16.msra.mxu0 %v12832_v59  ;;  %v13359_v59 = vld [vmem:[#allocation9 + $0x10c] ss:$16 sps:$4 sm:$0xff]  }
 0x5a6   :  { %9585 = vmatpush1.bf16.msra.mxu1 %v12834_v52  ;;  %9422 = vmatprep.subr.bf16.mxu0 %v12841_v56  ;;  %v13354_v52 = vld [vmem:[#allocation9 + $0x100] ss:$16 sps:$4 sm:$0xff]   ;;  %v13357_v56 = vld [vmem:[#allocation9 + $0x108] ss:$16 sps:$4 sm:$0xff]  }
 0x5a7   :  { %9586 = vmatprep.subr.bf16.mxu1 %v12843_v58  ;;  %v13362_v58 = vld [vmem:[#allocation9 + $0x124] ss:$16 sps:$4 sm:$0xff]  }
 0x5a9   :  { %9423 = vmatpush1.bf16.msra.mxu0 %v12840_v1  ;;  %v13366_v1 = vld [vmem:[#allocation9 + $0x140] ss:$16 sps:$4 sm:$0xff]  }
 0x5aa   :  { %9587 = vmatpush1.bf16.msra.mxu1 %v12842_v61  ;;  %9424 = vmatprep.subr.bf16.mxu0 %v12849_v62  ;;  %v13369_v61 = vld [vmem:[#allocation9 + $0x148] ss:$16 sps:$4 sm:$0xff]   ;;  %v13374_v62 = vld [vmem:[#allocation9 + $0x164] ss:$16 sps:$4 sm:$0xff]  }
 0x5ab   :  { %9588 = vmatprep.subr.bf16.mxu1 %v12851_v63  ;;  %v13377_v63 = vld [vmem:[#allocation9 + $0x16c] ss:$16 sps:$4 sm:$0xff]  }
 0x5ad   :  { %9425 = vmatpush1.bf16.msra.mxu0 %v12848_v40  ;;  %v13375_v40 = vld [vmem:[#allocation9 + $0x168] ss:$16 sps:$4 sm:$0xff]  }
 0x5ae   :  { %9589 = vmatpush1.bf16.msra.mxu1 %v12850_v18  ;;  %11173 = vmatprep.subr.bf16.mxu0 %v13308_v39  ;;  %v13380_v18 = vld [vmem:[#allocation9 + $0x184] ss:$16 sps:$4 sm:$0xff]   ;;  %v13383_v39 = vld [vmem:[#allocation9 + $0x18c] ss:$16 sps:$4 sm:$0xff]  }
 0x5af   :  { %11337 = vmatprep.subr.bf16.mxu1 %v13311_v4  ;;  %v13378_v4 = vld [vmem:[#allocation9 + $0x180] ss:$16 sps:$4 sm:$0xff]  }
 0x5b0   :  { %9427 = vmatmul.mubr.bf16.vlgmr.msra.gmra.mrb[12].mxu0 %v14265_v47 }
 0x5b1   :  { %9591 = vmatmul.mubr.bf16.vlgmr.msra.gmra.mrb[12].mxu1 %v14265_v47  ;;  %11174 = vmatpush1.bf16.msra.mxu0 %v13306_v3  ;;  %v13324_v47 = vld [vmem:[#allocation9 + $0x60] ss:$16 sps:$4 sm:$0xff]   ;;  %v13386_v3 = vld [vmem:[#allocation9 + $0x1a4] ss:$16 sps:$4 sm:$0xff]  }
 0x5b2   :  { %11205 = vmatprep.mubr.bf16.mxu0 %v9608_v9  ;;  %11338 = vmatpush1.bf16.msra.mxu1 %v13309_v5  ;;  %v13389_v5 = vld [vmem:[#allocation9 + $0x1ac] ss:$16 sps:$4 sm:$0xff]  }
 0x5b3   :  { %11369 = vmatprep.mubr.bf16.mxu1 %v9608_v9  ;;  %11175 = vmatprep.subr.bf16.mxu0 %v13314_v8  ;;  %v13384_v8 = vld [vmem:[#allocation9 + $0x1a0] ss:$16 sps:$4 sm:$0xff]   ;;  %v6346_v9 = vrot.slane %v14291_v25, %v14203_v22 }
 0x5b4   :  { %11339 = vmatprep.subr.bf16.mxu1 %v13317_v32  ;;  %v13387_v32 = vld [vmem:[#allocation9 + $0x1a8] ss:$16 sps:$4 sm:$0xff]  }
 0x5b5   :  { %11176 = vmatpush1.bf16.msra.mxu0 %v13312_v46  ;;  %v13392_v46 = vld [vmem:[#allocation9 + $0x1c4] ss:$16 sps:$4 sm:$0xff]  }
 0x5b6   :  { %11340 = vmatpush1.bf16.msra.mxu1 %v13315_v11  ;;  %11177 = vmatprep.subr.bf16.mxu0 %v13320_v14  ;;  %v13395_v11 = vld [vmem:[#allocation9 + $0x1cc] ss:$16 sps:$4 sm:$0xff]   ;;  %v6358_v14 = vrot.slane %v14291_v25, %v14206_v29 }
 0x5b7   :  { %11341 = vmatprep.subr.bf16.mxu1 %v13323_v17  ;;  %v13390_v17 = vld [vmem:[#allocation9 + $0x1c0] ss:$16 sps:$4 sm:$0xff]  }
 0x5b9   :  { %11178 = vmatpush1.bf16.msra.mxu0 %v13318_v57  ;;  %v13118_v57 = vadd.f32 %v14283_v55, %v6346_v9  ;;  %v13402_v55 = vld [vmem:[#allocation9 + $0x200] ss:$16 sps:$4 sm:$0xff]   ;;  %v13458_v9 = vld [vmem:[#allocation9 + $0x324] ss:$16 sps:$4 sm:$0xff]  }
 0x5ba   :  { %11342 = vmatpush1.bf16.msra.mxu1 %v13321_v20  ;;  %11179 = vmatprep.subr.bf16.mxu0 %v13326_v15  ;;  %v13393_v20 = vld [vmem:[#allocation9 + $0x1c8] ss:$16 sps:$4 sm:$0xff]   ;;  %v13398_v15 = vld [vmem:[#allocation9 + $0x1e4] ss:$16 sps:$4 sm:$0xff]  }
 0x5bb   :  { %11343 = vmatprep.subr.bf16.mxu1 %v13329_v21  ;;  %v13401_v21 = vld [vmem:[#allocation9 + $0x1ec] ss:$16 sps:$4 sm:$0xff]  }
 0x5bd   :  { %11180 = vmatpush1.bf16.msra.mxu0 %v13324_v47  ;;  %v13121_v47 = vadd.f32 %v14289_v33, %v6358_v14  ;;  %v13413_v33 = vld [vmem:[#allocation9 + $0x22c] ss:$16 sps:$4 sm:$0xff]   ;;  %v13464_v14 = vld [vmem:[#allocation9 + $0x344] ss:$16 sps:$4 sm:$0xff]  }
 0x5be   :  { %11344 = vmatpush1.bf16.msra.mxu1 %v13327_v53  ;;  %11181 = vmatprep.subr.bf16.mxu0 %v13332_v26  ;;  %v13396_v53 = vld [vmem:[#allocation9 + $0x1e0] ss:$16 sps:$4 sm:$0xff]   ;;  %v9599_v26 = vmax.f32 %v13118_v57, 0.0 }
 0x5bf   :  { %11345 = vmatprep.subr.bf16.mxu1 %v13335_v48  ;;  %v13399_v48 = vld [vmem:[#allocation9 + $0x1e8] ss:$16 sps:$4 sm:$0xff]   ;;  %v13462_v57 = vld [vmem:[#allocation9 + $0x340] ss:$16 sps:$4 sm:$0xff]  }
 0x5c1   :  { %11182 = vmatpush1.bf16.msra.mxu0 %v13330_v30  ;;  %v13404_v30 = vld [vmem:[#allocation9 + $0x204] ss:$16 sps:$4 sm:$0xff]  }
 0x5c2   :  { %11346 = vmatpush1.bf16.msra.mxu1 %v13333_v12  ;;  %11183 = vmatprep.subr.bf16.mxu0 %v13338_v27  ;;  %v13407_v12 = vld [vmem:[#allocation9 + $0x20c] ss:$16 sps:$4 sm:$0xff]   ;;  %v9602_v27 = vmax.f32 %v13121_v47, 0.0  ;;  %v13468_v47 = vld [vmem:[#allocation9 + $0x360] ss:$16 sps:$4 sm:$0xff]  }
 0x5c3   :  { %11347 = vmatprep.subr.bf16.mxu1 %v13341_v36  ;;  %v9607_v36 = vpack.c.bf16 %v9599_v26, %v9599_v26  ;;  %v13476_v26 = vld [vmem:[#allocation9 + $0x384] ss:$16 sps:$4 sm:$0xff]  }
 0x5c5   :  { %11184 = vmatpush1.bf16.msra.mxu0 %v13336_v37  ;;  %v13405_v37 = vld [vmem:[#allocation9 + $0x208] ss:$16 sps:$4 sm:$0xff]  }
 0x5c6   :  { %11348 = vmatpush1.bf16.msra.mxu1 %v13339_v38  ;;  %11185 = vmatprep.subr.bf16.mxu0 %v13344_v41  ;;  %v13410_v38 = vld [vmem:[#allocation9 + $0x224] ss:$16 sps:$4 sm:$0xff]   ;;  %v9610_v41 = vpack.c.bf16 %v9602_v27, %v9602_v27 }
 0x5c7   :  { %11349 = vmatprep.subr.bf16.mxu1 %v13347_v7  ;;  %v13408_v7 = vld [vmem:[#allocation9 + $0x220] ss:$16 sps:$4 sm:$0xff]   ;;  %v13482_v27 = vld [vmem:[#allocation9 + $0x3a4] ss:$16 sps:$4 sm:$0xff]  }
 0x5c9   :  { %11186 = vmatpush1.bf16.msra.mxu0 %v13342_v42  ;;  %v13411_v42 = vld [vmem:[#allocation9 + $0x228] ss:$16 sps:$4 sm:$0xff]  }
 0x5ca   :  { %11350 = vmatpush1.bf16.msra.mxu1 %v13345_v23  ;;  %11187 = vmatprep.subr.bf16.mxu0 %v13350_v16  ;;  %v13416_v23 = vld [vmem:[#allocation9 + $0x244] ss:$16 sps:$4 sm:$0xff]   ;;  %v13419_v16 = vld [vmem:[#allocation9 + $0x24c] ss:$16 sps:$4 sm:$0xff]  }
 0x5cb   :  { %11351 = vmatprep.subr.bf16.mxu1 %v13353_v24  ;;  %v13414_v24 = vld [vmem:[#allocation9 + $0x240] ss:$16 sps:$4 sm:$0xff]  }
 0x5cd   :  { %11188 = vmatpush1.bf16.msra.mxu0 %v13348_v35  ;;  %v13417_v35 = vld [vmem:[#allocation9 + $0x248] ss:$16 sps:$4 sm:$0xff]  }
 0x5ce   :  { %11352 = vmatpush1.bf16.msra.mxu1 %v13351_v49  ;;  %11189 = vmatprep.subr.bf16.mxu0 %v13356_v50  ;;  %v13422_v49 = vld [vmem:[#allocation9 + $0x264] ss:$16 sps:$4 sm:$0xff]   ;;  %v13425_v50 = vld [vmem:[#allocation9 + $0x26c] ss:$16 sps:$4 sm:$0xff]  }
 0x5cf   :  { %11353 = vmatprep.subr.bf16.mxu1 %v13359_v59  ;;  %v13420_v59 = vld [vmem:[#allocation9 + $0x260] ss:$16 sps:$4 sm:$0xff]  }
 0x5d1   :  { %11190 = vmatpush1.bf16.msra.mxu0 %v13354_v52  ;;  %v13423_v52 = vld [vmem:[#allocation9 + $0x268] ss:$16 sps:$4 sm:$0xff]  }
 0x5d2   :  { %11354 = vmatpush1.bf16.msra.mxu1 %v13357_v56  ;;  %11191 = vmatprep.subr.bf16.mxu0 %v13362_v58  ;;  %v13428_v56 = vld [vmem:[#allocation9 + $0x284] ss:$16 sps:$4 sm:$0xff]   ;;  %v13431_v58 = vld [vmem:[#allocation9 + $0x28c] ss:$16 sps:$4 sm:$0xff]  }
 0x5d3   :  { %11355 = vmatprep.subr.bf16.mxu1 %v13365_v60  ;;  %v13426_v60 = vld [vmem:[#allocation9 + $0x280] ss:$16 sps:$4 sm:$0xff]  }
 0x5d5   :  { %11192 = vmatpush1.bf16.msra.mxu0 %v13360_v54  ;;  %v13429_v54 = vld [vmem:[#allocation9 + $0x288] ss:$16 sps:$4 sm:$0xff]  }
 0x5d6   :  { %11356 = vmatpush1.bf16.msra.mxu1 %v13363_v31  ;;  %11193 = vmatprep.subr.bf16.mxu0 %v13368_v19  ;;  %v13434_v31 = vld [vmem:[#allocation9 + $0x2a4] ss:$16 sps:$4 sm:$0xff]   ;;  %v13437_v19 = vld [vmem:[#allocation9 + $0x2ac] ss:$16 sps:$4 sm:$0xff]  }
 0x5d7   :  { %11357 = vmatprep.subr.bf16.mxu1 %v13371_v10  ;;  %v13432_v10 = vld [vmem:[#allocation9 + $0x2a0] ss:$16 sps:$4 sm:$0xff]  }
 0x5d9   :  { %11194 = vmatpush1.bf16.msra.mxu0 %v13366_v1  ;;  %v13435_v1 = vld [vmem:[#allocation9 + $0x2a8] ss:$16 sps:$4 sm:$0xff]  }
 0x5da   :  { %11358 = vmatpush1.bf16.msra.mxu1 %v13369_v61  ;;  %11195 = vmatprep.subr.bf16.mxu0 %v13374_v62  ;;  %v13440_v61 = vld [vmem:[#allocation9 + $0x2c4] ss:$16 sps:$4 sm:$0xff]   ;;  %v13443_v62 = vld [vmem:[#allocation9 + $0x2cc] ss:$16 sps:$4 sm:$0xff]  }
 0x5db   :  { %11359 = vmatprep.subr.bf16.mxu1 %v13377_v63  ;;  %v13438_v63 = vld [vmem:[#allocation9 + $0x2c0] ss:$16 sps:$4 sm:$0xff]  }
 0x5dd   :  { %11196 = vmatpush1.bf16.msra.mxu0 %v13372_v0  ;;  %v13441_v0 = vld [vmem:[#allocation9 + $0x2c8] ss:$16 sps:$4 sm:$0xff]  }
 0x5de   :  { %11360 = vmatpush1.bf16.msra.mxu1 %v13375_v40  ;;  %11197 = vmatprep.subr.bf16.mxu0 %v13380_v18  ;;  %v13446_v40 = vld [vmem:[#allocation9 + $0x2e4] ss:$16 sps:$4 sm:$0xff]   ;;  %v13449_v18 = vld [vmem:[#allocation9 + $0x2ec] ss:$16 sps:$4 sm:$0xff]  }
 0x5df   :  { %11361 = vmatprep.subr.bf16.mxu1 %v13383_v39  ;;  %v13444_v39 = vld [vmem:[#allocation9 + $0x2e0] ss:$16 sps:$4 sm:$0xff]  }
 0x5e1   :  { %11198 = vmatpush1.bf16.msra.mxu0 %v13378_v4  ;;  %v13447_v4 = vld [vmem:[#allocation9 + $0x2e8] ss:$16 sps:$4 sm:$0xff]  }
 0x5e2   :  { %11362 = vmatpush1.bf16.msra.mxu1 %v13381_v2  ;;  %11199 = vmatprep.subr.bf16.mxu0 %v13386_v3  ;;  %v13452_v2 = vld [vmem:[#allocation9 + $0x304] ss:$16 sps:$4 sm:$0xff]   ;;  %v13455_v3 = vld [vmem:[#allocation9 + $0x30c] ss:$16 sps:$4 sm:$0xff]  }
 0x5e3   :  { %11363 = vmatprep.subr.bf16.mxu1 %v13389_v5  ;;  %v13450_v5 = vld [vmem:[#allocation9 + $0x300] ss:$16 sps:$4 sm:$0xff]  }
 0x5e5   :  { %11200 = vmatpush1.bf16.msra.mxu0 %v13384_v8  ;;  %v13453_v8 = vld [vmem:[#allocation9 + $0x308] ss:$16 sps:$4 sm:$0xff]  }
 0x5e6   :  { %11364 = vmatpush1.bf16.msra.mxu1 %v13387_v32  ;;  %11201 = vmatprep.subr.bf16.mxu0 %v13392_v46  ;;  %v13461_v32 = vld [vmem:[#allocation9 + $0x32c] ss:$16 sps:$4 sm:$0xff]   ;;  %v13456_v46 = vld [vmem:[#allocation9 + $0x320] ss:$16 sps:$4 sm:$0xff]  }
 0x5e7   :  { %11365 = vmatprep.subr.bf16.mxu1 %v13395_v11  ;;  %v13459_v11 = vld [vmem:[#allocation9 + $0x328] ss:$16 sps:$4 sm:$0xff]  }
 0x5e9   :  { %11202 = vmatpush1.bf16.msra.mxu0 %v13390_v17  ;;  %v13467_v17 = vld [vmem:[#allocation9 + $0x34c] ss:$16 sps:$4 sm:$0xff]  }
 0x5ea   :  { %11366 = vmatpush1.bf16.msra.mxu1 %v13393_v20  ;;  %11203 = vmatprep.subr.bf16.mxu0 %v13398_v15  ;;  %v13465_v20 = vld [vmem:[#allocation9 + $0x348] ss:$16 sps:$4 sm:$0xff]   ;;  %v13470_v15 = vld [vmem:[#allocation9 + $0x364] ss:$16 sps:$4 sm:$0xff]  }
 0x5eb   :  { %11367 = vmatprep.subr.bf16.mxu1 %v13401_v21  ;;  %v13473_v21 = vld [vmem:[#allocation9 + $0x36c] ss:$16 sps:$4 sm:$0xff]  }
 0x5ed   :  { %11204 = vmatpush1.bf16.msra.mxu0 %v13396_v53  ;;  %v13471_v53 = vld [vmem:[#allocation9 + $0x368] ss:$16 sps:$4 sm:$0xff]  }
 0x5ee   :  { %11368 = vmatpush1.bf16.msra.mxu1 %v13399_v48  ;;  %11214 = vmatprep.subr.bf16.mxu0 %v13404_v30  ;;  %v13479_v48 = vld [vmem:[#allocation9 + $0x38c] ss:$16 sps:$4 sm:$0xff]   ;;  %v13474_v30 = vld [vmem:[#allocation9 + $0x380] ss:$16 sps:$4 sm:$0xff]  }
 0x5ef   :  { %11378 = vmatprep.subr.bf16.mxu1 %v13407_v12  ;;  %v13477_v12 = vld [vmem:[#allocation9 + $0x388] ss:$16 sps:$4 sm:$0xff]  }
 0x5f0   :  { %11206 = vmatmul.mubr.bf16.vlgmr.msra.gmra.mrb[16].mxu0 %v9607_v36 }
 0x5f1   :  { %11370 = vmatmul.mubr.bf16.vlgmr.msra.gmra.mrb[16].mxu1 %v9607_v36  ;;  %11215 = vmatpush1.bf16.msra.mxu0 %v13402_v55  ;;  %v13485_v55 = vld [vmem:[#allocation9 + $0x3ac] ss:$16 sps:$4 sm:$0xff]   ;;  %v13480_v36 = vld [vmem:[#allocation9 + $0x3a0] ss:$16 sps:$4 sm:$0xff]  }
 0x5f2   :  { %11246 = vmatprep.mubr.bf16.mxu0 %v9610_v41  ;;  %11379 = vmatpush1.bf16.msra.mxu1 %v13405_v37  ;;  %v6354_v37 = vrot.slane %v14291_v25, %v14223_v51 }
 0x5f3   :  { %11410 = vmatprep.mubr.bf16.mxu1 %v9610_v41  ;;  %11216 = vmatprep.subr.bf16.mxu0 %v13410_v38  ;;  %v13483_v38 = vld [vmem:[#allocation9 + $0x3a8] ss:$16 sps:$4 sm:$0xff]   ;;  %v13488_v41 = vld [vmem:[#allocation9 + $0x3c4] ss:$16 sps:$4 sm:$0xff]  }
 0x5f4   :  { %11380 = vmatprep.subr.bf16.mxu1 %v13413_v33  ;;  %v13491_v33 = vld [vmem:[#allocation9 + $0x3cc] ss:$16 sps:$4 sm:$0xff]  }
 0x5f5   :  { %11217 = vmatpush1.bf16.msra.mxu0 %v13408_v7  ;;  %v13486_v7 = vld [vmem:[#allocation9 + $0x3c0] ss:$16 sps:$4 sm:$0xff]  }
 0x5f6   :  { %11381 = vmatpush1.bf16.msra.mxu1 %v13411_v42  ;;  %11218 = vmatprep.subr.bf16.mxu0 %v13416_v23  ;;  %v13120_v42 = vadd.f32 %v14285_v28, %v6354_v37  ;;  %v13489_v23 = vld [vmem:[#allocation9 + $0x3c8] ss:$16 sps:$4 sm:$0xff]   ;;  %v13563_v37 = vld [vmem:[#allocation9 + $0x54c] ss:$16 sps:$4 sm:$0xff]  }
 0x5f7   :  { %11382 = vmatprep.subr.bf16.mxu1 %v13419_v16  ;;  %v13494_v16 = vld [vmem:[#allocation9 + $0x3e4] ss:$16 sps:$4 sm:$0xff]   ;;  %v13501_v28 = vld [vmem:[#allocation9 + $0x408] ss:$16 sps:$4 sm:$0xff]  }
 0x5f9   :  { %11219 = vmatpush1.bf16.msra.mxu0 %v13414_v24  ;;  %v13497_v24 = vld [vmem:[#allocation9 + $0x3ec] ss:$16 sps:$4 sm:$0xff]  }
 0x5fa   :  { %11383 = vmatpush1.bf16.msra.mxu1 %v13417_v35  ;;  %11220 = vmatprep.subr.bf16.mxu0 %v13422_v49  ;;  %v13492_v35 = vld [vmem:[#allocation9 + $0x3e0] ss:$16 sps:$4 sm:$0xff]   ;;  %v9601_v49 = vmax.f32 %v13120_v42, 0.0 }
 0x5fb   :  { %11384 = vmatprep.subr.bf16.mxu1 %v13425_v50  ;;  %v13495_v50 = vld [vmem:[#allocation9 + $0x3e8] ss:$16 sps:$4 sm:$0xff]   ;;  %v13564_v42 = vld [vmem:[#allocation9 + $0x560] ss:$16 sps:$4 sm:$0xff]  }
 0x5fd   :  { %11221 = vmatpush1.bf16.msra.mxu0 %v13420_v59  ;;  %v13500_v59 = vld [vmem:[#allocation9 + $0x404] ss:$16 sps:$4 sm:$0xff]  }
 0x5fe   :  { %11385 = vmatpush1.bf16.msra.mxu1 %v13423_v52  ;;  %11222 = vmatprep.subr.bf16.mxu0 %v13428_v56  ;;  %v13503_v52 = vld [vmem:[#allocation9 + $0x40c] ss:$16 sps:$4 sm:$0xff]   ;;  %v13498_v56 = vld [vmem:[#allocation9 + $0x400] ss:$16 sps:$4 sm:$0xff]  }
 0x5ff   :  { %11386 = vmatprep.subr.bf16.mxu1 %v13431_v58  ;;  %v9609_v58 = vpack.c.bf16 %v9601_v49, %v9601_v49  ;;  %v13573_v49 = vld [vmem:[#allocation9 + $0x588] ss:$16 sps:$4 sm:$0xff]  }
 0x601   :  { %11223 = vmatpush1.bf16.msra.mxu0 %v13426_v60  ;;  %v13506_v60 = vld [vmem:[#allocation9 + $0x424] ss:$16 sps:$4 sm:$0xff]  }
 0x602   :  { %11387 = vmatpush1.bf16.msra.mxu1 %v13429_v54  ;;  %11224 = vmatprep.subr.bf16.mxu0 %v13434_v31  ;;  %v13509_v54 = vld [vmem:[#allocation9 + $0x42c] ss:$16 sps:$4 sm:$0xff]   ;;  %v13504_v31 = vld [vmem:[#allocation9 + $0x420] ss:$16 sps:$4 sm:$0xff]  }
 0x603   :  { %11388 = vmatprep.subr.bf16.mxu1 %v13437_v19  ;;  %v13507_v19 = vld [vmem:[#allocation9 + $0x428] ss:$16 sps:$4 sm:$0xff]  }
 0x605   :  { %11225 = vmatpush1.bf16.msra.mxu0 %v13432_v10  ;;  %v13512_v10 = vld [vmem:[#allocation9 + $0x444] ss:$16 sps:$4 sm:$0xff]  }
 0x606   :  { %11389 = vmatpush1.bf16.msra.mxu1 %v13435_v1  ;;  %11226 = vmatprep.subr.bf16.mxu0 %v13440_v61  ;;  %v13515_v1 = vld [vmem:[#allocation9 + $0x44c] ss:$16 sps:$4 sm:$0xff]   ;;  %v13510_v61 = vld [vmem:[#allocation9 + $0x440] ss:$16 sps:$4 sm:$0xff]  }
 0x607   :  { %11390 = vmatprep.subr.bf16.mxu1 %v13443_v62  ;;  %v13513_v62 = vld [vmem:[#allocation9 + $0x448] ss:$16 sps:$4 sm:$0xff]  }
 0x609   :  { %11227 = vmatpush1.bf16.msra.mxu0 %v13438_v63  ;;  %v13518_v63 = vld [vmem:[#allocation9 + $0x464] ss:$16 sps:$4 sm:$0xff]  }
 0x60a   :  { %11391 = vmatpush1.bf16.msra.mxu1 %v13441_v0  ;;  %11228 = vmatprep.subr.bf16.mxu0 %v13446_v40  ;;  %v13521_v0 = vld [vmem:[#allocation9 + $0x46c] ss:$16 sps:$4 sm:$0xff]   ;;  %v13516_v40 = vld [vmem:[#allocation9 + $0x460] ss:$16 sps:$4 sm:$0xff]  }
 0x60b   :  { %11392 = vmatprep.subr.bf16.mxu1 %v13449_v18  ;;  %v13519_v18 = vld [vmem:[#allocation9 + $0x468] ss:$16 sps:$4 sm:$0xff]  }
 0x60d   :  { %11229 = vmatpush1.bf16.msra.mxu0 %v13444_v39  ;;  %v13524_v39 = vld [vmem:[#allocation9 + $0x484] ss:$16 sps:$4 sm:$0xff]  }
 0x60e   :  { %11393 = vmatpush1.bf16.msra.mxu1 %v13447_v4  ;;  %11230 = vmatprep.subr.bf16.mxu0 %v13452_v2  ;;  %v13527_v4 = vld [vmem:[#allocation9 + $0x48c] ss:$16 sps:$4 sm:$0xff]   ;;  %v13522_v2 = vld [vmem:[#allocation9 + $0x480] ss:$16 sps:$4 sm:$0xff]  }
 0x60f   :  { %11394 = vmatprep.subr.bf16.mxu1 %v13455_v3  ;;  %v13525_v3 = vld [vmem:[#allocation9 + $0x488] ss:$16 sps:$4 sm:$0xff]  }
 0x611   :  { %11231 = vmatpush1.bf16.msra.mxu0 %v13450_v5  ;;  %v13530_v5 = vld [vmem:[#allocation9 + $0x4a4] ss:$16 sps:$4 sm:$0xff]  }
 0x612   :  { %11395 = vmatpush1.bf16.msra.mxu1 %v13453_v8  ;;  %11232 = vmatprep.subr.bf16.mxu0 %v13458_v9  ;;  %v13533_v8 = vld [vmem:[#allocation9 + $0x4ac] ss:$16 sps:$4 sm:$0xff]   ;;  %v13528_v9 = vld [vmem:[#allocation9 + $0x4a0] ss:$16 sps:$4 sm:$0xff]  }
 0x613   :  { %11396 = vmatprep.subr.bf16.mxu1 %v13461_v32  ;;  %v13531_v32 = vld [vmem:[#allocation9 + $0x4a8] ss:$16 sps:$4 sm:$0xff]  }
 0x615   :  { %11233 = vmatpush1.bf16.msra.mxu0 %v13456_v46  ;;  %v13536_v46 = vld [vmem:[#allocation9 + $0x4c4] ss:$16 sps:$4 sm:$0xff]  }
 0x616   :  { %11397 = vmatpush1.bf16.msra.mxu1 %v13459_v11  ;;  %11234 = vmatprep.subr.bf16.mxu0 %v13464_v14  ;;  %v13539_v11 = vld [vmem:[#allocation9 + $0x4cc] ss:$16 sps:$4 sm:$0xff]   ;;  %v13534_v14 = vld [vmem:[#allocation9 + $0x4c0] ss:$16 sps:$4 sm:$0xff]  }
 0x617   :  { %11398 = vmatprep.subr.bf16.mxu1 %v13467_v17  ;;  %v13537_v17 = vld [vmem:[#allocation9 + $0x4c8] ss:$16 sps:$4 sm:$0xff]  }
 0x619   :  { %11235 = vmatpush1.bf16.msra.mxu0 %v13462_v57  ;;  %v13542_v57 = vld [vmem:[#allocation9 + $0x4e4] ss:$16 sps:$4 sm:$0xff]  }
 0x61a   :  { %11399 = vmatpush1.bf16.msra.mxu1 %v13465_v20  ;;  %11236 = vmatprep.subr.bf16.mxu0 %v13470_v15  ;;  %v13545_v20 = vld [vmem:[#allocation9 + $0x4ec] ss:$16 sps:$4 sm:$0xff]   ;;  %v13540_v15 = vld [vmem:[#allocation9 + $0x4e0] ss:$16 sps:$4 sm:$0xff]  }
 0x61b   :  { %11400 = vmatprep.subr.bf16.mxu1 %v13473_v21  ;;  %v13543_v21 = vld [vmem:[#allocation9 + $0x4e8] ss:$16 sps:$4 sm:$0xff]  }
 0x61d   :  { %11237 = vmatpush1.bf16.msra.mxu0 %v13468_v47  ;;  %v13548_v47 = vld [vmem:[#allocation9 + $0x504] ss:$16 sps:$4 sm:$0xff]  }
 0x61e   :  { %11401 = vmatpush1.bf16.msra.mxu1 %v13471_v53  ;;  %11238 = vmatprep.subr.bf16.mxu0 %v13476_v26  ;;  %v13551_v53 = vld [vmem:[#allocation9 + $0x50c] ss:$16 sps:$4 sm:$0xff]   ;;  %v13546_v26 = vld [vmem:[#allocation9 + $0x500] ss:$16 sps:$4 sm:$0xff]  }
 0x61f   :  { %11402 = vmatprep.subr.bf16.mxu1 %v13479_v48  ;;  %v13549_v48 = vld [vmem:[#allocation9 + $0x508] ss:$16 sps:$4 sm:$0xff]  }
 0x621   :  { %11239 = vmatpush1.bf16.msra.mxu0 %v13474_v30  ;;  %v13554_v30 = vld [vmem:[#allocation9 + $0x524] ss:$16 sps:$4 sm:$0xff]  }
 0x622   :  { %11403 = vmatpush1.bf16.msra.mxu1 %v13477_v12  ;;  %11240 = vmatprep.subr.bf16.mxu0 %v13482_v27  ;;  %v13557_v12 = vld [vmem:[#allocation9 + $0x52c] ss:$16 sps:$4 sm:$0xff]   ;;  %v13552_v27 = vld [vmem:[#allocation9 + $0x520] ss:$16 sps:$4 sm:$0xff]  }
 0x623   :  { %11404 = vmatprep.subr.bf16.mxu1 %v13485_v55  ;;  %v13555_v55 = vld [vmem:[#allocation9 + $0x528] ss:$16 sps:$4 sm:$0xff]  }
 0x625   :  { %11241 = vmatpush1.bf16.msra.mxu0 %v13480_v36  ;;  %v13560_v36 = vld [vmem:[#allocation9 + $0x544] ss:$16 sps:$4 sm:$0xff]  }
 0x626   :  { %11405 = vmatpush1.bf16.msra.mxu1 %v13483_v38  ;;  %11242 = vmatprep.subr.bf16.mxu0 %v13488_v41  ;;  %v13558_v38 = vld [vmem:[#allocation9 + $0x540] ss:$16 sps:$4 sm:$0xff]   ;;  %v13561_v41 = vld [vmem:[#allocation9 + $0x548] ss:$16 sps:$4 sm:$0xff]  }
 0x627   :  { %11406 = vmatprep.subr.bf16.mxu1 %v13491_v33  ;;  %v13566_v33 = vld [vmem:[#allocation9 + $0x564] ss:$16 sps:$4 sm:$0xff]  }
 0x629   :  { %11243 = vmatpush1.bf16.msra.mxu0 %v13486_v7  ;;  %v13569_v7 = vld [vmem:[#allocation9 + $0x56c] ss:$16 sps:$4 sm:$0xff]  }
 0x62a   :  { %11407 = vmatpush1.bf16.msra.mxu1 %v13489_v23  ;;  %11244 = vmatprep.subr.bf16.mxu0 %v13494_v16  ;;  %v13567_v23 = vld [vmem:[#allocation9 + $0x568] ss:$16 sps:$4 sm:$0xff]   ;;  %v13572_v16 = vld [vmem:[#allocation9 + $0x584] ss:$16 sps:$4 sm:$0xff]  }
 0x62b   :  { %11408 = vmatprep.subr.bf16.mxu1 %v13497_v24  ;;  %v13575_v24 = vld [vmem:[#allocation9 + $0x58c] ss:$16 sps:$4 sm:$0xff]  }
 0x62d   :  { %11245 = vmatpush1.bf16.msra.mxu0 %v13492_v35  ;;  %v13570_v35 = vld [vmem:[#allocation9 + $0x580] ss:$16 sps:$4 sm:$0xff]  }
 0x62e   :  { %11409 = vmatpush1.bf16.msra.mxu1 %v13495_v50  ;;  %11255 = vmatprep.subr.bf16.mxu0 %v13500_v59  ;;  %v13578_v50 = vld [vmem:[#allocation9 + $0x5a4] ss:$16 sps:$4 sm:$0xff]   ;;  %v13581_v59 = vld [vmem:[#allocation9 + $0x5ac] ss:$16 sps:$4 sm:$0xff]  }
 0x62f   :  { %11419 = vmatprep.subr.bf16.mxu1 %v13503_v52  ;;  %v13576_v52 = vld [vmem:[#allocation9 + $0x5a0] ss:$16 sps:$4 sm:$0xff]  }
 0x630   :  { %11247 = vmatmul.mubr.bf16.vlgmr.msra.gmra.mrb[16].mxu0 %v9609_v58 }
 0x631   :  { %11411 = vmatmul.mubr.bf16.vlgmr.msra.gmra.mrb[16].mxu1 %v9609_v58  ;;  %11256 = vmatpush1.bf16.msra.mxu0 %v13498_v56  ;;  %v13579_v56 = vld [vmem:[#allocation9 + $0x5a8] ss:$16 sps:$4 sm:$0xff]   ;;  %v13584_v58 = vld [vmem:[#allocation9 + $0x5c4] ss:$16 sps:$4 sm:$0xff]  }
 0x632   :  { %11420 = vmatpush1.bf16.msra.mxu1 %v13501_v28  ;;  %11257 = vmatprep.subr.bf16.mxu0 %v13506_v60  ;;  %v13587_v28 = vld [vmem:[#allocation9 + $0x5cc] ss:$16 sps:$4 sm:$0xff]   ;;  %v13582_v60 = vld [vmem:[#allocation9 + $0x5c0] ss:$16 sps:$4 sm:$0xff]  }
 0x633   :  { %11421 = vmatprep.subr.bf16.mxu1 %v13509_v54  ;;  %v13585_v54 = vld [vmem:[#allocation9 + $0x5c8] ss:$16 sps:$4 sm:$0xff]  }
 0x635   :  { %11258 = vmatpush1.bf16.msra.mxu0 %v13504_v31  ;;  %v13590_v31 = vld [vmem:[#allocation9 + $0x5e4] ss:$16 sps:$4 sm:$0xff]  }
 0x636   :  { %11422 = vmatpush1.bf16.msra.mxu1 %v13507_v19  ;;  %11259 = vmatprep.subr.bf16.mxu0 %v13512_v10  ;;  %v13593_v19 = vld [vmem:[#allocation9 + $0x5ec] ss:$16 sps:$4 sm:$0xff]   ;;  %v13588_v10 = vld [vmem:[#allocation9 + $0x5e0] ss:$16 sps:$4 sm:$0xff]  }
 0x637   :  { %11423 = vmatprep.subr.bf16.mxu1 %v13515_v1  ;;  %v13591_v1 = vld [vmem:[#allocation9 + $0x5e8] ss:$16 sps:$4 sm:$0xff]  }
 0x639   :  { %11260 = vmatpush1.bf16.msra.mxu0 %v13510_v61  ;;  %v13596_v61 = vld [vmem:[#allocation9 + $0x604] ss:$16 sps:$4 sm:$0xff]  }
 0x63a   :  { %11424 = vmatpush1.bf16.msra.mxu1 %v13513_v62  ;;  %11261 = vmatprep.subr.bf16.mxu0 %v13518_v63  ;;  %v13599_v62 = vld [vmem:[#allocation9 + $0x60c] ss:$16 sps:$4 sm:$0xff]   ;;  %v6362_v63 = vrot.slane %v14291_v25, %v925_v43 }
 0x63b   :  { %11425 = vmatprep.subr.bf16.mxu1 %v13521_v0  ;;  %v6366_v0 = vrot.slane %v14291_v25, %v929_v44 }
 0x63d   :  { %11262 = vmatpush1.bf16.msra.mxu0 %v13516_v40  ;;  %v6374_v40 = vrot.slane %v14291_v25, %v937_v45  ;;  %v13602_v45 = vld [vmem:[#allocation9 + $0x624] ss:$16 sps:$4 sm:$0xff]   ;;  %v13605_v25 = vld [vmem:[#allocation9 + $0x62c] ss:$16 sps:$4 sm:$0xff]  }
 0x63e   :  { %11426 = vmatpush1.bf16.msra.mxu1 %v13519_v18  ;;  %11263 = vmatprep.subr.bf16.mxu0 %v13524_v39 }
 0x63f   :  { %11427 = vmatprep.subr.bf16.mxu1 %v13527_v4 }
 0x641   :  { %11264 = vmatpush1.bf16.msra.mxu0 %v13522_v2 }
 0x642   :  { %11428 = vmatpush1.bf16.msra.mxu1 %v13525_v3  ;;  %11265 = vmatprep.subr.bf16.mxu0 %v13530_v5 }
 0x643   :  { %11429 = vmatprep.subr.bf16.mxu1 %v13533_v8 }
 0x645   :  { %11266 = vmatpush1.bf16.msra.mxu0 %v13528_v9 }
 0x646   :  { %11430 = vmatpush1.bf16.msra.mxu1 %v13531_v32  ;;  %11267 = vmatprep.subr.bf16.mxu0 %v13536_v46 }
 0x647   :  { %11431 = vmatprep.subr.bf16.mxu1 %v13539_v11 }
 0x649   :  { %11268 = vmatpush1.bf16.msra.mxu0 %v13534_v14 }
 0x64a   :  { %11432 = vmatpush1.bf16.msra.mxu1 %v13537_v17  ;;  %11269 = vmatprep.subr.bf16.mxu0 %v13542_v57  ;;  %v13594_v57 = vld [vmem:[#allocation9 + $0x600] ss:$16 sps:$4 sm:$0xff]  }
 0x64b   :  { %11433 = vmatprep.subr.bf16.mxu1 %v13545_v20  ;;  %v13597_v20 = vld [vmem:[#allocation9 + $0x608] ss:$16 sps:$4 sm:$0xff]  }
 0x64d   :  { %11270 = vmatpush1.bf16.msra.mxu0 %v13540_v15 }
 0x64e   :  { %11434 = vmatpush1.bf16.msra.mxu1 %v13543_v21  ;;  %11271 = vmatprep.subr.bf16.mxu0 %v13548_v47  ;;  %v13600_v47 = vld [vmem:[#allocation9 + $0x620] ss:$16 sps:$4 sm:$0xff]  }
 0x64f   :  { %11435 = vmatprep.subr.bf16.mxu1 %v13551_v53  ;;  %v13603_v53 = vld [vmem:[#allocation9 + $0x628] ss:$16 sps:$4 sm:$0xff]  }
 0x651   :  { %11272 = vmatpush1.bf16.msra.mxu0 %v13546_v26  ;;  %v13608_v26 = vld [vmem:[#allocation9 + $0x644] ss:$16 sps:$4 sm:$0xff]  }
 0x652   :  { %11436 = vmatpush1.bf16.msra.mxu1 %v13549_v48  ;;  %11273 = vmatprep.subr.bf16.mxu0 %v13554_v30  ;;  %v13611_v48 = vld [vmem:[#allocation9 + $0x64c] ss:$16 sps:$4 sm:$0xff]   ;;  %v13606_v30 = vld [vmem:[#allocation9 + $0x640] ss:$16 sps:$4 sm:$0xff]  }
 0x653   :  { %11437 = vmatprep.subr.bf16.mxu1 %v13557_v12  ;;  %v13609_v12 = vld [vmem:[#allocation9 + $0x648] ss:$16 sps:$4 sm:$0xff]  }
 0x655   :  { %11274 = vmatpush1.bf16.msra.mxu0 %v13552_v27  ;;  %v13614_v27 = vld [vmem:[#allocation9 + $0x664] ss:$16 sps:$4 sm:$0xff]  }
 0x656   :  { %11438 = vmatpush1.bf16.msra.mxu1 %v13555_v55  ;;  %11275 = vmatprep.subr.bf16.mxu0 %v13560_v36  ;;  %v13617_v55 = vld [vmem:[#allocation9 + $0x66c] ss:$16 sps:$4 sm:$0xff]   ;;  %v13612_v36 = vld [vmem:[#allocation9 + $0x660] ss:$16 sps:$4 sm:$0xff]  }
 0x657   :  { %11439 = vmatprep.subr.bf16.mxu1 %v13563_v37  ;;  %v13615_v37 = vld [vmem:[#allocation9 + $0x668] ss:$16 sps:$4 sm:$0xff]  }
 0x659   :  { %11276 = vmatpush1.bf16.msra.mxu0 %v13558_v38  ;;  %v13620_v38 = vld [vmem:[#allocation9 + $0x684] ss:$16 sps:$4 sm:$0xff]  }
 0x65a   :  { %11440 = vmatpush1.bf16.msra.mxu1 %v13561_v41  ;;  %11277 = vmatprep.subr.bf16.mxu0 %v13566_v33  ;;  %v13623_v41 = vld [vmem:[#allocation9 + $0x68c] ss:$16 sps:$4 sm:$0xff]   ;;  %v13618_v33 = vld [vmem:[#allocation9 + $0x680] ss:$16 sps:$4 sm:$0xff]  }
 0x65b   :  { %11441 = vmatprep.subr.bf16.mxu1 %v13569_v7  ;;  %v13621_v7 = vld [vmem:[#allocation9 + $0x688] ss:$16 sps:$4 sm:$0xff]  }
 0x65d   :  { %11278 = vmatpush1.bf16.msra.mxu0 %v13564_v42  ;;  %v13626_v42 = vld [vmem:[#allocation9 + $0x6a4] ss:$16 sps:$4 sm:$0xff]  }
 0x65e   :  { %11442 = vmatpush1.bf16.msra.mxu1 %v13567_v23  ;;  %11279 = vmatprep.subr.bf16.mxu0 %v13572_v16  ;;  %v13629_v23 = vld [vmem:[#allocation9 + $0x6ac] ss:$16 sps:$4 sm:$0xff]   ;;  %v13624_v16 = vld [vmem:[#allocation9 + $0x6a0] ss:$16 sps:$4 sm:$0xff]  }
 0x65f   :  { %11443 = vmatprep.subr.bf16.mxu1 %v13575_v24  ;;  %v13627_v24 = vld [vmem:[#allocation9 + $0x6a8] ss:$16 sps:$4 sm:$0xff]  }
 0x661   :  { %11280 = vmatpush1.bf16.msra.mxu0 %v13570_v35  ;;  %v13632_v35 = vld [vmem:[#allocation9 + $0x6c4] ss:$16 sps:$4 sm:$0xff]  }
 0x662   :  { %11444 = vmatpush1.bf16.msra.mxu1 %v13573_v49  ;;  %11281 = vmatprep.subr.bf16.mxu0 %v13578_v50  ;;  %v13635_v49 = vld [vmem:[#allocation9 + $0x6cc] ss:$16 sps:$4 sm:$0xff]   ;;  %v13630_v50 = vld [vmem:[#allocation9 + $0x6c0] ss:$16 sps:$4 sm:$0xff]  }
 0x663   :  { %11445 = vmatprep.subr.bf16.mxu1 %v13581_v59  ;;  %v13633_v59 = vld [vmem:[#allocation9 + $0x6c8] ss:$16 sps:$4 sm:$0xff]  }
 0x665   :  { %11282 = vmatpush1.bf16.msra.mxu0 %v13576_v52  ;;  %v13638_v52 = vld [vmem:[#allocation9 + $0x6e4] ss:$16 sps:$4 sm:$0xff]  }
 0x666   :  { %11446 = vmatpush1.bf16.msra.mxu1 %v13579_v56  ;;  %11283 = vmatprep.subr.bf16.mxu0 %v13584_v58  ;;  %v13641_v56 = vld [vmem:[#allocation9 + $0x6ec] ss:$16 sps:$4 sm:$0xff]   ;;  %v13636_v58 = vld [vmem:[#allocation9 + $0x6e0] ss:$16 sps:$4 sm:$0xff]  }
 0x667   :  { %11447 = vmatprep.subr.bf16.mxu1 %v13587_v28  ;;  %v13639_v28 = vld [vmem:[#allocation9 + $0x6e8] ss:$16 sps:$4 sm:$0xff]  }
 0x669   :  { %11284 = vmatpush1.bf16.msra.mxu0 %v13582_v60  ;;  %v13644_v60 = vld [vmem:[#allocation9 + $0x704] ss:$16 sps:$4 sm:$0xff]  }
 0x66a   :  { %11448 = vmatpush1.bf16.msra.mxu1 %v13585_v54  ;;  %11285 = vmatprep.subr.bf16.mxu0 %v13590_v31  ;;  %v13647_v54 = vld [vmem:[#allocation9 + $0x70c] ss:$16 sps:$4 sm:$0xff]   ;;  %v13642_v31 = vld [vmem:[#allocation9 + $0x700] ss:$16 sps:$4 sm:$0xff]  }
 0x66b   :  { %11449 = vmatprep.subr.bf16.mxu1 %v13593_v19  ;;  %v13645_v19 = vld [vmem:[#allocation9 + $0x708] ss:$16 sps:$4 sm:$0xff]  }
 0x66d   :  { %11286 = vmatpush1.bf16.msra.mxu0 %v13588_v10  ;;  %v13650_v10 = vld [vmem:[#allocation9 + $0x724] ss:$16 sps:$4 sm:$0xff]  }
 0x66e   :  { %11450 = vmatpush1.bf16.msra.mxu1 %v13591_v1  ;;  %11296 = vmatprep.subr.bf16.mxu0 %v13596_v61  ;;  %v13653_v1 = vld [vmem:[#allocation9 + $0x72c] ss:$16 sps:$4 sm:$0xff]   ;;  %v13648_v61 = vld [vmem:[#allocation9 + $0x720] ss:$16 sps:$4 sm:$0xff]  }
 0x66f   :  { %11460 = vmatprep.subr.bf16.mxu1 %v13599_v62  ;;  %v13651_v62 = vld [vmem:[#allocation9 + $0x728] ss:$16 sps:$4 sm:$0xff]  }
 0x683   :  { %v9428_v18 = vpop.f32.mrb[12].mxu0 }
 0x684   :  { %v13122_v39 = vadd.f32 %v9428_v18, %v6362_v63  ;;  %v14316_v4 = vpop.f32.mrb[12].mxu1  ;;  %v9430_v2 = vpop.f32.mrb[13].mxu0  ;;  %v13656_v63 = vld [vmem:[#allocation9 + $0x744] ss:$16 sps:$4 sm:$0xff]   ;;  %v13657_v18 = vld [vmem:[#allocation9 + $0x748] ss:$16 sps:$4 sm:$0xff]  }
 0x685   :  { %v13123_v3 = vadd.f32 %v9430_v2, %v6366_v0  ;;  %v9594_v5 = vpop.f32.mrb[13].mxu1  ;;  %v9432_v8 = vpop.f32.mrb[14].mxu0  ;;  %v13659_v0 = vld [vmem:[#allocation9 + $0x74c] ss:$16 sps:$4 sm:$0xff]  }
 0x686   :  { %v9603_v9 = vmax.f32 %v13122_v39, 0.0  ;;  %v13125_v32 = vadd.f32 %v9594_v5, %v6374_v40  ;;  %v9596_v46 = vpop.f32.mrb[14].mxu1  ;;  %v9433_v43 = vpop.f32.mrb[15].mxu0  ;;  %v13654_v40 = vld [vmem:[#allocation9 + $0x740] ss:$16 sps:$4 sm:$0xff]  }
 0x687   :  { %v9604_v11 = vmax.f32 %v13123_v3, 0.0  ;;  %v9597_v14 = vpop.f32.mrb[15].mxu1  ;;  %v13662_v39 = vld [vmem:[#allocation9 + $0x764] ss:$16 sps:$4 sm:$0xff]   ;;  %v13665_v2 = vld [vmem:[#allocation9 + $0x76c] ss:$16 sps:$4 sm:$0xff]  }
 0x688   :  { %v9606_v17 = vmax.f32 %v13125_v32, 0.0  ;;  %v9611_v15 = vpack.c.bf16 %v9603_v9, %v9603_v9  ;;  %v13660_v3 = vld [vmem:[#allocation9 + $0x760] ss:$16 sps:$4 sm:$0xff]   ;;  %v13663_v5 = vld [vmem:[#allocation9 + $0x768] ss:$16 sps:$4 sm:$0xff]  }
 0x689   :  { %v9612_v44 = vpack.c.bf16 %v9604_v11, %v9604_v11  ;;  %v13668_v8 = vld [vmem:[#allocation9 + $0x784] ss:$16 sps:$4 sm:$0xff]   ;;  %v13671_v9 = vld [vmem:[#allocation9 + $0x78c] ss:$16 sps:$4 sm:$0xff]   ;;  %v13666_v32 = vld [vmem:[#allocation9 + $0x780] ss:$16 sps:$4 sm:$0xff]  }
 0x68a   :  { %v9614_v21 = vpack.c.bf16 %v9606_v17, %v9606_v17  ;;  %v13669_v46 = vld [vmem:[#allocation9 + $0x788] ss:$16 sps:$4 sm:$0xff]   ;;  %v13674_v43 = vld [vmem:[#allocation9 + $0x7a4] ss:$16 sps:$4 sm:$0xff]   ;;  %v13677_v11 = vld [vmem:[#allocation9 + $0x7ac] ss:$16 sps:$4 sm:$0xff]  }
 0x68b   :  { %11287 = vmatprep.mubr.bf16.mxu0 %v9612_v44  ;;  %11451 = vmatprep.mubr.bf16.mxu1 %v9612_v44  ;;  %v13672_v14 = vld [vmem:[#allocation9 + $0x7a0] ss:$16 sps:$4 sm:$0xff]   ;;  %v13675_v17 = vld [vmem:[#allocation9 + $0x7a8] ss:$16 sps:$4 sm:$0xff]  }
 0x68c   :  { %11288 = vmatmul.mubr.bf16.vlgmr.msra.gmra.mrb[16].mxu0 %v9611_v15  ;;  %11452 = vmatmul.mubr.bf16.vlgmr.msra.gmra.mrb[16].mxu1 %v9611_v15  ;;  %v13695_v44 = vld [vmem:[#allocation7] sm:$0xff] }
 0x68d   :  { %11297 = vmatpush1.bf16.msra.mxu0 %v13594_v57  ;;  %11461 = vmatpush1.bf16.msra.mxu1 %v13597_v20  ;;  %v6370_v57 = vrot.slane %v13695_v44, %v933_v13  ;;  %v13680_v20 = vld [vmem:[#allocation9 + $0x7c4] ss:$16 sps:$4 sm:$0xff]   ;;  %v13683_v15 = vld [vmem:[#allocation9 + $0x7cc] ss:$16 sps:$4 sm:$0xff]  }
 0x68e   :  { %11328 = vmatprep.mubr.bf16.mxu0 %v9614_v21  ;;  %11492 = vmatprep.mubr.bf16.mxu1 %v9614_v21 }
 0x68f   :  { %11298 = vmatprep.subr.bf16.mxu0 %v13602_v45  ;;  %11462 = vmatprep.subr.bf16.mxu1 %v13605_v25  ;;  %v13678_v45 = vld [vmem:[#allocation9 + $0x7c0] ss:$16 sps:$4 sm:$0xff]   ;;  %v13681_v25 = vld [vmem:[#allocation9 + $0x7c8] ss:$16 sps:$4 sm:$0xff]   ;;  %v13124_v21 = vadd.f32 %v14316_v4, %v6370_v57 }
 0x691   :  { %11299 = vmatpush1.bf16.msra.mxu0 %v13600_v47  ;;  %11463 = vmatpush1.bf16.msra.mxu1 %v13603_v53  ;;  %v13686_v47 = vld [vmem:[#allocation9 + $0x7e4] ss:$16 sps:$4 sm:$0xff]   ;;  %v13689_v53 = vld [vmem:[#allocation9 + $0x7ec] ss:$16 sps:$4 sm:$0xff]   ;;  %v9605_v34 = vmax.f32 %v13124_v21, 0.0 }
 0x692   :  { %11300 = vmatprep.subr.bf16.mxu0 %v13608_v26  ;;  %11464 = vmatprep.subr.bf16.mxu1 %v13611_v48  ;;  %v13684_v26 = vld [vmem:[#allocation9 + $0x7e0] ss:$16 sps:$4 sm:$0xff]   ;;  %v13687_v48 = vld [vmem:[#allocation9 + $0x7e8] ss:$16 sps:$4 sm:$0xff]  }
 0x693   :  { %v9613_v13 = vpack.c.bf16 %v9605_v34, %v9605_v34 }
 0x695   :  { %11301 = vmatpush1.bf16.msra.mxu0 %v13606_v30  ;;  %11465 = vmatpush1.bf16.msra.mxu1 %v13609_v12  ;;  %v9871_v30 = vld [vmem:[#allocation10] sm:$0xf] }
 0x696   :  { %11302 = vmatprep.subr.bf16.mxu0 %v13614_v27  ;;  %11466 = vmatprep.subr.bf16.mxu1 %v13617_v55  ;;  %v9876_v12 = vrot.slane %v9871_v30, %v14203_v22  ;;  %v9884_v4 = vrot.slane %v9871_v30, %v14223_v51  ;;  %v11505_v27 = vld [vmem:[#allocation12] sm:$0xf]  ;;  %v9880_v55 = vrot.slane %v9871_v30, %v14189_v6 }
 0x699   :  { %11303 = vmatpush1.bf16.msra.mxu0 %v13612_v36  ;;  %11467 = vmatpush1.bf16.msra.mxu1 %v13615_v37  ;;  %v9888_v36 = vrot.slane %v9871_v30, %v14206_v29 }
 0x69a   :  { %11304 = vmatprep.subr.bf16.mxu0 %v13620_v38  ;;  %11468 = vmatprep.subr.bf16.mxu1 %v13623_v41 }
 0x69d   :  { %11305 = vmatpush1.bf16.msra.mxu0 %v13618_v33  ;;  %11469 = vmatpush1.bf16.msra.mxu1 %v13621_v7  ;;  %v11510_v33 = vrot.slane %v11505_v27, %v14203_v22  ;;  %v11522_v22 = vrot.slane %v11505_v27, %v14206_v29 }
 0x69e   :  { %11306 = vmatprep.subr.bf16.mxu0 %v13626_v42  ;;  %11470 = vmatprep.subr.bf16.mxu1 %v13629_v23 }
 0x6a1   :  { %11307 = vmatpush1.bf16.msra.mxu0 %v13624_v16  ;;  %11471 = vmatpush1.bf16.msra.mxu1 %v13627_v24  ;;  %v11514_v24 = vrot.slane %v11505_v27, %v14189_v6 }
 0x6a2   :  { %11308 = vmatprep.subr.bf16.mxu0 %v13632_v35  ;;  %11472 = vmatprep.subr.bf16.mxu1 %v13635_v49 }
 0x6a5   :  { %11309 = vmatpush1.bf16.msra.mxu0 %v13630_v50  ;;  %11473 = vmatpush1.bf16.msra.mxu1 %v13633_v59 }
 0x6a6   :  { %11310 = vmatprep.subr.bf16.mxu0 %v13638_v52  ;;  %11474 = vmatprep.subr.bf16.mxu1 %v13641_v56 }
 0x6a9   :  { %11311 = vmatpush1.bf16.msra.mxu0 %v13636_v58  ;;  %11475 = vmatpush1.bf16.msra.mxu1 %v13639_v28  ;;  %v11518_v28 = vrot.slane %v11505_v27, %v14223_v51 }
 0x6aa   :  { %11312 = vmatprep.subr.bf16.mxu0 %v13644_v60  ;;  %11476 = vmatprep.subr.bf16.mxu1 %v13647_v54 }
 0x6ad   :  { %11313 = vmatpush1.bf16.msra.mxu0 %v13642_v31  ;;  %11477 = vmatpush1.bf16.msra.mxu1 %v13645_v19 }
 0x6ae   :  { %11314 = vmatprep.subr.bf16.mxu0 %v13650_v10  ;;  %11478 = vmatprep.subr.bf16.mxu1 %v13653_v1 }
 0x6b1   :  { %11315 = vmatpush1.bf16.msra.mxu0 %v13648_v61  ;;  %11479 = vmatpush1.bf16.msra.mxu1 %v13651_v62 }
 0x6b2   :  { %11316 = vmatprep.subr.bf16.mxu0 %v13656_v63  ;;  %11480 = vmatprep.subr.bf16.mxu1 %v13659_v0  ;;  %v13108_v63 = vld [vmem:[#allocation13] ss:$0 sm:$0xff] }
 0x6b5   :  { %11317 = vmatpush1.bf16.msra.mxu0 %v13654_v40  ;;  %11481 = vmatpush1.bf16.msra.mxu1 %v13657_v18 }
 0x6b6   :  { %11318 = vmatprep.subr.bf16.mxu0 %v13662_v39  ;;  %11482 = vmatprep.subr.bf16.mxu1 %v13665_v2 }
 0x6b9   :  { %11319 = vmatpush1.bf16.msra.mxu0 %v13660_v3  ;;  %11483 = vmatpush1.bf16.msra.mxu1 %v13663_v5 }
 0x6ba   :  { %11320 = vmatprep.subr.bf16.mxu0 %v13668_v8  ;;  %11484 = vmatprep.subr.bf16.mxu1 %v13671_v9 }
 0x6bd   :  { %11321 = vmatpush1.bf16.msra.mxu0 %v13666_v32  ;;  %11485 = vmatpush1.bf16.msra.mxu1 %v13669_v46 }
 0x6be   :  { %11322 = vmatprep.subr.bf16.mxu0 %v13674_v43  ;;  %11486 = vmatprep.subr.bf16.mxu1 %v13677_v11 }
 0x6c1   :  { %11323 = vmatpush1.bf16.msra.mxu0 %v13672_v14  ;;  %11487 = vmatpush1.bf16.msra.mxu1 %v13675_v17 }
 0x6c2   :  { %11324 = vmatprep.subr.bf16.mxu0 %v13680_v20  ;;  %11488 = vmatprep.subr.bf16.mxu1 %v13683_v15 }
 0x6c5   :  { %11325 = vmatpush1.bf16.msra.mxu0 %v13678_v45  ;;  %11489 = vmatpush1.bf16.msra.mxu1 %v13681_v25 }
 0x6c6   :  { %11326 = vmatprep.subr.bf16.mxu0 %v13686_v47  ;;  %11490 = vmatprep.subr.bf16.mxu1 %v13689_v53 }
 0x6c9   :  { %11327 = vmatpush1.bf16.msra.mxu0 %v13684_v26  ;;  %11491 = vmatpush1.bf16.msra.mxu1 %v13687_v48 }
 0x6cc   :  { %11329 = vmatmul.mubr.bf16.vlgmr.msra.gmra.mrb[16].mxu0 %v9613_v13  ;;  %11493 = vmatmul.mubr.bf16.vlgmr.msra.gmra.mrb[16].mxu1 %v9613_v13 }
 0x79f   :  { %v11330_v37 = vpop.f32.mrb[16].mxu0  ;;  %v11494_v38 = vpop.f32.mrb[16].mxu1 }
 0x7a0   :  { %v13126_v41 = vadd.f32 %v11330_v37, %v9876_v12  ;;  %v13128_v7 = vadd.f32 %v11494_v38, %v9884_v4  ;;  %v11332_v42 = vpop.f32.mrb[17].mxu0  ;;  %v11496_v23 = vpop.f32.mrb[17].mxu1 }
 0x7a1   :  { %v13127_v16 = vadd.f32 %v11332_v42, %v9880_v55  ;;  %v13129_v35 = vadd.f32 %v11496_v23, %v9888_v36  ;;  %v11334_v49 = vpop.f32.mrb[18].mxu0  ;;  %v11498_v50 = vpop.f32.mrb[18].mxu1 }
 0x7a2   :  { %v11501_v59 = vmax.f32 %v13126_v41, 0.0  ;;  %v11335_v52 = vpop.f32.mrb[19].mxu0  ;;  %v11499_v56 = vpop.f32.mrb[19].mxu1  ;;  %v11503_v58 = vmax.f32 %v13128_v7, 0.0 }
 0x7a3   :  { %v11502_v60 = vmax.f32 %v13127_v16, 0.0  ;;  %v11504_v19 = vmax.f32 %v13129_v35, 0.0 }
 0x7a4   :  { %v11527_v54 = vmul.f32 %v11510_v33, %v11501_v59  ;;  %v11529_v10 = vmul.f32 %v11518_v28, %v11503_v58 }
 0x7a5   :  { %v11528_v31 = vmul.f32 %v11514_v24, %v11502_v60  ;;  %v11530_v61 = vmul.f32 %v11522_v22, %v11504_v19 }
 0x7a7   :  { %v11531_v1 = vadd.f32 %v11528_v31, %v11527_v54 }
 0x7a9   :  { %v11532_v62 = vadd.f32 %v11531_v1, %v11529_v10 }
 0x7ab   :  { %v11533_v6 = vadd.f32 %v11532_v62, %v11530_v61 }
 0x7ad   :  { %11534 = vadd.xlane.f32.xlu0 %v11533_v6 }
 0x83a   :  { %v11535_v0 = vpop.xlane.xlu0 %11534 }
 0x83b   :  { %v11543_v40 = vadd.f32 %v13108_v63, %v11535_v0 }
 0x83d   :  { %v13109_v18 = vmul.f32 -1.442695, %v11543_v40 }
 0x83f   :  { %13690 = vpow2.f32 %v13109_v18 }
 0x849   :  { %v13691_v39 = vpop.eup %13690 }
 0x84a   :  { %v11547_v2 = vadd.f32 1.0, %v13691_v39 }
 0x84c   :  { %13692 = vrcp.f32 %v11547_v2 }
 0x856   :  { %v13693_v51 = vpop.eup %13692 }
 0x857   :  { %11550 = vst [vmem:[%s14341_s9] sm:$0xff] %v13693_v51 }
 0x858   :  { %11555 = vsyncpa [#allocation3], 1 }
 0x859   :  { %11556 = vsyncpa [#allocation5], 1 }
 0x85a   :  { %11557 = vsyncpa [#allocation8], 1 }
 0x85b   :  { %11558 = vsyncpa [#allocation11], 1 }
 0x85c   :  { %11559 = vsyncpa [#allocation14], 1 }

</bundles_post_ra>
